<compile_context>
chip_gen: v5e
topology: v5e:2x2
jax: 0.10.0
libtpu: 0.0.40
codegen_flags: <defaults>
</compile_context>

<pallas_src>
import functools

import jax
import jax.numpy as jnp
from jax import lax
from jax.experimental import pallas as pl
from jax.experimental.pallas import tpu as pltpu

EMB = 40       # emb_size
C_MID = 40     # channels after first conv
H_ELEC = 64    # EEG electrodes (conv2 kernel height)
K_T = 25       # temporal kernel width of conv1
POOL_K = 75    # avg-pool window (time)
POOL_S = 15    # avg-pool stride (time)
BN_EPS = 1e-5
_KROWS = K_T * H_ELEC   # 1600


def _patch_embed_kernel(xu_ref, wf_ref, shift_ref, pool_ref, wp_ref, bp_ref, out_ref):
    # xu_ref   : (1, 1600, N)      bf16  pre-unfolded input slab, N = b_tile*T1
    # wf_ref   : (40, 1600)        bf16  fused conv1∘conv2 weight, BN scale folded in
    # shift_ref: (40, 1)           f32   folded conv bias + BN shift
    # pool_ref : (N, b_tile*P)     bf16  0/1 pooling selection (1/75 folded into wp)
    # wp_ref   : (EMB, 40)         bf16  1x1 projection weight / POOL_K
    # bp_ref   : (EMB, 1)          f32
    # out_ref  : (1, EMB, b_tile*P)
    #
    # Fused Conv2d(1,40,(1,25)) o Conv2d(40,40,(64,1)) o BN-scale: one K=1600 MXU matmul.
    h2 = jnp.dot(wf_ref[...], xu_ref[0], preferred_element_type=jnp.float32)   # (40, N) f32
    h2 = h2 + shift_ref[...]
    # ELU (see TODO about expm1).
    h2 = jnp.where(h2 > 0.0, h2, jnp.exp(jnp.minimum(h2, 0.0)) - 1.0)
    # AvgPool2d((1,75),(1,15)) + batch demux as one bf16 MXU matmul (sum; /75 is in wp).
    hp = jnp.dot(h2.astype(jnp.bfloat16), pool_ref[...],
                 preferred_element_type=jnp.float32)                           # (40, b_tile*P)
    # Dropout(0.5): identity at inference.
    # Conv2d(40, emb, (1,1)) pointwise projection; lane-dense store.
    out = jnp.dot(wp_ref[...], hp.astype(jnp.bfloat16),
                  preferred_element_type=jnp.float32) + bp_ref[...]
    out_ref[0] = out.astype(out_ref.dtype)


def _vmem_estimate(b_tile, T1, P):
    cols = b_tile * T1
    bp = b_tile * P
    return (_KROWS * cols * 2 * 2            # xu slab, bf16, double-buffered input
            + cols * bp * 2 * 2              # pool matrix, bf16 (worst case 2 buffers)
            + C_MID * cols * (4 + 2)         # h2 f32 + bf16 copy
            + EMB * bp * 4 * 2               # output block, double-buffered
            + _KROWS * C_MID * 2 * 2)        # fused weight


def _choose_b_tile(B, T1, P, vmem_cap=24 * 1024 * 1024):
    divisors = [d for d in range(1, B + 1) if B % d == 0]
    fitting = [d for d in divisors if _vmem_estimate(d, T1, P) <= vmem_cap] or [1]
    # 1) Lane-dense output: b_tile*P a multiple of 128.  Smallest such tile keeps
    #    the grid long so v7x's two TensorCores both get work.
    lane_dense = [d for d in fitting if (d * P) % 128 == 0]
    if lane_dense:
        multi = [d for d in lane_dense if B // d >= 2]
        return min(multi) if multi else min(lane_dense)
    # 2) Otherwise maximize output lanes while keeping G >= 2 when the batch allows.
    multi = [d for d in fitting if B // d >= 2]
    return max(multi) if multi else max(fitting)


@functools.partial(jax.jit,
                   static_argnames=("b_tile", "single_buffer_consts", "out_dtype"))
def _forward_impl(x, params, *, b_tile, single_buffer_consts, out_dtype):
    B, c_in, H, W = x.shape
    assert c_in == 1 and H == H_ELEC
    T1 = W - (K_T - 1)
    P = (T1 - POOL_K) // POOL_S + 1
    assert P >= 1 and B % b_tile == 0
    G = B // b_tile
    N = b_tile * T1
    BP = b_tile * P

    # ---- parameter folding (f32, once per trace) ----
    hp = lax.Precision.HIGHEST
    w1 = params['w1'].reshape(C_MID, K_T).astype(jnp.float32)                 # (ci, k)
    w2 = params['w2'][:, :, :, 0].astype(jnp.float32)                         # (o, ci, h)
    wf = jnp.einsum('oih,ik->okh', w2, w1, precision=hp).reshape(C_MID, _KROWS)
    bias_f = jnp.einsum('oih,i->o', w2, params['b1'], precision=hp) + params['b2']
    bn_scale = params['bn_gamma'] / jnp.sqrt(params['bn_var'] + BN_EPS)
    bn_shift = params['bn_beta'] - params['bn_mean'] * bn_scale
    wf_bf = (wf * bn_scale[:, None]).astype(jnp.bfloat16)                     # scale folded
    shift = (bn_scale * bias_f + bn_shift).reshape(C_MID, 1).astype(jnp.float32)
    wp_bf = (params['wp'].reshape(EMB, C_MID) * (1.0 / POOL_K)).astype(jnp.bfloat16)
    bp = params['bp'].reshape(EMB, 1).astype(jnp.float32)

    # ---- im2col done by XLA in the same jit (kernel never rotates/concats) ----
    x2 = x[:, 0]                                                              # (B, 64, W)
    gidx = jnp.arange(K_T)[:, None] + jnp.arange(T1)[None, :]                 # (25, T1)
    patches = jnp.take(x2, gidx, axis=2)                                      # (B, 64, 25, T1)
    xu = (patches.transpose(0, 2, 1, 3)                                       # (B, 25, 64, T1)
          .reshape(G, b_tile, _KROWS, T1)
          .transpose(0, 2, 1, 3)
          .reshape(G, _KROWS, N)
          .astype(jnp.bfloat16))                                              # (G, 1600, N)

    # ---- block-diagonal 0/1 pooling selection matrix (exact in bf16) ----
    row = jnp.arange(N)
    col = jnp.arange(BP)
    u = row % T1
    src_b = row // T1
    pw = col % P
    dst_b = col // P
    sel = ((src_b[:, None] == dst_b[None, :])
           & (u[:, None] >= pw[None, :] * POOL_S)
           & (u[:, None] < pw[None, :] * POOL_S + POOL_K))
    pool_mat = sel.astype(jnp.bfloat16)                                       # (N, BP)

    def const_spec(shape):
        if single_buffer_consts:
            return pl.BlockSpec(shape, lambda g: (0,) * len(shape),
                                pipeline_mode=pl.Buffered(1))
        return pl.BlockSpec(shape, lambda g: (0,) * len(shape))

    out = pl.pallas_call(
        _patch_embed_kernel,
        out_shape=jax.ShapeDtypeStruct((G, EMB, BP), out_dtype),
        grid_spec=pltpu.PrefetchScalarGridSpec(
            num_scalar_prefetch=0,
            grid=(G,),
            in_specs=[
                pl.BlockSpec((1, _KROWS, N), lambda g: (g, 0, 0)),   # xu (bf16)
                const_spec((C_MID, _KROWS)),                         # fused conv weight
                const_spec((C_MID, 1)),                              # folded shift
                const_spec((N, BP)),                                 # pool selection
                const_spec((EMB, C_MID)),                            # wp / 75
                const_spec((EMB, 1)),                                # bp
            ],
            out_specs=pl.BlockSpec((1, EMB, BP), lambda g: (g, 0, 0)),
        ),
        compiler_params=pltpu.CompilerParams(
            dimension_semantics=("parallel",),
            vmem_limit_bytes=48 * 1024 * 1024),
    )(xu, wf_bf, shift, pool_mat, wp_bf, bp)

    # (G, EMB, b_tile*P) -> (B, P, EMB): 'b e 1 w -> b (1 w) e' + un-tile.
    out = out.reshape(G, EMB, b_tile, P)
    return jnp.transpose(out, (0, 2, 3, 1)).reshape(B, P, EMB)


def patch_embedding_forward(x, params, b_tile=None, out_dtype=jnp.float32):
    """x: (B, 1, 64, W) float32 (NCHW, like PyTorch). Returns (B, P, emb)."""
    B, _, _, W = x.shape
    T1 = W - (K_T - 1)
    P = (T1 - POOL_K) // POOL_S + 1
    if b_tile is None:
        b_tile = _choose_b_tile(B, T1, P)
    if hasattr(pl, "Buffered"):
        try:
            return _forward_impl(x, params, b_tile=b_tile,
                                 single_buffer_consts=True, out_dtype=out_dtype)
        except Exception:  # pipeline_mode=Buffered(1) unsupported on this jax version
            pass
    return _forward_impl(x, params, b_tile=b_tile,
                         single_buffer_consts=False, out_dtype=out_dtype)


def _reference_forward(x, params):
    """Pure-JAX (XLA) reference for correctness checking."""
    dn = ('NCHW', 'OIHW', 'NCHW')
    hp = lax.Precision.HIGHEST
    y = lax.conv_general_dilated(x, params['w1'], (1, 1), 'VALID',
                                 dimension_numbers=dn, precision=hp)
    y = y + params['b1'][None, :, None, None]
    y = lax.conv_general_dilated(y, params['w2'], (1, 1), 'VALID',
                                 dimension_numbers=dn, precision=hp)
    y = y + params['b2'][None, :, None, None]
    y = (y - params['bn_mean'][None, :, None, None]) / jnp.sqrt(
        params['bn_var'][None, :, None, None] + BN_EPS)
    y = y * params['bn_gamma'][None, :, None, None] + params['bn_beta'][None, :, None, None]
    y = jax.nn.elu(y)
    y = lax.reduce_window(y, 0.0, lax.add, (1, 1, 1, POOL_K),
                          (1, 1, 1, POOL_S), 'VALID') / float(POOL_K)
    y = lax.conv_general_dilated(y, params['wp'], (1, 1), 'VALID',
                                 dimension_numbers=dn, precision=hp)
    y = y + params['bp'][None, :, None, None]
    B, E, Hh, Ww = y.shape
    return jnp.transpose(y.reshape(B, E, Hh * Ww), (0, 2, 1))


if __name__ == "__main__":
    key = jax.random.PRNGKey(0)
    ks = jax.random.split(key, 11)

    B, W = 8, 144   # W survives conv(25) + pool(75, stride 15); B=8 gives a 2-step grid

    params = {
        'w1': 0.10 * jax.random.normal(ks[0], (C_MID, 1, 1, K_T), jnp.float32),
        'b1': 0.10 * jax.random.normal(ks[1], (C_MID,), jnp.float32),
        'w2': 0.05 * jax.random.normal(ks[2], (C_MID, C_MID, H_ELEC, 1), jnp.float32),
        'b2': 0.10 * jax.random.normal(ks[3], (C_MID,), jnp.float32),
        'bn_gamma': 1.0 + 0.1 * jax.random.normal(ks[4], (C_MID,), jnp.float32),
        'bn_beta': 0.1 * jax.random.normal(ks[5], (C_MID,), jnp.float32),
        'bn_mean': 0.1 * jax.random.normal(ks[6], (C_MID,), jnp.float32),
        'bn_var': jax.random.uniform(ks[7], (C_MID,), jnp.float32, 0.5, 1.5),
        'wp': 0.10 * jax.random.normal(ks[8], (EMB, C_MID, 1, 1), jnp.float32),
        'bp': 0.10 * jax.random.normal(ks[9], (EMB,), jnp.float32),
    }
    x = jax.random.normal(ks[10], (B, 1, H_ELEC, W), jnp.float32)

    out = jax.block_until_ready(patch_embedding_forward(x, params))
    ref = jax.block_until_ready(_reference_forward(x, params))

    assert out.shape == ref.shape, (out.shape, ref.shape)
    max_err = float(jnp.max(jnp.abs(out - ref)))
    # bf16 operands on the K=1600 contraction + bf16 pool/projection dominate the budget.
    assert max_err < 4e-2, max_err
    print("KERNEL_OK")
</pallas_src>

<mosaic_0001>
module attributes {stable_mosaic.version = 11 : i64} {
  func.func @_patch_embed_kernel(%arg0: i32, %arg1: memref<1x1600x480xbf16, #tpu.memory_space<vmem>>, %arg2: memref<40x1600xbf16, #tpu.memory_space<vmem>>, %arg3: memref<40x1xf32, #tpu.memory_space<vmem>>, %arg4: memref<480x16xbf16, #tpu.memory_space<vmem>>, %arg5: memref<40x40xbf16, #tpu.memory_space<vmem>>, %arg6: memref<40x1xf32, #tpu.memory_space<vmem>>, %arg7: memref<1x40x16xf32, #tpu.memory_space<vmem>>) attributes {dimension_semantics = [#tpu.dimension_semantics<parallel>], iteration_bounds = array<i64: 2>, scalar_prefetch = 0 : i64, scratch_operands = 0 : i64, tpu.core_type = #tpu.core_type<tc>, window_params = [{transform_indices = @transform_0, window_bounds = array<i64: 1, 1600, 480>}, {pipeline_mode = #tpu.pipeline_mode<synchronous>, transform_indices = @transform_1, window_bounds = array<i64: 40, 1600>}, {pipeline_mode = #tpu.pipeline_mode<synchronous>, transform_indices = @transform_2, window_bounds = array<i64: 40, 1>}, {pipeline_mode = #tpu.pipeline_mode<synchronous>, transform_indices = @transform_3, window_bounds = array<i64: 480, 16>}, {pipeline_mode = #tpu.pipeline_mode<synchronous>, transform_indices = @transform_4, window_bounds = array<i64: 40, 40>}, {pipeline_mode = #tpu.pipeline_mode<synchronous>, transform_indices = @transform_5, window_bounds = array<i64: 40, 1>}, {transform_indices = @transform_6, window_bounds = array<i64: 1, 40, 16>}]} {
    %c0 = arith.constant 0 : index
    %c0_0 = arith.constant 0 : index
    %0 = vector.load %arg2[%c0, %c0_0] : memref<40x1600xbf16, #tpu.memory_space<vmem>>, vector<40x1600xbf16>
    %c0_1 = arith.constant 0 : index
    %c0_2 = arith.constant 0 : index
    %c0_3 = arith.constant 0 : index
    %1 = vector.load %arg1[%c0_1, %c0_2, %c0_3] : memref<1x1600x480xbf16, #tpu.memory_space<vmem>>, vector<1x1600x480xbf16>
    %2 = vector.shape_cast %1 : vector<1x1600x480xbf16> to vector<1600x480xbf16>
    %cst = arith.constant dense<0.000000e+00> : vector<40x480xf32>
    %3 = tpu.matmul %0, %2, %cst {dimension_numbers = #tpu.dot_dimension_numbers<[1], [0], [0], [1], [0, 0, 1, 1], [], []>} : vector<40x1600xbf16>, vector<1600x480xbf16>, vector<40x480xf32> -> vector<40x480xf32>
    %c0_4 = arith.constant 0 : index
    %c0_5 = arith.constant 0 : index
    %4 = vector.load %arg3[%c0_4, %c0_5] : memref<40x1xf32, #tpu.memory_space<vmem>>, vector<40x1xf32>
    %5 = vector.broadcast %4 : vector<40x1xf32> to vector<40x480xf32>
    %6 = arith.addf %3, %5 : vector<40x480xf32>
    %cst_6 = arith.constant 0.000000e+00 : f32
    %7 = vector.broadcast %cst_6 : f32 to vector<40x480xf32>
    %8 = arith.cmpf ogt, %6, %7 : vector<40x480xf32>
    %cst_7 = arith.constant 0.000000e+00 : f32
    %9 = vector.broadcast %cst_7 : f32 to vector<40x480xf32>
    %10 = arith.minimumf %6, %9 : vector<40x480xf32>
    %11 = math.exp %10 : vector<40x480xf32>
    %cst_8 = arith.constant 1.000000e+00 : f32
    %12 = vector.broadcast %cst_8 : f32 to vector<40x480xf32>
    %13 = arith.subf %11, %12 : vector<40x480xf32>
    %14 = arith.select %8, %6, %13 : vector<40x480xi1>, vector<40x480xf32>
    %15 = arith.truncf %14 : vector<40x480xf32> to vector<40x480xbf16>
    %c0_9 = arith.constant 0 : index
    %c0_10 = arith.constant 0 : index
    %16 = vector.load %arg4[%c0_9, %c0_10] : memref<480x16xbf16, #tpu.memory_space<vmem>>, vector<480x16xbf16>
    %cst_11 = arith.constant dense<0.000000e+00> : vector<40x16xf32>
    %17 = tpu.matmul %15, %16, %cst_11 {dimension_numbers = #tpu.dot_dimension_numbers<[1], [0], [0], [1], [0, 0, 1, 1], [], []>} : vector<40x480xbf16>, vector<480x16xbf16>, vector<40x16xf32> -> vector<40x16xf32>
    %c0_12 = arith.constant 0 : index
    %c0_13 = arith.constant 0 : index
    %18 = vector.load %arg5[%c0_12, %c0_13] : memref<40x40xbf16, #tpu.memory_space<vmem>>, vector<40x40xbf16>
    %19 = arith.truncf %17 : vector<40x16xf32> to vector<40x16xbf16>
    %cst_14 = arith.constant dense<0.000000e+00> : vector<40x16xf32>
    %20 = tpu.matmul %18, %19, %cst_14 {dimension_numbers = #tpu.dot_dimension_numbers<[1], [0], [0], [1], [0, 0, 1, 1], [], []>} : vector<40x40xbf16>, vector<40x16xbf16>, vector<40x16xf32> -> vector<40x16xf32>
    %c0_15 = arith.constant 0 : index
    %c0_16 = arith.constant 0 : index
    %21 = vector.load %arg6[%c0_15, %c0_16] : memref<40x1xf32, #tpu.memory_space<vmem>>, vector<40x1xf32>
    %22 = vector.broadcast %21 : vector<40x1xf32> to vector<40x16xf32>
    %23 = arith.addf %20, %22 : vector<40x16xf32>
    %c0_17 = arith.constant 0 : index
    %c0_18 = arith.constant 0 : index
    %c0_19 = arith.constant 0 : index
    %24 = vector.load %arg7[%c0_17, %c0_18, %c0_19] : memref<1x40x16xf32, #tpu.memory_space<vmem>>, vector<1x40x16xf32>
    %25 = vector.shape_cast %24 : vector<1x40x16xf32> to vector<40x16xf32>
    %26 = vector.shape_cast %23 : vector<40x16xf32> to vector<1x40x16xf32>
    tpu.vector_store %arg7[%c0_17, %c0_18, %c0_19], %26 {strides = array<i32>} : memref<1x40x16xf32, #tpu.memory_space<vmem>>, vector<1x40x16xf32>,
    return
  }
  func.func @transform_0(%arg0: i32) -> (i32, i32, i32) {
    %c0_i32 = arith.constant 0 : i32
    %c0_i32_0 = arith.constant 0 : i32
    %c0_i32_1 = arith.constant 0 : i32
    return %arg0, %c0_i32, %c0_i32_0 : i32, i32, i32
  }
  func.func @transform_1(%arg0: i32) -> (i32, i32) {
    %c0_i32 = arith.constant 0 : i32
    %c0_i32_0 = arith.constant 0 : i32
    %c0_i32_1 = arith.constant 0 : i32
    return %c0_i32, %c0_i32_0 : i32, i32
  }
  func.func @transform_2(%arg0: i32) -> (i32, i32) {
    %c0_i32 = arith.constant 0 : i32
    %c0_i32_0 = arith.constant 0 : i32
    %c0_i32_1 = arith.constant 0 : i32
    return %c0_i32, %c0_i32_0 : i32, i32
  }
  func.func @transform_3(%arg0: i32) -> (i32, i32) {
    %c0_i32 = arith.constant 0 : i32
    %c0_i32_0 = arith.constant 0 : i32
    %c0_i32_1 = arith.constant 0 : i32
    return %c0_i32, %c0_i32_0 : i32, i32
  }
  func.func @transform_4(%arg0: i32) -> (i32, i32) {
    %c0_i32 = arith.constant 0 : i32
    %c0_i32_0 = arith.constant 0 : i32
    %c0_i32_1 = arith.constant 0 : i32
    return %c0_i32, %c0_i32_0 : i32, i32
  }
  func.func @transform_5(%arg0: i32) -> (i32, i32) {
    %c0_i32 = arith.constant 0 : i32
    %c0_i32_0 = arith.constant 0 : i32
    %c0_i32_1 = arith.constant 0 : i32
    return %c0_i32, %c0_i32_0 : i32, i32
  }
  func.func @transform_6(%arg0: i32) -> (i32, i32, i32) {
    %c0_i32 = arith.constant 0 : i32
    %c0_i32_0 = arith.constant 0 : i32
    %c0_i32_1 = arith.constant 0 : i32
    return %arg0, %c0_i32, %c0_i32_0 : i32, i32, i32
  }
}

module attributes {stable_mosaic.version = 11 : i64} {
  func.func @_patch_embed_kernel(%arg0: i32, %arg1: memref<1x1600x480xbf16, #tpu.memory_space<vmem>>, %arg2: memref<40x1600xbf16, #tpu.memory_space<vmem>>, %arg3: memref<40x1xf32, #tpu.memory_space<vmem>>, %arg4: memref<480x16xbf16, #tpu.memory_space<vmem>>, %arg5: memref<40x40xbf16, #tpu.memory_space<vmem>>, %arg6: memref<40x1xf32, #tpu.memory_space<vmem>>, %arg7: memref<1x40x16xf32, #tpu.memory_space<vmem>>) attributes {dimension_semantics = [#tpu.dimension_semantics<parallel>], iteration_bounds = array<i64: 2>, scalar_prefetch = 0 : i64, scratch_operands = 0 : i64, tpu.core_type = #tpu.core_type<tc>, window_params = [{transform_indices = @transform_0, window_bounds = array<i64: 1, 1600, 480>}, {pipeline_mode = #tpu.pipeline_mode<synchronous>, transform_indices = @transform_1, window_bounds = array<i64: 40, 1600>}, {pipeline_mode = #tpu.pipeline_mode<synchronous>, transform_indices = @transform_2, window_bounds = array<i64: 40, 1>}, {pipeline_mode = #tpu.pipeline_mode<synchronous>, transform_indices = @transform_3, window_bounds = array<i64: 480, 16>}, {pipeline_mode = #tpu.pipeline_mode<synchronous>, transform_indices = @transform_4, window_bounds = array<i64: 40, 40>}, {pipeline_mode = #tpu.pipeline_mode<synchronous>, transform_indices = @transform_5, window_bounds = array<i64: 40, 1>}, {transform_indices = @transform_6, window_bounds = array<i64: 1, 40, 16>}]} {
    %c0 = arith.constant 0 : index
    %c0_0 = arith.constant 0 : index
    %0 = vector.load %arg2[%c0, %c0_0] : memref<40x1600xbf16, #tpu.memory_space<vmem>>, vector<40x1600xbf16>
    %c0_1 = arith.constant 0 : index
    %c0_2 = arith.constant 0 : index
    %c0_3 = arith.constant 0 : index
    %1 = vector.load %arg1[%c0_1, %c0_2, %c0_3] : memref<1x1600x480xbf16, #tpu.memory_space<vmem>>, vector<1x1600x480xbf16>
    %2 = vector.shape_cast %1 : vector<1x1600x480xbf16> to vector<1600x480xbf16>
    %cst = arith.constant dense<0.000000e+00> : vector<40x480xf32>
    %3 = tpu.matmul %0, %2, %cst {dimension_numbers = #tpu.dot_dimension_numbers<[1], [0], [0], [1], [0, 0, 1, 1], [], []>} : vector<40x1600xbf16>, vector<1600x480xbf16>, vector<40x480xf32> -> vector<40x480xf32>
    %c0_4 = arith.constant 0 : index
    %c0_5 = arith.constant 0 : index
    %4 = vector.load %arg3[%c0_4, %c0_5] : memref<40x1xf32, #tpu.memory_space<vmem>>, vector<40x1xf32>
    %5 = vector.broadcast %4 : vector<40x1xf32> to vector<40x480xf32>
    %6 = arith.addf %3, %5 : vector<40x480xf32>
    %cst_6 = arith.constant 0.000000e+00 : f32
    %7 = vector.broadcast %cst_6 : f32 to vector<40x480xf32>
    %8 = arith.cmpf ogt, %6, %7 : vector<40x480xf32>
    %cst_7 = arith.constant 0.000000e+00 : f32
    %9 = vector.broadcast %cst_7 : f32 to vector<40x480xf32>
    %10 = arith.minimumf %6, %9 : vector<40x480xf32>
    %11 = math.exp %10 : vector<40x480xf32>
    %cst_8 = arith.constant 1.000000e+00 : f32
    %12 = vector.broadcast %cst_8 : f32 to vector<40x480xf32>
    %13 = arith.subf %11, %12 : vector<40x480xf32>
    %14 = arith.select %8, %6, %13 : vector<40x480xi1>, vector<40x480xf32>
    %15 = arith.truncf %14 : vector<40x480xf32> to vector<40x480xbf16>
    %c0_9 = arith.constant 0 : index
    %c0_10 = arith.constant 0 : index
    %16 = vector.load %arg4[%c0_9, %c0_10] : memref<480x16xbf16, #tpu.memory_space<vmem>>, vector<480x16xbf16>
    %cst_11 = arith.constant dense<0.000000e+00> : vector<40x16xf32>
    %17 = tpu.matmul %15, %16, %cst_11 {dimension_numbers = #tpu.dot_dimension_numbers<[1], [0], [0], [1], [0, 0, 1, 1], [], []>} : vector<40x480xbf16>, vector<480x16xbf16>, vector<40x16xf32> -> vector<40x16xf32>
    %c0_12 = arith.constant 0 : index
    %c0_13 = arith.constant 0 : index
    %18 = vector.load %arg5[%c0_12, %c0_13] : memref<40x40xbf16, #tpu.memory_space<vmem>>, vector<40x40xbf16>
    %19 = arith.truncf %17 : vector<40x16xf32> to vector<40x16xbf16>
    %cst_14 = arith.constant dense<0.000000e+00> : vector<40x16xf32>
    %20 = tpu.matmul %18, %19, %cst_14 {dimension_numbers = #tpu.dot_dimension_numbers<[1], [0], [0], [1], [0, 0, 1, 1], [], []>} : vector<40x40xbf16>, vector<40x16xbf16>, vector<40x16xf32> -> vector<40x16xf32>
    %c0_15 = arith.constant 0 : index
    %c0_16 = arith.constant 0 : index
    %21 = vector.load %arg6[%c0_15, %c0_16] : memref<40x1xf32, #tpu.memory_space<vmem>>, vector<40x1xf32>
    %22 = vector.broadcast %21 : vector<40x1xf32> to vector<40x16xf32>
    %23 = arith.addf %20, %22 : vector<40x16xf32>
    %c0_17 = arith.constant 0 : index
    %c0_18 = arith.constant 0 : index
    %c0_19 = arith.constant 0 : index
    %24 = vector.load %arg7[%c0_17, %c0_18, %c0_19] : memref<1x40x16xf32, #tpu.memory_space<vmem>>, vector<1x40x16xf32>
    %25 = vector.shape_cast %24 : vector<1x40x16xf32> to vector<40x16xf32>
    %26 = vector.shape_cast %23 : vector<40x16xf32> to vector<1x40x16xf32>
    tpu.vector_store %arg7[%c0_17, %c0_18, %c0_19], %26 {strides = array<i32>} : memref<1x40x16xf32, #tpu.memory_space<vmem>>, vector<1x40x16xf32>,
    return
  }
  func.func @transform_0(%arg0: i32) -> (i32, i32, i32) {
    %c0_i32 = arith.constant 0 : i32
    %c0_i32_0 = arith.constant 0 : i32
    %c0_i32_1 = arith.constant 0 : i32
    return %arg0, %c0_i32, %c0_i32_0 : i32, i32, i32
  }
  func.func @transform_1(%arg0: i32) -> (i32, i32) {
    %c0_i32 = arith.constant 0 : i32
    %c0_i32_0 = arith.constant 0 : i32
    %c0_i32_1 = arith.constant 0 : i32
    return %c0_i32, %c0_i32_0 : i32, i32
  }
  func.func @transform_2(%arg0: i32) -> (i32, i32) {
    %c0_i32 = arith.constant 0 : i32
    %c0_i32_0 = arith.constant 0 : i32
    %c0_i32_1 = arith.constant 0 : i32
    return %c0_i32, %c0_i32_0 : i32, i32
  }
  func.func @transform_3(%arg0: i32) -> (i32, i32) {
    %c0_i32 = arith.constant 0 : i32
    %c0_i32_0 = arith.constant 0 : i32
    %c0_i32_1 = arith.constant 0 : i32
    return %c0_i32, %c0_i32_0 : i32, i32
  }
  func.func @transform_4(%arg0: i32) -> (i32, i32) {
    %c0_i32 = arith.constant 0 : i32
    %c0_i32_0 = arith.constant 0 : i32
    %c0_i32_1 = arith.constant 0 : i32
    return %c0_i32, %c0_i32_0 : i32, i32
  }
  func.func @transform_5(%arg0: i32) -> (i32, i32) {
    %c0_i32 = arith.constant 0 : i32
    %c0_i32_0 = arith.constant 0 : i32
    %c0_i32_1 = arith.constant 0 : i32
    return %c0_i32, %c0_i32_0 : i32, i32
  }
  func.func @transform_6(%arg0: i32) -> (i32, i32, i32) {
    %c0_i32 = arith.constant 0 : i32
    %c0_i32_0 = arith.constant 0 : i32
    %c0_i32_1 = arith.constant 0 : i32
    return %arg0, %c0_i32, %c0_i32_0 : i32, i32, i32
  }
}

</mosaic_0001>

<bundles_post_ra>
// kernel: _forward_impl.1
= control target key start
LH: loop header
LB: loop body
LE: loop exit
PB: predicated region body
PF: predicated region fallthrough
CT: control target
= control target key end

     0   :  { %s7181_s21 = smov 0   ;;  %s9126_s0 = inlined_call_operand.vmem [shape: bf16[2,1600,480], index: 0, kind: input, shape index: {}]   ;;  %s9127_s1 = inlined_call_operand.vmem [shape: bf16[40,1600], index: 1, kind: input, shape index: {}]   ;;  %s9128_s2 = inlined_call_operand.vmem [shape: f32[40,1], index: 2, kind: input, shape index: {}]   ;;  %s9129_s3 = inlined_call_operand.vmem [shape: bf16[480,16], index: 3, kind: input, shape index: {}]   ;;  %s9130_s4 = inlined_call_operand.vmem [shape: bf16[40,40], index: 4, kind: input, shape index: {}]   ;;  %s9131_s5 = inlined_call_operand.vmem [shape: f32[40,1], index: 5, kind: input, shape index: {}]   ;;  %s9132_s6 = inlined_call_operand.vmem [shape: f32[2,40,16], index: 6, kind: output, shape index: {}]  }
   0x1 LB: > { %s4722_s22 = sadd.s32 4294967295, %s7143_s21   ;;  %p4726_p0 = scmp.ge.s32.totalorder %s7143_s21, 1  ;;  %s7143_s21 = sphi %s7181_s21, %s16_s21  }
   0x2   : > { %p212_p1 = scmp.lt.s32.totalorder %s7143_s21, 3 }
   0x4   : > { %p213_p2 = pnand %p4726_p0, %p212_p1 }
   0x6   : > { %216 = sbr.rel (%p213_p2) target bundleno = 1161 (0x489), region = 44 }
   0xb   : > { %p242_p3 = scmp.lt.s32.totalorder %s4722_s22, 1  ;;  %vm2893_vm0 = vcmask 523264  }
   0xd   : > { %s9207_s22 = smov (!%p242_p3, %s4722_s22), 1 }
   0xe   : > { %s7083_s23 = smul.u32 3200, %s9207_s22 }
   0xf   : > { %s7084_s15 = smul.u32 40, %s9207_s22 }
  0x10   : > { %s7195_s26 = scalar_lea.vmem %s9126_s0, %s7083_s23 }
  0x11   : > { %v4947_v0 = vld [vmem:[%s7195_s26 + $0xe0] sm:$0xf]  ;;  %v6657_v1 = vld [vmem:[%s7195_s26 + $0xec] sm:$0xf0]  ;;  %s251_s18 = scalar_lea.vmem %s9132_s6, %s7084_s15 }
  0x12   : > { %v5203_v2 = vld [vmem:[%s7195_s26 + $0x2e0] sm:$0xf]  ;;  %v4948_v3 = vor.u32 %v6657_v1, %v4947_v0  ;;  %v6721_v4 = vld [vmem:[%s7195_s26 + $0x2ec] sm:$0xf0] }
  0x13   : > { %v5331_v5 = vld [vmem:[%s7195_s26 + $0x3e0] sm:$0xf]  ;;  %v6753_v6 = vld [vmem:[%s7195_s26 + $0x3ec] sm:$0xf0]  ;;  %v5204_v7 = vor.u32 %v6721_v4, %v5203_v2 }
  0x14   : > { %v5332_v8 = vor.u32 %v6753_v6, %v5331_v5  ;;  %v4931_v9 = vld [vmem:[%s7195_s26 + $0xc0] sm:$0xf]  ;;  %v6653_v10 = vld [vmem:[%s7195_s26 + $0xcc] sm:$0xf0]  ;;  %2903 = vmatpush.bf16.msra.mxu0 %v4948_v3  ;;  %7059 = vmatpush.bf16.msra.mxu1 %v4948_v3 }
  0x15   : > { %v5187_v11 = vld [vmem:[%s7195_s26 + $0x2c0] sm:$0xf]  ;;  %v4932_v12 = vor.u32 %v6653_v10, %v4931_v9  ;;  %v6717_v13 = vld [vmem:[%s7195_s26 + $0x2cc] sm:$0xf0]  ;;  %2949 = vmatpush.bf16.msra.mxu2 %v5204_v7  ;;  %v6607_v9 = vld [vmem:[%s9127_s1 + $0x30] sm:$0xf0] }
  0x16   : > { %v5315_v14 = vld [vmem:[%s7195_s26 + $0x3c0] sm:$0xf]  ;;  %v6749_v15 = vld [vmem:[%s7195_s26 + $0x3cc] sm:$0xf0]  ;;  %2972 = vmatpush.bf16.msra.mxu3 %v5332_v8  ;;  %v5188_v16 = vor.u32 %v6717_v13, %v5187_v11 }
  0x17   : > { %v5316_v17 = vor.u32 %v6749_v15, %v5315_v14  ;;  %v4915_v18 = vld [vmem:[%s7195_s26 + $0xa0] sm:$0xf]  ;;  %v6649_v19 = vld [vmem:[%s7195_s26 + $0xac] sm:$0xf0]  ;;  %v4739_v14 = vld [vmem:[%s9127_s1 + $0x8] sm:$0xf] }
  0x18   : > { %v5171_v20 = vld [vmem:[%s7195_s26 + $0x2a0] sm:$0xf]  ;;  %v6713_v21 = vld [vmem:[%s7195_s26 + $0x2ac] sm:$0xf0]  ;;  %2904 = vmatpush.bf16.msra.mxu0 %v4932_v12  ;;  %7060 = vmatpush.bf16.msra.mxu1 %v4932_v12  ;;  %v4916_v24 = vor.u32 %v6649_v19, %v4915_v18  ;;  %v6608_v15 = vld [vmem:[%s9127_s1 + $0x38] sm:$0xf0] }
  0x19   : > { %v5299_v22 = vld [vmem:[%s7195_s26 + $0x3a0] sm:$0xf]  ;;  %v6745_v23 = vld [vmem:[%s7195_s26 + $0x3ac] sm:$0xf0]  ;;  %2950 = vmatpush.bf16.msra.mxu2 %v5188_v16  ;;  %v5172_v25 = vor.u32 %v6713_v21, %v5171_v20 }
  0x1a   : > { %2973 = vmatpush.bf16.msra.mxu3 %v5316_v17  ;;  %v5300_v26 = vor.u32 %v6745_v23, %v5299_v22  ;;  %v4899_v27 = vld [vmem:[%s7195_s26 + $0x80] sm:$0xf]  ;;  %v6645_v28 = vld [vmem:[%s7195_s26 + $0x8c] sm:$0xf0] }
  0x1b   : > { %v5155_v29 = vld [vmem:[%s7195_s26 + $0x280] sm:$0xf]  ;;  %v6709_v30 = vld [vmem:[%s7195_s26 + $0x28c] sm:$0xf0]  ;;  %v4900_v33 = vor.u32 %v6645_v28, %v4899_v27 }
  0x1c   : > { %v5283_v31 = vld [vmem:[%s7195_s26 + $0x380] sm:$0xf]  ;;  %v6741_v32 = vld [vmem:[%s7195_s26 + $0x38c] sm:$0xf0]  ;;  %2905 = vmatpush.bf16.msra.mxu0 %v4916_v24  ;;  %7061 = vmatpush.bf16.msra.mxu1 %v4916_v24  ;;  %v5156_v34 = vor.u32 %v6709_v30, %v5155_v29  ;;  %v6602_v24 = vld [vmem:[%s9127_s1 + $0xc] sm:$0xf] }
  0x1d   : > { %2951 = vmatpush.bf16.msra.mxu2 %v5172_v25  ;;  %v5284_v35 = vor.u32 %v6741_v32, %v5283_v31  ;;  %v4883_v36 = vld [vmem:[%s7195_s26 + $0x60] sm:$0xf]  ;;  %v6641_v37 = vld [vmem:[%s7195_s26 + $0x6c] sm:$0xf0]  ;;  %v7285_v32 = vor.u32 %v6608_v15, %v4739_v14 }
  0x1e   : > { %2974 = vmatpush.bf16.msra.mxu3 %v5300_v26  ;;  %v5139_v38 = vld [vmem:[%s7195_s26 + $0x260] sm:$0xf]  ;;  %v6705_v39 = vld [vmem:[%s7195_s26 + $0x26c] sm:$0xf0]  ;;  %v4884_v42 = vor.u32 %v6641_v37, %v4883_v36 }
  0x1f   : > { %v5267_v40 = vld [vmem:[%s7195_s26 + $0x360] sm:$0xf]  ;;  %v6737_v41 = vld [vmem:[%s7195_s26 + $0x36c] sm:$0xf0]  ;;  %v5140_v43 = vor.u32 %v6705_v39, %v5139_v38  ;;  %9162 = vst [vmem:[#allocation2_spill] sm:$0xff] %v7285_v32 }
  0x20   : > { %2906 = vmatpush.bf16.msra.mxu0 %v4900_v33  ;;  %7062 = vmatpush.bf16.msra.mxu1 %v4900_v33  ;;  %v5268_v44 = vor.u32 %v6737_v41, %v5267_v40  ;;  %v4867_v45 = vld [vmem:[%s7195_s26 + $0x40] sm:$0xf]  ;;  %v6637_v46 = vld [vmem:[%s7195_s26 + $0x4c] sm:$0xf0] }
  0x21   : > { %2952 = vmatpush.bf16.msra.mxu2 %v5156_v34  ;;  %v5123_v47 = vld [vmem:[%s7195_s26 + $0x240] sm:$0xf]  ;;  %v6701_v48 = vld [vmem:[%s7195_s26 + $0x24c] sm:$0xf0]  ;;  %v4868_v51 = vor.u32 %v6637_v46, %v4867_v45 }
  0x22   : > { %2975 = vmatpush.bf16.msra.mxu3 %v5284_v35  ;;  %v5251_v49 = vld [vmem:[%s7195_s26 + $0x340] sm:$0xf]  ;;  %v6733_v50 = vld [vmem:[%s7195_s26 + $0x34c] sm:$0xf0]  ;;  %v5124_v52 = vor.u32 %v6701_v48, %v5123_v47 }
  0x23   : > { %v5252_v53 = vor.u32 %v6733_v50, %v5251_v49  ;;  %v4851_v54 = vld [vmem:[%s7195_s26 + $0x20] sm:$0xf]  ;;  %v6633_v55 = vld [vmem:[%s7195_s26 + $0x2c] sm:$0xf0] }
  0x24   : > { %2907 = vmatpush.bf16.msra.mxu0 %v4884_v42  ;;  %7063 = vmatpush.bf16.msra.mxu1 %v4884_v42  ;;  %v5107_v56 = vld [vmem:[%s7195_s26 + $0x220] sm:$0xf]  ;;  %v6697_v57 = vld [vmem:[%s7195_s26 + $0x22c] sm:$0xf0]  ;;  %v4852_v61 = vor.u32 %v6633_v55, %v4851_v54 }
  0x25   : > { %2953 = vmatpush.bf16.msra.mxu2 %v5140_v43  ;;  %v5235_v58 = vld [vmem:[%s7195_s26 + $0x320] sm:$0xf]  ;;  %v6729_v59 = vld [vmem:[%s7195_s26 + $0x32c] sm:$0xf0]  ;;  %v5108_v1 = vor.u32 %v6697_v57, %v5107_v56 }
  0x26   : > { %2976 = vmatpush.bf16.msra.mxu3 %v5268_v44  ;;  %v4835_v60 = vld [vmem:[%s7195_s26] sm:$0xf]  ;;  %v6629_v62 = vld [vmem:[%s7195_s26 + $0xc] sm:$0xf0]  ;;  %v5236_v2 = vor.u32 %v6729_v59, %v5235_v58  ;;  %v7145_v58 = vmov 0  }
  0x27   : > { %v5091_v63 = vld [vmem:[%s7195_s26 + $0x200] sm:$0xf]  ;;  %v7245_v0 = vld [vmem:[%s9127_s1 + $0xd0] sm:$0xff]  ;;  %v4836_v13 = vor.u32 %v6629_v62, %v4835_v60  ;;  %7094 = vset.pattern.permute.xlu0 %v7145_v58  ;;  %7096 = vset.pattern.permute.xlu2 %v7145_v58 }
  0x28   : > { %2908 = vmatpush.bf16.msra.mxu0 %v4868_v51  ;;  %7064 = vmatpush.bf16.msra.mxu1 %v4868_v51  ;;  %v6693_v3 = vld [vmem:[%s7195_s26 + $0x20c] sm:$0xf0]  ;;  %v5075_v4 = vld [vmem:[%s7195_s26 + $0x1e0] sm:$0xf]  ;;  %v805_v12 = vunpack.c.l.b16 %v7245_v0 }
  0x29   : > { %2954 = vmatpush.bf16.msra.mxu2 %v5124_v52  ;;  %v6689_v5 = vld [vmem:[%s7195_s26 + $0x1ec] sm:$0xf0]  ;;  %v5219_v6 = vld [vmem:[%s7195_s26 + $0x300] sm:$0xf]  ;;  %v5092_v17 = vor.u32 %v6693_v3, %v5091_v63  ;;  %7095 = vset.pattern.permute.xlu1 %v7145_v58 }
  0x2a   : > { %2977 = vmatpush.bf16.msra.mxu3 %v5252_v53  ;;  %v6725_v7 = vld [vmem:[%s7195_s26 + $0x30c] sm:$0xf0]  ;;  %v4731_v8 = vld [vmem:[%s9127_s1] sm:$0xf]  ;;  %v5076_v18 = vor.u32 %v6689_v5, %v5075_v4  ;;  %v7280_v28 = vpack.c.b16 %v805_v12, %v805_v12  ;;  %v4783_v4 = vld [vmem:[%s9127_s1 + $0x68] sm:$0xf] }
  0x2b   : > { %v5459_v10 = vld [vmem:[%s7195_s26 + $0x4e0] sm:$0xf]  ;;  %v6785_v11 = vld [vmem:[%s7195_s26 + $0x4ec] sm:$0xf0]  ;;  %v5220_v22 = vor.u32 %v6725_v7, %v5219_v6  ;;  %v7278_v27 = vor.u32 %v6607_v9, %v4731_v8  ;;  %v6620_v5 = vld [vmem:[%s9127_s1 + $0x98] sm:$0xf0] }
  0x2c   : > { %2909 = vmatpush.bf16.msra.mxu0 %v4852_v61  ;;  %7065 = vmatpush.bf16.msra.mxu1 %v4852_v61  ;;  %v5059_v16 = vld [vmem:[%s7195_s26 + $0x1c0] sm:$0xf]  ;;  %v6685_v19 = vld [vmem:[%s7195_s26 + $0x1cc] sm:$0xf0]  ;;  %v5460_v23 = vor.u32 %v6785_v11, %v5459_v10  ;;  %v6621_v12 = vld [vmem:[%s9127_s1 + $0xa0] sm:$0xf0] }
  0x2d   : > { %2955 = vmatpush.bf16.msra.mxu2 %v5108_v1  ;;  %v5843_v20 = vld [vmem:[%s7195_s26 + $0x7e0] sm:$0xf]  ;;  %v6881_v21 = vld [vmem:[%s7195_s26 + $0x7ec] sm:$0xf0]  ;;  %v5060_v34 = vor.u32 %v6685_v19, %v5059_v16 }
  0x2e   : > { %2978 = vmatpush.bf16.msra.mxu3 %v5236_v2  ;;  %v4741_v25 = vld [vmem:[%s9127_s1 + $0x3c] sm:$0xf0]  ;;  %v6781_v29 = vld [vmem:[%s7195_s26 + $0x4cc] sm:$0xf0]  ;;  %v5844_v33 = vor.u32 %v6881_v21, %v5843_v20  ;;  %v6615_v20 = vld [vmem:[%s9127_s1 + $0x74] sm:$0xf] }
  0x2f   : > { %v5443_v26 = vld [vmem:[%s7195_s26 + $0x4c0] sm:$0xf]  ;;  %v6849_v31 = vld [vmem:[%s7195_s26 + $0x6ec] sm:$0xf0]  ;;  %v7287_v35 = vor.u32 %v6602_v24, %v4741_v25  ;;  %v4793_v21 = vld [vmem:[%s9127_s1 + $0xa4] sm:$0xf0]  ;;  %v7343_v24 = vor.u32 %v6620_v5, %v4783_v4 }
  0x30   : > { %v5715_v30 = vld [vmem:[%s7195_s26 + $0x6e0] sm:$0xf]  ;;  %2910 = vmatpush.bf16.msra.mxu0 %v4836_v13  ;;  %7066 = vmatpush.bf16.msra.mxu1 %v4836_v13  ;;  %v6877_v37 = vld [vmem:[%s7195_s26 + $0x7cc] sm:$0xf0]  ;;  %v5444_v38 = vor.u32 %v6781_v29, %v5443_v26 }
  0x31   : > { %2956 = vmatpush.bf16.msra.mxu2 %v5092_v17  ;;  %9163 = vst [vmem:[#allocation3_spill] sm:$0xff] %v7287_v35  ;;  %v5827_v36 = vld [vmem:[%s7195_s26 + $0x7c0] sm:$0xf]  ;;  %v6681_v40 = vld [vmem:[%s7195_s26 + $0x1ac] sm:$0xf0]  ;;  %v5716_v42 = vor.u32 %v6849_v31, %v5715_v30 }
  0x32   : > { %2979 = vmatpush.bf16.msra.mxu3 %v5220_v22  ;;  %v5043_v39 = vld [vmem:[%s7195_s26 + $0x1a0] sm:$0xf]  ;;  %v6777_v43 = vld [vmem:[%s7195_s26 + $0x4ac] sm:$0xf0]  ;;  %v5828_v46 = vor.u32 %v6877_v37, %v5827_v36  ;;  %v7353_v36 = vor.u32 %v6615_v20, %v4793_v21 }
  0x33   : > { %v5427_v41 = vld [vmem:[%s7195_s26 + $0x4a0] sm:$0xf]  ;;  %2911 = vmatmul.bf16.vlgmr.msra.gmra.mxu0 %v7278_v27  ;;  %2921 = vmatmul.bf16.vlgmr.msra.gmra.mxu1 %v7280_v28  ;;  %v6845_v45 = vld [vmem:[%s7195_s26 + $0x6cc] sm:$0xf0]  ;;  %v5044_v47 = vor.u32 %v6681_v40, %v5043_v39 }
  0x34   : > { %2926 = vmatpush.bf16.msrb.mxu1 %v5076_v18  ;;  %2995 = vmatpush.bf16.msrb.mxu0 %v5460_v23  ;;  %v5699_v44 = vld [vmem:[%s7195_s26 + $0x6c0] sm:$0xf]  ;;  %v6873_v50 = vld [vmem:[%s7195_s26 + $0x7ac] sm:$0xf0]  ;;  %v5428_v51 = vor.u32 %v6777_v43, %v5427_v41 }
  0x35   : > { %2957 = vmatmul.bf16.vlgmr.msra.gmra.mxu2 %v7285_v32  ;;  %2980 = vmatmul.bf16.vlgmr.msra.gmra.mxu3 %v7287_v35  ;;  %v5027_v48 = vld [vmem:[%s7195_s26 + $0x180] sm:$0xf]  ;;  %v6677_v52 = vld [vmem:[%s7195_s26 + $0x18c] sm:$0xf0]  ;;  %v5700_v54 = vor.u32 %v6845_v45, %v5699_v44 }
  0x36   : > { %3064 = vmatpush.bf16.msrb.mxu3 %v5844_v33  ;;  %v5811_v49 = vld [vmem:[%s7195_s26 + $0x7a0] sm:$0xf]  ;;  %3041 = vmatpush.bf16.msrb.mxu2 %v5716_v42  ;;  %v6773_v55 = vld [vmem:[%s7195_s26 + $0x48c] sm:$0xf0]  ;;  %v5028_v62 = vor.u32 %v6677_v52, %v5027_v48  ;;  %v689_v33 = vld [vmem:[%s9128_s2 + $0x8] sm:$0xff] }
  0x37   : > { %v5411_v53 = vld [vmem:[%s7195_s26 + $0x480] sm:$0xf]  ;;  %v6841_v57 = vld [vmem:[%s7195_s26 + $0x6ac] sm:$0xf0]  ;;  %v5812_v61 = vor.u32 %v6873_v50, %v5811_v49 }
  0x38   : > { %2927 = vmatpush.bf16.msrb.mxu1 %v5060_v34  ;;  %2996 = vmatpush.bf16.msrb.mxu0 %v5444_v38  ;;  %v5683_v56 = vld [vmem:[%s7195_s26 + $0x6a0] sm:$0xf]  ;;  %v6673_v60 = vld [vmem:[%s7195_s26 + $0x16c] sm:$0xf0]  ;;  %v5412_v3 = vor.u32 %v6773_v55, %v5411_v53 }
  0x39   : > { %v5011_v59 = vld [vmem:[%s7195_s26 + $0x160] sm:$0xf]  ;;  %v6869_v1 = vld [vmem:[%s7195_s26 + $0x78c] sm:$0xf0]  ;;  %v5684_v7 = vor.u32 %v6841_v57, %v5683_v56 }
  0x3a   : > { %3065 = vmatpush.bf16.msrb.mxu3 %v5828_v46  ;;  %v5795_v63 = vld [vmem:[%s7195_s26 + $0x780] sm:$0xf]  ;;  %3042 = vmatpush.bf16.msrb.mxu2 %v5700_v54  ;;  %v6769_v8 = vld [vmem:[%s7195_s26 + $0x46c] sm:$0xf0]  ;;  %v5012_v15 = vor.u32 %v6673_v60, %v5011_v59  ;;  %v6601_v59 = vld [vmem:[%s9127_s1 + $0x4] sm:$0xf] }
  0x3b   : > { %v688_v2 = vld [vmem:[%s9128_s2] sm:$0xff]  ;;  %v6837_v10 = vld [vmem:[%s7195_s26 + $0x68c] sm:$0xf0]  ;;  %v5796_v14 = vor.u32 %v6869_v1, %v5795_v63  ;;  %v4733_v60 = vld [vmem:[%s9127_s1 + $0x34] sm:$0xf0] }
  0x3c   : > { %2928 = vmatpush.bf16.msrb.mxu1 %v5044_v47  ;;  %2997 = vmatpush.bf16.msrb.mxu0 %v5428_v51  ;;  %v5395_v6 = vld [vmem:[%s7195_s26 + $0x460] sm:$0xf]  ;;  %v4791_v11 = vld [vmem:[%s9127_s1 + $0x70] sm:$0xf] }
  0x3d   : > { %v5667_v9 = vld [vmem:[%s7195_s26 + $0x680] sm:$0xf]  ;;  %695 = vperm.xlu0 %7094, %v688_v2   ;;  %v6669_v16 = vld [vmem:[%s7195_s26 + $0x14c] sm:$0xf0]  ;;  %v5396_v19 = vor.u32 %v6769_v8, %v5395_v6  ;;  %v7348_v30 = vor.u32 %v6621_v12, %v4791_v11  ;;  %v282_v6 = vld [vmem:[%s9127_s1 + $0xd8] sm:$0xff] }
  0x3e   : > { %v4995_v13 = vld [vmem:[%s7195_s26 + $0x140] sm:$0xf]  ;;  %3066 = vmatpush.bf16.msrb.mxu3 %v5812_v61  ;;  %v6865_v18 = vld [vmem:[%s7195_s26 + $0x76c] sm:$0xf0]  ;;  %3043 = vmatpush.bf16.msrb.mxu2 %v5684_v7  ;;  %v5668_v23 = vor.u32 %v6837_v10, %v5667_v9 }
  0x3f   : > { %v5779_v17 = vld [vmem:[%s7195_s26 + $0x760] sm:$0xf]  ;;  %v6765_v25 = vld [vmem:[%s7195_s26 + $0x44c] sm:$0xf0]  ;;  %9164 = vst [vmem:[#allocation4_spill] sm:$0xff] %v7348_v30  ;;  %v4996_v34 = vor.u32 %v6669_v16, %v4995_v13  ;;  %v7400_v16 = vor.u32 %v6601_v59, %v4733_v60 }
  0x40   : > { %2929 = vmatpush.bf16.msrb.mxu1 %v5028_v62  ;;  %2998 = vmatpush.bf16.msrb.mxu0 %v5412_v3  ;;  %v5379_v22 = vld [vmem:[%s7195_s26 + $0x440] sm:$0xf]  ;;  %v6833_v29 = vld [vmem:[%s7195_s26 + $0x66c] sm:$0xf0]  ;;  %v5780_v31 = vor.u32 %v6865_v18, %v5779_v17  ;;  %v807_v17 = vunpack.c.l.b16 %v282_v6  ;;  %v6609_v18 = vld [vmem:[%s9127_s1 + $0x40] sm:$0xf0] }
  0x41   : > { %v5651_v26 = vld [vmem:[%s7195_s26 + $0x660] sm:$0xf]  ;;  %v6861_v38 = vld [vmem:[%s7195_s26 + $0x74c] sm:$0xf0]  ;;  %v5380_v39 = vor.u32 %v6765_v25, %v5379_v22  ;;  %v808_v22 = vunpack.c.h.b16 %v282_v6 }
  0x42   : > { %3067 = vmatpush.bf16.msrb.mxu3 %v5796_v14  ;;  %v5763_v37 = vld [vmem:[%s7195_s26 + $0x740] sm:$0xf]  ;;  %v6665_v41 = vld [vmem:[%s7195_s26 + $0x12c] sm:$0xf0]  ;;  %3044 = vmatpush.bf16.msrb.mxu2 %v5668_v23  ;;  %v5652_v43 = vor.u32 %v6833_v29, %v5651_v26 }
  0x43   : > { %v4979_v40 = vld [vmem:[%s7195_s26 + $0x120] sm:$0xf]  ;;  %2916 = vmatmul.bf16.gmra.mxu0 %v7343_v24  ;;  %v6761_v44 = vld [vmem:[%s7195_s26 + $0x42c] sm:$0xf0]  ;;  %v5764_v48 = vor.u32 %v6861_v38, %v5763_v37 }
  0x44   : > { %2930 = vmatpush.bf16.msrb.mxu1 %v5012_v15  ;;  %2999 = vmatpush.bf16.msrb.mxu0 %v5396_v19  ;;  %v5363_v42 = vld [vmem:[%s7195_s26 + $0x420] sm:$0xf]  ;;  %v6829_v46 = vld [vmem:[%s7195_s26 + $0x64c] sm:$0xf0]  ;;  %v4980_v50 = vor.u32 %v6665_v41, %v4979_v40  ;;  %v7419_v40 = vpack.c.b16 %v808_v22, %v808_v22 }
  0x45   : > { %v5635_v45 = vld [vmem:[%s7195_s26 + $0x640] sm:$0xf]  ;;  %700 = vperm.xlu0 %7094, %v689_v33   ;;  %2962 = vmatmul.bf16.gmra.mxu2 %v7348_v30  ;;  %v6857_v52 = vld [vmem:[%s7195_s26 + $0x72c] sm:$0xf0]  ;;  %v5364_v54 = vor.u32 %v6761_v44, %v5363_v42  ;;  %v7412_v33 = vpack.c.b16 %v807_v17, %v807_v17 }
  0x46   : > { %v4963_v47 = vld [vmem:[%s7195_s26 + $0x100] sm:$0xf]  ;;  %3068 = vmatpush.bf16.msrb.mxu3 %v5780_v31  ;;  %v690_v53 = vld [vmem:[%s9128_s2 + $0x10] sm:$0xff]  ;;  %3045 = vmatpush.bf16.msrb.mxu2 %v5652_v43  ;;  %v5636_v58 = vor.u32 %v6829_v46, %v5635_v45  ;;  %9166 = vst [vmem:[#allocation6_spill] sm:$0xff] %v7419_v40 }
  0x47   : > { %v692_v49 = vld [vmem:[%s9128_s2 + $0x20] sm:$0xff]  ;;  %2985 = vmatmul.bf16.gmra.mxu3 %v7353_v36  ;;  %v6661_v55 = vld [vmem:[%s7195_s26 + $0x10c] sm:$0xf0]  ;;  %705 = vperm.xlu1 %7095, %v690_v53   ;;  %9165 = vst [vmem:[#allocation5_spill] sm:$0xff] %v7412_v33 }
  0x48   : > { %2931 = vmatpush.bf16.msrb.mxu1 %v4996_v34  ;;  %v5747_v51 = vld [vmem:[%s7195_s26 + $0x720] sm:$0xf]  ;;  %3000 = vmatpush.bf16.msrb.mxu0 %v5380_v39  ;;  %v6757_v57 = vld [vmem:[%s7195_s26 + $0x40c] sm:$0xf0]  ;;  %v4964_v5 = vor.u32 %v6661_v55, %v4963_v47  ;;  %v691_v39 = vld [vmem:[%s9128_s2 + $0x18] sm:$0xff] }
  0x49   : > { %v5347_v56 = vld [vmem:[%s7195_s26 + $0x400] sm:$0xf]  ;;  %v6825_v62 = vld [vmem:[%s7195_s26 + $0x62c] sm:$0xf0]  ;;  %715 = vperm.xlu2 %7096, %v692_v49   ;;  %v5748_v1 = vor.u32 %v6857_v52, %v5747_v51 }
  0x4a   : > { %v5619_v61 = vld [vmem:[%s7195_s26 + $0x620] sm:$0xf]  ;;  %3069 = vmatpush.bf16.msrb.mxu3 %v5764_v48  ;;  %v6817_v2 = vld [vmem:[%s7195_s26 + $0x5ec] sm:$0xf0]  ;;  %v5348_v9 = vor.u32 %v6757_v57, %v5347_v56  ;;  %3046 = vmatpush.bf16.msrb.mxu2 %v5636_v58  ;;  %v6614_v57 = vld [vmem:[%s9127_s1 + $0x6c] sm:$0xf] }
  0x4b   : > { %v5587_v63 = vld [vmem:[%s7195_s26 + $0x5e0] sm:$0xf]  ;;  %v6913_v4 = vld [vmem:[%s7195_s26 + $0x8ec] sm:$0xf0]  ;;  %v5620_v10 = vor.u32 %v6825_v62, %v5619_v61 }
  0x4c   : > { %v5971_v3 = vld [vmem:[%s7195_s26 + $0x8e0] sm:$0xf]  ;;  %2932 = vmatpush.bf16.msrb.mxu1 %v4980_v50  ;;  %v6853_v8 = vld [vmem:[%s7195_s26 + $0x70c] sm:$0xf0]  ;;  %3001 = vmatpush.bf16.msrb.mxu0 %v5364_v54  ;;  %v5588_v14 = vor.u32 %v6817_v2, %v5587_v63 }
  0x4d   : > { %v5731_v7 = vld [vmem:[%s7195_s26 + $0x700] sm:$0xf]  ;;  %v4747_v11 = vld [vmem:[%s9127_s1 + $0x10] sm:$0xf]  ;;  %v5972_v15 = vor.u32 %v6913_v4, %v5971_v3 }
  0x4e   : > { %v5603_v12 = vld [vmem:[%s7195_s26 + $0x600] sm:$0xf]  ;;  %v6821_v13 = vld [vmem:[%s7195_s26 + $0x60c] sm:$0xf0]  ;;  %3070 = vmatpush.bf16.msrb.mxu3 %v5748_v1  ;;  %v5732_v19 = vor.u32 %v6853_v8, %v5731_v7  ;;  %3047 = vmatpush.bf16.msrb.mxu2 %v5620_v10  ;;  %v7409_v29 = vor.u32 %v6609_v18, %v4747_v11  ;;  %v4799_v11 = vld [vmem:[%s9127_s1 + $0x78] sm:$0xf] }
  0x4f   : > { %v5571_v20 = vld [vmem:[%s7195_s26 + $0x5c0] sm:$0xf]  ;;  %v6813_v21 = vld [vmem:[%s7195_s26 + $0x5cc] sm:$0xf0]  ;;  %v5604_v26 = vor.u32 %v6821_v13, %v5603_v12  ;;  %710 = vperm.xlu1 %7095, %v691_v39   ;;  %v6622_v12 = vld [vmem:[%s9127_s1 + $0xa8] sm:$0xf0] }
  0x50   : > { %2933 = vmatpush.bf16.msrb.mxu1 %v4964_v5  ;;  %v5955_v23 = vld [vmem:[%s7195_s26 + $0x8c0] sm:$0xf]  ;;  %v6909_v25 = vld [vmem:[%s7195_s26 + $0x8cc] sm:$0xf0]  ;;  %3002 = vmatpush.bf16.msrb.mxu0 %v5348_v9  ;;  %v5572_v31 = vor.u32 %v6813_v21, %v5571_v20  ;;  %v6610_v20 = vld [vmem:[%s9127_s1 + $0x48] sm:$0xf0] }
  0x51   : > { %v5956_v34 = vor.u32 %v6909_v25, %v5955_v23  ;;  %v5555_v37 = vld [vmem:[%s7195_s26 + $0x5a0] sm:$0xf]  ;;  %v6809_v38 = vld [vmem:[%s7195_s26 + $0x5ac] sm:$0xf0]  ;;  %v6604_v25 = vld [vmem:[%s9127_s1 + $0x1c] sm:$0xf] }
  0x52   : > { %3071 = vmatpush.bf16.msrb.mxu3 %v5732_v19  ;;  %v5939_v41 = vld [vmem:[%s7195_s26 + $0x8a0] sm:$0xf]  ;;  %v6905_v42 = vld [vmem:[%s7195_s26 + $0x8ac] sm:$0xf0]  ;;  %3048 = vmatpush.bf16.msrb.mxu2 %v5604_v26  ;;  %v5556_v44 = vor.u32 %v6809_v38, %v5555_v37 }
  0x53   : > { %2934 = vmatmul.bf16.vlgmr.msrb.gmra.mxu1 %v7400_v16  ;;  %v6227_v43 = vld [vmem:[%s7195_s26 + $0xae0] sm:$0xf]  ;;  %3003 = vmatmul.bf16.vlgmr.msrb.gmra.mxu0 %v7409_v29  ;;  %v6977_v45 = vld [vmem:[%s7195_s26 + $0xaec] sm:$0xf0]  ;;  %v5940_v46 = vor.u32 %v6905_v42, %v5939_v41 }
  0x54   : > { %3018 = vmatpush.bf16.msra.mxu1 %v5588_v14  ;;  %3087 = vmatpush.bf16.msra.mxu0 %v5972_v15  ;;  %v5539_v47 = vld [vmem:[%s7195_s26 + $0x580] sm:$0xf]  ;;  %v6805_v48 = vld [vmem:[%s7195_s26 + $0x58c] sm:$0xf0]  ;;  %v6228_v49 = vor.u32 %v6977_v45, %v6227_v43  ;;  %v4755_v15 = vld [vmem:[%s9127_s1 + $0x18] sm:$0xf] }
  0x55   : > { %2967 = vmatmul.bf16.gmra.mxu2 %v7412_v33  ;;  %v6355_v50 = vld [vmem:[%s7195_s26 + $0xbe0] sm:$0xf]  ;;  %v6901_v52 = vld [vmem:[%s7195_s26 + $0x88c] sm:$0xf0]  ;;  %v5540_v59 = vor.u32 %v6805_v48, %v5539_v47  ;;  %v7482_v41 = vor.u32 %v6610_v20, %v4755_v15  ;;  %v6617_v20 = vld [vmem:[%s9127_s1 + $0x84] sm:$0xf] }
  0x56   : > { %v5923_v51 = vld [vmem:[%s7195_s26 + $0x880] sm:$0xf]  ;;  %v7009_v53 = vld [vmem:[%s7195_s26 + $0xbec] sm:$0xf0]  ;;  %3133 = vmatpush.bf16.msra.mxu2 %v6228_v49 }
  0x57   : > { %2990 = vmatmul.bf16.gmra.mxu3 %v7419_v40  ;;  %v6356_v54 = vor.u32 %v7009_v53, %v6355_v50  ;;  %v6211_v55 = vld [vmem:[%s7195_s26 + $0xac0] sm:$0xf]  ;;  %v6973_v56 = vld [vmem:[%s7195_s26 + $0xacc] sm:$0xf0]  ;;  %v5924_v63 = vor.u32 %v6901_v52, %v5923_v51  ;;  %9167 = vst [vmem:[#allocation7_spill] sm:$0xff] %v7482_v41 }
  0x58   : > { %3019 = vmatpush.bf16.msra.mxu1 %v5572_v31  ;;  %3088 = vmatpush.bf16.msra.mxu0 %v5956_v34  ;;  %v4785_v58 = vld [vmem:[%s9127_s1 + $0x9c] sm:$0xf0]  ;;  %v6212_v60 = vor.u32 %v6973_v56, %v6211_v55  ;;  %v7005_v62 = vld [vmem:[%s7195_s26 + $0xbcc] sm:$0xf0]  ;;  %v7477_v34 = vor.u32 %v6622_v12, %v4799_v11 }
  0x59   : > { %v6339_v61 = vld [vmem:[%s7195_s26 + $0xbc0] sm:$0xf]  ;;  %v6801_v2 = vld [vmem:[%s7195_s26 + $0x56c] sm:$0xf0]  ;;  %3156 = vmatpush.bf16.msra.mxu3 %v6356_v54  ;;  %v7458_v14 = vor.u32 %v6614_v57, %v4785_v58 }
  0x5a   : > { %v5523_v1 = vld [vmem:[%s7195_s26 + $0x560] sm:$0xf]  ;;  %v6340_v3 = vor.u32 %v7005_v62, %v6339_v61  ;;  %v6897_v6 = vld [vmem:[%s7195_s26 + $0x86c] sm:$0xf0]  ;;  %3134 = vmatpush.bf16.msra.mxu2 %v6212_v60 }
  0x5b   : > { %v6195_v4 = vld [vmem:[%s7195_s26 + $0xaa0] sm:$0xf]  ;;  %v6969_v7 = vld [vmem:[%s7195_s26 + $0xaac] sm:$0xf0]  ;;  %v5524_v13 = vor.u32 %v6801_v2, %v5523_v1 }
  0x5c   : > { %3020 = vmatpush.bf16.msra.mxu1 %v5556_v44  ;;  %3089 = vmatpush.bf16.msra.mxu0 %v5940_v46  ;;  %v5907_v5 = vld [vmem:[%s7195_s26 + $0x860] sm:$0xf]  ;;  %v6196_v8 = vor.u32 %v6969_v7, %v6195_v4  ;;  %v7001_v10 = vld [vmem:[%s7195_s26 + $0xbac] sm:$0xf0] }
  0x5d   : > { %v6323_v9 = vld [vmem:[%s7195_s26 + $0xba0] sm:$0xf]  ;;  %v5908_v17 = vor.u32 %v6897_v6, %v5907_v5  ;;  %v6797_v19 = vld [vmem:[%s7195_s26 + $0x54c] sm:$0xf0]  ;;  %3157 = vmatpush.bf16.msra.mxu3 %v6340_v3 }
  0x5e   : > { %v5507_v18 = vld [vmem:[%s7195_s26 + $0x540] sm:$0xf]  ;;  %v6893_v22 = vld [vmem:[%s7195_s26 + $0x84c] sm:$0xf0]  ;;  %v6324_v23 = vor.u32 %v7001_v10, %v6323_v9  ;;  %3135 = vmatpush.bf16.msra.mxu2 %v6196_v8  ;;  %v806_v8 = vunpack.c.h.b16 %v7245_v0 }
  0x5f   : > { %v5891_v21 = vld [vmem:[%s7195_s26 + $0x840] sm:$0xf]  ;;  %v4757_v26 = vld [vmem:[%s9127_s1 + $0x4c] sm:$0xf0]  ;;  %v5508_v37 = vor.u32 %v6797_v19, %v5507_v18  ;;  %v6623_v19 = vld [vmem:[%s9127_s1 + $0xb0] sm:$0xf0] }
  0x60   : > { %3021 = vmatpush.bf16.msra.mxu1 %v5540_v59  ;;  %3090 = vmatpush.bf16.msra.mxu0 %v5924_v63  ;;  %v6179_v31 = vld [vmem:[%s7195_s26 + $0xa80] sm:$0xf]  ;;  %v6965_v39 = vld [vmem:[%s7195_s26 + $0xa8c] sm:$0xf0]  ;;  %v5892_v42 = vor.u32 %v6893_v22, %v5891_v21  ;;  %v7487_v47 = vor.u32 %v6604_v25, %v4757_v26  ;;  %v4809_v21 = vld [vmem:[%s9127_s1 + $0xb4] sm:$0xf0] }
  0x61   : > { %v5491_v38 = vld [vmem:[%s7195_s26 + $0x520] sm:$0xf]  ;;  %v6793_v43 = vld [vmem:[%s7195_s26 + $0x52c] sm:$0xf0]  ;;  %v6180_v44 = vor.u32 %v6965_v39, %v6179_v31  ;;  %3158 = vmatpush.bf16.msra.mxu3 %v6324_v23 }
  0x62   : > { %v6307_v45 = vld [vmem:[%s7195_s26 + $0xb80] sm:$0xf]  ;;  %v6997_v46 = vld [vmem:[%s7195_s26 + $0xb8c] sm:$0xf0]  ;;  %v5492_v53 = vor.u32 %v6793_v43, %v5491_v38 }
  0x63   : > { %2939 = vmatmul.bf16.gmra.mxu1 %v7458_v14  ;;  %v5875_v48 = vld [vmem:[%s7195_s26 + $0x820] sm:$0xf]  ;;  %v6889_v49 = vld [vmem:[%s7195_s26 + $0x82c] sm:$0xf0]  ;;  %3136 = vmatpush.bf16.msra.mxu2 %v6180_v44  ;;  %v6308_v50 = vor.u32 %v6997_v46, %v6307_v45  ;;  %v7542_v45 = vor.u32 %v6617_v20, %v4809_v21  ;;  %v6719_v20 = vld [vmem:[%s7195_s26 + $0x2e4] sm:$0xf] }
  0x64   : > { %3022 = vmatpush.bf16.msra.mxu1 %v5524_v13  ;;  %3091 = vmatpush.bf16.msra.mxu0 %v5908_v17  ;;  %v6163_v51 = vld [vmem:[%s7195_s26 + $0xa60] sm:$0xf]  ;;  %v6961_v52 = vld [vmem:[%s7195_s26 + $0xa6c] sm:$0xf0]  ;;  %v5876_v57 = vor.u32 %v6889_v49, %v5875_v48  ;;  %v7517_v17 = vpack.c.b16 %v806_v8, %v806_v8  ;;  %v5205_v21 = vld [vmem:[%s7195_s26 + $0x2f0] sm:$0xf0] }
  0x65   : > { %3008 = vmatmul.bf16.gmra.mxu0 %v7477_v34  ;;  %v5475_v54 = vld [vmem:[%s7195_s26 + $0x500] sm:$0xf]  ;;  %v6789_v55 = vld [vmem:[%s7195_s26 + $0x50c] sm:$0xf0]  ;;  %v6164_v56 = vor.u32 %v6961_v52, %v6163_v51  ;;  %3049 = vmatmul.bf16.vlgmr.msrb.gmra.mxu2 %v7482_v41 }
  0x66   : > { %v5859_v58 = vld [vmem:[%s7195_s26 + $0x800] sm:$0xf]  ;;  %v6993_v60 = vld [vmem:[%s7195_s26 + $0xb6c] sm:$0xf0]  ;;  %3159 = vmatpush.bf16.msra.mxu3 %v6308_v50  ;;  %v5476_v4 = vor.u32 %v6789_v55, %v5475_v54 }
  0x67   : > { %v6291_v59 = vld [vmem:[%s7195_s26 + $0xb60] sm:$0xf]  ;;  %3072 = vmatmul.bf16.vlgmr.msrb.gmra.mxu3 %v7487_v47  ;;  %v6885_v61 = vld [vmem:[%s7195_s26 + $0x80c] sm:$0xf0]  ;;  %3137 = vmatpush.bf16.msra.mxu2 %v6164_v56  ;;  %v6603_v56 = vld [vmem:[%s9127_s1 + $0x14] sm:$0xf] }
  0x68   : > { %3023 = vmatpush.bf16.msra.mxu1 %v5508_v37  ;;  %3092 = vmatpush.bf16.msra.mxu0 %v5892_v42  ;;  %v6147_v62 = vld [vmem:[%s7195_s26 + $0xa40] sm:$0xf]  ;;  %v6957_v63 = vld [vmem:[%s7195_s26 + $0xa4c] sm:$0xf0]  ;;  %v6292_v1 = vor.u32 %v6993_v60, %v6291_v59  ;;  %v5860_v10 = vor.u32 %v6885_v61, %v5859_v58  ;;  %v284_v58 = vld [vmem:[%s9127_s1 + $0xe8] sm:$0xff] }
  0x69   : > { %v6148_v2 = vor.u32 %v6957_v63, %v6147_v62  ;;  %v6275_v3 = vld [vmem:[%s7195_s26 + $0xb40] sm:$0xf]  ;;  %v6989_v5 = vld [vmem:[%s7195_s26 + $0xb4c] sm:$0xf0]  ;;  %v811_v61 = vunpack.c.l.b16 %v284_v58  ;;  %v6611_v63 = vld [vmem:[%s9127_s1 + $0x50] sm:$0xf0] }
  0x6a   : > { %v6131_v6 = vld [vmem:[%s7195_s26 + $0xa20] sm:$0xf]  ;;  %v6953_v7 = vld [vmem:[%s7195_s26 + $0xa2c] sm:$0xf0]  ;;  %3160 = vmatpush.bf16.msra.mxu3 %v6292_v1  ;;  %v6276_v11 = vor.u32 %v6989_v5, %v6275_v3  ;;  %v812_v1 = vunpack.c.h.b16 %v284_v58 }
  0x6b   : > { %v7512_v9 = vld [vmem:[%s9127_s1 + $0xe0] sm:$0xff]  ;;  %3138 = vmatpush.bf16.msra.mxu2 %v6148_v2  ;;  %v6132_v12 = vor.u32 %v6953_v7, %v6131_v6  ;;  %v6985_v0 = vld [vmem:[%s7195_s26 + $0xb2c] sm:$0xf0]  ;;  %v7575_v5 = vpack.c.b16 %v811_v61, %v811_v61 }
  0x6c   : > { %3024 = vmatpush.bf16.msra.mxu1 %v5492_v53  ;;  %3093 = vmatpush.bf16.msra.mxu0 %v5876_v57  ;;  %v809_v13 = vunpack.c.l.b16 %v7512_v9  ;;  %v6259_v15 = vld [vmem:[%s7195_s26 + $0xb20] sm:$0xf]  ;;  %v6949_v25 = vld [vmem:[%s7195_s26 + $0xa0c] sm:$0xf0]  ;;  %v4749_v57 = vld [vmem:[%s9127_s1 + $0x44] sm:$0xf0]  ;;  %v7577_v7 = vpack.c.b16 %v812_v1, %v812_v1 }
  0x6d   : > { %v4807_v18 = vld [vmem:[%s9127_s1 + $0x80] sm:$0xf]  ;;  %v6260_v22 = vor.u32 %v6985_v0, %v6259_v15  ;;  %v6945_v38 = vld [vmem:[%s7195_s26 + $0x9ec] sm:$0xf0]  ;;  %v7562_v60 = vor.u32 %v6603_v56, %v4749_v57  ;;  %9169 = vst [vmem:[#allocation9_spill] sm:$0xff] %v7575_v5 }
  0x6e   : > { %3161 = vmatpush.bf16.msra.mxu3 %v6276_v11  ;;  %v6115_v23 = vld [vmem:[%s7195_s26 + $0xa00] sm:$0xf]  ;;  %v7533_v26 = vpack.c.b16 %v809_v13, %v809_v13  ;;  %v7538_v39 = vor.u32 %v6623_v19, %v4807_v18  ;;  %v6981_v44 = vld [vmem:[%s7195_s26 + $0xb0c] sm:$0xf0]  ;;  %9170 = vst [vmem:[#allocation10_spill] sm:$0xff] %v7577_v7 }
  0x6f   : > { %3139 = vmatpush.bf16.msra.mxu2 %v6132_v12  ;;  %v6116_v31 = vor.u32 %v6949_v25, %v6115_v23  ;;  %v6099_v37 = vld [vmem:[%s7195_s26 + $0x9e0] sm:$0xf]  ;;  %v6941_v49 = vld [vmem:[%s7195_s26 + $0x9cc] sm:$0xf0]  ;;  %v6687_v11 = vld [vmem:[%s7195_s26 + $0x1e4] sm:$0xf]  ;;  %v5208_v25 = vor.u32 %v6719_v20, %v5205_v21 }
  0x70   : > { %3025 = vmatpush.bf16.msra.mxu1 %v5476_v4  ;;  %3094 = vmatpush.bf16.msra.mxu0 %v5860_v10  ;;  %9168 = vst [vmem:[#allocation8_spill] sm:$0xff] %v7538_v39  ;;  %v6100_v42 = vor.u32 %v6945_v38, %v6099_v37  ;;  %v6243_v43 = vld [vmem:[%s7195_s26 + $0xb00] sm:$0xf]  ;;  %v6937_v52 = vld [vmem:[%s7195_s26 + $0x9ac] sm:$0xf0] }
  0x71   : > { %v6244_v46 = vor.u32 %v6981_v44, %v6243_v43  ;;  %v6083_v48 = vld [vmem:[%s7195_s26 + $0x9c0] sm:$0xf]  ;;  %v6933_v55 = vld [vmem:[%s7195_s26 + $0x98c] sm:$0xf0]  ;;  %v5077_v13 = vld [vmem:[%s7195_s26 + $0x1f0] sm:$0xf0] }
  0x72   : > { %3162 = vmatpush.bf16.msra.mxu3 %v6260_v22  ;;  %v6084_v50 = vor.u32 %v6941_v49, %v6083_v48  ;;  %v6067_v51 = vld [vmem:[%s7195_s26 + $0x9a0] sm:$0xf]  ;;  %v6929_v4 = vld [vmem:[%s7195_s26 + $0x96c] sm:$0xf0]  ;;  %v5080_v18 = vor.u32 %v6687_v11, %v5077_v13  ;;  %v6683_v37 = vld [vmem:[%s7195_s26 + $0x1c4] sm:$0xf] }
  0x73   : > { %2944 = vmatmul.bf16.gmra.mxu1 %v7517_v17  ;;  %3140 = vmatpush.bf16.msra.mxu2 %v6116_v31  ;;  %v6068_v53 = vor.u32 %v6937_v52, %v6067_v51  ;;  %v6051_v54 = vld [vmem:[%s7195_s26 + $0x980] sm:$0xf]  ;;  %v7025_v10 = vld [vmem:[%s7195_s26 + $0xc6c] sm:$0xf0]  ;;  %v5061_v38 = vld [vmem:[%s7195_s26 + $0x1d0] sm:$0xf0] }
  0x74   : > { %3110 = vmatpush.bf16.msrb.mxu1 %v6100_v42  ;;  %v6052_v59 = vor.u32 %v6933_v55, %v6051_v54  ;;  %v4763_v62 = vld [vmem:[%s9127_s1 + $0x20] sm:$0xf]  ;;  %v6925_v0 = vld [vmem:[%s7195_s26 + $0x94c] sm:$0xf0]  ;;  %v6616_v43 = vld [vmem:[%s9127_s1 + $0x7c] sm:$0xf] }
  0x75   : > { %3013 = vmatmul.bf16.gmra.mxu0 %v7533_v26  ;;  %3054 = vmatmul.bf16.gmra.mxu2 %v7538_v39  ;;  %v7570_v2 = vor.u32 %v6611_v63, %v4763_v62  ;;  %v6035_v3 = vld [vmem:[%s7195_s26 + $0x960] sm:$0xf]  ;;  %v7021_v23 = vld [vmem:[%s7195_s26 + $0xc4c] sm:$0xf0]  ;;  %v6715_v49 = vld [vmem:[%s7195_s26 + $0x2c4] sm:$0xf] }
  0x76   : > { %3163 = vmatpush.bf16.msra.mxu3 %v6244_v46  ;;  %v6036_v6 = vor.u32 %v6929_v4, %v6035_v3  ;;  %v6419_v8 = vld [vmem:[%s7195_s26 + $0xc60] sm:$0xf]  ;;  %v4801_v44 = vld [vmem:[%s9127_s1 + $0xac] sm:$0xf0]  ;;  %v5064_v46 = vor.u32 %v6683_v37, %v5061_v38  ;;  %v6679_v55 = vld [vmem:[%s7195_s26 + $0x1a4] sm:$0xf] }
  0x77   : > { %3077 = vmatmul.bf16.gmra.mxu3 %v7542_v45  ;;  %v6420_v12 = vor.u32 %v7025_v10, %v6419_v8  ;;  %v6019_v15 = vld [vmem:[%s7195_s26 + $0x940] sm:$0xf]  ;;  %3225 = vmatpush.bf16.msrb.mxu2 %v5080_v18  ;;  %v6921_v48 = vld [vmem:[%s7195_s26 + $0x92c] sm:$0xf0]  ;;  %v5045_v57 = vld [vmem:[%s7195_s26 + $0x1b0] sm:$0xf0]  ;;  %v7612_v3 = vor.u32 %v6616_v43, %v4801_v44 }
  0x78   : > { %3111 = vmatpush.bf16.msrb.mxu1 %v6084_v50  ;;  %v6020_v19 = vor.u32 %v6925_v0, %v6019_v15  ;;  %v6403_v22 = vld [vmem:[%s7195_s26 + $0xc40] sm:$0xf]  ;;  %v5189_v50 = vld [vmem:[%s7195_s26 + $0x2d0] sm:$0xf0]  ;;  %v7017_v54 = vld [vmem:[%s7195_s26 + $0xc2c] sm:$0xf0]  ;;  %v5048_v61 = vor.u32 %v6679_v55, %v5045_v57 }
  0x79   : > { %3183 = vmatpush.bf16.msrb.mxu0 %v6420_v12  ;;  %v6404_v31 = vor.u32 %v7021_v23, %v6403_v22  ;;  %v6003_v42 = vld [vmem:[%s7195_s26 + $0x920] sm:$0xf]  ;;  %v5192_v52 = vor.u32 %v6715_v49, %v5189_v50  ;;  %v6711_v62 = vld [vmem:[%s7195_s26 + $0x2a4] sm:$0xf]  ;;  %v5173_v63 = vld [vmem:[%s7195_s26 + $0x2b0] sm:$0xf0] }
  0x7a   : > { %3248 = vmatpush.bf16.msrb.mxu3 %v5208_v25  ;;  %v6004_v51 = vor.u32 %v6921_v48, %v6003_v42  ;;  %v5987_v58 = vld [vmem:[%s7195_s26 + $0x900] sm:$0xf]  ;;  %v4815_v4 = vld [vmem:[%s9127_s1 + $0x88] sm:$0xf]  ;;  %v5176_v8 = vor.u32 %v6711_v62, %v5173_v63  ;;  %v6612_v11 = vld [vmem:[%s9127_s1 + $0x58] sm:$0xf0] }
  0x7b   : > { %3226 = vmatpush.bf16.msrb.mxu2 %v5064_v46  ;;  %v4771_v10 = vld [vmem:[%s9127_s1 + $0x28] sm:$0xf]  ;;  %v6606_v12 = vld [vmem:[%s9127_s1 + $0x2c] sm:$0xf]  ;;  %v4773_v13 = vld [vmem:[%s9127_s1 + $0x5c] sm:$0xf0] }
  0x7c   : > { %3112 = vmatpush.bf16.msrb.mxu1 %v6068_v53  ;;  %v6387_v53 = vld [vmem:[%s7195_s26 + $0xc20] sm:$0xf]  ;;  %v7013_v18 = vld [vmem:[%s7195_s26 + $0xc0c] sm:$0xf0]  ;;  %v5029_v20 = vld [vmem:[%s7195_s26 + $0x190] sm:$0xf0]  ;;  %v7639_v21 = vor.u32 %v6612_v11, %v4771_v10  ;;  %v7643_v37 = vor.u32 %v6606_v12, %v4773_v13 }
  0x7d   : > { %3184 = vmatpush.bf16.msrb.mxu0 %v6404_v31  ;;  %v6388_v56 = vor.u32 %v7017_v54, %v6387_v53  ;;  %v6371_v15 = vld [vmem:[%s7195_s26 + $0xc00] sm:$0xf]  ;;  %v6707_v25 = vld [vmem:[%s7195_s26 + $0x284] sm:$0xf]  ;;  %v5157_v31 = vld [vmem:[%s7195_s26 + $0x290] sm:$0xf0]  ;;  %v810_v54 = vunpack.c.h.b16 %v7512_v9 }
  0x7e   : > { %3249 = vmatpush.bf16.msrb.mxu3 %v5192_v52  ;;  %v6372_v22 = vor.u32 %v7013_v18, %v6371_v15  ;;  %9172 = vst [vmem:[#allocation12_spill] sm:$0xff] %v7643_v37  ;;  %v5160_v38 = vor.u32 %v6707_v25, %v5157_v31  ;;  %v6671_v42 = vld [vmem:[%s7195_s26 + $0x164] sm:$0xf]  ;;  %v5013_v43 = vld [vmem:[%s7195_s26 + $0x170] sm:$0xf0] }
  0x7f   : > { %3227 = vmatpush.bf16.msrb.mxu2 %v5048_v61  ;;  %v5016_v44 = vor.u32 %v6671_v42, %v5013_v43  ;;  %v6703_v46 = vld [vmem:[%s7195_s26 + $0x264] sm:$0xf]  ;;  %v5141_v48 = vld [vmem:[%s7195_s26 + $0x270] sm:$0xf0]  ;;  %v7665_v63 = vpack.c.b16 %v810_v54, %v810_v54  ;;  %v4823_v9 = vld [vmem:[%s9127_s1 + $0x90] sm:$0xf] }
  0x80   : > { %3113 = vmatpush.bf16.msrb.mxu1 %v6052_v59  ;;  %v6917_v59 = vld [vmem:[%s7195_s26 + $0x90c] sm:$0xf0]  ;;  %v5144_v49 = vor.u32 %v6703_v46, %v5141_v48  ;;  %v6667_v50 = vld [vmem:[%s7195_s26 + $0x144] sm:$0xf]  ;;  %v6619_v10 = vld [vmem:[%s9127_s1 + $0x94] sm:$0xf] }
  0x81   : > { %v5988_v1 = vor.u32 %v6917_v59, %v5987_v58  ;;  %3185 = vmatpush.bf16.msrb.mxu0 %v6388_v56  ;;  %v7657_v52 = vld [vmem:[%s9127_s1 + $0xf0] sm:$0xff]  ;;  %v6699_v55 = vld [vmem:[%s7195_s26 + $0x244] sm:$0xf]  ;;  %v4825_v11 = vld [vmem:[%s9127_s1 + $0xc4] sm:$0xf0] }
  0x82   : > { %3250 = vmatpush.bf16.msrb.mxu3 %v5176_v8  ;;  %v5125_v56 = vld [vmem:[%s7195_s26 + $0x250] sm:$0xf0]  ;;  %v6663_v57 = vld [vmem:[%s7195_s26 + $0x124] sm:$0xf]  ;;  %v813_v62 = vunpack.c.l.b16 %v7657_v52 }
  0x83   : > { %3026 = vmatmul.bf16.vlgmr.msra.gmra.mxu1 %v7562_v60  ;;  %v5128_v58 = vor.u32 %v6699_v55, %v5125_v56  ;;  %v4981_v59 = vld [vmem:[%s7195_s26 + $0x130] sm:$0xf0]  ;;  %v6659_v12 = vld [vmem:[%s7195_s26 + $0x104] sm:$0xf] }
  0x84   : > { %3114 = vmatpush.bf16.msrb.mxu1 %v6036_v6  ;;  %v6624_v6 = vld [vmem:[%s9127_s1 + $0xb8] sm:$0xf0]  ;;  %v4984_v61 = vor.u32 %v6663_v57, %v4981_v59  ;;  %v7682_v13 = vpack.c.b16 %v813_v62, %v813_v62  ;;  %v4965_v15 = vld [vmem:[%s7195_s26 + $0x110] sm:$0xf0]  ;;  %v6655_v18 = vld [vmem:[%s7195_s26 + $0xe4] sm:$0xf] }
  0x85   : > { %3095 = vmatmul.bf16.vlgmr.msra.gmra.mxu0 %v7570_v2  ;;  %3059 = vmatmul.bf16.gmra.mxu2 %v7575_v5  ;;  %v7633_v0 = vor.u32 %v6624_v6, %v4815_v4  ;;  %v5109_v4 = vld [vmem:[%s7195_s26 + $0x230] sm:$0xf0]  ;;  %v6625_v6 = vld [vmem:[%s9127_s1 + $0xc0] sm:$0xf0]  ;;  %v4765_v62 = vld [vmem:[%s9127_s1 + $0x54] sm:$0xf0] }
  0x86   : > { %3186 = vmatpush.bf16.msrb.mxu0 %v6372_v22  ;;  %3251 = vmatpush.bf16.msrb.mxu3 %v5160_v38  ;;  %v4968_v22 = vor.u32 %v6659_v12, %v4965_v15  ;;  %v6691_v25 = vld [vmem:[%s7195_s26 + $0x204] sm:$0xf]  ;;  %v5093_v31 = vld [vmem:[%s7195_s26 + $0x210] sm:$0xf0]  ;;  %v7692_v38 = vor.u32 %v6619_v10, %v4825_v11  ;;  %v4779_v11 = vld [vmem:[%s9127_s1 + $0x30] sm:$0xf] }
  0x87   : > { %3082 = vmatmul.bf16.gmra.mxu3 %v7577_v7  ;;  %9171 = vst [vmem:[#allocation11_spill] sm:$0xff] %v7633_v0  ;;  %v5096_v42 = vor.u32 %v6691_v25, %v5093_v31  ;;  %v6751_v43 = vld [vmem:[%s7195_s26 + $0x3e4] sm:$0xf]  ;;  %v4917_v56 = vld [vmem:[%s7195_s26 + $0xb0] sm:$0xf0] }
  0x88   : > { %3115 = vmatpush.bf16.msrb.mxu1 %v6020_v19  ;;  %v6675_v19 = vld [vmem:[%s7195_s26 + $0x184] sm:$0xf]  ;;  %v5301_v59 = vld [vmem:[%s7195_s26 + $0x3b0] sm:$0xf0] }
  0x89   : > { %v5032_v23 = vor.u32 %v6675_v19, %v5029_v20  ;;  %v4949_v19 = vld [vmem:[%s7195_s26 + $0xf0] sm:$0xf0]  ;;  %v7688_v20 = vor.u32 %v6625_v6, %v4823_v9  ;;  %v6651_v48 = vld [vmem:[%s7195_s26 + $0xc4] sm:$0xf] }
  0x8a   : > { %3252 = vmatpush.bf16.msrb.mxu3 %v5144_v49  ;;  %v4933_v49 = vld [vmem:[%s7195_s26 + $0xd0] sm:$0xf0]  ;;  %v6647_v55 = vld [vmem:[%s7195_s26 + $0xa4] sm:$0xf] }
  0x8b   : > { %3228 = vmatpush.bf16.msrb.mxu2 %v5032_v23  ;;  %v4952_v23 = vor.u32 %v6655_v18, %v4949_v19  ;;  %v4920_v57 = vor.u32 %v6647_v55, %v4917_v56  ;;  %v6643_v9 = vld [vmem:[%s7195_s26 + $0x84] sm:$0xf]  ;;  %v4901_v6 = vld [vmem:[%s7195_s26 + $0x90] sm:$0xf0] }
  0x8c   : > { %3116 = vmatpush.bf16.msrb.mxu1 %v6004_v51  ;;  %v4997_v51 = vld [vmem:[%s7195_s26 + $0x150] sm:$0xf0]  ;;  %v6613_v12 = vld [vmem:[%s9127_s1 + $0x60] sm:$0xf0]  ;;  %v4904_v15 = vor.u32 %v6643_v9, %v4901_v6 }
  0x8d   : > { %v5000_v53 = vor.u32 %v6667_v50, %v4997_v51  ;;  %v4936_v50 = vor.u32 %v6651_v48, %v4933_v49  ;;  %v6747_v51 = vld [vmem:[%s7195_s26 + $0x3c4] sm:$0xf]  ;;  %v5589_v55 = vld [vmem:[%s7195_s26 + $0x5f0] sm:$0xf0] }
  0x8e   : > { %3253 = vmatpush.bf16.msrb.mxu3 %v5128_v58  ;;  %v6743_v58 = vld [vmem:[%s7195_s26 + $0x3a4] sm:$0xf]  ;;  %v5253_v9 = vld [vmem:[%s7195_s26 + $0x350] sm:$0xf0] }
  0x8f   : > { %3229 = vmatpush.bf16.msrb.mxu2 %v5016_v44  ;;  %v5333_v44 = vld [vmem:[%s7195_s26 + $0x3f0] sm:$0xf0]  ;;  %v6739_v19 = vld [vmem:[%s7195_s26 + $0x384] sm:$0xf] }
  0x90   : > { %3117 = vmatpush.bf16.msrb.mxu1 %v5988_v1  ;;  %v6695_v1 = vld [vmem:[%s7195_s26 + $0x224] sm:$0xf]  ;;  %v5336_v46 = vor.u32 %v6751_v43, %v5333_v44 }
  0x91   : > { %v5112_v8 = vor.u32 %v6695_v1, %v5109_v4  ;;  %v286_v1 = vld [vmem:[%s9127_s1 + $0xf8] sm:$0xff]  ;;  %v5304_v4 = vor.u32 %v6743_v58, %v5301_v59  ;;  %v6639_v31 = vld [vmem:[%s7195_s26 + $0x64] sm:$0xf] }
  0x92   : > { %3271 = vmatpush.bf16.msra.mxu0 %v5336_v46  ;;  %v815_v10 = vunpack.c.l.b16 %v286_v1  ;;  %v816_v18 = vunpack.c.h.b16 %v286_v1  ;;  %v6635_v56 = vld [vmem:[%s7195_s26 + $0x44] sm:$0xf] }
  0x93   : > { %3031 = vmatmul.bf16.gmra.mxu1 %v7612_v3  ;;  %3230 = vmatpush.bf16.msrb.mxu2 %v5000_v53  ;;  %v5317_v53 = vld [vmem:[%s7195_s26 + $0x3d0] sm:$0xf0]  ;;  %v6811_v6 = vld [vmem:[%s7195_s26 + $0x5c4] sm:$0xf] }
  0x94   : > { %3254 = vmatpush.bf16.msrb.mxu3 %v5112_v8  ;;  %3202 = vmatpush.bf16.msra.mxu1 %v4952_v23  ;;  %v5320_v54 = vor.u32 %v6747_v51, %v5317_v53  ;;  %v7728_v23 = vor.u32 %v6613_v12, %v4779_v11  ;;  %v7735_v44 = vpack.c.b16 %v815_v10, %v815_v10  ;;  %v5269_v51 = vld [vmem:[%s7195_s26 + $0x370] sm:$0xf0]  ;;  %v6815_v53 = vld [vmem:[%s7195_s26 + $0x5e4] sm:$0xf] }
  0x95   : > { %3100 = vmatmul.bf16.gmra.mxu0 %v7633_v0  ;;  %3141 = vmatmul.bf16.vlgmr.msra.gmra.mxu2 %v7639_v21  ;;  %v7739_v49 = vpack.c.b16 %v816_v18, %v816_v18  ;;  %v5592_v58 = vor.u32 %v6815_v53, %v5589_v55  ;;  %v5573_v12 = vld [vmem:[%s7195_s26 + $0x5d0] sm:$0xf0]  ;;  %v4817_v53 = vld [vmem:[%s9127_s1 + $0xbc] sm:$0xf0]  ;;  %v4831_v55 = vld [vmem:[%s9127_s1 + $0x98] sm:$0xf] }
  0x96   : > { %3272 = vmatpush.bf16.msra.mxu0 %v5320_v54  ;;  %9173 = vst [vmem:[#allocation13_spill] sm:$0xff] %v7728_v23  ;;  %v4853_v18 = vld [vmem:[%s7195_s26 + $0x30] sm:$0xf0] }
  0x97   : > { %3164 = vmatmul.bf16.vlgmr.msra.gmra.mxu3 %v7643_v37  ;;  %3231 = vmatpush.bf16.msrb.mxu2 %v4984_v61  ;;  %v6605_v61 = vld [vmem:[%s9127_s1 + $0x24] sm:$0xf] }
  0x98   : > { %3255 = vmatpush.bf16.msrb.mxu3 %v5096_v42  ;;  %3203 = vmatpush.bf16.msra.mxu1 %v4936_v50  ;;  %v7718_v8 = vor.u32 %v6605_v61, %v4765_v62  ;;  %v4885_v42 = vld [vmem:[%s7195_s26 + $0x70] sm:$0xf0]  ;;  %v6735_v50 = vld [vmem:[%s7195_s26 + $0x364] sm:$0xf] }
  0x99   : > { %v4888_v48 = vor.u32 %v6639_v31, %v4885_v42  ;;  %v5272_v54 = vor.u32 %v6735_v50, %v5269_v51  ;;  %v6847_v61 = vld [vmem:[%s7195_s26 + $0x6e4] sm:$0xf]  ;;  %v5717_v62 = vld [vmem:[%s7195_s26 + $0x6f0] sm:$0xf0]  ;;  %v6618_v51 = vld [vmem:[%s9127_s1 + $0x8c] sm:$0xf] }
  0x9a   : > { %3273 = vmatpush.bf16.msra.mxu0 %v5304_v4  ;;  %v5720_v1 = vor.u32 %v6847_v61, %v5717_v62  ;;  %v6731_v4 = vld [vmem:[%s7195_s26 + $0x344] sm:$0xf]  ;;  %v5557_v61 = vld [vmem:[%s7195_s26 + $0x5b0] sm:$0xf0] }
  0x9b   : > { %3232 = vmatpush.bf16.msrb.mxu2 %v4968_v22  ;;  %v5285_v22 = vld [vmem:[%s7195_s26 + $0x390] sm:$0xf0]  ;;  %v5256_v11 = vor.u32 %v6731_v4, %v5253_v9  ;;  %v6843_v42 = vld [vmem:[%s7195_s26 + $0x6c4] sm:$0xf]  ;;  %v7782_v4 = vor.u32 %v6618_v51, %v4817_v53  ;;  %v6626_v9 = vld [vmem:[%s9127_s1 + $0xc8] sm:$0xf0] }
  0x9c   : > { %3204 = vmatpush.bf16.msra.mxu1 %v4920_v57  ;;  %v5288_v25 = vor.u32 %v6739_v19, %v5285_v22  ;;  %v4869_v57 = vld [vmem:[%s7195_s26 + $0x50] sm:$0xf0]  ;;  %3340 = vmatpush.bf16.msra.mxu3 %v5720_v1  ;;  %v6627_v62 = vld [vmem:[%s7195_s26 + $0x4] sm:$0xf] }
  0x9d   : > { %v4872_v59 = vor.u32 %v6635_v56, %v4869_v57  ;;  %v6727_v56 = vld [vmem:[%s7195_s26 + $0x324] sm:$0xf]  ;;  %v5237_v57 = vld [vmem:[%s7195_s26 + $0x330] sm:$0xf0]  ;;  %9174 = vst [vmem:[#allocation14_spill] sm:$0xff] %v7782_v4 }
  0x9e   : > { %3274 = vmatpush.bf16.msra.mxu0 %v5288_v25  ;;  %v5576_v25 = vor.u32 %v6811_v6, %v5573_v12  ;;  %v4837_v1 = vld [vmem:[%s7195_s26 + $0x10] sm:$0xf0]  ;;  %v6839_v12 = vld [vmem:[%s7195_s26 + $0x6a4] sm:$0xf] }
  0x9f   : > { %3317 = vmatpush.bf16.msra.mxu2 %v5592_v58  ;;  %v6807_v58 = vld [vmem:[%s7195_s26 + $0x5a4] sm:$0xf]  ;;  %v5541_v53 = vld [vmem:[%s7195_s26 + $0x590] sm:$0xf0] }
  0xa0   : > { %3205 = vmatpush.bf16.msra.mxu1 %v4904_v15  ;;  %v6631_v15 = vld [vmem:[%s7195_s26 + $0x24] sm:$0xf]  ;;  %v5560_v6 = vor.u32 %v6807_v58, %v5557_v61 }
  0xa1   : > { %v4856_v31 = vor.u32 %v6631_v15, %v4853_v18  ;;  %v5685_v15 = vld [vmem:[%s7195_s26 + $0x6b0] sm:$0xf0]  ;;  %v6835_v58 = vld [vmem:[%s7195_s26 + $0x684] sm:$0xf] }
  0xa2   : > { %3275 = vmatpush.bf16.msra.mxu0 %v5272_v54  ;;  %v5688_v18 = vor.u32 %v6839_v12, %v5685_v15  ;;  %v6795_v15 = vld [vmem:[%s7195_s26 + $0x544] sm:$0xf] }
  0xa3   : > { %3036 = vmatmul.bf16.gmra.mxu1 %v7665_v63  ;;  %3318 = vmatpush.bf16.msra.mxu2 %v5576_v25  ;;  %v6723_v25 = vld [vmem:[%s7195_s26 + $0x304] sm:$0xf] }
  0xa4   : > { %3206 = vmatpush.bf16.msra.mxu1 %v4888_v48  ;;  %v5701_v48 = vld [vmem:[%s7195_s26 + $0x6d0] sm:$0xf0] }
  0xa5   : > { %3105 = vmatmul.bf16.gmra.mxu0 %v7682_v13  ;;  %3146 = vmatmul.bf16.gmra.mxu2 %v7688_v20  ;;  %v5704_v54 = vor.u32 %v6843_v42, %v5701_v48  ;;  %v6803_v42 = vld [vmem:[%s7195_s26 + $0x584] sm:$0xf] }
  0xa6   : > { %3276 = vmatpush.bf16.msra.mxu0 %v5256_v11  ;;  %v4840_v11 = vor.u32 %v6627_v62, %v4837_v1  ;;  %v5525_v62 = vld [vmem:[%s7195_s26 + $0x570] sm:$0xf0] }
  0xa7   : > { %3169 = vmatmul.bf16.gmra.mxu3 %v7692_v38  ;;  %3319 = vmatpush.bf16.msra.mxu2 %v5560_v6  ;;  %v5653_v6 = vld [vmem:[%s7195_s26 + $0x670] sm:$0xf0] }
  0xa8   : > { %3207 = vmatpush.bf16.msra.mxu1 %v4872_v59  ;;  %3341 = vmatpush.bf16.msra.mxu3 %v5704_v54  ;;  %v5240_v59 = vor.u32 %v6727_v56, %v5237_v57  ;;  %v5544_v57 = vor.u32 %v6803_v42, %v5541_v53  ;;  %v814_v53 = vunpack.c.h.b16 %v7657_v52 }
  0xaa   : > { %3277 = vmatpush.bf16.msra.mxu0 %v5240_v59  ;;  %v5669_v59 = vld [vmem:[%s7195_s26 + $0x690] sm:$0xf0]  ;;  %v7832_v52 = vpack.c.b16 %v814_v53, %v814_v53 }
  0xab   : > { %v5672_v61 = vor.u32 %v6835_v58, %v5669_v59  ;;  %3320 = vmatpush.bf16.msra.mxu2 %v5544_v57  ;;  %v287_v57 = vld [vmem:[%s9127_s1 + $0x100] sm:$0xf]  ;;  %v6827_v58 = vld [vmem:[%s7195_s26 + $0x644] sm:$0xf]  ;;  %v5637_v59 = vld [vmem:[%s7195_s26 + $0x650] sm:$0xf0] }
  0xac   : > { %3208 = vmatpush.bf16.msra.mxu1 %v4856_v31  ;;  %v5221_v31 = vld [vmem:[%s7195_s26 + $0x310] sm:$0xf0]  ;;  %3342 = vmatpush.bf16.msra.mxu3 %v5688_v18 }
  0xad   : > { %v5224_v51 = vor.u32 %v6723_v25, %v5221_v31  ;;  %v5509_v18 = vld [vmem:[%s7195_s26 + $0x550] sm:$0xf0] }
  0xae   : > { %v5512_v31 = vor.u32 %v6795_v15, %v5509_v18  ;;  %v5621_v15 = vld [vmem:[%s7195_s26 + $0x630] sm:$0xf0] }
  0xaf   : > { %3278 = vmatpush.bf16.msra.mxu0 %v5224_v51 }
  0xb0   : > { %v7732_v43 = vpop.f32.mrf.mxu0  ;;  %v7737_v46 = vpop.f32.mrf.mxu1  ;;  %3209 = vmatpush.bf16.msra.mxu1 %v4840_v11  ;;  %3343 = vmatpush.bf16.msra.mxu3 %v5672_v61  ;;  %v5640_v61 = vor.u32 %v6827_v58, %v5637_v59  ;;  %v6787_v58 = vld [vmem:[%s7195_s26 + $0x504] sm:$0xf] }
  0xb1   : > { %v7812_v11 = vpop.permute.xlu0 %695 }
  0xb3   : > { %3118 = vmatmul.bf16.vlgmr.msrb.gmra.mxu1 %v7718_v8 }
  0xb5   : > { %6433 = vmatmul.msk.bf16.vlgmr.msrb.gmra.mxu0 %vm2893_vm0, %v7728_v23  ;;  %3151 = vmatmul.bf16.gmra.mxu2 %v7735_v44  ;;  %v6867_v23 = vld [vmem:[%s7195_s26 + $0x784] sm:$0xf] }
  0xb7   : > { %3174 = vmatmul.bf16.gmra.mxu3 %v7739_v49 }
  0xb8   : > { %v7756_v10 = vpop.f32.mrf.mxu2  ;;  %v7761_v19 = vpop.f32.mrf.mxu0 }
  0xb9   : > { %v7763_v22 = vpop.f32.mrf.mxu3  ;;  %v2924_v50 = vpop.f32.mrf.mxu1 }
  0xba   : > { %v7794_v50 = vor.u32 %v6626_v9, %v4831_v55  ;;  %v6799_v55 = vld [vmem:[%s7195_s26 + $0x564] sm:$0xf]  ;;  %v7840_v59 = vpop.permute.xlu0 %700 }
  0xbb   : > { %v5528_v1 = vor.u32 %v6799_v55, %v5525_v62  ;;  %v6831_v9 = vld [vmem:[%s7195_s26 + $0x664] sm:$0xf]  ;;  %v2913_v55 = vadd.f32 %v7732_v43, %v7812_v11  ;;  %v5477_v43 = vld [vmem:[%s7195_s26 + $0x510] sm:$0xf0] }
  0xbc   : > { %9175 = vst [vmem:[#allocation15_spill] sm:$0xff] %v7794_v50  ;;  %v5656_v12 = vor.u32 %v6831_v9, %v5653_v6  ;;  %v6791_v62 = vld [vmem:[%s7195_s26 + $0x524] sm:$0xf]  ;;  %v817_v9 = vunpack.c.l.b16 %v287_v57  ;;  %v5480_v53 = vor.u32 %v6787_v58, %v5477_v43  ;;  %v2915_v58 = vadd.f32 %v7761_v19, %v7840_v59 }
  0xbd   : > { %3321 = vmatpush.bf16.msra.mxu2 %v5528_v1  ;;  %v5493_v1 = vld [vmem:[%s7195_s26 + $0x530] sm:$0xf0]  ;;  %v6879_v43 = vld [vmem:[%s7195_s26 + $0x7e4] sm:$0xf] }
  0xbe   : > { %3344 = vmatpush.bf16.msra.mxu3 %v5656_v12  ;;  %v5496_v6 = vor.u32 %v6791_v62, %v5493_v1  ;;  %v6823_v12 = vld [vmem:[%s7195_s26 + $0x624] sm:$0xf]  ;;  %v7842_v57 = vpack.c.b16 %v817_v9, %v817_v9  ;;  %v5461_v62 = vld [vmem:[%s7195_s26 + $0x4f0] sm:$0xf0] }
  0xc0   : > { %v7792_v48 = vpop.f32.mrf.mxu2  ;;  %v7797_v54 = vpop.f32.mrf.mxu0  ;;  %9176 = vst [vmem:[#allocation16_spill] sm:$0xff] %v7842_v57 }
  0xc1   : > { %v7799_v56 = vpop.f32.mrf.mxu3  ;;  %3322 = vmatpush.bf16.msra.mxu2 %v5512_v31 }
  0xc2   : > { %3345 = vmatpush.bf16.msra.mxu3 %v5640_v61  ;;  %v6783_v61 = vld [vmem:[%s7195_s26 + $0x4e4] sm:$0xf] }
  0xc3   : > { %3123 = vmatmul.bf16.gmra.mxu1 %v7782_v4 }
  0xc5   : > { %6434 = vmatmul.msk.bf16.gmra.mxu0 %vm2893_vm0, %v7794_v50  ;;  %3233 = vmatmul.bf16.vlgmr.msrb.gmra.mxu2 %v7400_v16  ;;  %v5624_v50 = vor.u32 %v6823_v12, %v5621_v15  ;;  %v5464_v12 = vor.u32 %v6783_v61, %v5461_v62  ;;  %v6819_v15 = vld [vmem:[%s7195_s26 + $0x604] sm:$0xf]  ;;  %v5445_v62 = vld [vmem:[%s7195_s26 + $0x4d0] sm:$0xf0] }
  0xc6   : > { %3323 = vmatpush.bf16.msra.mxu2 %v5496_v6  ;;  %v6779_v61 = vld [vmem:[%s7195_s26 + $0x4c4] sm:$0xf] }
  0xc7   : > { %3256 = vmatmul.bf16.vlgmr.msrb.gmra.mxu3 %v7285_v32  ;;  %3294 = vmatpush.bf16.msrb.mxu1 %v5464_v12  ;;  %v5448_v19 = vor.u32 %v6779_v61, %v5445_v62  ;;  %v6875_v12 = vld [vmem:[%s7195_s26 + $0x7c4] sm:$0xf] }
  0xc8   : > { %v7816_v25 = vpop.f32.mrf.mxu2  ;;  %v7818_v42 = vpop.f32.mrf.mxu0  ;;  %3346 = vmatpush.bf16.msra.mxu3 %v5624_v50 }
  0xca   : > { %v7820_v51 = vpop.f32.mrf.mxu3  ;;  %3324 = vmatpush.bf16.msra.mxu2 %v5480_v53  ;;  %v7865_v53 = vpop.permute.xlu1 %705 }
  0xcb   : > { %3295 = vmatpush.bf16.msrb.mxu1 %v5448_v19 }
  0xd0   : > { %v2935_v18 = vpop.f32.mrf.mxu1  ;;  %v7838_v31 = vpop.f32.mrf.mxu2 }
  0xd1   : > { %v2936_v32 = vadd.f32 %v2935_v18, %v2913_v55  ;;  %v3004_v6 = vpop.f32.mrf.mxu0  ;;  %v5605_v18 = vld [vmem:[%s7195_s26 + $0x610] sm:$0xf0] }
  0xd2   : > { %v7847_v55 = vpop.f32.mrf.mxu3  ;;  %v5608_v9 = vor.u32 %v6819_v15, %v5605_v18  ;;  %v5829_v18 = vld [vmem:[%s7195_s26 + $0x7d0] sm:$0xf0] }
  0xd3   : > { %v2959_v1 = vadd.f32 %v7756_v10, %v2936_v32  ;;  %3128 = vmatmul.bf16.gmra.mxu1 %v7832_v52  ;;  %v5845_v32 = vld [vmem:[%s7195_s26 + $0x7f0] sm:$0xf0] }
  0xd4   : > { %3347 = vmatpush.bf16.msra.mxu3 %v5608_v9  ;;  %v5848_v10 = vor.u32 %v6879_v43, %v5845_v32  ;;  %v5429_v43 = vld [vmem:[%s7195_s26 + $0x4b0] sm:$0xf0] }
  0xd5   : > { %v2982_v50 = vadd.f32 %v7763_v22, %v2959_v1  ;;  %6435 = vmatmul.msk.bf16.gmra.mxu0 %vm2893_vm0, %v7842_v57  ;;  %3238 = vmatmul.bf16.gmra.mxu2 %v7458_v14 }
  0xd6   : > { %3363 = vmatpush.bf16.msrb.mxu0 %v5848_v10 }
  0xd7   : > { %v7861_v15 = vadd.f32 %v3004_v6, %v2982_v50  ;;  %3261 = vmatmul.bf16.gmra.mxu3 %v7348_v30  ;;  %v5832_v6 = vor.u32 %v6875_v12, %v5829_v18  ;;  %v6775_v50 = vld [vmem:[%s7195_s26 + $0x4a4] sm:$0xf] }
  0xd8   : > { %v2937_v22 = vpop.f32.mrf.mxu1  ;;  %v7869_v9 = vpop.f32.mrf.mxu2  ;;  %v5432_v57 = vor.u32 %v6775_v50, %v5429_v43  ;;  %v6871_v30 = vld [vmem:[%s7195_s26 + $0x7a4] sm:$0xf] }
  0xd9   : > { %v2938_v1 = vadd.f32 %v2937_v22, %v2915_v58  ;;  %v3006_v62 = vpop.f32.mrf.mxu0  ;;  %v5813_v58 = vld [vmem:[%s7195_s26 + $0x7b0] sm:$0xf0]  ;;  %v2918_v22 = vadd.f32 %v7797_v54, %v7865_v53  ;;  %v6771_v12 = vld [vmem:[%s7195_s26 + $0x484] sm:$0xf] }
  0xda   : > { %v7874_v61 = vpop.f32.mrf.mxu3  ;;  %3364 = vmatpush.bf16.msrb.mxu0 %v5832_v6  ;;  %v5816_v10 = vor.u32 %v6871_v30, %v5813_v58  ;;  %3296 = vmatpush.bf16.msrb.mxu1 %v5432_v57  ;;  %v5797_v30 = vld [vmem:[%s7195_s26 + $0x790] sm:$0xf0]  ;;  %v7887_v6 = vpop.permute.xlu1 %710 }
  0xdb   : > { %v2961_v32 = vadd.f32 %v7792_v48, %v2938_v1  ;;  %v5413_v48 = vld [vmem:[%s7195_s26 + $0x490] sm:$0xf0]  ;;  %v5800_v54 = vor.u32 %v6867_v23, %v5797_v30  ;;  %v2920_v23 = vadd.f32 %v7818_v42, %v7887_v6  ;;  %v6975_v42 = vld [vmem:[%s7195_s26 + $0xae4] sm:$0xf] }
  0xdc   : > { %v5416_v18 = vor.u32 %v6771_v12, %v5413_v48  ;;  %v5397_v57 = vld [vmem:[%s7195_s26 + $0x470] sm:$0xf0]  ;;  %v6863_v12 = vld [vmem:[%s7195_s26 + $0x764] sm:$0xf] }
  0xdd   : > { %v2984_v19 = vadd.f32 %v7799_v56, %v2961_v32  ;;  %v6767_v32 = vld [vmem:[%s7195_s26 + $0x464] sm:$0xf]  ;;  %v5781_v48 = vld [vmem:[%s7195_s26 + $0x770] sm:$0xf0] }
  0xde   : > { %3365 = vmatpush.bf16.msrb.mxu0 %v5816_v10  ;;  %3297 = vmatpush.bf16.msrb.mxu1 %v5416_v18  ;;  %v6943_v18 = vld [vmem:[%s7195_s26 + $0x9e4] sm:$0xf]  ;;  %v5381_v30 = vld [vmem:[%s7195_s26 + $0x450] sm:$0xf0] }
  0xdf   : > { %v7883_v1 = vadd.f32 %v3006_v62, %v2984_v19  ;;  %v5400_v19 = vor.u32 %v6767_v32, %v5397_v57  ;;  %v6229_v32 = vld [vmem:[%s7195_s26 + $0xaf0] sm:$0xf0] }
  0xe0   : > { %v2940_v50 = vpop.f32.mrf.mxu1  ;;  %v2970_v56 = vpop.f32.mrf.mxu2 }
  0xe1   : > { %v2941_v43 = vadd.f32 %v2940_v50, %v2918_v22  ;;  %v6101_v50 = vld [vmem:[%s7195_s26 + $0x9f0] sm:$0xf0] }
  0xe2   : > { %v2993_v58 = vpop.f32.mrf.mxu3  ;;  %v3009_v10 = vpop.f32.mrf.mxu0  ;;  %3366 = vmatpush.bf16.msrb.mxu0 %v5800_v54  ;;  %3298 = vmatpush.bf16.msrb.mxu1 %v5400_v19  ;;  %v5765_v19 = vld [vmem:[%s7195_s26 + $0x750] sm:$0xf0] }
  0xe3   : > { %v2964_v62 = vadd.f32 %v7816_v25, %v2941_v43  ;;  %3210 = vmatmul.bf16.vlgmr.msra.gmra.mxu1 %v7278_v27  ;;  %v5784_v25 = vor.u32 %v6863_v12, %v5781_v48  ;;  %v6763_v43 = vld [vmem:[%s7195_s26 + $0x444] sm:$0xf] }
  0xe4   : > { %v5384_v54 = vor.u32 %v6763_v43, %v5381_v30  ;;  %v5365_v43 = vld [vmem:[%s7195_s26 + $0x430] sm:$0xf0] }
  0xe5   : > { %v2987_v22 = vadd.f32 %v7820_v51, %v2964_v62  ;;  %3279 = vmatmul.bf16.vlgmr.msra.gmra.mxu0 %v7287_v35  ;;  %3243 = vmatmul.bf16.gmra.mxu2 %v7517_v17  ;;  %v6104_v51 = vor.u32 %v6943_v18, %v6101_v50  ;;  %v6232_v62 = vor.u32 %v6975_v42, %v6229_v32  ;;  %v6085_v18 = vld [vmem:[%s7195_s26 + $0x9d0] sm:$0xf0]  ;;  %v6759_v50 = vld [vmem:[%s7195_s26 + $0x424] sm:$0xf] }
  0xe6   : > { %3367 = vmatpush.bf16.msrb.mxu0 %v5784_v25  ;;  %3299 = vmatpush.bf16.msrb.mxu1 %v5384_v54  ;;  %v5368_v54 = vor.u32 %v6759_v50, %v5365_v43  ;;  %v6971_v42 = vld [vmem:[%s7195_s26 + $0xac4] sm:$0xf]  ;;  %v6213_v32 = vld [vmem:[%s7195_s26 + $0xad0] sm:$0xf0] }
  0xe7   : > { %v7903_v56 = vadd.f32 %v3009_v10, %v2987_v22  ;;  %3266 = vmatmul.bf16.gmra.mxu3 %v7412_v33  ;;  %3409 = vmatpush.bf16.msrb.mxu2 %v6104_v51  ;;  %v6859_v10 = vld [vmem:[%s7195_s26 + $0x744] sm:$0xf]  ;;  %v5349_v43 = vld [vmem:[%s7195_s26 + $0x410] sm:$0xf0] }
  0xe8   : > { %v2942_v57 = vpop.f32.mrf.mxu1  ;;  %v6939_v22 = vld [vmem:[%s7195_s26 + $0x9c4] sm:$0xf]  ;;  %v7912_v12 = vpop.f32.mrf.mxu2  ;;  %3432 = vmatpush.bf16.msrb.mxu3 %v6232_v62  ;;  %v5768_v48 = vor.u32 %v6859_v10, %v5765_v19  ;;  %v6216_v62 = vor.u32 %v6971_v42, %v6213_v32 }
  0xe9   : > { %v2943_v58 = vadd.f32 %v2942_v57, %v2920_v23  ;;  %v6088_v51 = vor.u32 %v6939_v22, %v6085_v18  ;;  %v7922_v57 = vpop.permute.xlu2 %715  ;;  %v6935_v19 = vld [vmem:[%s7195_s26 + $0x9a4] sm:$0xf]  ;;  %v6069_v18 = vld [vmem:[%s7195_s26 + $0x9b0] sm:$0xf0] }
  0xea   : > { %v3011_v23 = vpop.f32.mrf.mxu0  ;;  %v7918_v30 = vpop.f32.mrf.mxu3  ;;  %3368 = vmatpush.bf16.msrb.mxu0 %v5768_v48  ;;  %3300 = vmatpush.bf16.msrb.mxu1 %v5368_v54  ;;  %v6755_v50 = vld [vmem:[%s7195_s26 + $0x404] sm:$0xf]  ;;  %v2923_v48 = vadd.f32 %v7737_v46, %v7922_v57  ;;  %v6197_v54 = vld [vmem:[%s7195_s26 + $0xab0] sm:$0xf0] }
  0xeb   : > { %v2966_v25 = vadd.f32 %v7838_v31, %v2943_v58  ;;  %3410 = vmatpush.bf16.msrb.mxu2 %v6088_v51  ;;  %v6855_v31 = vld [vmem:[%s7195_s26 + $0x724] sm:$0xf]  ;;  %v5749_v58 = vld [vmem:[%s7195_s26 + $0x730] sm:$0xf0] }
  0xec   : > { %3433 = vmatpush.bf16.msrb.mxu3 %v6216_v62  ;;  %v5752_v22 = vor.u32 %v6855_v31, %v5749_v58  ;;  %v6967_v51 = vld [vmem:[%s7195_s26 + $0xaa4] sm:$0xf]  ;;  %v5733_v58 = vld [vmem:[%s7195_s26 + $0x710] sm:$0xf0] }
  0xed   : > { %v2989_v10 = vadd.f32 %v7847_v55, %v2966_v25  ;;  %v6072_v55 = vor.u32 %v6935_v19, %v6069_v18  ;;  %v5352_v25 = vor.u32 %v6755_v50, %v5349_v43  ;;  %v6200_v32 = vor.u32 %v6967_v51, %v6197_v54  ;;  %v6851_v31 = vld [vmem:[%s7195_s26 + $0x704] sm:$0xf]  ;;  %v6053_v19 = vld [vmem:[%s7195_s26 + $0x990] sm:$0xf0] }
  0xee   : > { %3369 = vmatpush.bf16.msrb.mxu0 %v5752_v22  ;;  %v5736_v46 = vor.u32 %v6851_v31, %v5733_v58  ;;  %v6927_v54 = vld [vmem:[%s7195_s26 + $0x964] sm:$0xf]  ;;  %v6165_v31 = vld [vmem:[%s7195_s26 + $0xa70] sm:$0xf0] }
  0xef   : > { %v7931_v35 = vadd.f32 %v3011_v23, %v2989_v10  ;;  %3411 = vmatpush.bf16.msrb.mxu2 %v6072_v55  ;;  %3301 = vmatpush.bf16.msrb.mxu1 %v5352_v25  ;;  %v6931_v23 = vld [vmem:[%s7195_s26 + $0x984] sm:$0xf]  ;;  %v6181_v55 = vld [vmem:[%s7195_s26 + $0xa90] sm:$0xf0] }
  0xf0   : > { %v2945_v42 = vpop.f32.mrf.mxu1  ;;  %v7940_v10 = vpop.f32.mrf.mxu2  ;;  %3434 = vmatpush.bf16.msrb.mxu3 %v6200_v32  ;;  %v6056_v43 = vor.u32 %v6931_v23, %v6053_v19  ;;  %v6923_v23 = vld [vmem:[%s7195_s26 + $0x944] sm:$0xf] }
  0xf1   : > { %v2946_v62 = vadd.f32 %v2945_v42, %v2923_v48  ;;  %v6963_v48 = vld [vmem:[%s7195_s26 + $0xa84] sm:$0xf]  ;;  %v6037_v42 = vld [vmem:[%s7195_s26 + $0x970] sm:$0xf0] }
  0xf2   : > { %v3014_v50 = vpop.f32.mrf.mxu0  ;;  %v7944_v22 = vpop.f32.mrf.mxu3  ;;  %3370 = vmatpush.bf16.msrb.mxu0 %v5736_v46  ;;  %v6184_v25 = vor.u32 %v6963_v48, %v6181_v55  ;;  %v6021_v46 = vld [vmem:[%s7195_s26 + $0x950] sm:$0xf0]  ;;  %v6955_v48 = vld [vmem:[%s7195_s26 + $0xa44] sm:$0xf] }
  0xf3   : > { %v2969_v18 = vadd.f32 %v7869_v9, %v2946_v62  ;;  %3215 = vmatmul.bf16.gmra.mxu1 %v7343_v24  ;;  %3412 = vmatpush.bf16.msrb.mxu2 %v6056_v43  ;;  %v6040_v9 = vor.u32 %v6927_v54, %v6037_v42  ;;  %v6959_v62 = vld [vmem:[%s7195_s26 + $0xa64] sm:$0xf]  ;;  %v6149_v55 = vld [vmem:[%s7195_s26 + $0xa50] sm:$0xf0] }
  0xf4   : > { %3435 = vmatpush.bf16.msrb.mxu3 %v6184_v25  ;;  %v6152_v25 = vor.u32 %v6955_v48, %v6149_v55  ;;  %v6005_v54 = vld [vmem:[%s7195_s26 + $0x930] sm:$0xf0]  ;;  %v6911_v48 = vld [vmem:[%s7195_s26 + $0x8e4] sm:$0xf] }
  0xf5   : > { %v2992_v51 = vadd.f32 %v7874_v61, %v2969_v18  ;;  %3284 = vmatmul.bf16.gmra.mxu0 %v7353_v36  ;;  %3325 = vmatmul.bf16.vlgmr.msra.gmra.mxu2 %v7562_v60  ;;  %v6168_v61 = vor.u32 %v6959_v62, %v6165_v31  ;;  %v6024_v18 = vor.u32 %v6923_v23, %v6021_v46  ;;  %v6133_v62 = vld [vmem:[%s7195_s26 + $0xa30] sm:$0xf0]  ;;  %v6915_v23 = vld [vmem:[%s7195_s26 + $0x904] sm:$0xf] }
  0xf6   : > { %v5989_v46 = vld [vmem:[%s7195_s26 + $0x910] sm:$0xf0] }
  0xf7   : > { %v7953_v32 = vadd.f32 %v3014_v50, %v2992_v51  ;;  %3348 = vmatmul.bf16.vlgmr.msra.gmra.mxu3 %v7482_v41  ;;  %3413 = vmatpush.bf16.msrb.mxu2 %v6040_v9  ;;  %v6919_v51 = vld [vmem:[%s7195_s26 + $0x924] sm:$0xf]  ;;  %v5973_v55 = vld [vmem:[%s7195_s26 + $0x8f0] sm:$0xf0] }
  0xf8   : > { %v2947_v58 = vpop.f32.mrf.mxu1  ;;  %v7961_v19 = vpop.f32.mrf.mxu2  ;;  %3436 = vmatpush.bf16.msrb.mxu3 %v6168_v61  ;;  %v6008_v42 = vor.u32 %v6919_v51, %v6005_v54  ;;  %v6951_v9 = vld [vmem:[%s7195_s26 + $0xa24] sm:$0xf] }
  0xf9   : > { %v6136_v58 = vor.u32 %v6951_v9, %v6133_v62  ;;  %v6117_v9 = vld [vmem:[%s7195_s26 + $0xa10] sm:$0xf0] }
  0xfa   : > { %v3016_v50 = vpop.f32.mrf.mxu0  ;;  %v7963_v43 = vpop.f32.mrf.mxu3 }
  0xfb   : > { %3414 = vmatpush.bf16.msrb.mxu2 %v6024_v18  ;;  %v5992_v18 = vor.u32 %v6915_v23, %v5989_v46  ;;  %v6357_v23 = vld [vmem:[%s7195_s26 + $0xbf0] sm:$0xf0] }
  0xfc   : > { %3437 = vmatpush.bf16.msrb.mxu3 %v6152_v25  ;;  %v5957_v46 = vld [vmem:[%s7195_s26 + $0x8d0] sm:$0xf0] }
  0xff   : > { %3415 = vmatpush.bf16.msrb.mxu2 %v6008_v42  ;;  %v6947_v42 = vld [vmem:[%s7195_s26 + $0xa04] sm:$0xf] }
 0x100   : > { %v3027_v31 = vpop.f32.mrf.mxu1  ;;  %v7974_v50 = vpop.f32.mrf.mxu2  ;;  %3438 = vmatpush.bf16.msrb.mxu3 %v6136_v58  ;;  %v6120_v62 = vor.u32 %v6947_v42, %v6117_v9  ;;  %v7007_v58 = vld [vmem:[%s7195_s26 + $0xbe4] sm:$0xf] }
 0x101   : > { %v3028_v61 = vadd.f32 %v3027_v31, %v7861_v15  ;;  %v5976_v15 = vor.u32 %v6911_v48, %v5973_v55  ;;  %v6903_v9 = vld [vmem:[%s7195_s26 + $0x8a4] sm:$0xf] }
 0x102   : > { %v7979_v51 = vpop.f32.mrf.mxu3  ;;  %v3096_v54 = vpop.f32.mrf.mxu0 }
 0x103   : > { %v3051_v25 = vadd.f32 %v7912_v12, %v3028_v61  ;;  %3220 = vmatmul.bf16.gmra.mxu1 %v7280_v28  ;;  %3416 = vmatpush.bf16.msrb.mxu2 %v5992_v18  ;;  %v6360_v12 = vor.u32 %v7007_v58, %v6357_v23  ;;  %v6907_v61 = vld [vmem:[%s7195_s26 + $0x8c4] sm:$0xf] }
 0x104   : > { %3386 = vmatpush.bf16.msra.mxu1 %v5976_v15  ;;  %3439 = vmatpush.bf16.msrb.mxu3 %v6120_v62  ;;  %v5960_v55 = vor.u32 %v6907_v61, %v5957_v46  ;;  %v6341_v15 = vld [vmem:[%s7195_s26 + $0xbd0] sm:$0xf0] }
 0x105   : > { %v3074_v31 = vadd.f32 %v7918_v30, %v3051_v25  ;;  %3289 = vmatmul.bf16.gmra.mxu0 %v7419_v40  ;;  %3330 = vmatmul.bf16.gmra.mxu2 %v7612_v3  ;;  %v7003_v25 = vld [vmem:[%s7195_s26 + $0xbc4] sm:$0xf]  ;;  %v5941_v62 = vld [vmem:[%s7195_s26 + $0x8b0] sm:$0xf0] }
 0x106   : > { %3455 = vmatpush.bf16.msra.mxu0 %v6360_v12  ;;  %v5944_v61 = vor.u32 %v6903_v9, %v5941_v62  ;;  %v6999_v12 = vld [vmem:[%s7195_s26 + $0xba4] sm:$0xf] }
 0x107   : > { %v7990_v48 = vadd.f32 %v3096_v54, %v3074_v31  ;;  %3353 = vmatmul.bf16.gmra.mxu3 %v7538_v39  ;;  %v6344_v54 = vor.u32 %v7003_v25, %v6341_v15  ;;  %v5925_v25 = vld [vmem:[%s7195_s26 + $0x890] sm:$0xf0]  ;;  %v6995_v9 = vld [vmem:[%s7195_s26 + $0xb84] sm:$0xf] }
 0x108   : > { %v3029_v30 = vpop.f32.mrf.mxu1  ;;  %3387 = vmatpush.bf16.msra.mxu1 %v5960_v55  ;;  %v7997_v42 = vpop.f32.mrf.mxu2 }
 0x109   : > { %v3030_v18 = vadd.f32 %v3029_v30, %v7883_v1  ;;  %v6325_v1 = vld [vmem:[%s7195_s26 + $0xbb0] sm:$0xf0]  ;;  %v6899_v30 = vld [vmem:[%s7195_s26 + $0x884] sm:$0xf] }
 0x10a   : > { %v8002_v58 = vpop.f32.mrf.mxu3  ;;  %v3098_v23 = vpop.f32.mrf.mxu0  ;;  %3456 = vmatpush.bf16.msra.mxu0 %v6344_v54  ;;  %v6328_v46 = vor.u32 %v6999_v12, %v6325_v1  ;;  %v6309_v54 = vld [vmem:[%s7195_s26 + $0xb90] sm:$0xf0] }
 0x10b   : > { %v3053_v31 = vadd.f32 %v7940_v10, %v3030_v18  ;;  %v5928_v10 = vor.u32 %v6899_v30, %v5925_v25  ;;  %v6312_v12 = vor.u32 %v6995_v9, %v6309_v54  ;;  %v6293_v30 = vld [vmem:[%s7195_s26 + $0xb70] sm:$0xf0]  ;;  %v4955_v25 = vld [vmem:[%s7195_s26 + $0xe8] sm:$0xf] }
 0x10c   : > { %3388 = vmatpush.bf16.msra.mxu1 %v5944_v61 }
 0x10d   : > { %v3076_v55 = vadd.f32 %v7944_v22, %v3053_v31  ;;  %v6895_v22 = vld [vmem:[%s7195_s26 + $0x864] sm:$0xf]  ;;  %v5909_v31 = vld [vmem:[%s7195_s26 + $0x870] sm:$0xf0] }
 0x10e   : > { %3457 = vmatpush.bf16.msra.mxu0 %v6328_v46 }
 0x10f   : > { %v8009_v15 = vadd.f32 %v3098_v23, %v3076_v55  ;;  %v6991_v55 = vld [vmem:[%s7195_s26 + $0xb64] sm:$0xf] }
 0x110   : > { %v3032_v18 = vpop.f32.mrf.mxu1  ;;  %3389 = vmatpush.bf16.msra.mxu1 %v5928_v10  ;;  %v3062_v62 = vpop.f32.mrf.mxu2  ;;  %v6296_v10 = vor.u32 %v6991_v55, %v6293_v30  ;;  %v6654_v30 = vld [vmem:[%s7195_s26 + $0xd4] sm:$0xf0] }
 0x111   : > { %v3033_v40 = vadd.f32 %v3032_v18, %v7903_v56  ;;  %v5912_v56 = vor.u32 %v6895_v22, %v5909_v31  ;;  %v6658_v18 = vld [vmem:[%s7195_s26 + $0xf4] sm:$0xf0] }
 0x112   : > { %v3085_v61 = vpop.f32.mrf.mxu3  ;;  %v3101_v1 = vpop.f32.mrf.mxu0  ;;  %3458 = vmatpush.bf16.msra.mxu0 %v6312_v12  ;;  %v4956_v54 = vor.u32 %v6658_v18, %v4955_v25  ;;  %v6690_v12 = vld [vmem:[%s7195_s26 + $0x1f4] sm:$0xf0]  ;;  %v6887_v25 = vld [vmem:[%s7195_s26 + $0x824] sm:$0xf] }
 0x113   : > { %v3056_v23 = vadd.f32 %v7961_v19, %v3033_v40  ;;  %3302 = vmatmul.bf16.vlgmr.msrb.gmra.mxu1 %v7409_v29  ;;  %v6891_v40 = vld [vmem:[%s7195_s26 + $0x844] sm:$0xf]  ;;  %v5893_v19 = vld [vmem:[%s7195_s26 + $0x850] sm:$0xf0] }
 0x114   : > { %3390 = vmatpush.bf16.msra.mxu1 %v5912_v56  ;;  %v5896_v62 = vor.u32 %v6891_v40, %v5893_v19  ;;  %3501 = vmatpush.bf16.msra.mxu2 %v4956_v54  ;;  %v6987_v61 = vld [vmem:[%s7195_s26 + $0xb44] sm:$0xf]  ;;  %v4939_v56 = vld [vmem:[%s7195_s26 + $0xc8] sm:$0xf] }
 0x115   : > { %v3079_v46 = vadd.f32 %v7963_v43, %v3056_v23  ;;  %3371 = vmatmul.bf16.vlgmr.msrb.gmra.mxu0 %v7487_v47  ;;  %3335 = vmatmul.bf16.gmra.mxu2 %v7665_v63  ;;  %v5083_v43 = vld [vmem:[%s7195_s26 + $0x1e8] sm:$0xf]  ;;  %v4940_v19 = vor.u32 %v6654_v30, %v4939_v56  ;;  %v6883_v56 = vld [vmem:[%s7195_s26 + $0x804] sm:$0xf]  ;;  %v5861_v30 = vld [vmem:[%s7195_s26 + $0x810] sm:$0xf0] }
 0x116   : > { %3459 = vmatpush.bf16.msra.mxu0 %v6296_v10  ;;  %v5084_v31 = vor.u32 %v6690_v12, %v5083_v43  ;;  %v5877_v10 = vld [vmem:[%s7195_s26 + $0x830] sm:$0xf0]  ;;  %v6686_v43 = vld [vmem:[%s7195_s26 + $0x1d4] sm:$0xf0] }
 0x117   : > { %v8026_v9 = vadd.f32 %v3101_v1, %v3079_v46  ;;  %3358 = vmatmul.bf16.gmra.mxu3 %v7575_v5  ;;  %v6277_v1 = vld [vmem:[%s7195_s26 + $0xb50] sm:$0xf0]  ;;  %v5880_v54 = vor.u32 %v6887_v25, %v5877_v10  ;;  %v5864_v10 = vor.u32 %v6883_v56, %v5861_v30  ;;  %v5035_v56 = vld [vmem:[%s7195_s26 + $0x188] sm:$0xf]  ;;  %v6678_v30 = vld [vmem:[%s7195_s26 + $0x194] sm:$0xf0] }
 0x118   : > { %v3034_v22 = vpop.f32.mrf.mxu1  ;;  %3391 = vmatpush.bf16.msra.mxu1 %v5896_v62  ;;  %v8036_v46 = vpop.f32.mrf.mxu2  ;;  %3524 = vmatpush.bf16.msra.mxu3 %v5084_v31  ;;  %v6280_v55 = vor.u32 %v6987_v61, %v6277_v1  ;;  %v5067_v62 = vld [vmem:[%s7195_s26 + $0x1c8] sm:$0xf]  ;;  %v6983_v31 = vld [vmem:[%s7195_s26 + $0xb24] sm:$0xf]  ;;  %v6650_v1 = vld [vmem:[%s7195_s26 + $0xb4] sm:$0xf0] }
 0x119   : > { %v3035_v23 = vadd.f32 %v3034_v22, %v7931_v35  ;;  %v5068_v12 = vor.u32 %v6686_v43, %v5067_v62  ;;  %3502 = vmatpush.bf16.msra.mxu2 %v4940_v19  ;;  %v5051_v62 = vld [vmem:[%s7195_s26 + $0x1a8] sm:$0xf]  ;;  %v6979_v43 = vld [vmem:[%s7195_s26 + $0xb04] sm:$0xf] }
 0x11a   : > { %v3103_v35 = vpop.f32.mrf.mxu0  ;;  %v8042_v40 = vpop.f32.mrf.mxu3  ;;  %3460 = vmatpush.bf16.msra.mxu0 %v6280_v55 }
 0x11b   : > { %v3058_v18 = vadd.f32 %v7974_v50, %v3035_v23  ;;  %v6261_v50 = vld [vmem:[%s7195_s26 + $0xb30] sm:$0xf0]  ;;  %v4923_v23 = vld [vmem:[%s7195_s26 + $0xa8] sm:$0xf] }
 0x11c   : > { %3392 = vmatpush.bf16.msra.mxu1 %v5880_v54  ;;  %3525 = vmatpush.bf16.msra.mxu3 %v5068_v12  ;;  %v6264_v61 = vor.u32 %v6983_v31, %v6261_v50  ;;  %v4924_v55 = vor.u32 %v6650_v1, %v4923_v23  ;;  %v6245_v12 = vld [vmem:[%s7195_s26 + $0xb10] sm:$0xf0]  ;;  %v4907_v31 = vld [vmem:[%s7195_s26 + $0x88] sm:$0xf]  ;;  %v6646_v50 = vld [vmem:[%s7195_s26 + $0x94] sm:$0xf0] }
 0x11d   : > { %v3081_v22 = vadd.f32 %v7979_v51, %v3058_v18  ;;  %v6682_v51 = vld [vmem:[%s7195_s26 + $0x1b4] sm:$0xf0] }
 0x11e   : > { %3461 = vmatpush.bf16.msra.mxu0 %v6264_v61  ;;  %v5052_v19 = vor.u32 %v6682_v51, %v5051_v62  ;;  %3503 = vmatpush.bf16.msra.mxu2 %v4924_v55  ;;  %v5036_v55 = vor.u32 %v6678_v30, %v5035_v56  ;;  %v4891_v62 = vld [vmem:[%s7195_s26 + $0x68] sm:$0xf]  ;;  %v6642_v51 = vld [vmem:[%s7195_s26 + $0x74] sm:$0xf0] }
 0x11f   : > { %v8053_v25 = vadd.f32 %v3103_v35, %v3081_v22  ;;  %v6248_v22 = vor.u32 %v6979_v43, %v6245_v12  ;;  %v4875_v12 = vld [vmem:[%s7195_s26 + $0x48] sm:$0xf]  ;;  %v6670_v56 = vld [vmem:[%s7195_s26 + $0x154] sm:$0xf0] }
 0x120   : > { %v3037_v18 = vpop.f32.mrf.mxu1  ;;  %3393 = vmatpush.bf16.msra.mxu1 %v5864_v10  ;;  %v8061_v35 = vpop.f32.mrf.mxu2  ;;  %3526 = vmatpush.bf16.msra.mxu3 %v5052_v19  ;;  %v5019_v19 = vld [vmem:[%s7195_s26 + $0x168] sm:$0xf] }
 0x121   : > { %v3038_v54 = vadd.f32 %v3037_v18, %v7953_v32  ;;  %v4908_v32 = vor.u32 %v6646_v50, %v4907_v31  ;;  %v6638_v31 = vld [vmem:[%s7195_s26 + $0x54] sm:$0xf0] }
 0x122   : > { %v3106_v61 = vpop.f32.mrf.mxu0  ;;  %v8065_v1 = vpop.f32.mrf.mxu3  ;;  %3462 = vmatpush.bf16.msra.mxu0 %v6248_v22  ;;  %v4876_v50 = vor.u32 %v6638_v31, %v4875_v12  ;;  %v6630_v12 = vld [vmem:[%s7195_s26 + $0x14] sm:$0xf0] }
 0x123   : > { %v3061_v23 = vadd.f32 %v7997_v42, %v3038_v54  ;;  %3307 = vmatmul.bf16.gmra.mxu1 %v7477_v34  ;;  %3504 = vmatpush.bf16.msra.mxu2 %v4908_v32  ;;  %v4892_v42 = vor.u32 %v6642_v51, %v4891_v62  ;;  %v6674_v54 = vld [vmem:[%s7195_s26 + $0x174] sm:$0xf0]  ;;  %v5003_v32 = vld [vmem:[%s7195_s26 + $0x148] sm:$0xf] }
 0x124   : > { %3527 = vmatpush.bf16.msra.mxu3 %v5036_v55  ;;  %v5004_v30 = vor.u32 %v6670_v56, %v5003_v32  ;;  %v4859_v55 = vld [vmem:[%s7195_s26 + $0x28] sm:$0xf] }
 0x125   : > { %v3084_v10 = vadd.f32 %v8002_v58, %v3061_v23  ;;  %3376 = vmatmul.bf16.gmra.mxu0 %v7542_v45  ;;  %3417 = vmatmul.bf16.vlgmr.msrb.gmra.mxu2 %v7718_v8  ;;  %v5020_v58 = vor.u32 %v6674_v54, %v5019_v19  ;;  %v4987_v51 = vld [vmem:[%s7195_s26 + $0x128] sm:$0xf] }
 0x127   : > { %v8074_v18 = vadd.f32 %v3106_v61, %v3084_v10  ;;  %3440 = vmatmul.bf16.vlgmr.msrb.gmra.mxu3 %v7639_v21  ;;  %3505 = vmatpush.bf16.msra.mxu2 %v4892_v42  ;;  %v6634_v10 = vld [vmem:[%s7195_s26 + $0x34] sm:$0xf0] }
 0x128   : > { %v3039_v43 = vpop.f32.mrf.mxu1  ;;  %v8082_v22 = vpop.f32.mrf.mxu2  ;;  %3528 = vmatpush.bf16.msra.mxu3 %v5020_v58  ;;  %v4860_v62 = vor.u32 %v6634_v10, %v4859_v55  ;;  %v6666_v42 = vld [vmem:[%s7195_s26 + $0x134] sm:$0xf0]  ;;  %v4843_v58 = vld [vmem:[%s7195_s26 + $0x8] sm:$0xf] }
 0x129   : > { %v4988_v54 = vor.u32 %v6666_v42, %v4987_v51  ;;  %v6662_v55 = vld [vmem:[%s7195_s26 + $0x114] sm:$0xf0] }
 0x12a   : > { %v3108_v23 = vpop.f32.mrf.mxu0  ;;  %v8084_v61 = vpop.f32.mrf.mxu3  ;;  %v6722_v51 = vld [vmem:[%s7195_s26 + $0x2f4] sm:$0xf0] }
 0x12b   : > { %3506 = vmatpush.bf16.msra.mxu2 %v4876_v50  ;;  %v4844_v50 = vor.u32 %v6630_v12, %v4843_v58  ;;  %v6718_v58 = vld [vmem:[%s7195_s26 + $0x2d4] sm:$0xf0] }
 0x12c   : > { %3529 = vmatpush.bf16.msra.mxu3 %v5004_v30  ;;  %v4971_v30 = vld [vmem:[%s7195_s26 + $0x108] sm:$0xf] }
 0x12f   : > { %3507 = vmatpush.bf16.msra.mxu2 %v4860_v62  ;;  %v5211_v62 = vld [vmem:[%s7195_s26 + $0x2e8] sm:$0xf] }
 0x130   : > { %v3119_v19 = vpop.f32.mrf.mxu1  ;;  %v8095_v31 = vpop.f32.mrf.mxu2  ;;  %3530 = vmatpush.bf16.msra.mxu3 %v4988_v54  ;;  %v5212_v42 = vor.u32 %v6722_v51, %v5211_v62 }
 0x131   : > { %v3120_v43 = vadd.f32 %v3119_v19, %v7990_v48  ;;  %v4972_v48 = vor.u32 %v6662_v55, %v4971_v30 }
 0x132   : > { %v8098_v32 = vpop.f32.mrf.mxu3  ;;  %v3188_v56 = vpop.f32.mrf.mxu0  ;;  %3547 = vmatpush.bf16.msrb.mxu0 %v5212_v42 }
 0x133   : > { %v3143_v23 = vadd.f32 %v8036_v46, %v3120_v43  ;;  %3312 = vmatmul.bf16.gmra.mxu1 %v7533_v26  ;;  %3508 = vmatpush.bf16.msra.mxu2 %v4844_v50  ;;  %v5195_v43 = vld [vmem:[%s7195_s26 + $0x2c8] sm:$0xf] }
 0x134   : > { %3531 = vmatpush.bf16.msra.mxu3 %v4972_v48  ;;  %v5196_v50 = vor.u32 %v6718_v58, %v5195_v43 }
 0x135   : > { %v3166_v10 = vadd.f32 %v8042_v40, %v3143_v23  ;;  %3381 = vmatmul.bf16.gmra.mxu0 %v7577_v7  ;;  %3422 = vmatmul.bf16.gmra.mxu2 %v7782_v4 }
 0x136   : > { %3548 = vmatpush.bf16.msrb.mxu0 %v5196_v50  ;;  %v6421_v50 = vld [vmem:[%s7195_s26 + $0xc70] sm:$0xf0] }
 0x137   : > { %v8107_v46 = vadd.f32 %v3188_v56, %v3166_v10  ;;  %3445 = vmatmul.bf16.gmra.mxu3 %v7688_v20  ;;  %v5179_v10 = vld [vmem:[%s7195_s26 + $0x2a8] sm:$0xf] }
 0x138   : > { %v3121_v19 = vpop.f32.mrf.mxu1  ;;  %v8115_v12 = vpop.f32.mrf.mxu2 }
 0x139   : > { %v4119_v54 = vmin.f32 %v8107_v46, 0.0  ;;  %v3122_v40 = vadd.f32 %v3121_v19, %v8009_v15  ;;  %v6714_v15 = vld [vmem:[%s7195_s26 + $0x2b4] sm:$0xf0]  ;;  %vm4099_vm1 = vcmp.gt.f32.partialorder %v8107_v46, 0.0 }
 0x13a   : > { %v8118_v56 = vpop.f32.mrf.mxu3  ;;  %v3190_v30 = vpop.f32.mrf.mxu0  ;;  %v5180_v62 = vor.u32 %v6714_v15, %v5179_v10  ;;  %v5147_v15 = vld [vmem:[%s7195_s26 + $0x268] sm:$0xf] }
 0x13b   : > { %v3145_v23 = vadd.f32 %v8061_v35, %v3122_v40  ;;  %v4139_v55 = vmul.f32 1.442695, %v4119_v54  ;;  %v5163_v40 = vld [vmem:[%s7195_s26 + $0x288] sm:$0xf]  ;;  %v6710_v54 = vld [vmem:[%s7195_s26 + $0x294] sm:$0xf0] }
 0x13c   : > { %3549 = vmatpush.bf16.msrb.mxu0 %v5180_v62  ;;  %v5164_v58 = vor.u32 %v6710_v54, %v5163_v40  ;;  %v6706_v62 = vld [vmem:[%s7195_s26 + $0x274] sm:$0xf0]  ;;  %v7019_v40 = vld [vmem:[%s7195_s26 + $0xc44] sm:$0xf]  ;;  %v6405_v54 = vld [vmem:[%s7195_s26 + $0xc50] sm:$0xf0] }
 0x13d   : > { %v3168_v48 = vadd.f32 %v8065_v1, %v3145_v23  ;;  %7097 = vpow2.f32 %v4139_v55  ;;  %v7023_v1 = vld [vmem:[%s7195_s26 + $0xc64] sm:$0xf] }
 0x13f   : > { %v8123_v51 = vadd.f32 %v3190_v30, %v3168_v48 }
 0x140   : > { %v3124_v42 = vpop.f32.mrf.mxu1  ;;  %v3154_v43 = vpop.f32.mrf.mxu2  ;;  %3550 = vmatpush.bf16.msrb.mxu0 %v5164_v58 }
 0x141   : > { %v4123_v35 = vmin.f32 %v8123_v51, 0.0  ;;  %v3125_v19 = vadd.f32 %v3124_v42, %v8026_v9  ;;  %v6424_v9 = vor.u32 %v7023_v1, %v6421_v50  ;;  %v5467_v42 = vld [vmem:[%s7195_s26 + $0x4e8] sm:$0xf]  ;;  %v6818_v50 = vld [vmem:[%s7195_s26 + $0x5f4] sm:$0xf0]  ;;  %vm4103_vm2 = vcmp.gt.f32.partialorder %v8123_v51, 0.0 }
 0x142   : > { %v3177_v55 = vpop.f32.mrf.mxu3  ;;  %v3193_v48 = vpop.f32.mrf.mxu0  ;;  %v5595_v1 = vld [vmem:[%s7195_s26 + $0x5e8] sm:$0xf] }
 0x143   : > { %v4147_v23 = vmul.f32 1.442695, %v4123_v35  ;;  %v3148_v30 = vadd.f32 %v8082_v22, %v3125_v19  ;;  %3394 = vmatmul.bf16.vlgmr.msra.gmra.mxu1 %v7570_v2  ;;  %v7098_v35 = vpop.eup %7097  ;;  %v5148_v22 = vor.u32 %v6706_v62, %v5147_v15  ;;  %v6786_v19 = vld [vmem:[%s7195_s26 + $0x4f4] sm:$0xf0] }
 0x144   : > { %3482 = vmatpush.bf16.msrb.mxu1 %v6424_v9  ;;  %v5468_v58 = vor.u32 %v6786_v19, %v5467_v42  ;;  %v6445_v55 = vadd.f32 -1.0, %v7098_v35  ;;  %v6702_v15 = vld [vmem:[%s7195_s26 + $0x254] sm:$0xf0]  ;;  %v5451_v19 = vld [vmem:[%s7195_s26 + $0x4c8] sm:$0xf] }
 0x145   : > { %7099 = vpow2.f32 %v4147_v23  ;;  %v3171_v10 = vadd.f32 %v8084_v61, %v3148_v30  ;;  %3463 = vmatmul.bf16.vlgmr.msra.gmra.mxu0 %v7643_v37  ;;  %3427 = vmatmul.bf16.gmra.mxu2 %v7832_v52  ;;  %v6408_v61 = vor.u32 %v7019_v40, %v6405_v54  ;;  %v5596_v30 = vor.u32 %v6818_v50, %v5595_v1  ;;  %v6782_v40 = vld [vmem:[%s7195_s26 + $0x4d4] sm:$0xf0]  ;;  %v6389_v1 = vld [vmem:[%s7195_s26 + $0xc30] sm:$0xf0]  ;;  %v5579_v50 = vld [vmem:[%s7195_s26 + $0x5c8] sm:$0xf] }
 0x146   : > { %3551 = vmatpush.bf16.msrb.mxu0 %v5148_v22  ;;  %3593 = vmatpush.bf16.msrb.mxu2 %v5468_v58  ;;  %v7015_v22 = vld [vmem:[%s7195_s26 + $0xc24] sm:$0xf]  ;;  %v5115_v37 = vld [vmem:[%s7195_s26 + $0x228] sm:$0xf]  ;;  %v8171_v7 = vsel %vm4099_vm1, %v8107_v46, %v6445_v55 }
 0x147   : > { %v8141_v43 = vadd.f32 %v3193_v48, %v3171_v10  ;;  %3450 = vmatmul.bf16.gmra.mxu3 %v7735_v44  ;;  %v5131_v10 = vld [vmem:[%s7195_s26 + $0x248] sm:$0xf]  ;;  %9177 = vst [vmem:[#allocation17_spill] sm:$0xff] %v8171_v7  ;;  %v6922_v7 = vld [vmem:[%s7195_s26 + $0x934] sm:$0xf0] }
 0x148   : > { %v3126_v23 = vpop.f32.mrf.mxu1  ;;  %3483 = vmatpush.bf16.msrb.mxu1 %v6408_v61  ;;  %v8151_v62 = vpop.f32.mrf.mxu2  ;;  %3616 = vmatpush.bf16.msrb.mxu3 %v5596_v30  ;;  %v5132_v42 = vor.u32 %v6702_v15, %v5131_v10  ;;  %v5452_v61 = vor.u32 %v6782_v40, %v5451_v19  ;;  %v6392_v10 = vor.u32 %v7015_v22, %v6389_v1  ;;  %v6814_v15 = vld [vmem:[%s7195_s26 + $0x5d4] sm:$0xf0]  ;;  %v5435_v40 = vld [vmem:[%s7195_s26 + $0x4a8] sm:$0xf] }
 0x149   : > { %v4127_v9 = vmin.f32 %v8141_v43, 0.0  ;;  %v3127_v48 = vadd.f32 %v3126_v23, %v8053_v25  ;;  %v6698_v19 = vld [vmem:[%s7195_s26 + $0x234] sm:$0xf0]  ;;  %v5563_v55 = vld [vmem:[%s7195_s26 + $0x5a8] sm:$0xf]  ;;  %vm4107_vm3 = vcmp.gt.f32.partialorder %v8141_v43, 0.0 }
 0x14a   : > { %v3195_v35 = vpop.f32.mrf.mxu0  ;;  %v8158_v58 = vpop.f32.mrf.mxu3  ;;  %3552 = vmatpush.bf16.msrb.mxu0 %v5132_v42  ;;  %3594 = vmatpush.bf16.msrb.mxu2 %v5452_v61  ;;  %v5116_v42 = vor.u32 %v6698_v19, %v5115_v37  ;;  %v6778_v22 = vld [vmem:[%s7195_s26 + $0x4b4] sm:$0xf0]  ;;  %v5419_v19 = vld [vmem:[%s7195_s26 + $0x488] sm:$0xf] }
 0x14b   : > { %v7100_v54 = vpop.eup %7099  ;;  %v3150_v25 = vadd.f32 %v8095_v31, %v3127_v48  ;;  %v4155_v30 = vmul.f32 1.442695, %v4127_v9  ;;  %v5580_v48 = vor.u32 %v6814_v15, %v5579_v50  ;;  %v5436_v1 = vor.u32 %v6778_v22, %v5435_v40  ;;  %v6694_v15 = vld [vmem:[%s7195_s26 + $0x214] sm:$0xf0] }
 0x14c   : > { %v6449_v23 = vadd.f32 -1.0, %v7100_v54  ;;  %3484 = vmatpush.bf16.msrb.mxu1 %v6392_v10  ;;  %v7011_v54 = vld [vmem:[%s7195_s26 + $0xc04] sm:$0xf]  ;;  %v6774_v40 = vld [vmem:[%s7195_s26 + $0x494] sm:$0xf0] }
 0x14d   : > { %v3173_v31 = vadd.f32 %v8098_v32, %v3150_v25  ;;  %v6373_v32 = vld [vmem:[%s7195_s26 + $0xc10] sm:$0xf0]  ;;  %3617 = vmatpush.bf16.msrb.mxu3 %v5580_v48  ;;  %7101 = vpow2.f32 %v4155_v30 }
 0x14e   : > { %v8174_v9 = vsel %vm4103_vm2, %v8123_v51, %v6449_v23  ;;  %v6376_v46 = vor.u32 %v7011_v54, %v6373_v32  ;;  %v6810_v51 = vld [vmem:[%s7195_s26 + $0x5b4] sm:$0xf0]  ;;  %3553 = vmatpush.bf16.msrb.mxu0 %v5116_v42  ;;  %3595 = vmatpush.bf16.msrb.mxu2 %v5436_v1  ;;  %v5547_v32 = vld [vmem:[%s7195_s26 + $0x588] sm:$0xf]  ;;  %vm4471_vm2 = vcmask 785408  }
 0x14f   : > { %9178 = vst [vmem:[#allocation18_spill] sm:$0xff] %v8174_v9  ;;  %v8181_v61 = vadd.f32 %v3195_v35, %v3173_v31  ;;  %v5564_v37 = vor.u32 %v6810_v51, %v5563_v55  ;;  %v5099_v35 = vld [vmem:[%s7195_s26 + $0x208] sm:$0xf]  ;;  %v6806_v1 = vld [vmem:[%s7195_s26 + $0x594] sm:$0xf0] }
 0x150   : > { %v3129_v50 = vpop.f32.mrf.mxu1  ;;  %v8189_v31 = vpop.f32.mrf.mxu2  ;;  %3485 = vmatpush.bf16.msrb.mxu1 %v6376_v46  ;;  %v5100_v48 = vor.u32 %v6694_v15, %v5099_v35  ;;  %v5548_v46 = vor.u32 %v6806_v1, %v5547_v32  ;;  %v6770_v51 = vld [vmem:[%s7195_s26 + $0x474] sm:$0xf0]  ;;  %v5515_v1 = vld [vmem:[%s7195_s26 + $0x548] sm:$0xf] }
 0x151   : > { %v4131_v23 = vmin.f32 %v8181_v61, 0.0  ;;  %v3130_v10 = vadd.f32 %v3129_v50, %v8074_v18  ;;  %3618 = vmatpush.bf16.msrb.mxu3 %v5564_v37  ;;  %v5420_v18 = vor.u32 %v6774_v40, %v5419_v19  ;;  %v6802_v35 = vld [vmem:[%s7195_s26 + $0x574] sm:$0xf0]  ;;  %vm4111_vm4 = vcmp.gt.f32.partialorder %v8181_v61, 0.0 }
 0x152   : > { %v3198_v22 = vpop.f32.mrf.mxu0  ;;  %v8194_v54 = vpop.f32.mrf.mxu3  ;;  %3554 = vmatpush.bf16.msrb.mxu0 %v5100_v48  ;;  %v5387_v48 = vld [vmem:[%s7195_s26 + $0x448] sm:$0xf]  ;;  %v6766_v19 = vld [vmem:[%s7195_s26 + $0x454] sm:$0xf0] }
 0x153   : > { %v4163_v42 = vmul.f32 1.442695, %v4131_v23  ;;  %v3153_v30 = vadd.f32 %v8115_v12, %v3130_v10  ;;  %3399 = vmatmul.bf16.gmra.mxu1 %v7633_v0  ;;  %3596 = vmatpush.bf16.msrb.mxu2 %v5420_v18  ;;  %v5403_v12 = vld [vmem:[%s7195_s26 + $0x468] sm:$0xf]  ;;  %v7102_v23 = vpop.eup %7101 }
 0x154   : > { %v5404_v50 = vor.u32 %v6770_v51, %v5403_v12  ;;  %v5531_v10 = vld [vmem:[%s7195_s26 + $0x568] sm:$0xf]  ;;  %v6453_v40 = vadd.f32 -1.0, %v7102_v23 }
 0x155   : > { %7103 = vpow2.f32 %v4163_v42  ;;  %v3176_v55 = vadd.f32 %v8118_v56, %v3153_v30  ;;  %3468 = vmatmul.bf16.gmra.mxu0 %v7692_v38  ;;  %3509 = vmatmul.bf16.vlgmr.msra.gmra.mxu2 %v7278_v27  ;;  %v5532_v56 = vor.u32 %v6802_v35, %v5531_v10  ;;  %v5388_v30 = vor.u32 %v6766_v19, %v5387_v48  ;;  %v5371_v51 = vld [vmem:[%s7195_s26 + $0x428] sm:$0xf]  ;;  %v6750_v48 = vld [vmem:[%s7195_s26 + $0x3d4] sm:$0xf0] }
 0x156   : > { %3619 = vmatpush.bf16.msrb.mxu3 %v5548_v46  ;;  %v6798_v46 = vld [vmem:[%s7195_s26 + $0x554] sm:$0xf0]  ;;  %v8222_v10 = vsel %vm4107_vm3, %v8141_v43, %v6453_v40  ;;  %v5339_v40 = vld [vmem:[%s7195_s26 + $0x3e8] sm:$0xf] }
 0x157   : > { %v8203_v37 = vadd.f32 %v3198_v22, %v3176_v55  ;;  %3532 = vmatmul.bf16.vlgmr.msra.gmra.mxu3 %v7400_v16  ;;  %3597 = vmatpush.bf16.msrb.mxu2 %v5404_v50  ;;  %v5516_v12 = vor.u32 %v6798_v46, %v5515_v1  ;;  %v6762_v50 = vld [vmem:[%s7195_s26 + $0x434] sm:$0xf0]  ;;  %9180 = vst [vmem:[#allocation20_spill] sm:$0xff] %v8222_v10  ;;  %v6091_v10 = vld [vmem:[%s7195_s26 + $0x9c8] sm:$0xf] }
 0x158   : > { %v3131_v15 = vpop.f32.mrf.mxu1  ;;  %v8211_v42 = vpop.f32.mrf.mxu2  ;;  %v5372_v23 = vor.u32 %v6762_v50, %v5371_v51  ;;  %v6758_v1 = vld [vmem:[%s7195_s26 + $0x414] sm:$0xf0] }
 0x159   : > { %9179 = vst [vmem:[#allocation19_spill] sm:$0xff] %v8203_v37  ;;  %v5499_v15 = vld [vmem:[%s7195_s26 + $0x528] sm:$0xf]  ;;  %v6754_v46 = vld [vmem:[%s7195_s26 + $0x3f4] sm:$0xf0] }
 0x15a   : > { %v3200_v18 = vpop.f32.mrf.mxu0  ;;  %v8213_v32 = vpop.f32.mrf.mxu3  ;;  %3620 = vmatpush.bf16.msrb.mxu3 %v5532_v56  ;;  %v6794_v56 = vld [vmem:[%s7195_s26 + $0x534] sm:$0xf0]  ;;  %v5340_v50 = vor.u32 %v6754_v46, %v5339_v40  ;;  %v5707_v46 = vld [vmem:[%s7195_s26 + $0x6c8] sm:$0xf] }
 0x15b   : > { %v7104_v22 = vpop.eup %7103  ;;  %3598 = vmatpush.bf16.msrb.mxu2 %v5388_v30  ;;  %v5500_v30 = vor.u32 %v6794_v56, %v5499_v15  ;;  %v5355_v18 = vld [vmem:[%s7195_s26 + $0x408] sm:$0xf]  ;;  %v6790_v15 = vld [vmem:[%s7195_s26 + $0x514] sm:$0xf0] }
 0x15c   : > { %v6457_v55 = vadd.f32 -1.0, %v7104_v22  ;;  %3570 = vmatpush.bf16.msra.mxu1 %v5340_v50 }
 0x15e   : > { %v8225_v35 = vsel %vm4111_vm4, %v8181_v61, %v6457_v55  ;;  %3621 = vmatpush.bf16.msrb.mxu3 %v5516_v12  ;;  %v5356_v61 = vor.u32 %v6758_v1, %v5355_v18  ;;  %v5723_v18 = vld [vmem:[%s7195_s26 + $0x6e8] sm:$0xf] }
 0x15f   : > { %9181 = vst [vmem:[#allocation21_spill] sm:$0xff] %v8225_v35  ;;  %3599 = vmatpush.bf16.msrb.mxu2 %v5372_v23  ;;  %v5483_v23 = vld [vmem:[%s7195_s26 + $0x508] sm:$0xf]  ;;  %v6942_v35 = vld [vmem:[%s7195_s26 + $0x9d4] sm:$0xf0] }
 0x160   : > { %v3211_v19 = vpop.f32.mrf.mxu1  ;;  %v8234_v43 = vpop.f32.mrf.mxu2  ;;  %v5484_v56 = vor.u32 %v6790_v15, %v5483_v23  ;;  %v5323_v1 = vld [vmem:[%s7195_s26 + $0x3c8] sm:$0xf]  ;;  %v6746_v15 = vld [vmem:[%s7195_s26 + $0x3b4] sm:$0xf0] }
 0x161   : > { %v3212_v22 = vadd.f32 %v3211_v19, %v7812_v11  ;;  %v5324_v40 = vor.u32 %v6750_v48, %v5323_v1  ;;  %v5307_v23 = vld [vmem:[%s7195_s26 + $0x3a8] sm:$0xf] }
 0x162   : > { %v8239_v12 = vpop.f32.mrf.mxu3  ;;  %v3280_v51 = vpop.f32.mrf.mxu0  ;;  %3622 = vmatpush.bf16.msrb.mxu3 %v5500_v30 }
 0x163   : > { %v3235_v55 = vadd.f32 %v8151_v62, %v3212_v22  ;;  %3404 = vmatmul.bf16.gmra.mxu1 %v7682_v13  ;;  %3600 = vmatpush.bf16.msrb.mxu2 %v5356_v61  ;;  %v6850_v62 = vld [vmem:[%s7195_s26 + $0x6f4] sm:$0xf0] }
 0x164   : > { %v5724_v22 = vor.u32 %v6850_v62, %v5723_v18  ;;  %3571 = vmatpush.bf16.msra.mxu1 %v5324_v40  ;;  %v5308_v18 = vor.u32 %v6746_v15, %v5307_v23  ;;  %v5691_v62 = vld [vmem:[%s7195_s26 + $0x6a8] sm:$0xf] }
 0x165   : > { %v3258_v19 = vadd.f32 %v8158_v58, %v3235_v55  ;;  %3473 = vmatmul.bf16.gmra.mxu0 %v7739_v49  ;;  %3514 = vmatmul.bf16.gmra.mxu2 %v7343_v24  ;;  %v6846_v55 = vld [vmem:[%s7195_s26 + $0x6d4] sm:$0xf0]  ;;  %v5675_v23 = vld [vmem:[%s7195_s26 + $0x688] sm:$0xf] }
 0x166   : > { %3623 = vmatpush.bf16.msrb.mxu3 %v5484_v56  ;;  %3639 = vmatpush.bf16.msra.mxu0 %v5724_v22  ;;  %v6842_v22 = vld [vmem:[%s7195_s26 + $0x6b4] sm:$0xf0] }
 0x167   : > { %v8250_v30 = vadd.f32 %v3280_v51, %v3258_v19  ;;  %3537 = vmatmul.bf16.gmra.mxu3 %v7458_v14  ;;  %v5708_v51 = vor.u32 %v6846_v55, %v5707_v46  ;;  %v5692_v1 = vor.u32 %v6842_v22, %v5691_v62  ;;  %v6742_v46 = vld [vmem:[%s7195_s26 + $0x394] sm:$0xf0] }
 0x168   : > { %v3213_v58 = vpop.f32.mrf.mxu1  ;;  %v8257_v50 = vpop.f32.mrf.mxu2  ;;  %3572 = vmatpush.bf16.msra.mxu1 %v5308_v18 }
 0x169   : > { %v3214_v61 = vadd.f32 %v3213_v58, %v7840_v59  ;;  %v5291_v58 = vld [vmem:[%s7195_s26 + $0x388] sm:$0xf] }
 0x16a   : > { %v8262_v56 = vpop.f32.mrf.mxu3  ;;  %v3282_v19 = vpop.f32.mrf.mxu0  ;;  %3640 = vmatpush.bf16.msra.mxu0 %v5708_v51  ;;  %v6838_v51 = vld [vmem:[%s7195_s26 + $0x694] sm:$0xf0] }
 0x16b   : > { %v3237_v48 = vadd.f32 %v8189_v31, %v3214_v61  ;;  %v5292_v31 = vor.u32 %v6742_v46, %v5291_v58  ;;  %v5676_v62 = vor.u32 %v6838_v51, %v5675_v23  ;;  %v5659_v46 = vld [vmem:[%s7195_s26 + $0x668] sm:$0xf]  ;;  %v9183_v23 = vld [vmem:[#allocation2_spill] sm:$0xff] }
 0x16d   : > { %v3260_v40 = vadd.f32 %v8194_v54, %v3237_v48  ;;  %3573 = vmatpush.bf16.msra.mxu1 %v5292_v31  ;;  %v5275_v54 = vld [vmem:[%s7195_s26 + $0x368] sm:$0xf]  ;;  %v6738_v48 = vld [vmem:[%s7195_s26 + $0x374] sm:$0xf0] }
 0x16e   : > { %3641 = vmatpush.bf16.msra.mxu0 %v5692_v1  ;;  %v9182_v1 = vld [vmem:[#allocation13_spill] sm:$0xff] }
 0x16f   : > { %v8269_v55 = vadd.f32 %v3282_v19, %v3260_v40  ;;  %v5276_v40 = vor.u32 %v6738_v48, %v5275_v54  ;;  %v6834_v31 = vld [vmem:[%s7195_s26 + $0x674] sm:$0xf0] }
 0x170   : > { %v3216_v61 = vpop.f32.mrf.mxu1  ;;  %v3246_v15 = vpop.f32.mrf.mxu2  ;;  %v5660_v51 = vor.u32 %v6834_v31, %v5659_v46  ;;  %v6946_v48 = vld [vmem:[%s7195_s26 + $0x9f4] sm:$0xf0]  ;;  %v5963_v31 = vld [vmem:[%s7195_s26 + $0x8c8] sm:$0xf] }
 0x171   : > { %v3217_v25 = vadd.f32 %v3216_v61, %v7865_v53  ;;  %3574 = vmatpush.bf16.msra.mxu1 %v5276_v40  ;;  %v5979_v61 = vld [vmem:[%s7195_s26 + $0x8e8] sm:$0xf]  ;;  %v6914_v15 = vld [vmem:[%s7195_s26 + $0x8f4] sm:$0xf0] }
 0x172   : > { %v3269_v18 = vpop.f32.mrf.mxu3  ;;  %v3285_v22 = vpop.f32.mrf.mxu0  ;;  %3642 = vmatpush.bf16.msra.mxu0 %v5676_v62  ;;  %v5980_v62 = vor.u32 %v6914_v15, %v5979_v61 }
 0x173   : > { %v3240_v19 = vadd.f32 %v8211_v42, %v3217_v25  ;;  %6436 = vmatmul.msk.bf16.vlgmr.msrb.gmra.mxu1 %vm2893_vm0, %v9182_v1  ;;  %v5259_v25 = vld [vmem:[%s7195_s26 + $0x348] sm:$0xf]  ;;  %v6734_v42 = vld [vmem:[%s7195_s26 + $0x354] sm:$0xf0] }
 0x174   : > { %v5260_v54 = vor.u32 %v6734_v42, %v5259_v25  ;;  %3685 = vmatpush.bf16.msra.mxu2 %v5980_v62  ;;  %v6910_v25 = vld [vmem:[%s7195_s26 + $0x8d4] sm:$0xf0]  ;;  %v5243_v42 = vld [vmem:[%s7195_s26 + $0x328] sm:$0xf] }
 0x175   : > { %v3263_v58 = vadd.f32 %v8213_v32, %v3240_v19  ;;  %3555 = vmatmul.bf16.vlgmr.msrb.gmra.mxu0 %v9183_v23  ;;  %3519 = vmatmul.bf16.gmra.mxu2 %v7280_v28  ;;  %v6107_v32 = vld [vmem:[%s7195_s26 + $0x9e8] sm:$0xf]  ;;  %v6878_v23 = vld [vmem:[%s7195_s26 + $0x7d4] sm:$0xf0] }
 0x176   : > { %3643 = vmatpush.bf16.msra.mxu0 %v5660_v51  ;;  %v6108_v40 = vor.u32 %v6946_v48, %v6107_v32  ;;  %3575 = vmatpush.bf16.msra.mxu1 %v5260_v54  ;;  %v6730_v51 = vld [vmem:[%s7195_s26 + $0x334] sm:$0xf0]  ;;  %v5964_v54 = vor.u32 %v6910_v25, %v5963_v31  ;;  %v5227_v25 = vld [vmem:[%s7195_s26 + $0x308] sm:$0xf] }
 0x177   : > { %v8287_v18 = vadd.f32 %v3285_v22, %v3263_v58  ;;  %3542 = vmatmul.bf16.gmra.mxu3 %v7517_v17  ;;  %v5643_v22 = vld [vmem:[%s7195_s26 + $0x648] sm:$0xf]  ;;  %v6830_v58 = vld [vmem:[%s7195_s26 + $0x654] sm:$0xf0] }
 0x178   : > { %v3218_v19 = vpop.f32.mrf.mxu1  ;;  %v8297_v61 = vpop.f32.mrf.mxu2  ;;  %3708 = vmatpush.bf16.msra.mxu3 %v6108_v40  ;;  %v5644_v15 = vor.u32 %v6830_v58, %v5643_v22  ;;  %v6092_v40 = vor.u32 %v6942_v35, %v6091_v10  ;;  %3686 = vmatpush.bf16.msra.mxu2 %v5964_v54  ;;  %v5627_v58 = vld [vmem:[%s7195_s26 + $0x628] sm:$0xf]  ;;  %v6906_v31 = vld [vmem:[%s7195_s26 + $0x8b4] sm:$0xf0] }
 0x179   : > { %v3219_v46 = vadd.f32 %v3218_v19, %v7887_v6  ;;  %v5244_v19 = vor.u32 %v6730_v51, %v5243_v42  ;;  %v6726_v42 = vld [vmem:[%s7195_s26 + $0x314] sm:$0xf0]  ;;  %v6075_v35 = vld [vmem:[%s7195_s26 + $0x9a8] sm:$0xf] }
 0x17a   : > { %v3287_v48 = vpop.f32.mrf.mxu0  ;;  %v8303_v62 = vpop.f32.mrf.mxu3  ;;  %3644 = vmatpush.bf16.msra.mxu0 %v5644_v15  ;;  %v5228_v10 = vor.u32 %v6726_v42, %v5227_v25  ;;  %v9184_v42 = vld [vmem:[#allocation15_spill] sm:$0xff] }
 0x17b   : > { %v3242_v32 = vadd.f32 %v8234_v43, %v3219_v46  ;;  %3576 = vmatpush.bf16.msra.mxu1 %v5244_v19  ;;  %v6826_v43 = vld [vmem:[%s7195_s26 + $0x634] sm:$0xf0]  ;;  %v5947_v46 = vld [vmem:[%s7195_s26 + $0x8a8] sm:$0xf] }
 0x17c   : > { %3709 = vmatpush.bf16.msra.mxu3 %v6092_v40  ;;  %v5628_v37 = vor.u32 %v6826_v43, %v5627_v58  ;;  %v5948_v15 = vor.u32 %v6906_v31, %v5947_v46  ;;  %v5611_v40 = vld [vmem:[%s7195_s26 + $0x608] sm:$0xf]  ;;  %v6822_v58 = vld [vmem:[%s7195_s26 + $0x614] sm:$0xf0] }
 0x17d   : > { %v3265_v22 = vadd.f32 %v8239_v12, %v3242_v32  ;;  %v6938_v12 = vld [vmem:[%s7195_s26 + $0x9b4] sm:$0xf0]  ;;  %v5931_v43 = vld [vmem:[%s7195_s26 + $0x888] sm:$0xf] }
 0x17e   : > { %3645 = vmatpush.bf16.msra.mxu0 %v5628_v37  ;;  %v6076_v54 = vor.u32 %v6938_v12, %v6075_v35  ;;  %3687 = vmatpush.bf16.msra.mxu2 %v5948_v15  ;;  %v6902_v46 = vld [vmem:[%s7195_s26 + $0x894] sm:$0xf0] }
 0x17f   : > { %v8314_v51 = vadd.f32 %v3287_v48, %v3265_v22  ;;  %3577 = vmatpush.bf16.msra.mxu1 %v5228_v10  ;;  %v5612_v22 = vor.u32 %v6822_v58, %v5611_v40  ;;  %v5932_v15 = vor.u32 %v6902_v46, %v5931_v43  ;;  %v6059_v10 = vld [vmem:[%s7195_s26 + $0x988] sm:$0xf]  ;;  %v6934_v35 = vld [vmem:[%s7195_s26 + $0x994] sm:$0xf0] }
 0x180   : > { %v3221_v32 = vpop.f32.mrf.mxu1  ;;  %v8322_v48 = vpop.f32.mrf.mxu2  ;;  %3710 = vmatpush.bf16.msra.mxu3 %v6076_v54  ;;  %v6060_v12 = vor.u32 %v6934_v35, %v6059_v10  ;;  %v5915_v54 = vld [vmem:[%s7195_s26 + $0x868] sm:$0xf] }
 0x181   : > { %v3222_v19 = vadd.f32 %v3221_v32, %v7922_v57  ;;  %v6043_v43 = vld [vmem:[%s7195_s26 + $0x968] sm:$0xf] }
 0x182   : > { %v3290_v37 = vpop.f32.mrf.mxu0  ;;  %v8326_v25 = vpop.f32.mrf.mxu3  ;;  %3646 = vmatpush.bf16.msra.mxu0 %v5612_v22  ;;  %3688 = vmatpush.bf16.msra.mxu2 %v5932_v15  ;;  %v6930_v22 = vld [vmem:[%s7195_s26 + $0x974] sm:$0xf0] }
 0x183   : > { %v3245_v31 = vadd.f32 %v8257_v50, %v3222_v19  ;;  %6437 = vmatmul.msk.bf16.gmra.mxu1 %vm2893_vm0, %v9184_v42  ;;  %v6898_v50 = vld [vmem:[%s7195_s26 + $0x874] sm:$0xf0]  ;;  %v9185_v19 = vld [vmem:[#allocation4_spill] sm:$0xff] }
 0x184   : > { %3711 = vmatpush.bf16.msra.mxu3 %v6060_v12  ;;  %v5916_v40 = vor.u32 %v6898_v50, %v5915_v54  ;;  %v6894_v15 = vld [vmem:[%s7195_s26 + $0x854] sm:$0xf0] }
 0x185   : > { %v3268_v32 = vadd.f32 %v8262_v56, %v3245_v31  ;;  %3560 = vmatmul.bf16.gmra.mxu0 %v9185_v19  ;;  %3601 = vmatmul.bf16.vlgmr.msrb.gmra.mxu2 %v7409_v29  ;;  %v6044_v56 = vor.u32 %v6930_v22, %v6043_v43  ;;  %v5899_v31 = vld [vmem:[%s7195_s26 + $0x848] sm:$0xf]  ;;  %v6926_v54 = vld [vmem:[%s7195_s26 + $0x954] sm:$0xf0] }
 0x186   : > { %3689 = vmatpush.bf16.msra.mxu2 %v5916_v40  ;;  %v5883_v43 = vld [vmem:[%s7195_s26 + $0x828] sm:$0xf]  ;;  %v6890_v40 = vld [vmem:[%s7195_s26 + $0x834] sm:$0xf0] }
 0x187   : > { %v8336_v58 = vadd.f32 %v3290_v37, %v3268_v32  ;;  %3624 = vmatmul.bf16.vlgmr.msrb.gmra.mxu3 %v7562_v60  ;;  %v5900_v37 = vor.u32 %v6894_v15, %v5899_v31  ;;  %v6027_v32 = vld [vmem:[%s7195_s26 + $0x948] sm:$0xf]  ;;  %v5884_v22 = vor.u32 %v6890_v40, %v5883_v43  ;;  %v9186_v40 = vld [vmem:[#allocation16_spill] sm:$0xff] }
 0x188   : > { %v3223_v46 = vpop.f32.mrf.mxu1  ;;  %v8344_v10 = vpop.f32.mrf.mxu2  ;;  %3712 = vmatpush.bf16.msra.mxu3 %v6044_v56  ;;  %v6028_v50 = vor.u32 %v6926_v54, %v6027_v32  ;;  %v5867_v15 = vld [vmem:[%s7195_s26 + $0x808] sm:$0xf]  ;;  %v6882_v54 = vld [vmem:[%s7195_s26 + $0x7f4] sm:$0xf0] }
 0x189   : > { %v6011_v46 = vld [vmem:[%s7195_s26 + $0x928] sm:$0xf] }
 0x18a   : > { %v3292_v35 = vpop.f32.mrf.mxu0  ;;  %v8346_v12 = vpop.f32.mrf.mxu3  ;;  %3690 = vmatpush.bf16.msra.mxu2 %v5900_v37  ;;  %v6012_v56 = vor.u32 %v6922_v7, %v6011_v46  ;;  %v5851_v32 = vld [vmem:[%s7195_s26 + $0x7e8] sm:$0xf] }
 0x18b   : > { %v6886_v35 = vld [vmem:[%s7195_s26 + $0x814] sm:$0xf0] }
 0x18c   : > { %3713 = vmatpush.bf16.msra.mxu3 %v6028_v50  ;;  %v5868_v37 = vor.u32 %v6886_v35, %v5867_v15  ;;  %v6235_v15 = vld [vmem:[%s7195_s26 + $0xae8] sm:$0xf] }
 0x18d   : > { %v5835_v35 = vld [vmem:[%s7195_s26 + $0x7c8] sm:$0xf] }
 0x18e   : > { %3691 = vmatpush.bf16.msra.mxu2 %v5884_v22  ;;  %v6918_v22 = vld [vmem:[%s7195_s26 + $0x914] sm:$0xf0] }
 0x190   : > { %v3303_v9 = vpop.f32.mrf.mxu1  ;;  %v8357_v19 = vpop.f32.mrf.mxu2  ;;  %3714 = vmatpush.bf16.msra.mxu3 %v6012_v56 }
 0x191   : > { %v3304_v31 = vadd.f32 %v3303_v9, %v8250_v30  ;;  %v5852_v9 = vor.u32 %v6882_v54, %v5851_v32  ;;  %v5995_v30 = vld [vmem:[%s7195_s26 + $0x908] sm:$0xf]  ;;  %v5836_v54 = vor.u32 %v6878_v23, %v5835_v35 }
 0x192   : > { %v8362_v43 = vpop.f32.mrf.mxu3  ;;  %v3372_v7 = vpop.f32.mrf.mxu0  ;;  %v5996_v46 = vor.u32 %v6918_v22, %v5995_v30  ;;  %3692 = vmatpush.bf16.msra.mxu2 %v5868_v37  ;;  %v5819_v22 = vld [vmem:[%s7195_s26 + $0x7a8] sm:$0xf] }
 0x193   : > { %v3327_v50 = vadd.f32 %v8297_v61, %v3304_v31  ;;  %6438 = vmatmul.msk.bf16.gmra.mxu1 %vm2893_vm0, %v9186_v40  ;;  %v6978_v61 = vld [vmem:[%s7195_s26 + $0xaf4] sm:$0xf0]  ;;  %v6203_v35 = vld [vmem:[%s7195_s26 + $0xaa8] sm:$0xf] }
 0x194   : > { %3662 = vmatpush.bf16.msrb.mxu1 %v5852_v9  ;;  %3715 = vmatpush.bf16.msra.mxu3 %v5996_v46  ;;  %v6236_v31 = vor.u32 %v6978_v61, %v6235_v15  ;;  %v6974_v9 = vld [vmem:[%s7195_s26 + $0xad4] sm:$0xf0] }
 0x195   : > { %v3350_v56 = vadd.f32 %v8303_v62, %v3327_v50  ;;  %3565 = vmatmul.bf16.gmra.mxu0 %v7412_v33  ;;  %3606 = vmatmul.bf16.gmra.mxu2 %v7477_v34  ;;  %v6219_v50 = vld [vmem:[%s7195_s26 + $0xac8] sm:$0xf]  ;;  %v6874_v46 = vld [vmem:[%s7195_s26 + $0x7b4] sm:$0xf0] }
 0x196   : > { %3731 = vmatpush.bf16.msrb.mxu0 %v6236_v31  ;;  %7067 = vmatpush.bf16.msrb.mxu2 %v6236_v31  ;;  %v5820_v61 = vor.u32 %v6874_v46, %v5819_v22  ;;  %v6187_v46 = vld [vmem:[%s7195_s26 + $0xa88] sm:$0xf] }
 0x197   : > { %v8374_v32 = vadd.f32 %v3372_v7, %v3350_v56  ;;  %3629 = vmatmul.bf16.gmra.mxu3 %v7612_v3  ;;  %v6220_v7 = vor.u32 %v6974_v9, %v6219_v50  ;;  %v6870_v50 = vld [vmem:[%s7195_s26 + $0x794] sm:$0xf0] }
 0x198   : > { %v3305_v62 = vpop.f32.mrf.mxu1  ;;  %3663 = vmatpush.bf16.msrb.mxu1 %v5836_v54  ;;  %v8381_v30 = vpop.f32.mrf.mxu2 }
 0x199   : > { %v3306_v37 = vadd.f32 %v3305_v62, %v8269_v55  ;;  %v6970_v55 = vld [vmem:[%s7195_s26 + $0xab4] sm:$0xf0]  ;;  %v5803_v62 = vld [vmem:[%s7195_s26 + $0x788] sm:$0xf] }
 0x19a   : > { %v8386_v56 = vpop.f32.mrf.mxu3  ;;  %v3374_v15 = vpop.f32.mrf.mxu0  ;;  %3732 = vmatpush.bf16.msrb.mxu0 %v6220_v7  ;;  %v6204_v54 = vor.u32 %v6970_v55, %v6203_v35  ;;  %7068 = vmatpush.bf16.msrb.mxu2 %v6220_v7  ;;  %v6966_v35 = vld [vmem:[%s7195_s26 + $0xa94] sm:$0xf0] }
 0x19b   : > { %v3329_v23 = vadd.f32 %v8322_v48, %v3306_v37  ;;  %v5804_v48 = vor.u32 %v6870_v50, %v5803_v62  ;;  %v6866_v7 = vld [vmem:[%s7195_s26 + $0x774] sm:$0xf0]  ;;  %v9187_v62 = vld [vmem:[#allocation3_spill] sm:$0xff] }
 0x19c   : > { %3664 = vmatpush.bf16.msrb.mxu1 %v5820_v61  ;;  %v5787_v61 = vld [vmem:[%s7195_s26 + $0x768] sm:$0xf] }
 0x19d   : > { %v3352_v31 = vadd.f32 %v8326_v25, %v3329_v23  ;;  %v6188_v23 = vor.u32 %v6966_v35, %v6187_v46 }
 0x19e   : > { %3733 = vmatpush.bf16.msrb.mxu0 %v6204_v54  ;;  %7069 = vmatpush.bf16.msrb.mxu2 %v6204_v54  ;;  %v6171_v54 = vld [vmem:[%s7195_s26 + $0xa68] sm:$0xf] }
 0x19f   : > { %v8393_v9 = vadd.f32 %v3374_v15, %v3352_v31 }
 0x1a0   : > { %v3308_v37 = vpop.f32.mrf.mxu1  ;;  %3665 = vmatpush.bf16.msrb.mxu1 %v5804_v48  ;;  %v3338_v25 = vpop.f32.mrf.mxu2  ;;  %v6962_v48 = vld [vmem:[%s7195_s26 + $0xa74] sm:$0xf0] }
 0x1a1   : > { %v3309_v22 = vadd.f32 %v3308_v37, %v8287_v18  ;;  %v5788_v18 = vor.u32 %v6866_v7, %v5787_v61  ;;  %v6172_v37 = vor.u32 %v6962_v48, %v6171_v54  ;;  %v6656_v25 = vld [vmem:[%s7195_s26 + $0xec] sm:$0xf]  ;;  %v6858_v54 = vld [vmem:[%s7195_s26 + $0x734] sm:$0xf0] }
 0x1a2   : > { %v3361_v55 = vpop.f32.mrf.mxu3  ;;  %v3377_v31 = vpop.f32.mrf.mxu0  ;;  %3734 = vmatpush.bf16.msrb.mxu0 %v6188_v23  ;;  %7070 = vmatpush.bf16.msrb.mxu2 %v6188_v23 }
 0x1a3   : > { %v3332_v15 = vadd.f32 %v8344_v10, %v3309_v22  ;;  %3578 = vmatmul.bf16.vlgmr.msra.gmra.mxu1 %v9187_v62  ;;  %v5771_v10 = vld [vmem:[%s7195_s26 + $0x748] sm:$0xf]  ;;  %v6862_v22 = vld [vmem:[%s7195_s26 + $0x754] sm:$0xf0] }
 0x1a4   : > { %3666 = vmatpush.bf16.msrb.mxu1 %v5788_v18  ;;  %v5772_v35 = vor.u32 %v6862_v22, %v5771_v10  ;;  %v6958_v55 = vld [vmem:[%s7195_s26 + $0xa54] sm:$0xf0] }
 0x1a5   : > { %v3355_v50 = vadd.f32 %v8346_v12, %v3332_v15  ;;  %3647 = vmatmul.bf16.vlgmr.msra.gmra.mxu0 %v7482_v41  ;;  %3611 = vmatmul.bf16.gmra.mxu2 %v7533_v26  ;;  %v4957_v12 = vld [vmem:[%s7195_s26 + $0xf8] sm:$0xf0]  ;;  %v6155_v15 = vld [vmem:[%s7195_s26 + $0xa48] sm:$0xf] }
 0x1a6   : > { %3735 = vmatpush.bf16.msrb.mxu0 %v6172_v37  ;;  %v4960_v23 = vor.u32 %v6656_v25, %v4957_v12  ;;  %7071 = vmatpush.bf16.msrb.mxu2 %v6172_v37  ;;  %v6156_v18 = vor.u32 %v6958_v55, %v6155_v15  ;;  %v4941_v37 = vld [vmem:[%s7195_s26 + $0xd8] sm:$0xf0]  ;;  %v6854_v15 = vld [vmem:[%s7195_s26 + $0x714] sm:$0xf0] }
 0x1a7   : > { %v8408_v46 = vadd.f32 %v3377_v31, %v3355_v50  ;;  %3634 = vmatmul.bf16.gmra.mxu3 %v7665_v63  ;;  %v5755_v50 = vld [vmem:[%s7195_s26 + $0x728] sm:$0xf]  ;;  %v4925_v41 = vld [vmem:[%s7195_s26 + $0xb8] sm:$0xf0] }
 0x1a8   : > { %v3310_v61 = vpop.f32.mrf.mxu1  ;;  %3667 = vmatpush.bf16.msrb.mxu1 %v5772_v35  ;;  %v8417_v31 = vpop.f32.mrf.mxu2  ;;  %3800 = vmatpush.bf16.msrb.mxu3 %v4960_v23  ;;  %v6652_v35 = vld [vmem:[%s7195_s26 + $0xcc] sm:$0xf]  ;;  %v6954_v23 = vld [vmem:[%s7195_s26 + $0xa34] sm:$0xf0] }
 0x1a9   : > { %v3311_v7 = vadd.f32 %v3310_v61, %v8314_v51  ;;  %v5756_v51 = vor.u32 %v6858_v54, %v5755_v50  ;;  %v4944_v25 = vor.u32 %v6652_v35, %v4941_v37  ;;  %v6139_v61 = vld [vmem:[%s7195_s26 + $0xa28] sm:$0xf]  ;;  %v6648_v54 = vld [vmem:[%s7195_s26 + $0xac] sm:$0xf] }
 0x1aa   : > { %v3379_v10 = vpop.f32.mrf.mxu0  ;;  %v8422_v22 = vpop.f32.mrf.mxu3  ;;  %3736 = vmatpush.bf16.msrb.mxu0 %v6156_v18  ;;  %7072 = vmatpush.bf16.msrb.mxu2 %v6156_v18  ;;  %v6950_v18 = vld [vmem:[%s7195_s26 + $0xa14] sm:$0xf0] }
 0x1ab   : > { %v3334_v48 = vadd.f32 %v8357_v19, %v3311_v7  ;;  %v6140_v19 = vor.u32 %v6954_v23, %v6139_v61  ;;  %v5739_v7 = vld [vmem:[%s7195_s26 + $0x708] sm:$0xf]  ;;  %v6688_v23 = vld [vmem:[%s7195_s26 + $0x1ec] sm:$0xf] }
 0x1ac   : > { %3668 = vmatpush.bf16.msrb.mxu1 %v5756_v51  ;;  %3801 = vmatpush.bf16.msrb.mxu3 %v4944_v25  ;;  %v5740_v50 = vor.u32 %v6854_v15, %v5739_v7  ;;  %v6123_v51 = vld [vmem:[%s7195_s26 + $0xa08] sm:$0xf]  ;;  %v6640_v15 = vld [vmem:[%s7195_s26 + $0x6c] sm:$0xf] }
 0x1ad   : > { %v3357_v12 = vadd.f32 %v8362_v43, %v3334_v48  ;;  %v4928_v43 = vor.u32 %v6648_v54, %v4925_v41  ;;  %v4909_v41 = vld [vmem:[%s7195_s26 + $0x98] sm:$0xf0] }
 0x1ae   : > { %3737 = vmatpush.bf16.msrb.mxu0 %v6140_v19  ;;  %7073 = vmatpush.bf16.msrb.mxu2 %v6140_v19  ;;  %v5085_v19 = vld [vmem:[%s7195_s26 + $0x1f8] sm:$0xf0] }
 0x1af   : > { %v8431_v55 = vadd.f32 %v3379_v10, %v3357_v12  ;;  %v6124_v10 = vor.u32 %v6950_v18, %v6123_v51 }
 0x1b0   : > { %v3313_v33 = vpop.f32.mrf.mxu1  ;;  %3669 = vmatpush.bf16.msrb.mxu1 %v5740_v50  ;;  %v8438_v35 = vpop.f32.mrf.mxu2  ;;  %3802 = vmatpush.bf16.msrb.mxu3 %v4928_v43  ;;  %v4893_v50 = vld [vmem:[%s7195_s26 + $0x78] sm:$0xf0]  ;;  %v6684_v43 = vld [vmem:[%s7195_s26 + $0x1cc] sm:$0xf] }
 0x1b1   : > { %v3314_v48 = vadd.f32 %v3313_v33, %v8336_v58  ;;  %v6644_v33 = vld [vmem:[%s7195_s26 + $0x8c] sm:$0xf] }
 0x1b2   : > { %v3382_v25 = vpop.f32.mrf.mxu0  ;;  %v8441_v12 = vpop.f32.mrf.mxu3  ;;  %3738 = vmatpush.bf16.msrb.mxu0 %v6124_v10  ;;  %v4912_v58 = vor.u32 %v6644_v33, %v4909_v41  ;;  %7074 = vmatpush.bf16.msrb.mxu2 %v6124_v10  ;;  %v4877_v33 = vld [vmem:[%s7195_s26 + $0x58] sm:$0xf0] }
 0x1b3   : > { %v3337_v37 = vadd.f32 %v8381_v30, %v3314_v48  ;;  %3583 = vmatmul.bf16.gmra.mxu1 %v7353_v36  ;;  %v5088_v30 = vor.u32 %v6688_v23, %v5085_v19  ;;  %v5069_v48 = vld [vmem:[%s7195_s26 + $0x1d8] sm:$0xf0]  ;;  %v6632_v19 = vld [vmem:[%s7195_s26 + $0x2c] sm:$0xf] }
 0x1b4   : > { %3803 = vmatpush.bf16.msrb.mxu3 %v4912_v58  ;;  %v5072_v18 = vor.u32 %v6684_v43, %v5069_v48  ;;  %v6680_v58 = vld [vmem:[%s7195_s26 + $0x1ac] sm:$0xf]  ;;  %v5037_v43 = vld [vmem:[%s7195_s26 + $0x198] sm:$0xf0] }
 0x1b5   : > { %v3360_v61 = vadd.f32 %v8386_v56, %v3337_v37  ;;  %3652 = vmatmul.bf16.gmra.mxu0 %v7538_v39  ;;  %3693 = vmatmul.bf16.vlgmr.msra.gmra.mxu2 %v7570_v2  ;;  %v4896_v56 = vor.u32 %v6640_v15, %v4893_v50  ;;  %v6347_v39 = vld [vmem:[%s7195_s26 + $0xbc8] sm:$0xf] }
 0x1b6   : > { %3823 = vmatpush.bf16.msra.mxu0 %v5088_v30  ;;  %v4861_v30 = vld [vmem:[%s7195_s26 + $0x38] sm:$0xf0] }
 0x1b7   : > { %v8450_v7 = vadd.f32 %v3382_v25, %v3360_v61  ;;  %3716 = vmatmul.bf16.vlgmr.msra.gmra.mxu3 %v7718_v8  ;;  %v6636_v25 = vld [vmem:[%s7195_s26 + $0x4c] sm:$0xf]  ;;  %v5053_v61 = vld [vmem:[%s7195_s26 + $0x1b8] sm:$0xf0]  ;;  %v4864_v50 = vor.u32 %v6632_v19, %v4861_v30 }
 0x1b8   : > { %v3315_v54 = vpop.f32.mrf.mxu1  ;;  %v8458_v51 = vpop.f32.mrf.mxu2  ;;  %3804 = vmatpush.bf16.msrb.mxu3 %v4896_v56  ;;  %v4880_v41 = vor.u32 %v6636_v25, %v4877_v33  ;;  %v5056_v23 = vor.u32 %v6680_v58, %v5053_v61  ;;  %v6676_v56 = vld [vmem:[%s7195_s26 + $0x18c] sm:$0xf]  ;;  %v7010_v25 = vld [vmem:[%s7195_s26 + $0xbf4] sm:$0xf0]  ;;  %v9188_v61 = vld [vmem:[#allocation6_spill] sm:$0xff] }
 0x1b9   : > { %v4845_v19 = vld [vmem:[%s7195_s26 + $0x18] sm:$0xf0] }
 0x1ba   : > { %v3384_v10 = vpop.f32.mrf.mxu0  ;;  %v8460_v37 = vpop.f32.mrf.mxu3  ;;  %3824 = vmatpush.bf16.msra.mxu0 %v5072_v18  ;;  %v5040_v18 = vor.u32 %v6676_v56, %v5037_v43  ;;  %v7026_v56 = vld [vmem:[%s7195_s26 + $0xc74] sm:$0xf0]  ;;  %v6672_v43 = vld [vmem:[%s7195_s26 + $0x16c] sm:$0xf] }
 0x1bb   : > { %v6363_v10 = vld [vmem:[%s7195_s26 + $0xbe8] sm:$0xf] }
 0x1bc   : > { %3805 = vmatpush.bf16.msrb.mxu3 %v4880_v41 }
 0x1be   : > { %3825 = vmatpush.bf16.msra.mxu0 %v5056_v23  ;;  %v6628_v23 = vld [vmem:[%s7195_s26 + $0xc] sm:$0xf] }
 0x1bf   : > { %v4848_v30 = vor.u32 %v6628_v23, %v4845_v19  ;;  %v6411_v23 = vld [vmem:[%s7195_s26 + $0xc48] sm:$0xf]  ;;  %v7022_v19 = vld [vmem:[%s7195_s26 + $0xc54] sm:$0xf0] }
 0x1c0   : > { %v3395_v15 = vpop.f32.mrf.mxu1  ;;  %v8471_v48 = vpop.f32.mrf.mxu2  ;;  %3806 = vmatpush.bf16.msrb.mxu3 %v4864_v50  ;;  %v6427_v50 = vld [vmem:[%s7195_s26 + $0xc68] sm:$0xf] }
 0x1c1   : > { %v3396_v54 = vadd.f32 %v3395_v15, %v8374_v32  ;;  %v6364_v32 = vor.u32 %v7010_v25, %v6363_v10  ;;  %v7006_v10 = vld [vmem:[%s7195_s26 + $0xbd4] sm:$0xf0] }
 0x1c2   : > { %v8476_v41 = vpop.f32.mrf.mxu3  ;;  %v3464_v58 = vpop.f32.mrf.mxu0  ;;  %3826 = vmatpush.bf16.msra.mxu0 %v5040_v18  ;;  %v6348_v18 = vor.u32 %v7006_v10, %v6347_v39  ;;  %v6331_v39 = vld [vmem:[%s7195_s26 + $0xba8] sm:$0xf] }
 0x1c3   : > { %v3419_v33 = vadd.f32 %v8417_v31, %v3396_v54  ;;  %3588 = vmatmul.bf16.gmra.mxu1 %v9188_v61  ;;  %v6428_v31 = vor.u32 %v7026_v56, %v6427_v50  ;;  %v5021_v54 = vld [vmem:[%s7195_s26 + $0x178] sm:$0xf0]  ;;  %v7002_v56 = vld [vmem:[%s7195_s26 + $0xbb4] sm:$0xf0] }
 0x1c4   : > { %3754 = vmatpush.bf16.msra.mxu1 %v6364_v32  ;;  %3807 = vmatpush.bf16.msrb.mxu3 %v4848_v30  ;;  %v6668_v30 = vld [vmem:[%s7195_s26 + $0x14c] sm:$0xf]  ;;  %v5005_v50 = vld [vmem:[%s7195_s26 + $0x158] sm:$0xf0]  ;;  %v6332_v10 = vor.u32 %v7002_v56, %v6331_v39  ;;  %v6379_v56 = vld [vmem:[%s7195_s26 + $0xc08] sm:$0xf] }
 0x1c5   : > { %v3442_v15 = vadd.f32 %v8422_v22, %v3419_v33  ;;  %3657 = vmatmul.bf16.gmra.mxu0 %v7575_v5  ;;  %3698 = vmatmul.bf16.gmra.mxu2 %v7633_v0  ;;  %v5024_v22 = vor.u32 %v6672_v43, %v5021_v54  ;;  %v5008_v54 = vor.u32 %v6668_v30, %v5005_v50  ;;  %v4989_v5 = vld [vmem:[%s7195_s26 + $0x138] sm:$0xf0]  ;;  %v6994_v0 = vld [vmem:[%s7195_s26 + $0xb74] sm:$0xf0] }
 0x1c6   : > { %3781 = vmatpush.bf16.msra.mxu2 %v6428_v31 }
 0x1c7   : > { %v8489_v25 = vadd.f32 %v3464_v58, %v3442_v15  ;;  %3721 = vmatmul.bf16.gmra.mxu3 %v7782_v4  ;;  %3827 = vmatpush.bf16.msra.mxu0 %v5024_v22  ;;  %v6412_v15 = vor.u32 %v7022_v19, %v6411_v23  ;;  %v6664_v23 = vld [vmem:[%s7195_s26 + $0x12c] sm:$0xf]  ;;  %v6299_v4 = vld [vmem:[%s7195_s26 + $0xb68] sm:$0xf] }
 0x1c8   : > { %v3397_v33 = vpop.f32.mrf.mxu1  ;;  %3755 = vmatpush.bf16.msra.mxu1 %v6348_v18  ;;  %v8497_v58 = vpop.f32.mrf.mxu2  ;;  %v6395_v18 = vld [vmem:[%s7195_s26 + $0xc28] sm:$0xf] }
 0x1c9   : > { %v3398_v32 = vadd.f32 %v3397_v33, %v8393_v9  ;;  %v7018_v33 = vld [vmem:[%s7195_s26 + $0xc34] sm:$0xf0] }
 0x1ca   : > { %v8503_v9 = vpop.f32.mrf.mxu3  ;;  %v3466_v31 = vpop.f32.mrf.mxu0  ;;  %3782 = vmatpush.bf16.msra.mxu2 %v6412_v15  ;;  %v6396_v19 = vor.u32 %v7018_v33, %v6395_v18  ;;  %v4992_v15 = vor.u32 %v6664_v23, %v4989_v5  ;;  %v4973_v33 = vld [vmem:[%s7195_s26 + $0x118] sm:$0xf0]  ;;  %v6300_v23 = vor.u32 %v6994_v0, %v6299_v4 }
 0x1cb   : > { %v3421_v43 = vadd.f32 %v8438_v35, %v3398_v32  ;;  %3828 = vmatpush.bf16.msra.mxu0 %v5008_v54  ;;  %v6315_v35 = vld [vmem:[%s7195_s26 + $0xb88] sm:$0xf]  ;;  %v6998_v32 = vld [vmem:[%s7195_s26 + $0xb94] sm:$0xf0]  ;;  %v6660_v54 = vld [vmem:[%s7195_s26 + $0x10c] sm:$0xf] }
 0x1cc   : > { %3756 = vmatpush.bf16.msra.mxu1 %v6332_v10  ;;  %v6316_v50 = vor.u32 %v6998_v32, %v6315_v35  ;;  %v6283_v35 = vld [vmem:[%s7195_s26 + $0xb48] sm:$0xf]  ;;  %v6990_v32 = vld [vmem:[%s7195_s26 + $0xb54] sm:$0xf0] }
 0x1cd   : > { %v3444_v22 = vadd.f32 %v8441_v12, %v3421_v43  ;;  %v7014_v43 = vld [vmem:[%s7195_s26 + $0xc14] sm:$0xf0] }
 0x1ce   : > { %3783 = vmatpush.bf16.msra.mxu2 %v6396_v19  ;;  %v6380_v18 = vor.u32 %v7014_v43, %v6379_v56  ;;  %v6267_v56 = vld [vmem:[%s7195_s26 + $0xb28] sm:$0xf]  ;;  %v6986_v43 = vld [vmem:[%s7195_s26 + $0xb34] sm:$0xf0] }
 0x1cf   : > { %v8512_v30 = vadd.f32 %v3466_v31, %v3444_v22  ;;  %3829 = vmatpush.bf16.msra.mxu0 %v4992_v15  ;;  %v6284_v15 = vor.u32 %v6990_v32, %v6283_v35  ;;  %v6982_v35 = vld [vmem:[%s7195_s26 + $0xb14] sm:$0xf0] }
 0x1d0   : > { %v3400_v12 = vpop.f32.mrf.mxu1  ;;  %3757 = vmatpush.bf16.msra.mxu1 %v6316_v50  ;;  %v3430_v10 = vpop.f32.mrf.mxu2  ;;  %v6784_v50 = vld [vmem:[%s7195_s26 + $0x4ec] sm:$0xf] }
 0x1d1   : > { %v3401_v39 = vadd.f32 %v3400_v12, %v8408_v46  ;;  %v4976_v46 = vor.u32 %v6660_v54, %v4973_v33  ;;  %v5469_v12 = vld [vmem:[%s7195_s26 + $0x4f8] sm:$0xf0] }
 0x1d2   : > { %v3453_v5 = vpop.f32.mrf.mxu3  ;;  %v3469_v22 = vpop.f32.mrf.mxu0  ;;  %3784 = vmatpush.bf16.msra.mxu2 %v6380_v18  ;;  %v5472_v4 = vor.u32 %v6784_v50, %v5469_v12  ;;  %v5437_v50 = vld [vmem:[%s7195_s26 + $0x4b8] sm:$0xf0] }
 0x1d3   : > { %v3424_v31 = vadd.f32 %v8458_v51, %v3401_v39  ;;  %3670 = vmatmul.bf16.vlgmr.msrb.gmra.mxu1 %v7487_v47  ;;  %3830 = vmatpush.bf16.msra.mxu0 %v4976_v46  ;;  %v6780_v5 = vld [vmem:[%s7195_s26 + $0x4cc] sm:$0xf] }
 0x1d4   : > { %3758 = vmatpush.bf16.msra.mxu1 %v6300_v23  ;;  %3892 = vmatpush.bf16.msra.mxu3 %v5472_v4 }
 0x1d5   : > { %v3447_v19 = vadd.f32 %v8460_v37, %v3424_v31  ;;  %3739 = vmatmul.bf16.vlgmr.msrb.gmra.mxu0 %v7639_v21  ;;  %3703 = vmatmul.bf16.gmra.mxu2 %v7682_v13  ;;  %v6268_v31 = vor.u32 %v6986_v43, %v6267_v56 }
 0x1d7   : > { %v8527_v51 = vadd.f32 %v3469_v22, %v3447_v19  ;;  %3726 = vmatmul.bf16.gmra.mxu3 %v7832_v52  ;;  %v5453_v22 = vld [vmem:[%s7195_s26 + $0x4d8] sm:$0xf0]  ;;  %v6251_v19 = vld [vmem:[%s7195_s26 + $0xb08] sm:$0xf] }
 0x1d8   : > { %v3402_v0 = vpop.f32.mrf.mxu1  ;;  %3759 = vmatpush.bf16.msra.mxu1 %v6284_v15  ;;  %v3510_v39 = vpop.f32.mrf.mxu2  ;;  %v5456_v46 = vor.u32 %v6780_v5, %v5453_v22  ;;  %v6252_v32 = vor.u32 %v6982_v35, %v6251_v19  ;;  %v6776_v15 = vld [vmem:[%s7195_s26 + $0x4ac] sm:$0xf]  ;;  %v5341_v5 = vld [vmem:[%s7195_s26 + $0x3f8] sm:$0xf0] }
 0x1d9   : > { %v3403_v37 = vadd.f32 %v3402_v0, %v8431_v55  ;;  %v3511_v10 = vadd.f32 %v3510_v39, %v7812_v11  ;;  %v5440_v0 = vor.u32 %v6776_v15, %v5437_v50  ;;  %v5405_v35 = vld [vmem:[%s7195_s26 + $0x478] sm:$0xf0]  ;;  %v6748_v50 = vld [vmem:[%s7195_s26 + $0x3cc] sm:$0xf] }
 0x1da   : > { %v3471_v18 = vpop.f32.mrf.mxu0  ;;  %v3533_v33 = vpop.f32.mrf.mxu3  ;;  %3893 = vmatpush.bf16.msra.mxu3 %v5456_v46  ;;  %v5597_v46 = vld [vmem:[%s7195_s26 + $0x5f8] sm:$0xf0] }
 0x1db   : > { %v3426_v54 = vadd.f32 %v8471_v48, %v3403_v37  ;;  %v8541_v23 = vadd.f32 %v3533_v33, %v3511_v10  ;;  %v5421_v10 = vld [vmem:[%s7195_s26 + $0x498] sm:$0xf0] }
 0x1dc   : > { %3760 = vmatpush.bf16.msra.mxu1 %v6268_v31  ;;  %v6752_v31 = vld [vmem:[%s7195_s26 + $0x3ec] sm:$0xf] }
 0x1dd   : > { %v3449_v55 = vadd.f32 %v8476_v41, %v3426_v54  ;;  %v6772_v54 = vld [vmem:[%s7195_s26 + $0x48c] sm:$0xf]  ;;  %v5344_v22 = vor.u32 %v6752_v31, %v5341_v5  ;;  %v5309_v5 = vld [vmem:[%s7195_s26 + $0x3b8] sm:$0xf0] }
 0x1de   : > { %3894 = vmatpush.bf16.msra.mxu3 %v5440_v0  ;;  %v6812_v0 = vld [vmem:[%s7195_s26 + $0x5cc] sm:$0xf] }
 0x1df   : > { %v8545_v48 = vadd.f32 %v3471_v18, %v3449_v55  ;;  %v5424_v18 = vor.u32 %v6772_v54, %v5421_v10  ;;  %v6764_v54 = vld [vmem:[%s7195_s26 + $0x44c] sm:$0xf]  ;;  %v5389_v10 = vld [vmem:[%s7195_s26 + $0x458] sm:$0xf0] }
 0x1e0   : > { %v3405_v12 = vpop.f32.mrf.mxu1  ;;  %3761 = vmatpush.bf16.msra.mxu1 %v6252_v32  ;;  %v3512_v41 = vpop.f32.mrf.mxu2  ;;  %v6744_v31 = vld [vmem:[%s7195_s26 + $0x3ac] sm:$0xf] }
 0x1e1   : > { %v3406_v4 = vadd.f32 %v3405_v12, %v8450_v7  ;;  %v3513_v39 = vadd.f32 %v3512_v41, %v7840_v59  ;;  %v5325_v12 = vld [vmem:[%s7195_s26 + $0x3d8] sm:$0xf0] }
 0x1e2   : > { %v3474_v56 = vpop.f32.mrf.mxu0  ;;  %v3535_v43 = vpop.f32.mrf.mxu3  ;;  %3895 = vmatpush.bf16.msra.mxu3 %v5424_v18  ;;  %v5328_v41 = vor.u32 %v6748_v50, %v5325_v12  ;;  %v5392_v18 = vor.u32 %v6764_v54, %v5389_v10  ;;  %v6740_v12 = vld [vmem:[%s7195_s26 + $0x38c] sm:$0xf] }
 0x1e3   : > { %v3429_v37 = vadd.f32 %v8497_v58, %v3406_v4  ;;  %3675 = vmatmul.bf16.gmra.mxu1 %v7542_v45  ;;  %v8556_v33 = vadd.f32 %v3535_v43, %v3513_v39  ;;  %v6816_v58 = vld [vmem:[%s7195_s26 + $0x5ec] sm:$0xf] }
 0x1e4   : > { %v5600_v19 = vor.u32 %v6816_v58, %v5597_v46  ;;  %v6808_v58 = vld [vmem:[%s7195_s26 + $0x5ac] sm:$0xf]  ;;  %v5565_v46 = vld [vmem:[%s7195_s26 + $0x5b8] sm:$0xf0] }
 0x1e5   : > { %v3452_v7 = vadd.f32 %v8503_v9, %v3429_v37  ;;  %3744 = vmatmul.bf16.gmra.mxu0 %v7688_v20  ;;  %3749 = vmatmul.bf16.vlgmr.msrb.gmra.mxu2 %v7735_v44  ;;  %v6768_v9 = vld [vmem:[%s7195_s26 + $0x46c] sm:$0xf]  ;;  %v5581_v37 = vld [vmem:[%s7195_s26 + $0x5d8] sm:$0xf0] }
 0x1e6   : > { %3869 = vmatpush.bf16.msrb.mxu2 %v5344_v22  ;;  %v5408_v15 = vor.u32 %v6768_v9, %v5405_v35  ;;  %3915 = vmatpush.bf16.msrb.mxu0 %v5600_v19  ;;  %v5584_v43 = vor.u32 %v6812_v0, %v5581_v37  ;;  %v5312_v22 = vor.u32 %v6744_v31, %v5309_v5  ;;  %v6760_v9 = vld [vmem:[%s7195_s26 + $0x42c] sm:$0xf]  ;;  %v5373_v35 = vld [vmem:[%s7195_s26 + $0x438] sm:$0xf0] }
 0x1e7   : > { %v8563_v55 = vadd.f32 %v3474_v56, %v3452_v7  ;;  %3808 = vmatmul.bf16.vlgmr.msrb.gmra.mxu3 %v7278_v27  ;;  %v5568_v19 = vor.u32 %v6808_v58, %v5565_v46  ;;  %v5293_v0 = vld [vmem:[%s7195_s26 + $0x398] sm:$0xf0]  ;;  %v6756_v5 = vld [vmem:[%s7195_s26 + $0x40c] sm:$0xf] }
 0x1e8   : > { %v3407_v32 = vpop.f32.mrf.mxu1  ;;  %v3515_v4 = vpop.f32.mrf.mxu2  ;;  %3896 = vmatpush.bf16.msra.mxu3 %v5408_v15  ;;  %v5376_v15 = vor.u32 %v6760_v9, %v5373_v35  ;;  %v5296_v37 = vor.u32 %v6740_v12, %v5293_v0  ;;  %v5357_v58 = vld [vmem:[%s7195_s26 + $0x418] sm:$0xf0]  ;;  %v6736_v35 = vld [vmem:[%s7195_s26 + $0x36c] sm:$0xf] }
 0x1e9   : > { %v3516_v39 = vadd.f32 %v3515_v4, %v7865_v53  ;;  %v6804_v4 = vld [vmem:[%s7195_s26 + $0x58c] sm:$0xf]  ;;  %v5533_v0 = vld [vmem:[%s7195_s26 + $0x578] sm:$0xf0] }
 0x1ea   : > { %v3476_v56 = vpop.f32.mrf.mxu0  ;;  %v3538_v27 = vpop.f32.mrf.mxu3  ;;  %3870 = vmatpush.bf16.msrb.mxu2 %v5328_v41  ;;  %3916 = vmatpush.bf16.msrb.mxu0 %v5584_v43  ;;  %v6800_v12 = vld [vmem:[%s7195_s26 + $0x56c] sm:$0xf] }
 0x1eb   : > { %v8576_v7 = vadd.f32 %v3538_v27, %v3516_v39  ;;  %v5549_v39 = vld [vmem:[%s7195_s26 + $0x598] sm:$0xf0]  ;;  %v6720_v56 = vld [vmem:[%s7195_s26 + $0x2ec] sm:$0xf] }
 0x1ec   : > { %3897 = vmatpush.bf16.msra.mxu3 %v5392_v18  ;;  %v5213_v27 = vld [vmem:[%s7195_s26 + $0x2f8] sm:$0xf0]  ;;  %v9189_v18 = vld [vmem:[#allocation10_spill] sm:$0xff]  ;;  %v5552_v31 = vor.u32 %v6804_v4, %v5549_v39 }
 0x1ed   : > { %v5216_v46 = vor.u32 %v6720_v56, %v5213_v27  ;;  %v6732_v27 = vld [vmem:[%s7195_s26 + $0x34c] sm:$0xf] }
 0x1ee   : > { %3871 = vmatpush.bf16.msrb.mxu2 %v5312_v22  ;;  %3917 = vmatpush.bf16.msrb.mxu0 %v5568_v19  ;;  %v5360_v19 = vor.u32 %v6756_v5, %v5357_v58  ;;  %v6712_v5 = vld [vmem:[%s7195_s26 + $0x2ac] sm:$0xf]  ;;  %v5181_v58 = vld [vmem:[%s7195_s26 + $0x2b8] sm:$0xf0] }
 0x1ef   : > { %3846 = vmatpush.bf16.msrb.mxu1 %v5216_v46 }
 0x1f0   : > { %v3487_v32 = vpop.f32.mrf.mxu1  ;;  %v3517_v41 = vpop.f32.mrf.mxu2  ;;  %3898 = vmatpush.bf16.msra.mxu3 %v5376_v15 }
 0x1f1   : > { %v8585_v50 = vadd.f32 %v3487_v32, %v8489_v25  ;;  %v3518_v54 = vadd.f32 %v3517_v41, %v7887_v6  ;;  %v5277_v32 = vld [vmem:[%s7195_s26 + $0x378] sm:$0xf0]  ;;  %v5536_v41 = vor.u32 %v6800_v12, %v5533_v0 }
 0x1f2   : > { %v3540_v25 = vpop.f32.mrf.mxu3  ;;  %v3556_v10 = vpop.f32.mrf.mxu0  ;;  %3872 = vmatpush.bf16.msrb.mxu2 %v5296_v37  ;;  %3918 = vmatpush.bf16.msrb.mxu0 %v5552_v31  ;;  %v5280_v15 = vor.u32 %v6736_v35, %v5277_v32  ;;  %v5197_v37 = vld [vmem:[%s7195_s26 + $0x2d8] sm:$0xf0] }
 0x1f3   : > { %v4120_v43 = vmin.f32 %v8585_v50, 0.0  ;;  %3680 = vmatmul.bf16.gmra.mxu1 %v9189_v18  ;;  %v8599_v22 = vadd.f32 %v3556_v10, %v8541_v23  ;;  %v8601_v9 = vadd.f32 %v3540_v25, %v3518_v54  ;;  %v6716_v23 = vld [vmem:[%s7195_s26 + $0x2cc] sm:$0xf]  ;;  %v5517_v31 = vld [vmem:[%s7195_s26 + $0x558] sm:$0xf0]  ;;  %vm4100_vm5 = vcmp.gt.f32.partialorder %v8585_v50, 0.0 }
 0x1f4   : > { %3899 = vmatpush.bf16.msra.mxu3 %v5360_v19  ;;  %v6796_v54 = vld [vmem:[%s7195_s26 + $0x54c] sm:$0xf] }
 0x1f5   : > { %3831 = vmatmul.bf16.vlgmr.msra.gmra.mxu0 %v7400_v16  ;;  %v4141_v4 = vmul.f32 1.442695, %v4120_v43  ;;  %6439 = vmatmul.msk.bf16.vlgmr.msra.gmra.mxu2 %vm2893_vm0, %v9182_v1  ;;  %v5200_v16 = vor.u32 %v6716_v23, %v5197_v37  ;;  %v5261_v43 = vld [vmem:[%s7195_s26 + $0x358] sm:$0xf0]  ;;  %v5520_v35 = vor.u32 %v6796_v54, %v5517_v31  ;;  %v6728_v23 = vld [vmem:[%s7195_s26 + $0x32c] sm:$0xf] }
 0x1f6   : > { %3873 = vmatpush.bf16.msrb.mxu2 %v5280_v15  ;;  %3919 = vmatpush.bf16.msrb.mxu0 %v5536_v41  ;;  %v5264_v10 = vor.u32 %v6732_v27, %v5261_v43  ;;  %v5184_v15 = vor.u32 %v6712_v5, %v5181_v58  ;;  %v6792_v37 = vld [vmem:[%s7195_s26 + $0x52c] sm:$0xf]  ;;  %v5165_v27 = vld [vmem:[%s7195_s26 + $0x298] sm:$0xf0] }
 0x1f7   : > { %3813 = vmatmul.bf16.gmra.mxu3 %v7343_v24  ;;  %3847 = vmatpush.bf16.msrb.mxu1 %v5200_v16  ;;  %7105 = vpow2.f32 %v4141_v4  ;;  %v5245_v4 = vld [vmem:[%s7195_s26 + $0x338] sm:$0xf0]  ;;  %v6724_v31 = vld [vmem:[%s7195_s26 + $0x30c] sm:$0xf] }
 0x1f8   : > { %v3489_v39 = vpop.f32.mrf.mxu1  ;;  %v3520_v25 = vpop.f32.mrf.mxu2  ;;  %v5248_v41 = vor.u32 %v6728_v23, %v5245_v4  ;;  %v5229_v5 = vld [vmem:[%s7195_s26 + $0x318] sm:$0xf0]  ;;  %v6788_v58 = vld [vmem:[%s7195_s26 + $0x50c] sm:$0xf]  ;;  %v9190_v4 = vld [vmem:[#allocation12_spill] sm:$0xff] }
 0x1f9   : > { %v8614_v56 = vadd.f32 %v3489_v39, %v8512_v30  ;;  %v3521_v30 = vadd.f32 %v3520_v25, %v7922_v57  ;;  %v5501_v39 = vld [vmem:[%s7195_s26 + $0x538] sm:$0xf0] }
 0x1fa   : > { %v3543_v46 = vpop.f32.mrf.mxu3  ;;  %v3558_v19 = vpop.f32.mrf.mxu0  ;;  %3874 = vmatpush.bf16.msrb.mxu2 %v5264_v10  ;;  %3920 = vmatpush.bf16.msrb.mxu0 %v5520_v35  ;;  %v5504_v16 = vor.u32 %v6792_v37, %v5501_v39  ;;  %v5149_v35 = vld [vmem:[%s7195_s26 + $0x278] sm:$0xf0] }
 0x1fb   : > { %v4124_v24 = vmin.f32 %v8614_v56, 0.0  ;;  %v8625_v32 = vadd.f32 %v3558_v19, %v8556_v33  ;;  %v8627_v0 = vadd.f32 %v3543_v46, %v3521_v30  ;;  %3848 = vmatpush.bf16.msrb.mxu1 %v5184_v15  ;;  %v6708_v33 = vld [vmem:[%s7195_s26 + $0x28c] sm:$0xf]  ;;  %v5232_v30 = vor.u32 %v6724_v31, %v5229_v5  ;;  %v5485_v46 = vld [vmem:[%s7195_s26 + $0x518] sm:$0xf0] }
 0x1fc   : > { %v5168_v54 = vor.u32 %v6708_v33, %v5165_v27  ;;  %v6704_v19 = vld [vmem:[%s7195_s26 + $0x26c] sm:$0xf]  ;;  %vm4104_vm6 = vcmp.gt.f32.partialorder %v8614_v56, 0.0  ;;  %v5981_v31 = vld [vmem:[%s7195_s26 + $0x8f8] sm:$0xf0] }
 0x1fd   : > { %v4149_v12 = vmul.f32 1.442695, %v4124_v24  ;;  %v7106_v25 = vpop.eup %7105  ;;  %v6700_v27 = vld [vmem:[%s7195_s26 + $0x24c] sm:$0xf] }
 0x1fe   : > { %3875 = vmatpush.bf16.msrb.mxu2 %v5248_v41  ;;  %3921 = vmatpush.bf16.msrb.mxu0 %v5504_v16  ;;  %v5152_v41 = vor.u32 %v6704_v19, %v5149_v35  ;;  %v6446_v37 = vadd.f32 -1.0, %v7106_v25  ;;  %v6912_v25 = vld [vmem:[%s7195_s26 + $0x8ec] sm:$0xf] }
 0x1ff   : > { %7107 = vpow2.f32 %v4149_v12  ;;  %3849 = vmatpush.bf16.msrb.mxu1 %v5168_v54 }
 0x200   : > { %v3492_v43 = vpop.f32.mrf.mxu1  ;;  %v3522_v24 = vpop.f32.mrf.mxu2  ;;  %v8659_v5 = vsel %vm4100_vm5, %v8585_v50, %v6446_v37  ;;  %v6696_v50 = vld [vmem:[%s7195_s26 + $0x22c] sm:$0xf] }
 0x201   : > { %v8636_v10 = vadd.f32 %v3492_v43, %v8527_v51  ;;  %v5488_v51 = vor.u32 %v6788_v58, %v5485_v46  ;;  %v5133_v43 = vld [vmem:[%s7195_s26 + $0x258] sm:$0xf0]  ;;  %v5984_v24 = vor.u32 %v6912_v25, %v5981_v31 }
 0x202   : > { %v3545_v12 = vpop.f32.mrf.mxu3  ;;  %v3561_v23 = vpop.f32.mrf.mxu0  ;;  %3876 = vmatpush.bf16.msrb.mxu2 %v5232_v30 }
 0x203   : > { %v4128_v15 = vmin.f32 %v8636_v10, 0.0  ;;  %3762 = vmatmul.bf16.vlgmr.msra.gmra.mxu1 %v9190_v4  ;;  %v8647_v39 = vadd.f32 %v3561_v23, %v8576_v7  ;;  %3922 = vmatpush.bf16.msrb.mxu0 %v5488_v51  ;;  %v5136_v7 = vor.u32 %v6700_v27, %v5133_v43  ;;  %v6908_v23 = vld [vmem:[%s7195_s26 + $0x8cc] sm:$0xf]  ;;  %v5965_v51 = vld [vmem:[%s7195_s26 + $0x8d8] sm:$0xf0]  ;;  %vm4108_vm7 = vcmp.gt.f32.partialorder %v8636_v10, 0.0 }
 0x204   : > { %3850 = vmatpush.bf16.msrb.mxu1 %v5152_v41  ;;  %3984 = vmatpush.bf16.msrb.mxu3 %v5984_v24  ;;  %v5968_v41 = vor.u32 %v6908_v23, %v5965_v51  ;;  %v6904_v43 = vld [vmem:[%s7195_s26 + $0x8ac] sm:$0xf] }
 0x205   : > { %v7108_v16 = vpop.eup %7107  ;;  %3836 = vmatmul.bf16.gmra.mxu0 %v7458_v14  ;;  %v4157_v54 = vmul.f32 1.442695, %v4128_v15  ;;  %6440 = vmatmul.msk.bf16.gmra.mxu2 %vm2893_vm0, %v9184_v42  ;;  %v6880_v51 = vld [vmem:[%s7195_s26 + $0x7ec] sm:$0xf] }
 0x206   : > { %v6450_v33 = vadd.f32 -1.0, %v7108_v16  ;;  %v6692_v16 = vld [vmem:[%s7195_s26 + $0x20c] sm:$0xf] }
 0x207   : > { %3818 = vmatmul.bf16.gmra.mxu3 %v7280_v28  ;;  %7109 = vpow2.f32 %v4157_v54  ;;  %v5949_v54 = vld [vmem:[%s7195_s26 + $0x8b8] sm:$0xf0] }
 0x208   : > { %v8662_v58 = vsel %vm4104_vm6, %v8614_v56, %v6450_v33  ;;  %v3494_v14 = vpop.f32.mrf.mxu1  ;;  %v8668_v19 = vpop.f32.mrf.mxu2  ;;  %3851 = vmatpush.bf16.msrb.mxu1 %v5136_v7  ;;  %v5117_v56 = vld [vmem:[%s7195_s26 + $0x238] sm:$0xf0]  ;;  %3985 = vmatpush.bf16.msrb.mxu3 %v5968_v41  ;;  %v5952_v25 = vor.u32 %v6904_v43, %v5949_v54  ;;  %v6896_v43 = vld [vmem:[%s7195_s26 + $0x86c] sm:$0xf]  ;;  %vm4634_vm6 = vcmask 1043456  }
 0x209   : > { %v4220_v30 = vpack.c.bf16 %v8662_v58, %v8659_v5  ;;  %v3495_v46 = vadd.f32 %v3494_v14, %v8545_v48  ;;  %v5120_v12 = vor.u32 %v6696_v50, %v5117_v56  ;;  %v5101_v33 = vld [vmem:[%s7195_s26 + $0x218] sm:$0xf0]  ;;  %v6900_v56 = vld [vmem:[%s7195_s26 + $0x88c] sm:$0xf] }
 0x20a   : > { %v3563_v15 = vpop.f32.mrf.mxu0  ;;  %v8672_v28 = vpop.f32.mrf.mxu3  ;;  %v5104_v27 = vor.u32 %v6692_v16, %v5101_v33  ;;  %v5853_v41 = vld [vmem:[%s7195_s26 + $0x7f8] sm:$0xf0]  ;;  %v6944_v33 = vld [vmem:[%s7195_s26 + $0x9ec] sm:$0xf] }
 0x20b   : > { %v4132_v35 = vmin.f32 %v3495_v46, 0.0  ;;  %v8677_v48 = vadd.f32 %v3563_v15, %v8601_v9  ;;  %v5856_v16 = vor.u32 %v6880_v51, %v5853_v41  ;;  %vm4112_vm8 = vcmp.gt.f32.partialorder %v3495_v46, 0.0  ;;  %v5917_v54 = vld [vmem:[%s7195_s26 + $0x878] sm:$0xf0]  ;;  %v6892_v41 = vld [vmem:[%s7195_s26 + $0x84c] sm:$0xf] }
 0x20c   : > { %3852 = vmatpush.bf16.msrb.mxu1 %v5120_v12  ;;  %3986 = vmatpush.bf16.msrb.mxu3 %v5952_v25  ;;  %v6093_v51 = vld [vmem:[%s7195_s26 + $0x9d8] sm:$0xf0] }
 0x20d   : > { %v4165_v37 = vmul.f32 1.442695, %v4132_v35  ;;  %v7110_v31 = vpop.eup %7109  ;;  %v5933_v35 = vld [vmem:[%s7195_s26 + $0x898] sm:$0xf0]  ;;  %3961 = vmatpush.bf16.msra.mxu2 %v5856_v16 }
 0x20e   : > { %v6454_v15 = vadd.f32 -1.0, %v7110_v31 }
 0x20f   : > { %7111 = vpow2.f32 %v4165_v37 }
 0x210   : > { %v3497_v7 = vpop.f32.mrf.mxu1  ;;  %v8686_v14 = vpop.f32.mrf.mxu2  ;;  %3853 = vmatpush.bf16.msrb.mxu1 %v5104_v27  ;;  %v6109_v27 = vld [vmem:[%s7195_s26 + $0x9f8] sm:$0xf0]  ;;  %v8708_v25 = vsel %vm4108_vm7, %v8636_v10, %v6454_v15  ;;  %vm4624_vm7 = vcmask 326656  }
 0x211   : > { %v8684_v9 = vadd.f32 %v3497_v7, %v8563_v55  ;;  %v5936_v55 = vor.u32 %v6900_v56, %v5933_v35  ;;  %v5837_v56 = vld [vmem:[%s7195_s26 + $0x7d8] sm:$0xf0]  ;;  %v6940_v35 = vld [vmem:[%s7195_s26 + $0x9cc] sm:$0xf] }
 0x212   : > { %v3566_v24 = vpop.f32.mrf.mxu0  ;;  %v8688_v50 = vpop.f32.mrf.mxu3  ;;  %v6096_v15 = vor.u32 %v6940_v35, %v6093_v51  ;;  %v6868_v51 = vld [vmem:[%s7195_s26 + $0x78c] sm:$0xf] }
 0x213   : > { %3767 = vmatmul.bf16.gmra.mxu1 %v7692_v38  ;;  %v8694_v12 = vadd.f32 %v3566_v24, %v8627_v0  ;;  %3987 = vmatpush.bf16.msrb.mxu3 %v5936_v55  ;;  %v6112_v0 = vor.u32 %v6944_v33, %v6109_v27  ;;  %v6876_v24 = vld [vmem:[%s7195_s26 + $0x7cc] sm:$0xf]  ;;  %v5821_v27 = vld [vmem:[%s7195_s26 + $0x7b8] sm:$0xf0]  ;;  %vm4116_vm14 = vcmp.gt.f32.partialorder %v8684_v9, 0.0 }
 0x214   : > { %v6872_v33 = vld [vmem:[%s7195_s26 + $0x7ac] sm:$0xf] }
 0x215   : > { %v7112_v23 = vpop.eup %7111  ;;  %3841 = vmatmul.bf16.gmra.mxu0 %v7517_v17  ;;  %6441 = vmatmul.msk.bf16.gmra.mxu2 %vm2893_vm0, %v9186_v40  ;;  %v5920_v17 = vor.u32 %v6896_v43, %v5917_v54  ;;  %v5824_v43 = vor.u32 %v6872_v33, %v5821_v27  ;;  %v6077_v54 = vld [vmem:[%s7195_s26 + $0x9b8] sm:$0xf0]  ;;  %v6848_v33 = vld [vmem:[%s7195_s26 + $0x6ec] sm:$0xf] }
 0x216   : > { %v6458_v37 = vadd.f32 -1.0, %v7112_v23  ;;  %4007 = vmatpush.bf16.msra.mxu0 %v6112_v0  ;;  %v5840_v23 = vor.u32 %v6876_v24, %v5837_v56  ;;  %v6936_v0 = vld [vmem:[%s7195_s26 + $0x9ac] sm:$0xf]  ;;  %v5885_v24 = vld [vmem:[%s7195_s26 + $0x838] sm:$0xf0] }
 0x217   : > { %3900 = vmatmul.bf16.vlgmr.msra.gmra.mxu3 %v7409_v29  ;;  %v5725_v27 = vld [vmem:[%s7195_s26 + $0x6f8] sm:$0xf0] }
 0x218   : > { %v3499_v7 = vpop.f32.mrf.mxu1  ;;  %v8710_v31 = vsel %vm4112_vm8, %v3495_v46, %v6458_v37  ;;  %v8717_v29 = vpop.f32.mrf.mxu2  ;;  %3988 = vmatpush.bf16.msrb.mxu3 %v5920_v17  ;;  %v5901_v37 = vld [vmem:[%s7195_s26 + $0x858] sm:$0xf0]  ;;  %3962 = vmatpush.bf16.msra.mxu2 %v5840_v23  ;;  %v6888_v17 = vld [vmem:[%s7195_s26 + $0x82c] sm:$0xf]  ;;  %vm4661_vm8 = vcmask 130048  }
 0x219   : > { %v4224_v55 = vpack.c.bf16 %v8710_v31, %v8708_v25  ;;  %v5904_v16 = vor.u32 %v6892_v41, %v5901_v37  ;;  %v6080_v7 = vor.u32 %v6936_v0, %v6077_v54  ;;  %v5888_v35 = vor.u32 %v6888_v17, %v5885_v24  ;;  %v6884_v17 = vld [vmem:[%s7195_s26 + $0x80c] sm:$0xf]  ;;  %v5869_v24 = vld [vmem:[%s7195_s26 + $0x818] sm:$0xf0] }
 0x21a   : > { %v3568_v10 = vpop.f32.mrf.mxu0  ;;  %v8720_v46 = vpop.f32.mrf.mxu3  ;;  %4008 = vmatpush.bf16.msra.mxu0 %v6096_v15  ;;  %v6932_v15 = vld [vmem:[%s7195_s26 + $0x98c] sm:$0xf] }
 0x21b   : > { %v5805_v10 = vld [vmem:[%s7195_s26 + $0x798] sm:$0xf0] }
 0x21c   : > { %3989 = vmatpush.bf16.msrb.mxu3 %v5904_v16  ;;  %3963 = vmatpush.bf16.msra.mxu2 %v5824_v43  ;;  %v5808_v37 = vor.u32 %v6868_v51, %v5805_v10  ;;  %v6061_v16 = vld [vmem:[%s7195_s26 + $0x998] sm:$0xf0]  ;;  %v6864_v51 = vld [vmem:[%s7195_s26 + $0x76c] sm:$0xf] }
 0x21d   : > { %v6064_v54 = vor.u32 %v6932_v15, %v6061_v16  ;;  %v6045_v15 = vld [vmem:[%s7195_s26 + $0x978] sm:$0xf0]  ;;  %v6844_v16 = vld [vmem:[%s7195_s26 + $0x6cc] sm:$0xf] }
 0x21e   : > { %4009 = vmatpush.bf16.msra.mxu0 %v6080_v7  ;;  %v5728_v7 = vor.u32 %v6848_v33, %v5725_v27  ;;  %v5709_v33 = vld [vmem:[%s7195_s26 + $0x6d8] sm:$0xf0] }
 0x21f   : > { %v5712_v27 = vor.u32 %v6844_v16, %v5709_v33  ;;  %v6920_v16 = vld [vmem:[%s7195_s26 + $0x92c] sm:$0xf] }
 0x220   : > { %v3579_v56 = vpop.f32.mrf.mxu1  ;;  %v8734_v41 = vpop.f32.mrf.mxu2  ;;  %3990 = vmatpush.bf16.msrb.mxu3 %v5888_v35  ;;  %3964 = vmatpush.bf16.msra.mxu2 %v5808_v37 }
 0x221   : > { %v3580_v23 = vadd.f32 %v3579_v56, %v8599_v22  ;;  %v5872_v56 = vor.u32 %v6884_v17, %v5869_v24  ;;  %3938 = vmatpush.bf16.msra.mxu1 %v5728_v7  ;;  %v6924_v7 = vld [vmem:[%s7195_s26 + $0x94c] sm:$0xf]  ;;  %v6029_v24 = vld [vmem:[%s7195_s26 + $0x958] sm:$0xf0] }
 0x222   : > { %v8740_v43 = vpop.f32.mrf.mxu3  ;;  %v3648_v22 = vpop.f32.mrf.mxu0  ;;  %4010 = vmatpush.bf16.msra.mxu0 %v6064_v54  ;;  %v6860_v54 = vld [vmem:[%s7195_s26 + $0x74c] sm:$0xf] }
 0x223   : > { %v3603_v0 = vadd.f32 %v8668_v19, %v3580_v23  ;;  %3772 = vmatmul.bf16.gmra.mxu1 %v7739_v49  ;;  %v5789_v19 = vld [vmem:[%s7195_s26 + $0x778] sm:$0xf0]  ;;  %v6928_v23 = vld [vmem:[%s7195_s26 + $0x96c] sm:$0xf] }
 0x224   : > { %3991 = vmatpush.bf16.msrb.mxu3 %v5872_v56  ;;  %v5792_v10 = vor.u32 %v6864_v51, %v5789_v19  ;;  %v6840_v56 = vld [vmem:[%s7195_s26 + $0x6ac] sm:$0xf]  ;;  %v6032_v19 = vor.u32 %v6924_v7, %v6029_v24 }
 0x225   : > { %v3626_v35 = vadd.f32 %v8672_v28, %v3603_v0  ;;  %3923 = vmatmul.bf16.vlgmr.msrb.gmra.mxu0 %v7562_v60  ;;  %3877 = vmatmul.bf16.vlgmr.msrb.gmra.mxu2 %v9187_v62  ;;  %v6048_v28 = vor.u32 %v6928_v23, %v6045_v15  ;;  %v5757_v15 = vld [vmem:[%s7195_s26 + $0x738] sm:$0xf0]  ;;  %v6852_v24 = vld [vmem:[%s7195_s26 + $0x70c] sm:$0xf] }
 0x226   : > { %3965 = vmatpush.bf16.msra.mxu2 %v5792_v10  ;;  %3939 = vmatpush.bf16.msra.mxu1 %v5712_v27  ;;  %v6856_v10 = vld [vmem:[%s7195_s26 + $0x72c] sm:$0xf] }
 0x227   : > { %v8753_v37 = vadd.f32 %v3648_v22, %v3626_v35  ;;  %3905 = vmatmul.bf16.gmra.mxu3 %v7477_v34  ;;  %4011 = vmatpush.bf16.msra.mxu0 %v6048_v28  ;;  %v5773_v22 = vld [vmem:[%s7195_s26 + $0x758] sm:$0xf0]  ;;  %v5760_v33 = vor.u32 %v6856_v10, %v5757_v15 }
 0x228   : > { %v3581_v0 = vpop.f32.mrf.mxu1  ;;  %v8761_v17 = vpop.f32.mrf.mxu2  ;;  %v5776_v62 = vor.u32 %v6860_v54, %v5773_v22  ;;  %v5693_v35 = vld [vmem:[%s7195_s26 + $0x6b8] sm:$0xf0] }
 0x229   : > { %v3582_v60 = vadd.f32 %v3581_v0, %v8625_v32  ;;  %v5696_v23 = vor.u32 %v6840_v56, %v5693_v35  ;;  %v6013_v28 = vld [vmem:[%s7195_s26 + $0x938] sm:$0xf0]  ;;  %v6836_v0 = vld [vmem:[%s7195_s26 + $0x68c] sm:$0xf] }
 0x22a   : > { %v8767_v32 = vpop.f32.mrf.mxu3  ;;  %v3650_v51 = vpop.f32.mrf.mxu0  ;;  %3966 = vmatpush.bf16.msra.mxu2 %v5776_v62  ;;  %v5741_v56 = vld [vmem:[%s7195_s26 + $0x718] sm:$0xf0] }
 0x22b   : > { %v3605_v34 = vadd.f32 %v8686_v14, %v3582_v60  ;;  %4012 = vmatpush.bf16.msra.mxu0 %v6032_v19  ;;  %3940 = vmatpush.bf16.msra.mxu1 %v5696_v23  ;;  %v6016_v14 = vor.u32 %v6920_v16, %v6013_v28  ;;  %v5677_v60 = vld [vmem:[%s7195_s26 + $0x698] sm:$0xf0]  ;;  %v6832_v23 = vld [vmem:[%s7195_s26 + $0x66c] sm:$0xf] }
 0x22c   : > { %v5680_v22 = vor.u32 %v6836_v0, %v5677_v60  ;;  %v5997_v19 = vld [vmem:[%s7195_s26 + $0x918] sm:$0xf0] }
 0x22d   : > { %v3628_v27 = vadd.f32 %v8688_v50, %v3605_v34  ;;  %v6916_v50 = vld [vmem:[%s7195_s26 + $0x90c] sm:$0xf]  ;;  %v5744_v34 = vor.u32 %v6852_v24, %v5741_v56  ;;  %v5661_v10 = vld [vmem:[%s7195_s26 + $0x678] sm:$0xf0] }
 0x22e   : > { %3967 = vmatpush.bf16.msra.mxu2 %v5760_v33  ;;  %v9191_v33 = vld [vmem:[#allocation2_spill] sm:$0xff]  ;;  %v5664_v28 = vor.u32 %v6832_v23, %v5661_v10  ;;  %v5645_v0 = vld [vmem:[%s7195_s26 + $0x658] sm:$0xf0]  ;;  %v6824_v56 = vld [vmem:[%s7195_s26 + $0x62c] sm:$0xf] }
 0x22f   : > { %v8776_v54 = vadd.f32 %v3650_v51, %v3628_v27  ;;  %4013 = vmatpush.bf16.msra.mxu0 %v6016_v14  ;;  %3941 = vmatpush.bf16.msra.mxu1 %v5680_v22  ;;  %v6828_v14 = vld [vmem:[%s7195_s26 + $0x64c] sm:$0xf]  ;;  %v6221_v23 = vld [vmem:[%s7195_s26 + $0xad8] sm:$0xf0] }
 0x230   : > { %v3584_v7 = vpop.f32.mrf.mxu1  ;;  %v3614_v35 = vpop.f32.mrf.mxu2  ;;  %v5648_v60 = vor.u32 %v6828_v14, %v5645_v0  ;;  %v6976_v22 = vld [vmem:[%s7195_s26 + $0xaec] sm:$0xf] }
 0x231   : > { %v3585_v62 = vadd.f32 %v3584_v7, %v8647_v39  ;;  %v6000_v39 = vor.u32 %v6916_v50, %v5997_v19  ;;  %v6237_v7 = vld [vmem:[%s7195_s26 + $0xaf8] sm:$0xf0] }
 0x232   : > { %v3637_v15 = vpop.f32.mrf.mxu3  ;;  %v3653_v16 = vpop.f32.mrf.mxu0  ;;  %3968 = vmatpush.bf16.msra.mxu2 %v5744_v34 }
 0x233   : > { %v3608_v51 = vadd.f32 %v8717_v29, %v3585_v62  ;;  %3854 = vmatmul.bf16.vlgmr.msrb.gmra.mxu1 %v9191_v33  ;;  %4014 = vmatpush.bf16.msra.mxu0 %v6000_v39  ;;  %v5613_v15 = vld [vmem:[%s7195_s26 + $0x618] sm:$0xf0]  ;;  %v6968_v39 = vld [vmem:[%s7195_s26 + $0xaac] sm:$0xf] }
 0x234   : > { %3942 = vmatpush.bf16.msra.mxu1 %v5664_v28 }
 0x235   : > { %v3631_v27 = vadd.f32 %v8720_v46, %v3608_v51  ;;  %3928 = vmatmul.bf16.gmra.mxu0 %v7612_v3  ;;  %3882 = vmatmul.bf16.gmra.mxu2 %v7353_v36  ;;  %v6240_v46 = vor.u32 %v6976_v22, %v6237_v7  ;;  %v5629_v36 = vld [vmem:[%s7195_s26 + $0x638] sm:$0xf0]  ;;  %v6820_v51 = vld [vmem:[%s7195_s26 + $0x60c] sm:$0xf]  ;;  %v9192_v7 = vld [vmem:[#allocation4_spill] sm:$0xff] }
 0x236   : > { %v5632_v19 = vor.u32 %v6824_v56, %v5629_v36  ;;  %v5616_v33 = vor.u32 %v6820_v51, %v5613_v15 }
 0x237   : > { %v8791_v29 = vadd.f32 %v3653_v16, %v3631_v27  ;;  %3910 = vmatmul.bf16.gmra.mxu3 %v7533_v26  ;;  %v6972_v26 = vld [vmem:[%s7195_s26 + $0xacc] sm:$0xf] }
 0x238   : > { %v3586_v62 = vpop.f32.mrf.mxu1  ;;  %3943 = vmatpush.bf16.msra.mxu1 %v5648_v60  ;;  %v8798_v3 = vpop.f32.mrf.mxu2  ;;  %7075 = vmatpush.bf16.msra.mxu3 %v6240_v46  ;;  %v6224_v10 = vor.u32 %v6972_v26, %v6221_v23  ;;  %v6173_v26 = vld [vmem:[%s7195_s26 + $0xa78] sm:$0xf0]  ;;  %v7004_v23 = vld [vmem:[%s7195_s26 + $0xbcc] sm:$0xf] }
 0x239   : > { %v3587_v24 = vadd.f32 %v3586_v62, %v8677_v48  ;;  %v6964_v62 = vld [vmem:[%s7195_s26 + $0xa8c] sm:$0xf] }
 0x23a   : > { %v3655_v35 = vpop.f32.mrf.mxu0  ;;  %v8803_v34 = vpop.f32.mrf.mxu3 }
 0x23b   : > { %v3610_v50 = vadd.f32 %v8734_v41, %v3587_v24  ;;  %v6205_v41 = vld [vmem:[%s7195_s26 + $0xab8] sm:$0xf0] }
 0x23c   : > { %3944 = vmatpush.bf16.msra.mxu1 %v5632_v19  ;;  %7076 = vmatpush.bf16.msra.mxu3 %v6224_v10  ;;  %v6208_v27 = vor.u32 %v6968_v39, %v6205_v41  ;;  %v6189_v24 = vld [vmem:[%s7195_s26 + $0xa98] sm:$0xf0]  ;;  %v6960_v19 = vld [vmem:[%s7195_s26 + $0xa6c] sm:$0xf] }
 0x23d   : > { %v3633_v48 = vadd.f32 %v8740_v43, %v3610_v50  ;;  %v6192_v56 = vor.u32 %v6964_v62, %v6189_v24  ;;  %v6365_v50 = vld [vmem:[%s7195_s26 + $0xbf8] sm:$0xf0] }
 0x23e   : > { %v6157_v39 = vld [vmem:[%s7195_s26 + $0xa58] sm:$0xf0] }
 0x23f   : > { %v8810_v16 = vadd.f32 %v3655_v35, %v3633_v48  ;;  %v6349_v48 = vld [vmem:[%s7195_s26 + $0xbd8] sm:$0xf0] }
 0x240   : > { %v3589_v28 = vpop.f32.mrf.mxu1  ;;  %3945 = vmatpush.bf16.msra.mxu1 %v5616_v33  ;;  %v8815_v0 = vpop.f32.mrf.mxu2  ;;  %7077 = vmatpush.bf16.msra.mxu3 %v6208_v27  ;;  %v6141_v62 = vld [vmem:[%s7195_s26 + $0xa38] sm:$0xf0] }
 0x241   : > { %v3590_v14 = vadd.f32 %v3589_v28, %v8694_v12  ;;  %v7008_v12 = vld [vmem:[%s7195_s26 + $0xbec] sm:$0xf] }
 0x242   : > { %v3658_v60 = vpop.f32.mrf.mxu0  ;;  %v8818_v22 = vpop.f32.mrf.mxu3  ;;  %v7000_v28 = vld [vmem:[%s7195_s26 + $0xbac] sm:$0xf] }
 0x243   : > { %v3613_v43 = vadd.f32 %v8761_v17, %v3590_v14  ;;  %3859 = vmatmul.bf16.gmra.mxu1 %v9192_v7  ;;  %v6368_v17 = vor.u32 %v7008_v12, %v6365_v50  ;;  %v6333_v14 = vld [vmem:[%s7195_s26 + $0xbb8] sm:$0xf0]  ;;  %v6952_v7 = vld [vmem:[%s7195_s26 + $0xa2c] sm:$0xf] }
 0x244   : > { %4030 = vmatpush.bf16.msrb.mxu1 %v6240_v46  ;;  %7078 = vmatpush.bf16.msra.mxu3 %v6192_v56  ;;  %v7034_v46 = vld [vmem:[%s9129_s3 + $0x38] sm:$0xff]  ;;  %v6996_v12 = vld [vmem:[%s7195_s26 + $0xb8c] sm:$0xf] }
 0x245   : > { %v3636_v36 = vadd.f32 %v8767_v32, %v3613_v43  ;;  %3933 = vmatmul.bf16.gmra.mxu0 %v7665_v63  ;;  %3887 = vmatmul.bf16.gmra.mxu2 %v9188_v61  ;;  %v6176_v63 = vor.u32 %v6960_v19, %v6173_v26  ;;  %v6352_v61 = vor.u32 %v7004_v23, %v6349_v48  ;;  %v6317_v50 = vld [vmem:[%s7195_s26 + $0xb98] sm:$0xf0] }
 0x246   : > { %4053 = vmatpush.bf16.msrb.mxu2 %v6368_v17  ;;  %4481 = vmatpush.bf16.msrb.mxu0 %v7034_v46  ;;  %v6336_v43 = vor.u32 %v7000_v28, %v6333_v14  ;;  %v6320_v46 = vor.u32 %v6996_v12, %v6317_v50  ;;  %v9193_v23 = vld [vmem:[#allocation5_spill] sm:$0xff] }
 0x247   : > { %v8830_v35 = vadd.f32 %v3658_v60, %v3636_v36  ;;  %3992 = vmatmul.bf16.vlgmr.msrb.gmra.mxu3 %v7570_v2  ;;  %v6956_v2 = vld [vmem:[%s7195_s26 + $0xa4c] sm:$0xf]  ;;  %v6125_v48 = vld [vmem:[%s7195_s26 + $0xa18] sm:$0xf0] }
 0x248   : > { %4031 = vmatpush.bf16.msrb.mxu1 %v6224_v10  ;;  %v3591_v32 = vpop.f32.mrf.mxu1  ;;  %v8838_v51 = vpop.f32.mrf.mxu2  ;;  %7079 = vmatpush.bf16.msra.mxu3 %v6176_v63  ;;  %v7033_v10 = vld [vmem:[%s9129_s3 + $0x30] sm:$0xff]  ;;  %v6160_v41 = vor.u32 %v6956_v2, %v6157_v39  ;;  %v7032_v60 = vld [vmem:[%s9129_s3 + $0x28] sm:$0xff]  ;;  %v6301_v2 = vld [vmem:[%s7195_s26 + $0xb78] sm:$0xf0] }
 0x249   : > { %v7030_v39 = vld [vmem:[%s9129_s3 + $0x18] sm:$0xff] }
 0x24a   : > { %v3660_v15 = vpop.f32.mrf.mxu0  ;;  %v8843_v33 = vpop.f32.mrf.mxu3  ;;  %4054 = vmatpush.bf16.msrb.mxu2 %v6352_v61  ;;  %4482 = vmatpush.bf16.msrb.mxu0 %v7033_v10  ;;  %v6429_v14 = vld [vmem:[%s7195_s26 + $0xc78] sm:$0xf0] }
 0x24b   : > { %v6992_v15 = vld [vmem:[%s7195_s26 + $0xb6c] sm:$0xf] }
 0x24c   : > { %4032 = vmatpush.bf16.msrb.mxu1 %v6208_v27  ;;  %7080 = vmatpush.bf16.msra.mxu3 %v6160_v41  ;;  %v6144_v27 = vor.u32 %v6952_v7, %v6141_v62  ;;  %v6988_v7 = vld [vmem:[%s7195_s26 + $0xb4c] sm:$0xf]  ;;  %v6285_v62 = vld [vmem:[%s7195_s26 + $0xb58] sm:$0xf0] }
 0x24e   : > { %4055 = vmatpush.bf16.msrb.mxu2 %v6336_v43  ;;  %4483 = vmatpush.bf16.msrb.mxu0 %v7032_v60  ;;  %v9194_v43 = vld [vmem:[#allocation11_spill] sm:$0xff] }
 0x250   : > { %4033 = vmatpush.bf16.msrb.mxu1 %v6192_v56  ;;  %v3671_v24 = vpop.f32.mrf.mxu1  ;;  %v8857_v17 = vpop.f32.mrf.mxu2  ;;  %7081 = vmatpush.bf16.msra.mxu3 %v6144_v27  ;;  %v7031_v56 = vld [vmem:[%s9129_s3 + $0x20] sm:$0xff] }
 0x251   : > { %v3672_v36 = vadd.f32 %v3671_v24, %v8753_v37  ;;  %v6948_v37 = vld [vmem:[%s7195_s26 + $0xa0c] sm:$0xf] }
 0x252   : > { %v8863_v26 = vpop.f32.mrf.mxu3  ;;  %v3740_v32 = vpop.f32.mrf.mxu0  ;;  %4056 = vmatpush.bf16.msrb.mxu2 %v6320_v46  ;;  %v6128_v61 = vor.u32 %v6948_v37, %v6125_v48  ;;  %4484 = vmatpush.bf16.msrb.mxu0 %v7031_v56  ;;  %v6413_v56 = vld [vmem:[%s7195_s26 + $0xc58] sm:$0xf0]  ;;  %v4582_v48 = vld [vmem:[%s9131_s5 + $0x8] sm:$0xff] }
 0x253   : > { %v3695_v19 = vadd.f32 %v8798_v3, %v3672_v36  ;;  %3864 = vmatmul.bf16.gmra.mxu1 %v9193_v23  ;;  %v6304_v3 = vor.u32 %v6992_v15, %v6301_v2  ;;  %v7029_v36 = vld [vmem:[%s9129_s3 + $0x10] sm:$0xff]  ;;  %4593 = vperm.xlu0 %7094, %v4582_v48   ;;  %v7016_v15 = vld [vmem:[%s7195_s26 + $0xc2c] sm:$0xf]  ;;  %v6397_v2 = vld [vmem:[%s7195_s26 + $0xc38] sm:$0xf0] }
 0x254   : > { %4034 = vmatpush.bf16.msrb.mxu1 %v6176_v63  ;;  %7082 = vmatpush.bf16.msra.mxu3 %v6128_v61  ;;  %v7024_v63 = vld [vmem:[%s7195_s26 + $0xc6c] sm:$0xf] }
 0x255   : > { %v3718_v10 = vadd.f32 %v8803_v34, %v3695_v19  ;;  %4015 = vmatmul.bf16.vlgmr.msra.gmra.mxu0 %v7718_v8  ;;  %3969 = vmatmul.bf16.vlgmr.msra.gmra.mxu2 %v7487_v47  ;;  %v6432_v60 = vor.u32 %v7024_v63, %v6429_v14  ;;  %v6288_v47 = vor.u32 %v6988_v7, %v6285_v62  ;;  %v6980_v63 = vld [vmem:[%s7195_s26 + $0xb0c] sm:$0xf]  ;;  %v6253_v14 = vld [vmem:[%s7195_s26 + $0xb18] sm:$0xf0] }
 0x256   : > { %4057 = vmatpush.bf16.msrb.mxu2 %v6304_v3  ;;  %4485 = vmatpush.bf16.msrb.mxu0 %v7030_v39  ;;  %v6400_v3 = vor.u32 %v7016_v15, %v6397_v2  ;;  %v9195_v62 = vld [vmem:[#allocation7_spill] sm:$0xff] }
 0x257   : > { %v8875_v28 = vadd.f32 %v3740_v32, %v3718_v10  ;;  %3997 = vmatmul.bf16.gmra.mxu3 %v9194_v43  ;;  %v6269_v32 = vld [vmem:[%s7195_s26 + $0xb38] sm:$0xf0]  ;;  %v7027_v43 = vld [vmem:[%s9129_s3] sm:$0xff] }
 0x258   : > { %v3673_v34 = vpop.f32.mrf.mxu1  ;;  %4035 = vmatpush.bf16.msrb.mxu1 %v6160_v41  ;;  %v8884_v24 = vpop.f32.mrf.mxu2  ;;  %4080 = vmatpush.bf16.msrb.mxu3 %v6432_v60  ;;  %v6984_v41 = vld [vmem:[%s7195_s26 + $0xb2c] sm:$0xf] }
 0x259   : > { %v3674_v8 = vadd.f32 %v3673_v34, %v8776_v54  ;;  %v7020_v54 = vld [vmem:[%s7195_s26 + $0xc4c] sm:$0xf]  ;;  %v6272_v37 = vor.u32 %v6984_v41, %v6269_v32 }
 0x25a   : > { %v8890_v50 = vpop.f32.mrf.mxu3  ;;  %v3742_v46 = vpop.f32.mrf.mxu0  ;;  %4058 = vmatpush.bf16.msrb.mxu2 %v6288_v47  ;;  %v6416_v19 = vor.u32 %v7020_v54, %v6413_v56  ;;  %4486 = vmatpush.bf16.msrb.mxu0 %v7029_v36  ;;  %v7012_v47 = vld [vmem:[%s7195_s26 + $0xc0c] sm:$0xf]  ;;  %v6381_v36 = vld [vmem:[%s7195_s26 + $0xc18] sm:$0xf0] }
 0x25b   : > { %v3697_v12 = vadd.f32 %v8815_v0, %v3674_v8  ;;  %v7028_v0 = vld [vmem:[%s9129_s3 + $0x8] sm:$0xff] }
 0x25c   : > { %4036 = vmatpush.bf16.msrb.mxu1 %v6144_v27  ;;  %4081 = vmatpush.bf16.msrb.mxu3 %v6416_v19  ;;  %v6256_v27 = vor.u32 %v6980_v63, %v6253_v14 }
 0x25d   : > { %v3720_v23 = vadd.f32 %v8818_v22, %v3697_v12 }
 0x25e   : > { %4059 = vmatpush.bf16.msrb.mxu2 %v6272_v37  ;;  %4487 = vmatpush.bf16.msrb.mxu0 %v7028_v0 }
 0x25f   : > { %v8903_v10 = vadd.f32 %v3742_v46, %v3720_v23 }
 0x260   : > { %v3676_v22 = vpop.f32.mrf.mxu1  ;;  %4037 = vmatpush.bf16.msrb.mxu1 %v6128_v61  ;;  %v3706_v34 = vpop.f32.mrf.mxu2  ;;  %4082 = vmatpush.bf16.msrb.mxu3 %v6400_v3  ;;  %v9196_v61 = vld [vmem:[#allocation14_spill] sm:$0xff] }
 0x261   : > { %v3677_v39 = vadd.f32 %v3676_v22, %v8791_v29  ;;  %v6384_v29 = vor.u32 %v7012_v47, %v6381_v36  ;;  %v9197_v22 = vld [vmem:[#allocation8_spill] sm:$0xff]  ;;  %v7040_v34 = vld [vmem:[%s9129_s3 + $0x68] sm:$0xff] }
 0x262   : > { %v3729_v8 = vpop.f32.mrf.mxu3  ;;  %v3745_v7 = vpop.f32.mrf.mxu0  ;;  %4060 = vmatpush.bf16.msrb.mxu2 %v6256_v27  ;;  %4488 = vmatpush.bf16.msrb.mxu0 %v7027_v43  ;;  %v7039_v27 = vld [vmem:[%s9129_s3 + $0x60] sm:$0xff] }
 0x263   : > { %v3700_v60 = vadd.f32 %v8838_v51, %v3677_v39  ;;  %3946 = vmatmul.bf16.vlgmr.msra.gmra.mxu1 %v9195_v62  ;;  %v4585_v51 = vld [vmem:[%s9131_s5 + $0x20] sm:$0xff] }
 0x264   : > { %4083 = vmatpush.bf16.msrb.mxu3 %v6384_v29  ;;  %4608 = vperm.xlu0 %7094, %v4585_v51   ;;  %v7047_v62 = vld [vmem:[%s9129_s3 + $0xa0] sm:$0xff]  ;;  %v9200_v51 = vld [vmem:[#allocation17_spill] sm:$0xff] }
 0x265   : > { %v3723_v12 = vadd.f32 %v8843_v33, %v3700_v60  ;;  %4020 = vmatmul.bf16.gmra.mxu0 %v9196_v61  ;;  %3974 = vmatmul.bf16.gmra.mxu2 %v7542_v45 }
 0x267   : > { %v8919_v46 = vadd.f32 %v3745_v7, %v3723_v12  ;;  %4002 = vmatmul.bf16.gmra.mxu3 %v7682_v13  ;;  %v9198_v12 = vld [vmem:[#allocation9_spill] sm:$0xff] }
 0x268   : > { %v3678_v54 = vpop.f32.mrf.mxu1  ;;  %v3750_v19 = vpop.f32.mrf.mxu2 }
 0x269   : > { %v3679_v56 = vadd.f32 %v3678_v54, %v8810_v16  ;;  %v9199_v54 = vld [vmem:[#allocation18_spill] sm:$0xff] }
 0x26a   : > { %v3747_v41 = vpop.f32.mrf.mxu0  ;;  %v3809_v32 = vpop.f32.mrf.mxu3 }
 0x26b   : > { %v3702_v33 = vadd.f32 %v8857_v17, %v3679_v56  ;;  %v3810_v45 = vadd.f32 %v3809_v32, %v7812_v11  ;;  %v7042_v17 = vld [vmem:[%s9129_s3 + $0x78] sm:$0xff]  ;;  %v9201_v56 = vpack.c.bf16 %v9199_v54, %v9200_v51 }
 0x26c   : > { %4504 = vmatpush.bf16.msra.mxu1 %v7042_v17 }
 0x26d   : > { %v3725_v23 = vadd.f32 %v8863_v26, %v3702_v33  ;;  %v7037_v33 = vld [vmem:[%s9129_s3 + $0x50] sm:$0xff] }
 0x26f   : > { %v8929_v37 = vadd.f32 %v3747_v41, %v3725_v23 }
 0x270   : > { %v3681_v0 = vpop.f32.mrf.mxu1  ;;  %v3752_v48 = vpop.f32.mrf.mxu2 }
 0x271   : > { %v3682_v13 = vadd.f32 %v3681_v0, %v8830_v35  ;;  %v7050_v35 = vld [vmem:[%s9129_s3 + $0xb8] sm:$0xff]  ;;  %v7045_v0 = vld [vmem:[%s9129_s3 + $0x90] sm:$0xff] }
 0x272   : > { %v8934_v2 = vpop.f32.mrf.mxu3  ;;  %v3832_v16 = vpop.f32.mrf.mxu0  ;;  %4527 = vmatpush.bf16.msra.mxu2 %v7050_v35 }
 0x273   : > { %v3705_v15 = vadd.f32 %v8884_v24, %v3682_v13  ;;  %3951 = vmatmul.bf16.gmra.mxu1 %v9197_v22  ;;  %v8940_v26 = vadd.f32 %v3832_v16, %v3810_v45  ;;  %v7041_v24 = vld [vmem:[%s9129_s3 + $0x70] sm:$0xff]  ;;  %v9202_v16 = vld [vmem:[#allocation19_spill] sm:$0xff] }
 0x274   : > { %4505 = vmatpush.bf16.msra.mxu1 %v7041_v24  ;;  %vm4115_vm11 = vcmp.gt.f32.partialorder %v9202_v16, 0.0 }
 0x275   : > { %v3728_v11 = vadd.f32 %v8890_v50, %v3705_v15  ;;  %4025 = vmatmul.bf16.gmra.mxu0 %v7832_v52  ;;  %3979 = vmatmul.bf16.gmra.mxu2 %v9189_v18  ;;  %v4583_v52 = vld [vmem:[%s9131_s5 + $0x10] sm:$0xff]  ;;  %v7036_v15 = vld [vmem:[%s9129_s3 + $0x48] sm:$0xff] }
 0x276   : > { %4598 = vperm.xlu1 %7095, %v4583_v52   ;;  %v7049_v18 = vld [vmem:[%s9129_s3 + $0xb0] sm:$0xff] }
 0x277   : > { %v8951_v3 = vadd.f32 %v3750_v19, %v3728_v11  ;;  %4048 = vmatmul.bf16.vlgmr.msra.gmra.mxu3 %v7735_v44  ;;  %4528 = vmatpush.bf16.msra.mxu2 %v7049_v18  ;;  %v7048_v44 = vld [vmem:[%s9129_s3 + $0xa8] sm:$0xff]  ;;  %v7046_v19 = vld [vmem:[%s9129_s3 + $0x98] sm:$0xff]  ;;  %v7035_v11 = vld [vmem:[%s9129_s3 + $0x40] sm:$0xff] }
 0x278   : > { %v3683_v39 = vpop.f32.mrf.mxu1  ;;  %v3786_v50 = vpop.f32.mrf.mxu2  ;;  %4506 = vmatpush.bf16.msra.mxu1 %v7040_v34  ;;  %v7043_v18 = vld [vmem:[%s9129_s3 + $0x80] sm:$0xff] }
 0x27a   : > { %v3814_v63 = vpop.f32.mrf.mxu3  ;;  %v8960_v14 = vpop.f32.mrf.mxu0 }
 0x27b   : > { %v3815_v43 = vadd.f32 %v3814_v63, %v7865_v53  ;;  %4529 = vmatpush.bf16.msra.mxu2 %v7048_v44  ;;  %v7038_v53 = vld [vmem:[%s9129_s3 + $0x58] sm:$0xff] }
 0x27c   : > { %4507 = vmatpush.bf16.msra.mxu1 %v7039_v27 }
 0x27f   : > { %4530 = vmatpush.bf16.msra.mxu2 %v7047_v62 }
 0x280   : > { %v3763_v60 = vpop.f32.mrf.mxu1  ;;  %v3788_v7 = vpop.f32.mrf.mxu2  ;;  %4508 = vmatpush.bf16.msra.mxu1 %v7038_v53 }
 0x281   : > { %v3764_v8 = vadd.f32 %v3763_v60, %v8875_v28 }
 0x282   : > { %v8978_v36 = vpop.f32.mrf.mxu3  ;;  %v3837_v29 = vpop.f32.mrf.mxu0 }
 0x283   : > { %v8976_v47 = vadd.f32 %v3786_v50, %v3764_v8  ;;  %3956 = vmatmul.bf16.gmra.mxu1 %v9198_v12  ;;  %v8984_v61 = vadd.f32 %v3837_v29, %v3815_v43  ;;  %4531 = vmatpush.bf16.msra.mxu2 %v7046_v19  ;;  %v9203_v8 = vld [vmem:[#allocation21_spill] sm:$0xff] }
 0x284   : > { %4509 = vmatpush.bf16.msra.mxu1 %v7037_v33 }
 0x285   : > { %v4121_v28 = vmin.f32 %v8976_v47, 0.0  ;;  %4489 = vmatmul.bf16.vlgmr.msrb.gmra.mxu0 %v9201_v56  ;;  %4061 = vmatmul.bf16.vlgmr.msrb.gmra.mxu2 %v9190_v4  ;;  %vm4101_vm9 = vcmp.gt.f32.partialorder %v8976_v47, 0.0 }
 0x287   : > { %6442 = vmatmul.msk.bf16.vlgmr.msrb.gmra.mxu3 %vm2893_vm0, %v9182_v1  ;;  %v4143_v32 = vmul.f32 1.442695, %v4121_v28  ;;  %v4135_v1 = vmin.f32 %v9202_v16, 0.0  ;;  %4532 = vmatpush.bf16.msra.mxu2 %v7045_v0 }
 0x288   : > { %v3765_v41 = vpop.f32.mrf.mxu1  ;;  %v3791_v45 = vpop.f32.mrf.mxu2  ;;  %4510 = vmatpush.bf16.msra.mxu1 %v7036_v15 }
 0x289   : > { %v3766_v23 = vadd.f32 %v3765_v41, %v8903_v10  ;;  %v7044_v10 = vld [vmem:[%s9129_s3 + $0x88] sm:$0xff]  ;;  %7113 = vpow2.f32 %v4143_v32  ;;  %v4171_v35 = vmul.f32 1.442695, %v4135_v1  ;;  %v4581_v32 = vld [vmem:[%s9131_s5] sm:$0xff] }
 0x28a   : > { %v3819_v4 = vpop.f32.mrf.mxu3  ;;  %v9003_v48 = vpop.f32.mrf.mxu0  ;;  %4588 = vperm.xlu2 %7096, %v4581_v32  }
 0x28b   : > { %v3789_v13 = vadd.f32 %v3788_v7, %v3766_v23  ;;  %v3820_v24 = vadd.f32 %v3819_v4, %v7922_v57  ;;  %4533 = vmatpush.bf16.msra.mxu2 %v7044_v10 }
 0x28c   : > { %4511 = vmatpush.bf16.msra.mxu1 %v7035_v11 }
 0x28d   : > { %v4125_v22 = vmin.f32 %v3789_v13, 0.0  ;;  %vm4105_vm10 = vcmp.gt.f32.partialorder %v3789_v13, 0.0 }
 0x28f   : > { %v4151_v17 = vmul.f32 1.442695, %v4125_v22  ;;  %v7114_v63 = vpop.eup %7113  ;;  %4534 = vmatpush.bf16.msra.mxu2 %v7043_v18 }
 0x290   : > { %v3768_v39 = vpop.f32.mrf.mxu1  ;;  %v3793_v50 = vpop.f32.mrf.mxu2  ;;  %v6447_v60 = vadd.f32 -1.0, %v7114_v63 }
 0x291   : > { %7115 = vpow2.f32 %v4151_v17  ;;  %v3769_v52 = vadd.f32 %v3768_v39, %v8919_v46  ;;  %v9204_v46 = vld [vmem:[#allocation20_spill] sm:$0xff]  ;;  %v4584_v17 = vld [vmem:[%s9131_s5 + $0x18] sm:$0xff] }
 0x292   : > { %v3821_v44 = vpop.f32.mrf.mxu3  ;;  %v3842_v27 = vpop.f32.mrf.mxu0  ;;  %7117 = vpow2.f32 %v4171_v35  ;;  %v9205_v7 = vpack.c.bf16 %v9203_v8, %v9204_v46  ;;  %v4201_v54 = vsel %vm4101_vm9, %v8976_v47, %v6447_v60  ;;  %4603 = vperm.xlu2 %7096, %v4584_v17  }
 0x293   : > { %v3792_v34 = vadd.f32 %v3791_v45, %v3769_v52  ;;  %4038 = vmatmul.bf16.vlgmr.msrb.gmra.mxu1 %v7639_v21  ;;  %v9021_v43 = vadd.f32 %v3842_v27, %v3820_v24 }
 0x295   : > { %v4129_v57 = vmin.f32 %v3792_v34, 0.0  ;;  %4494 = vmatmul.bf16.gmra.mxu0 %v9205_v7  ;;  %4066 = vmatmul.bf16.gmra.mxu2 %v7692_v38  ;;  %vm4109_vm12 = vcmp.gt.f32.partialorder %v3792_v34, 0.0 }
 0x297   : > { %v7116_v62 = vpop.eup %7115  ;;  %6443 = vmatmul.msk.bf16.gmra.mxu3 %vm2893_vm0, %v9184_v42  ;;  %v4159_v21 = vmul.f32 1.442695, %v4129_v57 }
 0x298   : > { %v6451_v29 = vadd.f32 -1.0, %v7116_v62  ;;  %v3770_v12 = vpop.f32.mrf.mxu1  ;;  %v7118_v28 = vpop.eup %7117 }
 0x299   : > { %v3771_v53 = vadd.f32 %v3770_v12, %v8929_v37  ;;  %v3796_v56 = vpop.f32.mrf.mxu2  ;;  %v6461_v42 = vadd.f32 -1.0, %v7118_v28  ;;  %7119 = vpow2.f32 %v4159_v21 }
 0x29a   : > { %v4205_v51 = vsel %vm4105_vm10, %v3789_v13, %v6451_v29  ;;  %v3844_v41 = vpop.f32.mrf.mxu0  ;;  %v3901_v38 = vpop.f32.mrf.mxu3 }
 0x29b   : > { %v4221_v19 = vpack.c.bf16 %v4205_v51, %v4201_v54  ;;  %v3794_v33 = vadd.f32 %v3793_v50, %v3771_v53  ;;  %v4215_v47 = vsel %vm4115_vm11, %v9202_v16, %v6461_v42 }
 0x29c   : > { %v4227_v1 = vpack.c.bf16 %v4215_v47, %v4215_v47 }
 0x29d   : > { %v4133_v23 = vmin.f32 %v3794_v33, 0.0  ;;  %vm4113_vm13 = vcmp.gt.f32.partialorder %v3794_v33, 0.0 }
 0x29f   : > { %v4167_v45 = vmul.f32 1.442695, %v4133_v23  ;;  %v7120_v13 = vpop.eup %7119 }
 0x2a0   : > { %v3773_v37 = vpop.f32.mrf.mxu1  ;;  %v6455_v10 = vadd.f32 -1.0, %v7120_v13 }
 0x2a1   : > { %7121 = vpow2.f32 %v4167_v45  ;;  %v3798_v0 = vpop.f32.mrf.mxu2 }
 0x2a2   : > { %v3903_v4 = vpop.f32.mrf.mxu3  ;;  %v3924_v15 = vpop.f32.mrf.mxu0 }
 0x2a3   : > { %4043 = vmatmul.bf16.gmra.mxu1 %v7688_v20  ;;  %v4209_v20 = vsel %vm4109_vm12, %v3792_v34, %v6455_v10  ;;  %v3774_v34 = vadd.f32 %v3773_v37, %v8951_v3 }
 0x2a5   : > { %4499 = vmatmul.bf16.gmra.mxu0 %v4227_v1  ;;  %4071 = vmatmul.bf16.gmra.mxu2 %v7739_v49  ;;  %v3797_v62 = vadd.f32 %v3796_v56, %v3774_v34  ;;  %v3817_v56 = vadd.f32 %v8978_v36, %v7887_v6 }
 0x2a7   : > { %v7122_v22 = vpop.eup %7121  ;;  %6444 = vmatmul.msk.bf16.gmra.mxu3 %vm2893_vm0, %v9186_v40  ;;  %v3812_v40 = vadd.f32 %v8934_v2, %v7840_v59  ;;  %v3840_v32 = vadd.f32 %v9003_v48, %v3817_v56  ;;  %vm4117_vm15 = vcmp.gt.f32.partialorder %v3797_v62, 0.0  ;;  %v7054_v56 = vld [vmem:[%s9129_s3 + $0xd8] sm:$0xff] }
 0x2a8   : > { %v3775_v11 = vpop.f32.mrf.mxu1  ;;  %v6459_v16 = vadd.f32 -1.0, %v7122_v22 }
 0x2a9   : > { %v3878_v35 = vpop.f32.mrf.mxu2  ;;  %v3835_v8 = vadd.f32 %v8960_v14, %v3812_v40 }
 0x2aa   : > { %v4213_v24 = vsel %vm4113_vm13, %v3794_v33, %v6459_v16  ;;  %v3906_v39 = vpop.f32.mrf.mxu3  ;;  %v3926_v52 = vpop.f32.mrf.mxu0 }
 0x2ab   : > { %v4225_v50 = vpack.c.bf16 %v4213_v24, %v4209_v20 }
 0x2b0   : > { %v3855_v18 = vpop.f32.mrf.mxu1 }
 0x2b1   : > { %v3856_v49 = vadd.f32 %v3855_v18, %v8940_v26  ;;  %v3880_v63 = vpop.f32.mrf.mxu2  ;;  %v4136_v26 = vmin.f32 %v8684_v9, 0.0 }
 0x2b2   : > { %v3908_v27 = vpop.f32.mrf.mxu3  ;;  %v3929_v57 = vpop.f32.mrf.mxu0 }
 0x2b3   : > { %v3879_v44 = vadd.f32 %v3878_v35, %v3856_v49  ;;  %4512 = vmatmul.bf16.vlgmr.msra.gmra.mxu1 %v4220_v30  ;;  %v4173_v58 = vmul.f32 1.442695, %v4136_v26  ;;  %v4137_v30 = vmin.f32 %v3797_v62, 0.0 }
 0x2b5   : > { %v3902_v60 = vadd.f32 %v3901_v38, %v3879_v44  ;;  %4535 = vmatmul.bf16.vlgmr.msra.gmra.mxu2 %v4221_v19  ;;  %7123 = vpow2.f32 %v4173_v58  ;;  %v4175_v3 = vmul.f32 1.442695, %v4137_v30  ;;  %v7056_v30 = vld [vmem:[%s9129_s3 + $0xe8] sm:$0xff] }
 0x2b6   : > { %4552 = vmatpush.bf16.msra.mxu3 %v7056_v30 }
 0x2b7   : > { %v3925_v46 = vadd.f32 %v3924_v15, %v3902_v60  ;;  %7125 = vpow2.f32 %v4175_v3 }
 0x2b8   : > { %v3857_v7 = vpop.f32.mrf.mxu1 }
 0x2b9   : > { %v3858_v29 = vadd.f32 %v3857_v7, %v3835_v8  ;;  %v3883_v12 = vpop.f32.mrf.mxu2 }
 0x2ba   : > { %v3911_v53 = vpop.f32.mrf.mxu3  ;;  %v3931_v5 = vpop.f32.mrf.mxu0 }
 0x2bb   : > { %v3881_v21 = vadd.f32 %v3880_v63, %v3858_v29  ;;  %v7124_v38 = vpop.eup %7123 }
 0x2bc   : > { %v6462_v45 = vadd.f32 -1.0, %v7124_v38 }
 0x2bd   : > { %v3904_v28 = vadd.f32 %v3903_v4, %v3881_v21  ;;  %v7126_v47 = vpop.eup %7125 }
 0x2be   : > { %v4216_v6 = vsel %vm4116_vm14, %v8684_v9, %v6462_v45  ;;  %v6463_v31 = vadd.f32 -1.0, %v7126_v47  ;;  %v7053_v45 = vld [vmem:[%s9129_s3 + $0xd0] sm:$0xff]  ;;  %v7052_v47 = vld [vmem:[%s9129_s3 + $0xc8] sm:$0xff] }
 0x2bf   : > { %v3927_v59 = vadd.f32 %v3926_v52, %v3904_v28  ;;  %v4228_v15 = vpack.c.bf16 %v4216_v6, %v4216_v6 }
 0x2c0   : > { %v3860_v2 = vpop.f32.mrf.mxu1  ;;  %v4217_v10 = vsel %vm4117_vm15, %v3797_v62, %v6463_v31  ;;  %v7051_v31 = vld [vmem:[%s9129_s3 + $0xc0] sm:$0xff] }
 0x2c1   : > { %v3861_v14 = vadd.f32 %v3860_v2, %v8984_v61  ;;  %v3885_v54 = vpop.f32.mrf.mxu2  ;;  %v4229_v16 = vpack.c.bf16 %v4217_v10, %v4217_v10 }
 0x2c2   : > { %v3913_v19 = vpop.f32.mrf.mxu3  ;;  %v3934_v33 = vpop.f32.mrf.mxu0 }
 0x2c3   : > { %v3884_v51 = vadd.f32 %v3883_v12, %v3861_v14  ;;  %4517 = vmatmul.bf16.gmra.mxu1 %v4224_v55  ;;  %v7055_v19 = vld [vmem:[%s9129_s3 + $0xe0] sm:$0xff] }
 0x2c4   : > { %4553 = vmatpush.bf16.msra.mxu3 %v7055_v19 }
 0x2c5   : > { %v3907_v41 = vadd.f32 %v3906_v39, %v3884_v51  ;;  %4540 = vmatmul.bf16.gmra.mxu2 %v4225_v50 }
 0x2c7   : > { %v3930_v42 = vadd.f32 %v3929_v57, %v3907_v41 }
 0x2c8   : > { %v3862_v23 = vpop.f32.mrf.mxu1  ;;  %4554 = vmatpush.bf16.msra.mxu3 %v7054_v56 }
 0x2c9   : > { %v3863_v61 = vadd.f32 %v3862_v23, %v3840_v32  ;;  %v3888_v37 = vpop.f32.mrf.mxu2 }
 0x2ca   : > { %v3936_v13 = vpop.f32.mrf.mxu0  ;;  %v3993_v4 = vpop.f32.mrf.mxu3 }
 0x2cb   : > { %v3886_v0 = vadd.f32 %v3885_v54, %v3863_v61 }
 0x2cc   : > { %4555 = vmatpush.bf16.msra.mxu3 %v7053_v45 }
 0x2cd   : > { %v3909_v25 = vadd.f32 %v3908_v27, %v3886_v0 }
 0x2cf   : > { %v3932_v55 = vadd.f32 %v3931_v5, %v3909_v25 }
 0x2d0   : > { %v3865_v36 = vpop.f32.mrf.mxu1  ;;  %4556 = vmatpush.bf16.msra.mxu3 %v7052_v47 }
 0x2d1   : > { %v3866_v48 = vadd.f32 %v3865_v36, %v9021_v43  ;;  %v3890_v1 = vpop.f32.mrf.mxu2 }
 0x2d2   : > { %v3995_v17 = vpop.f32.mrf.mxu3  ;;  %v4016_v11 = vpop.f32.mrf.mxu0 }
 0x2d3   : > { %v3889_v22 = vadd.f32 %v3888_v37, %v3866_v48  ;;  %4522 = vmatmul.bf16.gmra.mxu1 %v4228_v15 }
 0x2d4   : > { %4557 = vmatpush.bf16.msra.mxu3 %v7051_v31 }
 0x2d5   : > { %v3912_v35 = vadd.f32 %v3911_v53, %v3889_v22  ;;  %4545 = vmatmul.bf16.gmra.mxu2 %v4229_v16 }
 0x2d7   : > { %v3935_v20 = vadd.f32 %v3934_v33, %v3912_v35 }
 0x2d8   : > { %v3867_v24 = vpop.f32.mrf.mxu1 }
 0x2d9   : > { %v3970_v39 = vpop.f32.mrf.mxu2 }
 0x2da   : > { %v3998_v9 = vpop.f32.mrf.mxu3  ;;  %v9063_v52 = vpop.f32.mrf.mxu0 }
 0x2e0   : > { %v3947_v50 = vpop.f32.mrf.mxu1 }
 0x2e1   : > { %v3948_v18 = vadd.f32 %v3947_v50, %v3925_v46  ;;  %v3972_v43 = vpop.f32.mrf.mxu2 }
 0x2e2   : > { %v4000_v63 = vpop.f32.mrf.mxu3  ;;  %v4021_v44 = vpop.f32.mrf.mxu0 }
 0x2e3   : > { %v3971_v49 = vadd.f32 %v3970_v39, %v3948_v18 }
 0x2e5   : > { %v3994_v27 = vadd.f32 %v3993_v4, %v3971_v49 }
 0x2e7   : > { %v4017_v57 = vadd.f32 %v4016_v11, %v3994_v27 }
 0x2e8   : > { %v3949_v40 = vpop.f32.mrf.mxu1 }
 0x2e9   : > { %v3950_v34 = vadd.f32 %v3949_v40, %v3927_v59  ;;  %v3975_v60 = vpop.f32.mrf.mxu2 }
 0x2ea   : > { %v4003_v7 = vpop.f32.mrf.mxu3  ;;  %v9065_v26 = vpop.f32.mrf.mxu0 }
 0x2eb   : > { %v3973_v8 = vadd.f32 %v3972_v43, %v3950_v34 }
 0x2ed   : > { %v3996_v62 = vadd.f32 %v3995_v17, %v3973_v8 }
 0x2ef   : > { %v4019_v11 = vadd.f32 %v9063_v52, %v3996_v62 }
 0x2f0   : > { %v3952_v29 = vpop.f32.mrf.mxu1 }
 0x2f1   : > { %v3953_v12 = vadd.f32 %v3952_v29, %v3930_v42  ;;  %v3977_v21 = vpop.f32.mrf.mxu2 }
 0x2f2   : > { %v4005_v5 = vpop.f32.mrf.mxu3  ;;  %v4026_v46 = vpop.f32.mrf.mxu0 }
 0x2f3   : > { %v3976_v53 = vadd.f32 %v3975_v60, %v3953_v12 }
 0x2f5   : > { %v3999_v58 = vadd.f32 %v3998_v9, %v3976_v53 }
 0x2f7   : > { %v4022_v28 = vadd.f32 %v4021_v44, %v3999_v58 }
 0x2f8   : > { %v3954_v2 = vpop.f32.mrf.mxu1 }
 0x2f9   : > { %v3955_v59 = vadd.f32 %v3954_v2, %v3932_v55  ;;  %v3980_v3 = vpop.f32.mrf.mxu2 }
 0x2fa   : > { %v4028_v54 = vpop.f32.mrf.mxu0  ;;  %v4049_v51 = vpop.f32.mrf.mxu3 }
 0x2fb   : > { %v3978_v14 = vadd.f32 %v3977_v21, %v3955_v59 }
 0x2fd   : > { %v4001_v33 = vadd.f32 %v4000_v63, %v3978_v14 }
 0x300   : > { %v3957_v41 = vpop.f32.mrf.mxu1 }
 0x301   : > { %v3958_v38 = vadd.f32 %v3957_v41, %v3935_v20  ;;  %v3982_v32 = vpop.f32.mrf.mxu2 }
 0x302   : > { %v4051_v23 = vpop.f32.mrf.mxu3  ;;  %v9076_v61 = vpop.f32.mrf.mxu0 }
 0x303   : > { %v3981_v42 = vadd.f32 %v3980_v3, %v3958_v38 }
 0x305   : > { %v4004_v37 = vadd.f32 %v4003_v7, %v3981_v42  ;;  %v4024_v7 = vadd.f32 %v9065_v26, %v4001_v33 }
 0x307   : > { %v4027_v0 = vadd.f32 %v4026_v46, %v4004_v37 }
 0x308   : > { %v3959_v13 = vpop.f32.mrf.mxu1 }
 0x309   : > { %v4062_v4 = vpop.f32.mrf.mxu2  ;;  %v4050_v5 = vadd.f32 %v4049_v51, %v4027_v0 }
 0x30a   : > { %v4085_v25 = vpop.f32.mrf.mxu3  ;;  %v9084_v6 = vpop.f32.mrf.mxu0 }
 0x310   : > { %v4039_v55 = vpop.f32.mrf.mxu1 }
 0x311   : > { %v4040_v36 = vadd.f32 %v4039_v55, %v4017_v57  ;;  %v4064_v48 = vpop.f32.mrf.mxu2 }
 0x312   : > { %v4087_v1 = vpop.f32.mrf.mxu3  ;;  %v9089_v10 = vpop.f32.mrf.mxu0 }
 0x313   : > { %v4063_v15 = vadd.f32 %v4062_v4, %v4040_v36 }
 0x315   : > { %v4086_v22 = vadd.f32 %v4085_v25, %v4063_v15 }
 0x317   : > { %v4122_v17 = vmin.f32 %v4086_v22, 0.0  ;;  %vm4102_vm0 = vcmp.gt.f32.partialorder %v4086_v22, 0.0 }
 0x318   : > { %v4041_v16 = vpop.f32.mrf.mxu1 }
 0x319   : > { %v4042_v35 = vadd.f32 %v4041_v16, %v4019_v11  ;;  %v4067_v20 = vpop.f32.mrf.mxu2  ;;  %v4145_v24 = vmul.f32 1.442695, %v4122_v17 }
 0x31a   : > { %v4090_v9 = vpop.f32.mrf.mxu3  ;;  %v9092_v50 = vpop.f32.mrf.mxu0 }
 0x31b   : > { %v4065_v39 = vadd.f32 %v4064_v48, %v4042_v35  ;;  %7127 = vpow2.f32 %v4145_v24 }
 0x31d   : > { %v4088_v18 = vadd.f32 %v4087_v1, %v4065_v39 }
 0x31f   : > { %v4126_v43 = vmin.f32 %v4088_v18, 0.0  ;;  %vm4106_vm1 = vcmp.gt.f32.partialorder %v4088_v18, 0.0 }
 0x320   : > { %v4044_v49 = vpop.f32.mrf.mxu1 }
 0x321   : > { %v4153_v63 = vmul.f32 1.442695, %v4126_v43  ;;  %v4045_v44 = vadd.f32 %v4044_v49, %v4022_v28  ;;  %v4069_v27 = vpop.f32.mrf.mxu2  ;;  %v7128_v52 = vpop.eup %7127 }
 0x322   : > { %v4092_v40 = vpop.f32.mrf.mxu3  ;;  %v9094_v34 = vpop.f32.mrf.mxu0  ;;  %v6448_v62 = vadd.f32 -1.0, %v7128_v52 }
 0x323   : > { %7129 = vpow2.f32 %v4153_v63  ;;  %v4068_v57 = vadd.f32 %v4067_v20, %v4045_v44 }
 0x324   : > { %v4202_v59 = vsel %vm4102_vm0, %v4086_v22, %v6448_v62 }
 0x325   : > { %v4091_v60 = vadd.f32 %v4090_v9, %v4068_v57 }
 0x327   : > { %v4130_v8 = vmin.f32 %v4091_v60, 0.0  ;;  %vm4110_vm3 = vcmp.gt.f32.partialorder %v4091_v60, 0.0 }
 0x328   : > { %v4046_v29 = vpop.f32.mrf.mxu1 }
 0x329   : > { %v7130_v12 = vpop.eup %7129  ;;  %v4047_v21 = vadd.f32 %v4046_v29, %v4024_v7  ;;  %v4072_v46 = vpop.f32.mrf.mxu2  ;;  %v4161_v58 = vmul.f32 1.442695, %v4130_v8 }
 0x32a   : > { %v6452_v53 = vadd.f32 -1.0, %v7130_v12  ;;  %v4095_v28 = vpop.f32.mrf.mxu3  ;;  %v4502_v2 = vpop.f32.mrf.mxu0  ;;  %v4073_v19 = vadd.f32 %v4072_v46, %v4050_v5 }
 0x32b   : > { %v4070_v30 = vadd.f32 %v4069_v27, %v4047_v21  ;;  %7131 = vpow2.f32 %v4161_v58  ;;  %v7057_v58 = vld [vmem:[%s9130_s4] sm:$0xff] }
 0x32c   : > { %v4206_v3 = vsel %vm4106_vm1, %v4088_v18, %v6452_v53  ;;  %v4096_v51 = vadd.f32 %v4095_v28, %v4073_v19  ;;  %v4577_v28 = vld [vmem:[%s9130_s4 + $0x10] sm:$0xf]  ;;  %v4594_v19 = vpop.permute.xlu0 %4593 }
 0x32d   : > { %v4222_v14 = vpack.c.bf16 %v4206_v3, %v4202_v59  ;;  %v4093_v54 = vadd.f32 %v4092_v40, %v4070_v30  ;;  %v7058_v30 = vld [vmem:[%s9130_s4 + $0x8] sm:$0xff]  ;;  %v4620_v2 = vunpack.c.l.b16 %v4577_v28  ;;  %v4589_v3 = vpop.permute.xlu2 %4588 }
 0x32e   : > { %v4138_v23 = vmin.f32 %v4096_v51, 0.0  ;;  %vm4118_vm5 = vcmp.gt.f32.partialorder %v4096_v51, 0.0 }
 0x32f   : > { %v4134_v26 = vmin.f32 %v4093_v54, 0.0  ;;  %6585 = vmatmul.msk.bf16.vlgmr.msra.gmra.mxu3 %vm4471_vm2, %v4222_v14  ;;  %vm4114_vm4 = vcmp.gt.f32.partialorder %v4093_v54, 0.0  ;;  %v4623_v59 = vpack.c.b16 %v4620_v2, %v4620_v2 }
 0x330   : > { %v4513_v33 = vpop.f32.mrf.mxu1  ;;  %v4177_v0 = vmul.f32 1.442695, %v4138_v23 }
 0x331   : > { %v4169_v56 = vmul.f32 1.442695, %v4134_v26  ;;  %v4514_v41 = vadd.f32 %v4513_v33, %v9076_v61  ;;  %v4074_v38 = vpop.f32.mrf.mxu2  ;;  %v7132_v42 = vpop.eup %7131 }
 0x332   : > { %v4097_v32 = vpop.f32.mrf.mxu3  ;;  %v6456_v45 = vadd.f32 -1.0, %v7132_v42 }
 0x333   : > { %7133 = vpow2.f32 %v4169_v56  ;;  %v4599_v56 = vpop.permute.xlu1 %4598 }
 0x334   : > { %v4210_v55 = vsel %vm4110_vm3, %v4091_v60, %v6456_v45  ;;  %7135 = vpow2.f32 %v4177_v0  ;;  %v4609_v23 = vpop.permute.xlu0 %4608 }
 0x335   : > { %v4604_v38 = vpop.permute.xlu2 %4603 }
 0x338   : > { %v4515_v37 = vpop.f32.mrf.mxu1 }
 0x339   : > { %v7134_v47 = vpop.eup %7133  ;;  %v4516_v13 = vadd.f32 %v4515_v37, %v9084_v6  ;;  %v4536_v25 = vpop.f32.mrf.mxu2 }
 0x33a   : > { %v6460_v4 = vadd.f32 -1.0, %v7134_v47  ;;  %v4537_v31 = vadd.f32 %v4536_v25, %v4514_v41  ;;  %v7136_v22 = vpop.eup %7135 }
 0x33b   : > { %v6464_v11 = vadd.f32 -1.0, %v7136_v22 }
 0x33c   : > { %v4214_v36 = vsel %vm4114_vm4, %v4093_v54, %v6460_v4 }
 0x33d   : > { %v4226_v61 = vpack.c.bf16 %v4214_v36, %v4210_v55  ;;  %v4218_v35 = vsel %vm4118_vm5, %v4096_v51, %v6464_v11 }
 0x33e   : > { %v4230_v39 = vpack.c.bf16 %v4218_v35, %v4218_v35 }
 0x33f   : > { %6586 = vmatmul.msk.bf16.gmra.mxu3 %vm4471_vm2, %v4226_v61 }
 0x340   : > { %v4518_v48 = vpop.f32.mrf.mxu1 }
 0x341   : > { %v4519_v15 = vadd.f32 %v4518_v48, %v9089_v10  ;;  %v4538_v1 = vpop.f32.mrf.mxu2 }
 0x342   : > { %v4539_v17 = vadd.f32 %v4538_v1, %v4516_v13 }
 0x348   : > { %v4520_v16 = vpop.f32.mrf.mxu1 }
 0x349   : > { %v4521_v6 = vadd.f32 %v4520_v16, %v9092_v50  ;;  %v4541_v20 = vpop.f32.mrf.mxu2 }
 0x34a   : > { %v4542_v24 = vadd.f32 %v4541_v20, %v4519_v15 }
 0x34f   : > { %6587 = vmatmul.msk.bf16.gmra.mxu3 %vm4471_vm2, %v4230_v39 }
 0x350   : > { %v4523_v9 = vpop.f32.mrf.mxu1 }
 0x351   : > { %v4524_v18 = vadd.f32 %v4523_v9, %v9094_v34  ;;  %v4543_v43 = vpop.f32.mrf.mxu2 }
 0x352   : > { %v4544_v49 = vadd.f32 %v4543_v43, %v4521_v6 }
 0x358   : > { %v4525_v10 = vpop.f32.mrf.mxu1 }
 0x359   : > { %v4546_v63 = vpop.f32.mrf.mxu2 }
 0x35a   : > { %v4547_v44 = vadd.f32 %v4546_v63, %v4524_v18 }
 0x361   : > { %v4548_v27 = vpop.f32.mrf.mxu2 }
 0x3b2   : > { %v4559_v57 = vpop.f32.mrf.mxu3 }
 0x3b3   : > { %v4560_v52 = vadd.f32 %v4559_v57, %v4537_v31 }
 0x3ba   : > { %v4561_v40 = vpop.f32.mrf.mxu3 }
 0x3bb   : > { %v4562_v60 = vadd.f32 %v4561_v40, %v4539_v17 }
 0x3bd   : > { %v4578_v50 = vpack.c.bf16 %v4562_v60, %v4560_v52 }
 0x3c2   : > { %v4564_v8 = vpop.f32.mrf.mxu3 }
 0x3c3   : > { %v4565_v62 = vadd.f32 %v4564_v8, %v4542_v24 }
 0x3ca   : > { %v4566_v7 = vpop.f32.mrf.mxu3 }
 0x3cb   : > { %v4567_v29 = vadd.f32 %v4566_v7, %v4544_v49 }
 0x3cd   : > { %v4579_v12 = vpack.c.bf16 %v4567_v29, %v4565_v62 }
 0x3d2   : > { %v4569_v21 = vpop.f32.mrf.mxu3 }
 0x3d3   : > { %v4570_v53 = vadd.f32 %v4569_v21, %v4547_v44 }
 0x3d5   : > { %v4580_v34 = vpack.c.bf16 %v4570_v53, %v4570_v53 }
 0x3d7   : > { %v4636_v5 = vsel %vm4634_vm6, %v4580_v34, 0 }
 0x3d8   : > { %4643 = vmatpush.bf16.msra.mxu0 %v4636_v5 }
 0x3da   : > { %v4571_v46 = vpop.f32.mrf.mxu3 }
 0x3dc   : > { %4644 = vmatpush.bf16.msra.mxu0 %v4579_v12 }
 0x3e0   : > { %4645 = vmatpush.bf16.msra.mxu0 %v4578_v50 }
 0x3e3   : > { %6596 = vmatmul.msk.bf16.vlgmr.msra.gmra.mxu0 %vm4624_vm7, %v7057_v58 }
 0x3f3   : > { %6597 = vmatmul.msk.bf16.gmra.mxu0 %vm4624_vm7, %v7058_v30 }
 0x403   : > { %6598 = vmatmul.msk.bf16.gmra.mxu0 %vm4624_vm7, %v4623_v59 }
 0x460   : > { %v4647_v14 = vpop.f32.mrf.mxu0 }
 0x461   : > { %v4648_v54 = vadd.f32 %v4647_v14, %v4589_v3 }
 0x463   : > { %4662 = vst.msk [vmem:[%s251_s18] sm:$0xff] %vm4661_vm8, %v4648_v54 }
 0x468   : > { %v4649_v26 = vpop.f32.mrf.mxu0 }
 0x469   : > { %v4650_v33 = vadd.f32 %v4649_v26, %v4594_v19 }
 0x46b   : > { %4663 = vst.msk [vmem:[%s251_s18 + $0x8] sm:$0xff] %vm4661_vm8, %v4650_v33 }
 0x470   : > { %v4652_v51 = vpop.f32.mrf.mxu0 }
 0x471   : > { %v4653_v41 = vadd.f32 %v4652_v51, %v4599_v56 }
 0x473   : > { %4664 = vst.msk [vmem:[%s251_s18 + $0x10] sm:$0xff] %vm4661_vm8, %v4653_v41 }
 0x478   : > { %v4654_v32 = vpop.f32.mrf.mxu0 }
 0x479   : > { %v4655_v42 = vadd.f32 %v4654_v32, %v4604_v38 }
 0x47b   : > { %4665 = vst.msk [vmem:[%s251_s18 + $0x18] sm:$0xff] %vm4661_vm8, %v4655_v42 }
 0x480   : > { %v4657_v45 = vpop.f32.mrf.mxu0 }
 0x481   : > { %v4658_v37 = vadd.f32 %v4657_v45, %v4609_v23 }
 0x483   : > { %4666 = vst.msk [vmem:[%s251_s18 + $0x20] sm:$0xff] %vm4661_vm8, %v4658_v37 }
 0x488   : > { %v4659_v47 = vpop.f32.mrf.mxu0 }
 0x489 PF: > { %s16_s21 = sadd.s32 1, %s7143_s21  }
 0x48a   : > { %p13_p4 = scmp.ge.s32.totalorder %s16_s21, 4  }
 0x48c   :  { %15 = sbr.rel (!%p13_p4) target bundleno = 1 (0x1), region = 74 }

// kernel: _forward_impl.1
= control target key start
LH: loop header
LB: loop body
LE: loop exit
PB: predicated region body
PF: predicated region fallthrough
CT: control target
= control target key end

     0   :  { %s7181_s21 = smov 0   ;;  %s9126_s0 = inlined_call_operand.vmem [shape: bf16[2,1600,480], index: 0, kind: input, shape index: {}]   ;;  %s9127_s1 = inlined_call_operand.vmem [shape: bf16[40,1600], index: 1, kind: input, shape index: {}]   ;;  %s9128_s2 = inlined_call_operand.vmem [shape: f32[40,1], index: 2, kind: input, shape index: {}]   ;;  %s9129_s3 = inlined_call_operand.vmem [shape: bf16[480,16], index: 3, kind: input, shape index: {}]   ;;  %s9130_s4 = inlined_call_operand.vmem [shape: bf16[40,40], index: 4, kind: input, shape index: {}]   ;;  %s9131_s5 = inlined_call_operand.vmem [shape: f32[40,1], index: 5, kind: input, shape index: {}]   ;;  %s9132_s6 = inlined_call_operand.vmem [shape: f32[2,40,16], index: 6, kind: output, shape index: {}]  }
   0x1 LB: > { %s4722_s22 = sadd.s32 4294967295, %s7143_s21   ;;  %p4726_p0 = scmp.ge.s32.totalorder %s7143_s21, 1  ;;  %s7143_s21 = sphi %s7181_s21, %s16_s21  }
   0x2   : > { %p212_p1 = scmp.lt.s32.totalorder %s7143_s21, 3 }
   0x4   : > { %p213_p2 = pnand %p4726_p0, %p212_p1 }
   0x6   : > { %216 = sbr.rel (%p213_p2) target bundleno = 1161 (0x489), region = 44 }
   0xb   : > { %p242_p3 = scmp.lt.s32.totalorder %s4722_s22, 1  ;;  %vm2893_vm0 = vcmask 523264  }
   0xd   : > { %s9207_s22 = smov (!%p242_p3, %s4722_s22), 1 }
   0xe   : > { %s7083_s23 = smul.u32 3200, %s9207_s22 }
   0xf   : > { %s7084_s15 = smul.u32 40, %s9207_s22 }
  0x10   : > { %s7195_s26 = scalar_lea.vmem %s9126_s0, %s7083_s23 }
  0x11   : > { %v4947_v0 = vld [vmem:[%s7195_s26 + $0xe0] sm:$0xf]  ;;  %v6657_v1 = vld [vmem:[%s7195_s26 + $0xec] sm:$0xf0]  ;;  %s251_s18 = scalar_lea.vmem %s9132_s6, %s7084_s15 }
  0x12   : > { %v5203_v2 = vld [vmem:[%s7195_s26 + $0x2e0] sm:$0xf]  ;;  %v4948_v3 = vor.u32 %v6657_v1, %v4947_v0  ;;  %v6721_v4 = vld [vmem:[%s7195_s26 + $0x2ec] sm:$0xf0] }
  0x13   : > { %v5331_v5 = vld [vmem:[%s7195_s26 + $0x3e0] sm:$0xf]  ;;  %v6753_v6 = vld [vmem:[%s7195_s26 + $0x3ec] sm:$0xf0]  ;;  %v5204_v7 = vor.u32 %v6721_v4, %v5203_v2 }
  0x14   : > { %v5332_v8 = vor.u32 %v6753_v6, %v5331_v5  ;;  %v4931_v9 = vld [vmem:[%s7195_s26 + $0xc0] sm:$0xf]  ;;  %v6653_v10 = vld [vmem:[%s7195_s26 + $0xcc] sm:$0xf0]  ;;  %2903 = vmatpush.bf16.msra.mxu0 %v4948_v3  ;;  %7059 = vmatpush.bf16.msra.mxu1 %v4948_v3 }
  0x15   : > { %v5187_v11 = vld [vmem:[%s7195_s26 + $0x2c0] sm:$0xf]  ;;  %v4932_v12 = vor.u32 %v6653_v10, %v4931_v9  ;;  %v6717_v13 = vld [vmem:[%s7195_s26 + $0x2cc] sm:$0xf0]  ;;  %2949 = vmatpush.bf16.msra.mxu2 %v5204_v7  ;;  %v6607_v9 = vld [vmem:[%s9127_s1 + $0x30] sm:$0xf0] }
  0x16   : > { %v5315_v14 = vld [vmem:[%s7195_s26 + $0x3c0] sm:$0xf]  ;;  %v6749_v15 = vld [vmem:[%s7195_s26 + $0x3cc] sm:$0xf0]  ;;  %2972 = vmatpush.bf16.msra.mxu3 %v5332_v8  ;;  %v5188_v16 = vor.u32 %v6717_v13, %v5187_v11 }
  0x17   : > { %v5316_v17 = vor.u32 %v6749_v15, %v5315_v14  ;;  %v4915_v18 = vld [vmem:[%s7195_s26 + $0xa0] sm:$0xf]  ;;  %v6649_v19 = vld [vmem:[%s7195_s26 + $0xac] sm:$0xf0]  ;;  %v4739_v14 = vld [vmem:[%s9127_s1 + $0x8] sm:$0xf] }
  0x18   : > { %v5171_v20 = vld [vmem:[%s7195_s26 + $0x2a0] sm:$0xf]  ;;  %v6713_v21 = vld [vmem:[%s7195_s26 + $0x2ac] sm:$0xf0]  ;;  %2904 = vmatpush.bf16.msra.mxu0 %v4932_v12  ;;  %7060 = vmatpush.bf16.msra.mxu1 %v4932_v12  ;;  %v4916_v24 = vor.u32 %v6649_v19, %v4915_v18  ;;  %v6608_v15 = vld [vmem:[%s9127_s1 + $0x38] sm:$0xf0] }
  0x19   : > { %v5299_v22 = vld [vmem:[%s7195_s26 + $0x3a0] sm:$0xf]  ;;  %v6745_v23 = vld [vmem:[%s7195_s26 + $0x3ac] sm:$0xf0]  ;;  %2950 = vmatpush.bf16.msra.mxu2 %v5188_v16  ;;  %v5172_v25 = vor.u32 %v6713_v21, %v5171_v20 }
  0x1a   : > { %2973 = vmatpush.bf16.msra.mxu3 %v5316_v17  ;;  %v5300_v26 = vor.u32 %v6745_v23, %v5299_v22  ;;  %v4899_v27 = vld [vmem:[%s7195_s26 + $0x80] sm:$0xf]  ;;  %v6645_v28 = vld [vmem:[%s7195_s26 + $0x8c] sm:$0xf0] }
  0x1b   : > { %v5155_v29 = vld [vmem:[%s7195_s26 + $0x280] sm:$0xf]  ;;  %v6709_v30 = vld [vmem:[%s7195_s26 + $0x28c] sm:$0xf0]  ;;  %v4900_v33 = vor.u32 %v6645_v28, %v4899_v27 }
  0x1c   : > { %v5283_v31 = vld [vmem:[%s7195_s26 + $0x380] sm:$0xf]  ;;  %v6741_v32 = vld [vmem:[%s7195_s26 + $0x38c] sm:$0xf0]  ;;  %2905 = vmatpush.bf16.msra.mxu0 %v4916_v24  ;;  %7061 = vmatpush.bf16.msra.mxu1 %v4916_v24  ;;  %v5156_v34 = vor.u32 %v6709_v30, %v5155_v29  ;;  %v6602_v24 = vld [vmem:[%s9127_s1 + $0xc] sm:$0xf] }
  0x1d   : > { %2951 = vmatpush.bf16.msra.mxu2 %v5172_v25  ;;  %v5284_v35 = vor.u32 %v6741_v32, %v5283_v31  ;;  %v4883_v36 = vld [vmem:[%s7195_s26 + $0x60] sm:$0xf]  ;;  %v6641_v37 = vld [vmem:[%s7195_s26 + $0x6c] sm:$0xf0]  ;;  %v7285_v32 = vor.u32 %v6608_v15, %v4739_v14 }
  0x1e   : > { %2974 = vmatpush.bf16.msra.mxu3 %v5300_v26  ;;  %v5139_v38 = vld [vmem:[%s7195_s26 + $0x260] sm:$0xf]  ;;  %v6705_v39 = vld [vmem:[%s7195_s26 + $0x26c] sm:$0xf0]  ;;  %v4884_v42 = vor.u32 %v6641_v37, %v4883_v36 }
  0x1f   : > { %v5267_v40 = vld [vmem:[%s7195_s26 + $0x360] sm:$0xf]  ;;  %v6737_v41 = vld [vmem:[%s7195_s26 + $0x36c] sm:$0xf0]  ;;  %v5140_v43 = vor.u32 %v6705_v39, %v5139_v38  ;;  %9162 = vst [vmem:[#allocation2_spill] sm:$0xff] %v7285_v32 }
  0x20   : > { %2906 = vmatpush.bf16.msra.mxu0 %v4900_v33  ;;  %7062 = vmatpush.bf16.msra.mxu1 %v4900_v33  ;;  %v5268_v44 = vor.u32 %v6737_v41, %v5267_v40  ;;  %v4867_v45 = vld [vmem:[%s7195_s26 + $0x40] sm:$0xf]  ;;  %v6637_v46 = vld [vmem:[%s7195_s26 + $0x4c] sm:$0xf0] }
  0x21   : > { %2952 = vmatpush.bf16.msra.mxu2 %v5156_v34  ;;  %v5123_v47 = vld [vmem:[%s7195_s26 + $0x240] sm:$0xf]  ;;  %v6701_v48 = vld [vmem:[%s7195_s26 + $0x24c] sm:$0xf0]  ;;  %v4868_v51 = vor.u32 %v6637_v46, %v4867_v45 }
  0x22   : > { %2975 = vmatpush.bf16.msra.mxu3 %v5284_v35  ;;  %v5251_v49 = vld [vmem:[%s7195_s26 + $0x340] sm:$0xf]  ;;  %v6733_v50 = vld [vmem:[%s7195_s26 + $0x34c] sm:$0xf0]  ;;  %v5124_v52 = vor.u32 %v6701_v48, %v5123_v47 }
  0x23   : > { %v5252_v53 = vor.u32 %v6733_v50, %v5251_v49  ;;  %v4851_v54 = vld [vmem:[%s7195_s26 + $0x20] sm:$0xf]  ;;  %v6633_v55 = vld [vmem:[%s7195_s26 + $0x2c] sm:$0xf0] }
  0x24   : > { %2907 = vmatpush.bf16.msra.mxu0 %v4884_v42  ;;  %7063 = vmatpush.bf16.msra.mxu1 %v4884_v42  ;;  %v5107_v56 = vld [vmem:[%s7195_s26 + $0x220] sm:$0xf]  ;;  %v6697_v57 = vld [vmem:[%s7195_s26 + $0x22c] sm:$0xf0]  ;;  %v4852_v61 = vor.u32 %v6633_v55, %v4851_v54 }
  0x25   : > { %2953 = vmatpush.bf16.msra.mxu2 %v5140_v43  ;;  %v5235_v58 = vld [vmem:[%s7195_s26 + $0x320] sm:$0xf]  ;;  %v6729_v59 = vld [vmem:[%s7195_s26 + $0x32c] sm:$0xf0]  ;;  %v5108_v1 = vor.u32 %v6697_v57, %v5107_v56 }
  0x26   : > { %2976 = vmatpush.bf16.msra.mxu3 %v5268_v44  ;;  %v4835_v60 = vld [vmem:[%s7195_s26] sm:$0xf]  ;;  %v6629_v62 = vld [vmem:[%s7195_s26 + $0xc] sm:$0xf0]  ;;  %v5236_v2 = vor.u32 %v6729_v59, %v5235_v58  ;;  %v7145_v58 = vmov 0  }
  0x27   : > { %v5091_v63 = vld [vmem:[%s7195_s26 + $0x200] sm:$0xf]  ;;  %v7245_v0 = vld [vmem:[%s9127_s1 + $0xd0] sm:$0xff]  ;;  %v4836_v13 = vor.u32 %v6629_v62, %v4835_v60  ;;  %7094 = vset.pattern.permute.xlu0 %v7145_v58  ;;  %7096 = vset.pattern.permute.xlu2 %v7145_v58 }
  0x28   : > { %2908 = vmatpush.bf16.msra.mxu0 %v4868_v51  ;;  %7064 = vmatpush.bf16.msra.mxu1 %v4868_v51  ;;  %v6693_v3 = vld [vmem:[%s7195_s26 + $0x20c] sm:$0xf0]  ;;  %v5075_v4 = vld [vmem:[%s7195_s26 + $0x1e0] sm:$0xf]  ;;  %v805_v12 = vunpack.c.l.b16 %v7245_v0 }
  0x29   : > { %2954 = vmatpush.bf16.msra.mxu2 %v5124_v52  ;;  %v6689_v5 = vld [vmem:[%s7195_s26 + $0x1ec] sm:$0xf0]  ;;  %v5219_v6 = vld [vmem:[%s7195_s26 + $0x300] sm:$0xf]  ;;  %v5092_v17 = vor.u32 %v6693_v3, %v5091_v63  ;;  %7095 = vset.pattern.permute.xlu1 %v7145_v58 }
  0x2a   : > { %2977 = vmatpush.bf16.msra.mxu3 %v5252_v53  ;;  %v6725_v7 = vld [vmem:[%s7195_s26 + $0x30c] sm:$0xf0]  ;;  %v4731_v8 = vld [vmem:[%s9127_s1] sm:$0xf]  ;;  %v5076_v18 = vor.u32 %v6689_v5, %v5075_v4  ;;  %v7280_v28 = vpack.c.b16 %v805_v12, %v805_v12  ;;  %v4783_v4 = vld [vmem:[%s9127_s1 + $0x68] sm:$0xf] }
  0x2b   : > { %v5459_v10 = vld [vmem:[%s7195_s26 + $0x4e0] sm:$0xf]  ;;  %v6785_v11 = vld [vmem:[%s7195_s26 + $0x4ec] sm:$0xf0]  ;;  %v5220_v22 = vor.u32 %v6725_v7, %v5219_v6  ;;  %v7278_v27 = vor.u32 %v6607_v9, %v4731_v8  ;;  %v6620_v5 = vld [vmem:[%s9127_s1 + $0x98] sm:$0xf0] }
  0x2c   : > { %2909 = vmatpush.bf16.msra.mxu0 %v4852_v61  ;;  %7065 = vmatpush.bf16.msra.mxu1 %v4852_v61  ;;  %v5059_v16 = vld [vmem:[%s7195_s26 + $0x1c0] sm:$0xf]  ;;  %v6685_v19 = vld [vmem:[%s7195_s26 + $0x1cc] sm:$0xf0]  ;;  %v5460_v23 = vor.u32 %v6785_v11, %v5459_v10  ;;  %v6621_v12 = vld [vmem:[%s9127_s1 + $0xa0] sm:$0xf0] }
  0x2d   : > { %2955 = vmatpush.bf16.msra.mxu2 %v5108_v1  ;;  %v5843_v20 = vld [vmem:[%s7195_s26 + $0x7e0] sm:$0xf]  ;;  %v6881_v21 = vld [vmem:[%s7195_s26 + $0x7ec] sm:$0xf0]  ;;  %v5060_v34 = vor.u32 %v6685_v19, %v5059_v16 }
  0x2e   : > { %2978 = vmatpush.bf16.msra.mxu3 %v5236_v2  ;;  %v4741_v25 = vld [vmem:[%s9127_s1 + $0x3c] sm:$0xf0]  ;;  %v6781_v29 = vld [vmem:[%s7195_s26 + $0x4cc] sm:$0xf0]  ;;  %v5844_v33 = vor.u32 %v6881_v21, %v5843_v20  ;;  %v6615_v20 = vld [vmem:[%s9127_s1 + $0x74] sm:$0xf] }
  0x2f   : > { %v5443_v26 = vld [vmem:[%s7195_s26 + $0x4c0] sm:$0xf]  ;;  %v6849_v31 = vld [vmem:[%s7195_s26 + $0x6ec] sm:$0xf0]  ;;  %v7287_v35 = vor.u32 %v6602_v24, %v4741_v25  ;;  %v4793_v21 = vld [vmem:[%s9127_s1 + $0xa4] sm:$0xf0]  ;;  %v7343_v24 = vor.u32 %v6620_v5, %v4783_v4 }
  0x30   : > { %v5715_v30 = vld [vmem:[%s7195_s26 + $0x6e0] sm:$0xf]  ;;  %2910 = vmatpush.bf16.msra.mxu0 %v4836_v13  ;;  %7066 = vmatpush.bf16.msra.mxu1 %v4836_v13  ;;  %v6877_v37 = vld [vmem:[%s7195_s26 + $0x7cc] sm:$0xf0]  ;;  %v5444_v38 = vor.u32 %v6781_v29, %v5443_v26 }
  0x31   : > { %2956 = vmatpush.bf16.msra.mxu2 %v5092_v17  ;;  %9163 = vst [vmem:[#allocation3_spill] sm:$0xff] %v7287_v35  ;;  %v5827_v36 = vld [vmem:[%s7195_s26 + $0x7c0] sm:$0xf]  ;;  %v6681_v40 = vld [vmem:[%s7195_s26 + $0x1ac] sm:$0xf0]  ;;  %v5716_v42 = vor.u32 %v6849_v31, %v5715_v30 }
  0x32   : > { %2979 = vmatpush.bf16.msra.mxu3 %v5220_v22  ;;  %v5043_v39 = vld [vmem:[%s7195_s26 + $0x1a0] sm:$0xf]  ;;  %v6777_v43 = vld [vmem:[%s7195_s26 + $0x4ac] sm:$0xf0]  ;;  %v5828_v46 = vor.u32 %v6877_v37, %v5827_v36  ;;  %v7353_v36 = vor.u32 %v6615_v20, %v4793_v21 }
  0x33   : > { %v5427_v41 = vld [vmem:[%s7195_s26 + $0x4a0] sm:$0xf]  ;;  %2911 = vmatmul.bf16.vlgmr.msra.gmra.mxu0 %v7278_v27  ;;  %2921 = vmatmul.bf16.vlgmr.msra.gmra.mxu1 %v7280_v28  ;;  %v6845_v45 = vld [vmem:[%s7195_s26 + $0x6cc] sm:$0xf0]  ;;  %v5044_v47 = vor.u32 %v6681_v40, %v5043_v39 }
  0x34   : > { %2926 = vmatpush.bf16.msrb.mxu1 %v5076_v18  ;;  %2995 = vmatpush.bf16.msrb.mxu0 %v5460_v23  ;;  %v5699_v44 = vld [vmem:[%s7195_s26 + $0x6c0] sm:$0xf]  ;;  %v6873_v50 = vld [vmem:[%s7195_s26 + $0x7ac] sm:$0xf0]  ;;  %v5428_v51 = vor.u32 %v6777_v43, %v5427_v41 }
  0x35   : > { %2957 = vmatmul.bf16.vlgmr.msra.gmra.mxu2 %v7285_v32  ;;  %2980 = vmatmul.bf16.vlgmr.msra.gmra.mxu3 %v7287_v35  ;;  %v5027_v48 = vld [vmem:[%s7195_s26 + $0x180] sm:$0xf]  ;;  %v6677_v52 = vld [vmem:[%s7195_s26 + $0x18c] sm:$0xf0]  ;;  %v5700_v54 = vor.u32 %v6845_v45, %v5699_v44 }
  0x36   : > { %3064 = vmatpush.bf16.msrb.mxu3 %v5844_v33  ;;  %v5811_v49 = vld [vmem:[%s7195_s26 + $0x7a0] sm:$0xf]  ;;  %3041 = vmatpush.bf16.msrb.mxu2 %v5716_v42  ;;  %v6773_v55 = vld [vmem:[%s7195_s26 + $0x48c] sm:$0xf0]  ;;  %v5028_v62 = vor.u32 %v6677_v52, %v5027_v48  ;;  %v689_v33 = vld [vmem:[%s9128_s2 + $0x8] sm:$0xff] }
  0x37   : > { %v5411_v53 = vld [vmem:[%s7195_s26 + $0x480] sm:$0xf]  ;;  %v6841_v57 = vld [vmem:[%s7195_s26 + $0x6ac] sm:$0xf0]  ;;  %v5812_v61 = vor.u32 %v6873_v50, %v5811_v49 }
  0x38   : > { %2927 = vmatpush.bf16.msrb.mxu1 %v5060_v34  ;;  %2996 = vmatpush.bf16.msrb.mxu0 %v5444_v38  ;;  %v5683_v56 = vld [vmem:[%s7195_s26 + $0x6a0] sm:$0xf]  ;;  %v6673_v60 = vld [vmem:[%s7195_s26 + $0x16c] sm:$0xf0]  ;;  %v5412_v3 = vor.u32 %v6773_v55, %v5411_v53 }
  0x39   : > { %v5011_v59 = vld [vmem:[%s7195_s26 + $0x160] sm:$0xf]  ;;  %v6869_v1 = vld [vmem:[%s7195_s26 + $0x78c] sm:$0xf0]  ;;  %v5684_v7 = vor.u32 %v6841_v57, %v5683_v56 }
  0x3a   : > { %3065 = vmatpush.bf16.msrb.mxu3 %v5828_v46  ;;  %v5795_v63 = vld [vmem:[%s7195_s26 + $0x780] sm:$0xf]  ;;  %3042 = vmatpush.bf16.msrb.mxu2 %v5700_v54  ;;  %v6769_v8 = vld [vmem:[%s7195_s26 + $0x46c] sm:$0xf0]  ;;  %v5012_v15 = vor.u32 %v6673_v60, %v5011_v59  ;;  %v6601_v59 = vld [vmem:[%s9127_s1 + $0x4] sm:$0xf] }
  0x3b   : > { %v688_v2 = vld [vmem:[%s9128_s2] sm:$0xff]  ;;  %v6837_v10 = vld [vmem:[%s7195_s26 + $0x68c] sm:$0xf0]  ;;  %v5796_v14 = vor.u32 %v6869_v1, %v5795_v63  ;;  %v4733_v60 = vld [vmem:[%s9127_s1 + $0x34] sm:$0xf0] }
  0x3c   : > { %2928 = vmatpush.bf16.msrb.mxu1 %v5044_v47  ;;  %2997 = vmatpush.bf16.msrb.mxu0 %v5428_v51  ;;  %v5395_v6 = vld [vmem:[%s7195_s26 + $0x460] sm:$0xf]  ;;  %v4791_v11 = vld [vmem:[%s9127_s1 + $0x70] sm:$0xf] }
  0x3d   : > { %v5667_v9 = vld [vmem:[%s7195_s26 + $0x680] sm:$0xf]  ;;  %695 = vperm.xlu0 %7094, %v688_v2   ;;  %v6669_v16 = vld [vmem:[%s7195_s26 + $0x14c] sm:$0xf0]  ;;  %v5396_v19 = vor.u32 %v6769_v8, %v5395_v6  ;;  %v7348_v30 = vor.u32 %v6621_v12, %v4791_v11  ;;  %v282_v6 = vld [vmem:[%s9127_s1 + $0xd8] sm:$0xff] }
  0x3e   : > { %v4995_v13 = vld [vmem:[%s7195_s26 + $0x140] sm:$0xf]  ;;  %3066 = vmatpush.bf16.msrb.mxu3 %v5812_v61  ;;  %v6865_v18 = vld [vmem:[%s7195_s26 + $0x76c] sm:$0xf0]  ;;  %3043 = vmatpush.bf16.msrb.mxu2 %v5684_v7  ;;  %v5668_v23 = vor.u32 %v6837_v10, %v5667_v9 }
  0x3f   : > { %v5779_v17 = vld [vmem:[%s7195_s26 + $0x760] sm:$0xf]  ;;  %v6765_v25 = vld [vmem:[%s7195_s26 + $0x44c] sm:$0xf0]  ;;  %9164 = vst [vmem:[#allocation4_spill] sm:$0xff] %v7348_v30  ;;  %v4996_v34 = vor.u32 %v6669_v16, %v4995_v13  ;;  %v7400_v16 = vor.u32 %v6601_v59, %v4733_v60 }
  0x40   : > { %2929 = vmatpush.bf16.msrb.mxu1 %v5028_v62  ;;  %2998 = vmatpush.bf16.msrb.mxu0 %v5412_v3  ;;  %v5379_v22 = vld [vmem:[%s7195_s26 + $0x440] sm:$0xf]  ;;  %v6833_v29 = vld [vmem:[%s7195_s26 + $0x66c] sm:$0xf0]  ;;  %v5780_v31 = vor.u32 %v6865_v18, %v5779_v17  ;;  %v807_v17 = vunpack.c.l.b16 %v282_v6  ;;  %v6609_v18 = vld [vmem:[%s9127_s1 + $0x40] sm:$0xf0] }
  0x41   : > { %v5651_v26 = vld [vmem:[%s7195_s26 + $0x660] sm:$0xf]  ;;  %v6861_v38 = vld [vmem:[%s7195_s26 + $0x74c] sm:$0xf0]  ;;  %v5380_v39 = vor.u32 %v6765_v25, %v5379_v22  ;;  %v808_v22 = vunpack.c.h.b16 %v282_v6 }
  0x42   : > { %3067 = vmatpush.bf16.msrb.mxu3 %v5796_v14  ;;  %v5763_v37 = vld [vmem:[%s7195_s26 + $0x740] sm:$0xf]  ;;  %v6665_v41 = vld [vmem:[%s7195_s26 + $0x12c] sm:$0xf0]  ;;  %3044 = vmatpush.bf16.msrb.mxu2 %v5668_v23  ;;  %v5652_v43 = vor.u32 %v6833_v29, %v5651_v26 }
  0x43   : > { %v4979_v40 = vld [vmem:[%s7195_s26 + $0x120] sm:$0xf]  ;;  %2916 = vmatmul.bf16.gmra.mxu0 %v7343_v24  ;;  %v6761_v44 = vld [vmem:[%s7195_s26 + $0x42c] sm:$0xf0]  ;;  %v5764_v48 = vor.u32 %v6861_v38, %v5763_v37 }
  0x44   : > { %2930 = vmatpush.bf16.msrb.mxu1 %v5012_v15  ;;  %2999 = vmatpush.bf16.msrb.mxu0 %v5396_v19  ;;  %v5363_v42 = vld [vmem:[%s7195_s26 + $0x420] sm:$0xf]  ;;  %v6829_v46 = vld [vmem:[%s7195_s26 + $0x64c] sm:$0xf0]  ;;  %v4980_v50 = vor.u32 %v6665_v41, %v4979_v40  ;;  %v7419_v40 = vpack.c.b16 %v808_v22, %v808_v22 }
  0x45   : > { %v5635_v45 = vld [vmem:[%s7195_s26 + $0x640] sm:$0xf]  ;;  %700 = vperm.xlu0 %7094, %v689_v33   ;;  %2962 = vmatmul.bf16.gmra.mxu2 %v7348_v30  ;;  %v6857_v52 = vld [vmem:[%s7195_s26 + $0x72c] sm:$0xf0]  ;;  %v5364_v54 = vor.u32 %v6761_v44, %v5363_v42  ;;  %v7412_v33 = vpack.c.b16 %v807_v17, %v807_v17 }
  0x46   : > { %v4963_v47 = vld [vmem:[%s7195_s26 + $0x100] sm:$0xf]  ;;  %3068 = vmatpush.bf16.msrb.mxu3 %v5780_v31  ;;  %v690_v53 = vld [vmem:[%s9128_s2 + $0x10] sm:$0xff]  ;;  %3045 = vmatpush.bf16.msrb.mxu2 %v5652_v43  ;;  %v5636_v58 = vor.u32 %v6829_v46, %v5635_v45  ;;  %9166 = vst [vmem:[#allocation6_spill] sm:$0xff] %v7419_v40 }
  0x47   : > { %v692_v49 = vld [vmem:[%s9128_s2 + $0x20] sm:$0xff]  ;;  %2985 = vmatmul.bf16.gmra.mxu3 %v7353_v36  ;;  %v6661_v55 = vld [vmem:[%s7195_s26 + $0x10c] sm:$0xf0]  ;;  %705 = vperm.xlu1 %7095, %v690_v53   ;;  %9165 = vst [vmem:[#allocation5_spill] sm:$0xff] %v7412_v33 }
  0x48   : > { %2931 = vmatpush.bf16.msrb.mxu1 %v4996_v34  ;;  %v5747_v51 = vld [vmem:[%s7195_s26 + $0x720] sm:$0xf]  ;;  %3000 = vmatpush.bf16.msrb.mxu0 %v5380_v39  ;;  %v6757_v57 = vld [vmem:[%s7195_s26 + $0x40c] sm:$0xf0]  ;;  %v4964_v5 = vor.u32 %v6661_v55, %v4963_v47  ;;  %v691_v39 = vld [vmem:[%s9128_s2 + $0x18] sm:$0xff] }
  0x49   : > { %v5347_v56 = vld [vmem:[%s7195_s26 + $0x400] sm:$0xf]  ;;  %v6825_v62 = vld [vmem:[%s7195_s26 + $0x62c] sm:$0xf0]  ;;  %715 = vperm.xlu2 %7096, %v692_v49   ;;  %v5748_v1 = vor.u32 %v6857_v52, %v5747_v51 }
  0x4a   : > { %v5619_v61 = vld [vmem:[%s7195_s26 + $0x620] sm:$0xf]  ;;  %3069 = vmatpush.bf16.msrb.mxu3 %v5764_v48  ;;  %v6817_v2 = vld [vmem:[%s7195_s26 + $0x5ec] sm:$0xf0]  ;;  %v5348_v9 = vor.u32 %v6757_v57, %v5347_v56  ;;  %3046 = vmatpush.bf16.msrb.mxu2 %v5636_v58  ;;  %v6614_v57 = vld [vmem:[%s9127_s1 + $0x6c] sm:$0xf] }
  0x4b   : > { %v5587_v63 = vld [vmem:[%s7195_s26 + $0x5e0] sm:$0xf]  ;;  %v6913_v4 = vld [vmem:[%s7195_s26 + $0x8ec] sm:$0xf0]  ;;  %v5620_v10 = vor.u32 %v6825_v62, %v5619_v61 }
  0x4c   : > { %v5971_v3 = vld [vmem:[%s7195_s26 + $0x8e0] sm:$0xf]  ;;  %2932 = vmatpush.bf16.msrb.mxu1 %v4980_v50  ;;  %v6853_v8 = vld [vmem:[%s7195_s26 + $0x70c] sm:$0xf0]  ;;  %3001 = vmatpush.bf16.msrb.mxu0 %v5364_v54  ;;  %v5588_v14 = vor.u32 %v6817_v2, %v5587_v63 }
  0x4d   : > { %v5731_v7 = vld [vmem:[%s7195_s26 + $0x700] sm:$0xf]  ;;  %v4747_v11 = vld [vmem:[%s9127_s1 + $0x10] sm:$0xf]  ;;  %v5972_v15 = vor.u32 %v6913_v4, %v5971_v3 }
  0x4e   : > { %v5603_v12 = vld [vmem:[%s7195_s26 + $0x600] sm:$0xf]  ;;  %v6821_v13 = vld [vmem:[%s7195_s26 + $0x60c] sm:$0xf0]  ;;  %3070 = vmatpush.bf16.msrb.mxu3 %v5748_v1  ;;  %v5732_v19 = vor.u32 %v6853_v8, %v5731_v7  ;;  %3047 = vmatpush.bf16.msrb.mxu2 %v5620_v10  ;;  %v7409_v29 = vor.u32 %v6609_v18, %v4747_v11  ;;  %v4799_v11 = vld [vmem:[%s9127_s1 + $0x78] sm:$0xf] }
  0x4f   : > { %v5571_v20 = vld [vmem:[%s7195_s26 + $0x5c0] sm:$0xf]  ;;  %v6813_v21 = vld [vmem:[%s7195_s26 + $0x5cc] sm:$0xf0]  ;;  %v5604_v26 = vor.u32 %v6821_v13, %v5603_v12  ;;  %710 = vperm.xlu1 %7095, %v691_v39   ;;  %v6622_v12 = vld [vmem:[%s9127_s1 + $0xa8] sm:$0xf0] }
  0x50   : > { %2933 = vmatpush.bf16.msrb.mxu1 %v4964_v5  ;;  %v5955_v23 = vld [vmem:[%s7195_s26 + $0x8c0] sm:$0xf]  ;;  %v6909_v25 = vld [vmem:[%s7195_s26 + $0x8cc] sm:$0xf0]  ;;  %3002 = vmatpush.bf16.msrb.mxu0 %v5348_v9  ;;  %v5572_v31 = vor.u32 %v6813_v21, %v5571_v20  ;;  %v6610_v20 = vld [vmem:[%s9127_s1 + $0x48] sm:$0xf0] }
  0x51   : > { %v5956_v34 = vor.u32 %v6909_v25, %v5955_v23  ;;  %v5555_v37 = vld [vmem:[%s7195_s26 + $0x5a0] sm:$0xf]  ;;  %v6809_v38 = vld [vmem:[%s7195_s26 + $0x5ac] sm:$0xf0]  ;;  %v6604_v25 = vld [vmem:[%s9127_s1 + $0x1c] sm:$0xf] }
  0x52   : > { %3071 = vmatpush.bf16.msrb.mxu3 %v5732_v19  ;;  %v5939_v41 = vld [vmem:[%s7195_s26 + $0x8a0] sm:$0xf]  ;;  %v6905_v42 = vld [vmem:[%s7195_s26 + $0x8ac] sm:$0xf0]  ;;  %3048 = vmatpush.bf16.msrb.mxu2 %v5604_v26  ;;  %v5556_v44 = vor.u32 %v6809_v38, %v5555_v37 }
  0x53   : > { %2934 = vmatmul.bf16.vlgmr.msrb.gmra.mxu1 %v7400_v16  ;;  %v6227_v43 = vld [vmem:[%s7195_s26 + $0xae0] sm:$0xf]  ;;  %3003 = vmatmul.bf16.vlgmr.msrb.gmra.mxu0 %v7409_v29  ;;  %v6977_v45 = vld [vmem:[%s7195_s26 + $0xaec] sm:$0xf0]  ;;  %v5940_v46 = vor.u32 %v6905_v42, %v5939_v41 }
  0x54   : > { %3018 = vmatpush.bf16.msra.mxu1 %v5588_v14  ;;  %3087 = vmatpush.bf16.msra.mxu0 %v5972_v15  ;;  %v5539_v47 = vld [vmem:[%s7195_s26 + $0x580] sm:$0xf]  ;;  %v6805_v48 = vld [vmem:[%s7195_s26 + $0x58c] sm:$0xf0]  ;;  %v6228_v49 = vor.u32 %v6977_v45, %v6227_v43  ;;  %v4755_v15 = vld [vmem:[%s9127_s1 + $0x18] sm:$0xf] }
  0x55   : > { %2967 = vmatmul.bf16.gmra.mxu2 %v7412_v33  ;;  %v6355_v50 = vld [vmem:[%s7195_s26 + $0xbe0] sm:$0xf]  ;;  %v6901_v52 = vld [vmem:[%s7195_s26 + $0x88c] sm:$0xf0]  ;;  %v5540_v59 = vor.u32 %v6805_v48, %v5539_v47  ;;  %v7482_v41 = vor.u32 %v6610_v20, %v4755_v15  ;;  %v6617_v20 = vld [vmem:[%s9127_s1 + $0x84] sm:$0xf] }
  0x56   : > { %v5923_v51 = vld [vmem:[%s7195_s26 + $0x880] sm:$0xf]  ;;  %v7009_v53 = vld [vmem:[%s7195_s26 + $0xbec] sm:$0xf0]  ;;  %3133 = vmatpush.bf16.msra.mxu2 %v6228_v49 }
  0x57   : > { %2990 = vmatmul.bf16.gmra.mxu3 %v7419_v40  ;;  %v6356_v54 = vor.u32 %v7009_v53, %v6355_v50  ;;  %v6211_v55 = vld [vmem:[%s7195_s26 + $0xac0] sm:$0xf]  ;;  %v6973_v56 = vld [vmem:[%s7195_s26 + $0xacc] sm:$0xf0]  ;;  %v5924_v63 = vor.u32 %v6901_v52, %v5923_v51  ;;  %9167 = vst [vmem:[#allocation7_spill] sm:$0xff] %v7482_v41 }
  0x58   : > { %3019 = vmatpush.bf16.msra.mxu1 %v5572_v31  ;;  %3088 = vmatpush.bf16.msra.mxu0 %v5956_v34  ;;  %v4785_v58 = vld [vmem:[%s9127_s1 + $0x9c] sm:$0xf0]  ;;  %v6212_v60 = vor.u32 %v6973_v56, %v6211_v55  ;;  %v7005_v62 = vld [vmem:[%s7195_s26 + $0xbcc] sm:$0xf0]  ;;  %v7477_v34 = vor.u32 %v6622_v12, %v4799_v11 }
  0x59   : > { %v6339_v61 = vld [vmem:[%s7195_s26 + $0xbc0] sm:$0xf]  ;;  %v6801_v2 = vld [vmem:[%s7195_s26 + $0x56c] sm:$0xf0]  ;;  %3156 = vmatpush.bf16.msra.mxu3 %v6356_v54  ;;  %v7458_v14 = vor.u32 %v6614_v57, %v4785_v58 }
  0x5a   : > { %v5523_v1 = vld [vmem:[%s7195_s26 + $0x560] sm:$0xf]  ;;  %v6340_v3 = vor.u32 %v7005_v62, %v6339_v61  ;;  %v6897_v6 = vld [vmem:[%s7195_s26 + $0x86c] sm:$0xf0]  ;;  %3134 = vmatpush.bf16.msra.mxu2 %v6212_v60 }
  0x5b   : > { %v6195_v4 = vld [vmem:[%s7195_s26 + $0xaa0] sm:$0xf]  ;;  %v6969_v7 = vld [vmem:[%s7195_s26 + $0xaac] sm:$0xf0]  ;;  %v5524_v13 = vor.u32 %v6801_v2, %v5523_v1 }
  0x5c   : > { %3020 = vmatpush.bf16.msra.mxu1 %v5556_v44  ;;  %3089 = vmatpush.bf16.msra.mxu0 %v5940_v46  ;;  %v5907_v5 = vld [vmem:[%s7195_s26 + $0x860] sm:$0xf]  ;;  %v6196_v8 = vor.u32 %v6969_v7, %v6195_v4  ;;  %v7001_v10 = vld [vmem:[%s7195_s26 + $0xbac] sm:$0xf0] }
  0x5d   : > { %v6323_v9 = vld [vmem:[%s7195_s26 + $0xba0] sm:$0xf]  ;;  %v5908_v17 = vor.u32 %v6897_v6, %v5907_v5  ;;  %v6797_v19 = vld [vmem:[%s7195_s26 + $0x54c] sm:$0xf0]  ;;  %3157 = vmatpush.bf16.msra.mxu3 %v6340_v3 }
  0x5e   : > { %v5507_v18 = vld [vmem:[%s7195_s26 + $0x540] sm:$0xf]  ;;  %v6893_v22 = vld [vmem:[%s7195_s26 + $0x84c] sm:$0xf0]  ;;  %v6324_v23 = vor.u32 %v7001_v10, %v6323_v9  ;;  %3135 = vmatpush.bf16.msra.mxu2 %v6196_v8  ;;  %v806_v8 = vunpack.c.h.b16 %v7245_v0 }
  0x5f   : > { %v5891_v21 = vld [vmem:[%s7195_s26 + $0x840] sm:$0xf]  ;;  %v4757_v26 = vld [vmem:[%s9127_s1 + $0x4c] sm:$0xf0]  ;;  %v5508_v37 = vor.u32 %v6797_v19, %v5507_v18  ;;  %v6623_v19 = vld [vmem:[%s9127_s1 + $0xb0] sm:$0xf0] }
  0x60   : > { %3021 = vmatpush.bf16.msra.mxu1 %v5540_v59  ;;  %3090 = vmatpush.bf16.msra.mxu0 %v5924_v63  ;;  %v6179_v31 = vld [vmem:[%s7195_s26 + $0xa80] sm:$0xf]  ;;  %v6965_v39 = vld [vmem:[%s7195_s26 + $0xa8c] sm:$0xf0]  ;;  %v5892_v42 = vor.u32 %v6893_v22, %v5891_v21  ;;  %v7487_v47 = vor.u32 %v6604_v25, %v4757_v26  ;;  %v4809_v21 = vld [vmem:[%s9127_s1 + $0xb4] sm:$0xf0] }
  0x61   : > { %v5491_v38 = vld [vmem:[%s7195_s26 + $0x520] sm:$0xf]  ;;  %v6793_v43 = vld [vmem:[%s7195_s26 + $0x52c] sm:$0xf0]  ;;  %v6180_v44 = vor.u32 %v6965_v39, %v6179_v31  ;;  %3158 = vmatpush.bf16.msra.mxu3 %v6324_v23 }
  0x62   : > { %v6307_v45 = vld [vmem:[%s7195_s26 + $0xb80] sm:$0xf]  ;;  %v6997_v46 = vld [vmem:[%s7195_s26 + $0xb8c] sm:$0xf0]  ;;  %v5492_v53 = vor.u32 %v6793_v43, %v5491_v38 }
  0x63   : > { %2939 = vmatmul.bf16.gmra.mxu1 %v7458_v14  ;;  %v5875_v48 = vld [vmem:[%s7195_s26 + $0x820] sm:$0xf]  ;;  %v6889_v49 = vld [vmem:[%s7195_s26 + $0x82c] sm:$0xf0]  ;;  %3136 = vmatpush.bf16.msra.mxu2 %v6180_v44  ;;  %v6308_v50 = vor.u32 %v6997_v46, %v6307_v45  ;;  %v7542_v45 = vor.u32 %v6617_v20, %v4809_v21  ;;  %v6719_v20 = vld [vmem:[%s7195_s26 + $0x2e4] sm:$0xf] }
  0x64   : > { %3022 = vmatpush.bf16.msra.mxu1 %v5524_v13  ;;  %3091 = vmatpush.bf16.msra.mxu0 %v5908_v17  ;;  %v6163_v51 = vld [vmem:[%s7195_s26 + $0xa60] sm:$0xf]  ;;  %v6961_v52 = vld [vmem:[%s7195_s26 + $0xa6c] sm:$0xf0]  ;;  %v5876_v57 = vor.u32 %v6889_v49, %v5875_v48  ;;  %v7517_v17 = vpack.c.b16 %v806_v8, %v806_v8  ;;  %v5205_v21 = vld [vmem:[%s7195_s26 + $0x2f0] sm:$0xf0] }
  0x65   : > { %3008 = vmatmul.bf16.gmra.mxu0 %v7477_v34  ;;  %v5475_v54 = vld [vmem:[%s7195_s26 + $0x500] sm:$0xf]  ;;  %v6789_v55 = vld [vmem:[%s7195_s26 + $0x50c] sm:$0xf0]  ;;  %v6164_v56 = vor.u32 %v6961_v52, %v6163_v51  ;;  %3049 = vmatmul.bf16.vlgmr.msrb.gmra.mxu2 %v7482_v41 }
  0x66   : > { %v5859_v58 = vld [vmem:[%s7195_s26 + $0x800] sm:$0xf]  ;;  %v6993_v60 = vld [vmem:[%s7195_s26 + $0xb6c] sm:$0xf0]  ;;  %3159 = vmatpush.bf16.msra.mxu3 %v6308_v50  ;;  %v5476_v4 = vor.u32 %v6789_v55, %v5475_v54 }
  0x67   : > { %v6291_v59 = vld [vmem:[%s7195_s26 + $0xb60] sm:$0xf]  ;;  %3072 = vmatmul.bf16.vlgmr.msrb.gmra.mxu3 %v7487_v47  ;;  %v6885_v61 = vld [vmem:[%s7195_s26 + $0x80c] sm:$0xf0]  ;;  %3137 = vmatpush.bf16.msra.mxu2 %v6164_v56  ;;  %v6603_v56 = vld [vmem:[%s9127_s1 + $0x14] sm:$0xf] }
  0x68   : > { %3023 = vmatpush.bf16.msra.mxu1 %v5508_v37  ;;  %3092 = vmatpush.bf16.msra.mxu0 %v5892_v42  ;;  %v6147_v62 = vld [vmem:[%s7195_s26 + $0xa40] sm:$0xf]  ;;  %v6957_v63 = vld [vmem:[%s7195_s26 + $0xa4c] sm:$0xf0]  ;;  %v6292_v1 = vor.u32 %v6993_v60, %v6291_v59  ;;  %v5860_v10 = vor.u32 %v6885_v61, %v5859_v58  ;;  %v284_v58 = vld [vmem:[%s9127_s1 + $0xe8] sm:$0xff] }
  0x69   : > { %v6148_v2 = vor.u32 %v6957_v63, %v6147_v62  ;;  %v6275_v3 = vld [vmem:[%s7195_s26 + $0xb40] sm:$0xf]  ;;  %v6989_v5 = vld [vmem:[%s7195_s26 + $0xb4c] sm:$0xf0]  ;;  %v811_v61 = vunpack.c.l.b16 %v284_v58  ;;  %v6611_v63 = vld [vmem:[%s9127_s1 + $0x50] sm:$0xf0] }
  0x6a   : > { %v6131_v6 = vld [vmem:[%s7195_s26 + $0xa20] sm:$0xf]  ;;  %v6953_v7 = vld [vmem:[%s7195_s26 + $0xa2c] sm:$0xf0]  ;;  %3160 = vmatpush.bf16.msra.mxu3 %v6292_v1  ;;  %v6276_v11 = vor.u32 %v6989_v5, %v6275_v3  ;;  %v812_v1 = vunpack.c.h.b16 %v284_v58 }
  0x6b   : > { %v7512_v9 = vld [vmem:[%s9127_s1 + $0xe0] sm:$0xff]  ;;  %3138 = vmatpush.bf16.msra.mxu2 %v6148_v2  ;;  %v6132_v12 = vor.u32 %v6953_v7, %v6131_v6  ;;  %v6985_v0 = vld [vmem:[%s7195_s26 + $0xb2c] sm:$0xf0]  ;;  %v7575_v5 = vpack.c.b16 %v811_v61, %v811_v61 }
  0x6c   : > { %3024 = vmatpush.bf16.msra.mxu1 %v5492_v53  ;;  %3093 = vmatpush.bf16.msra.mxu0 %v5876_v57  ;;  %v809_v13 = vunpack.c.l.b16 %v7512_v9  ;;  %v6259_v15 = vld [vmem:[%s7195_s26 + $0xb20] sm:$0xf]  ;;  %v6949_v25 = vld [vmem:[%s7195_s26 + $0xa0c] sm:$0xf0]  ;;  %v4749_v57 = vld [vmem:[%s9127_s1 + $0x44] sm:$0xf0]  ;;  %v7577_v7 = vpack.c.b16 %v812_v1, %v812_v1 }
  0x6d   : > { %v4807_v18 = vld [vmem:[%s9127_s1 + $0x80] sm:$0xf]  ;;  %v6260_v22 = vor.u32 %v6985_v0, %v6259_v15  ;;  %v6945_v38 = vld [vmem:[%s7195_s26 + $0x9ec] sm:$0xf0]  ;;  %v7562_v60 = vor.u32 %v6603_v56, %v4749_v57  ;;  %9169 = vst [vmem:[#allocation9_spill] sm:$0xff] %v7575_v5 }
  0x6e   : > { %3161 = vmatpush.bf16.msra.mxu3 %v6276_v11  ;;  %v6115_v23 = vld [vmem:[%s7195_s26 + $0xa00] sm:$0xf]  ;;  %v7533_v26 = vpack.c.b16 %v809_v13, %v809_v13  ;;  %v7538_v39 = vor.u32 %v6623_v19, %v4807_v18  ;;  %v6981_v44 = vld [vmem:[%s7195_s26 + $0xb0c] sm:$0xf0]  ;;  %9170 = vst [vmem:[#allocation10_spill] sm:$0xff] %v7577_v7 }
  0x6f   : > { %3139 = vmatpush.bf16.msra.mxu2 %v6132_v12  ;;  %v6116_v31 = vor.u32 %v6949_v25, %v6115_v23  ;;  %v6099_v37 = vld [vmem:[%s7195_s26 + $0x9e0] sm:$0xf]  ;;  %v6941_v49 = vld [vmem:[%s7195_s26 + $0x9cc] sm:$0xf0]  ;;  %v6687_v11 = vld [vmem:[%s7195_s26 + $0x1e4] sm:$0xf]  ;;  %v5208_v25 = vor.u32 %v6719_v20, %v5205_v21 }
  0x70   : > { %3025 = vmatpush.bf16.msra.mxu1 %v5476_v4  ;;  %3094 = vmatpush.bf16.msra.mxu0 %v5860_v10  ;;  %9168 = vst [vmem:[#allocation8_spill] sm:$0xff] %v7538_v39  ;;  %v6100_v42 = vor.u32 %v6945_v38, %v6099_v37  ;;  %v6243_v43 = vld [vmem:[%s7195_s26 + $0xb00] sm:$0xf]  ;;  %v6937_v52 = vld [vmem:[%s7195_s26 + $0x9ac] sm:$0xf0] }
  0x71   : > { %v6244_v46 = vor.u32 %v6981_v44, %v6243_v43  ;;  %v6083_v48 = vld [vmem:[%s7195_s26 + $0x9c0] sm:$0xf]  ;;  %v6933_v55 = vld [vmem:[%s7195_s26 + $0x98c] sm:$0xf0]  ;;  %v5077_v13 = vld [vmem:[%s7195_s26 + $0x1f0] sm:$0xf0] }
  0x72   : > { %3162 = vmatpush.bf16.msra.mxu3 %v6260_v22  ;;  %v6084_v50 = vor.u32 %v6941_v49, %v6083_v48  ;;  %v6067_v51 = vld [vmem:[%s7195_s26 + $0x9a0] sm:$0xf]  ;;  %v6929_v4 = vld [vmem:[%s7195_s26 + $0x96c] sm:$0xf0]  ;;  %v5080_v18 = vor.u32 %v6687_v11, %v5077_v13  ;;  %v6683_v37 = vld [vmem:[%s7195_s26 + $0x1c4] sm:$0xf] }
  0x73   : > { %2944 = vmatmul.bf16.gmra.mxu1 %v7517_v17  ;;  %3140 = vmatpush.bf16.msra.mxu2 %v6116_v31  ;;  %v6068_v53 = vor.u32 %v6937_v52, %v6067_v51  ;;  %v6051_v54 = vld [vmem:[%s7195_s26 + $0x980] sm:$0xf]  ;;  %v7025_v10 = vld [vmem:[%s7195_s26 + $0xc6c] sm:$0xf0]  ;;  %v5061_v38 = vld [vmem:[%s7195_s26 + $0x1d0] sm:$0xf0] }
  0x74   : > { %3110 = vmatpush.bf16.msrb.mxu1 %v6100_v42  ;;  %v6052_v59 = vor.u32 %v6933_v55, %v6051_v54  ;;  %v4763_v62 = vld [vmem:[%s9127_s1 + $0x20] sm:$0xf]  ;;  %v6925_v0 = vld [vmem:[%s7195_s26 + $0x94c] sm:$0xf0]  ;;  %v6616_v43 = vld [vmem:[%s9127_s1 + $0x7c] sm:$0xf] }
  0x75   : > { %3013 = vmatmul.bf16.gmra.mxu0 %v7533_v26  ;;  %3054 = vmatmul.bf16.gmra.mxu2 %v7538_v39  ;;  %v7570_v2 = vor.u32 %v6611_v63, %v4763_v62  ;;  %v6035_v3 = vld [vmem:[%s7195_s26 + $0x960] sm:$0xf]  ;;  %v7021_v23 = vld [vmem:[%s7195_s26 + $0xc4c] sm:$0xf0]  ;;  %v6715_v49 = vld [vmem:[%s7195_s26 + $0x2c4] sm:$0xf] }
  0x76   : > { %3163 = vmatpush.bf16.msra.mxu3 %v6244_v46  ;;  %v6036_v6 = vor.u32 %v6929_v4, %v6035_v3  ;;  %v6419_v8 = vld [vmem:[%s7195_s26 + $0xc60] sm:$0xf]  ;;  %v4801_v44 = vld [vmem:[%s9127_s1 + $0xac] sm:$0xf0]  ;;  %v5064_v46 = vor.u32 %v6683_v37, %v5061_v38  ;;  %v6679_v55 = vld [vmem:[%s7195_s26 + $0x1a4] sm:$0xf] }
  0x77   : > { %3077 = vmatmul.bf16.gmra.mxu3 %v7542_v45  ;;  %v6420_v12 = vor.u32 %v7025_v10, %v6419_v8  ;;  %v6019_v15 = vld [vmem:[%s7195_s26 + $0x940] sm:$0xf]  ;;  %3225 = vmatpush.bf16.msrb.mxu2 %v5080_v18  ;;  %v6921_v48 = vld [vmem:[%s7195_s26 + $0x92c] sm:$0xf0]  ;;  %v5045_v57 = vld [vmem:[%s7195_s26 + $0x1b0] sm:$0xf0]  ;;  %v7612_v3 = vor.u32 %v6616_v43, %v4801_v44 }
  0x78   : > { %3111 = vmatpush.bf16.msrb.mxu1 %v6084_v50  ;;  %v6020_v19 = vor.u32 %v6925_v0, %v6019_v15  ;;  %v6403_v22 = vld [vmem:[%s7195_s26 + $0xc40] sm:$0xf]  ;;  %v5189_v50 = vld [vmem:[%s7195_s26 + $0x2d0] sm:$0xf0]  ;;  %v7017_v54 = vld [vmem:[%s7195_s26 + $0xc2c] sm:$0xf0]  ;;  %v5048_v61 = vor.u32 %v6679_v55, %v5045_v57 }
  0x79   : > { %3183 = vmatpush.bf16.msrb.mxu0 %v6420_v12  ;;  %v6404_v31 = vor.u32 %v7021_v23, %v6403_v22  ;;  %v6003_v42 = vld [vmem:[%s7195_s26 + $0x920] sm:$0xf]  ;;  %v5192_v52 = vor.u32 %v6715_v49, %v5189_v50  ;;  %v6711_v62 = vld [vmem:[%s7195_s26 + $0x2a4] sm:$0xf]  ;;  %v5173_v63 = vld [vmem:[%s7195_s26 + $0x2b0] sm:$0xf0] }
  0x7a   : > { %3248 = vmatpush.bf16.msrb.mxu3 %v5208_v25  ;;  %v6004_v51 = vor.u32 %v6921_v48, %v6003_v42  ;;  %v5987_v58 = vld [vmem:[%s7195_s26 + $0x900] sm:$0xf]  ;;  %v4815_v4 = vld [vmem:[%s9127_s1 + $0x88] sm:$0xf]  ;;  %v5176_v8 = vor.u32 %v6711_v62, %v5173_v63  ;;  %v6612_v11 = vld [vmem:[%s9127_s1 + $0x58] sm:$0xf0] }
  0x7b   : > { %3226 = vmatpush.bf16.msrb.mxu2 %v5064_v46  ;;  %v4771_v10 = vld [vmem:[%s9127_s1 + $0x28] sm:$0xf]  ;;  %v6606_v12 = vld [vmem:[%s9127_s1 + $0x2c] sm:$0xf]  ;;  %v4773_v13 = vld [vmem:[%s9127_s1 + $0x5c] sm:$0xf0] }
  0x7c   : > { %3112 = vmatpush.bf16.msrb.mxu1 %v6068_v53  ;;  %v6387_v53 = vld [vmem:[%s7195_s26 + $0xc20] sm:$0xf]  ;;  %v7013_v18 = vld [vmem:[%s7195_s26 + $0xc0c] sm:$0xf0]  ;;  %v5029_v20 = vld [vmem:[%s7195_s26 + $0x190] sm:$0xf0]  ;;  %v7639_v21 = vor.u32 %v6612_v11, %v4771_v10  ;;  %v7643_v37 = vor.u32 %v6606_v12, %v4773_v13 }
  0x7d   : > { %3184 = vmatpush.bf16.msrb.mxu0 %v6404_v31  ;;  %v6388_v56 = vor.u32 %v7017_v54, %v6387_v53  ;;  %v6371_v15 = vld [vmem:[%s7195_s26 + $0xc00] sm:$0xf]  ;;  %v6707_v25 = vld [vmem:[%s7195_s26 + $0x284] sm:$0xf]  ;;  %v5157_v31 = vld [vmem:[%s7195_s26 + $0x290] sm:$0xf0]  ;;  %v810_v54 = vunpack.c.h.b16 %v7512_v9 }
  0x7e   : > { %3249 = vmatpush.bf16.msrb.mxu3 %v5192_v52  ;;  %v6372_v22 = vor.u32 %v7013_v18, %v6371_v15  ;;  %9172 = vst [vmem:[#allocation12_spill] sm:$0xff] %v7643_v37  ;;  %v5160_v38 = vor.u32 %v6707_v25, %v5157_v31  ;;  %v6671_v42 = vld [vmem:[%s7195_s26 + $0x164] sm:$0xf]  ;;  %v5013_v43 = vld [vmem:[%s7195_s26 + $0x170] sm:$0xf0] }
  0x7f   : > { %3227 = vmatpush.bf16.msrb.mxu2 %v5048_v61  ;;  %v5016_v44 = vor.u32 %v6671_v42, %v5013_v43  ;;  %v6703_v46 = vld [vmem:[%s7195_s26 + $0x264] sm:$0xf]  ;;  %v5141_v48 = vld [vmem:[%s7195_s26 + $0x270] sm:$0xf0]  ;;  %v7665_v63 = vpack.c.b16 %v810_v54, %v810_v54  ;;  %v4823_v9 = vld [vmem:[%s9127_s1 + $0x90] sm:$0xf] }
  0x80   : > { %3113 = vmatpush.bf16.msrb.mxu1 %v6052_v59  ;;  %v6917_v59 = vld [vmem:[%s7195_s26 + $0x90c] sm:$0xf0]  ;;  %v5144_v49 = vor.u32 %v6703_v46, %v5141_v48  ;;  %v6667_v50 = vld [vmem:[%s7195_s26 + $0x144] sm:$0xf]  ;;  %v6619_v10 = vld [vmem:[%s9127_s1 + $0x94] sm:$0xf] }
  0x81   : > { %v5988_v1 = vor.u32 %v6917_v59, %v5987_v58  ;;  %3185 = vmatpush.bf16.msrb.mxu0 %v6388_v56  ;;  %v7657_v52 = vld [vmem:[%s9127_s1 + $0xf0] sm:$0xff]  ;;  %v6699_v55 = vld [vmem:[%s7195_s26 + $0x244] sm:$0xf]  ;;  %v4825_v11 = vld [vmem:[%s9127_s1 + $0xc4] sm:$0xf0] }
  0x82   : > { %3250 = vmatpush.bf16.msrb.mxu3 %v5176_v8  ;;  %v5125_v56 = vld [vmem:[%s7195_s26 + $0x250] sm:$0xf0]  ;;  %v6663_v57 = vld [vmem:[%s7195_s26 + $0x124] sm:$0xf]  ;;  %v813_v62 = vunpack.c.l.b16 %v7657_v52 }
  0x83   : > { %3026 = vmatmul.bf16.vlgmr.msra.gmra.mxu1 %v7562_v60  ;;  %v5128_v58 = vor.u32 %v6699_v55, %v5125_v56  ;;  %v4981_v59 = vld [vmem:[%s7195_s26 + $0x130] sm:$0xf0]  ;;  %v6659_v12 = vld [vmem:[%s7195_s26 + $0x104] sm:$0xf] }
  0x84   : > { %3114 = vmatpush.bf16.msrb.mxu1 %v6036_v6  ;;  %v6624_v6 = vld [vmem:[%s9127_s1 + $0xb8] sm:$0xf0]  ;;  %v4984_v61 = vor.u32 %v6663_v57, %v4981_v59  ;;  %v7682_v13 = vpack.c.b16 %v813_v62, %v813_v62  ;;  %v4965_v15 = vld [vmem:[%s7195_s26 + $0x110] sm:$0xf0]  ;;  %v6655_v18 = vld [vmem:[%s7195_s26 + $0xe4] sm:$0xf] }
  0x85   : > { %3095 = vmatmul.bf16.vlgmr.msra.gmra.mxu0 %v7570_v2  ;;  %3059 = vmatmul.bf16.gmra.mxu2 %v7575_v5  ;;  %v7633_v0 = vor.u32 %v6624_v6, %v4815_v4  ;;  %v5109_v4 = vld [vmem:[%s7195_s26 + $0x230] sm:$0xf0]  ;;  %v6625_v6 = vld [vmem:[%s9127_s1 + $0xc0] sm:$0xf0]  ;;  %v4765_v62 = vld [vmem:[%s9127_s1 + $0x54] sm:$0xf0] }
  0x86   : > { %3186 = vmatpush.bf16.msrb.mxu0 %v6372_v22  ;;  %3251 = vmatpush.bf16.msrb.mxu3 %v5160_v38  ;;  %v4968_v22 = vor.u32 %v6659_v12, %v4965_v15  ;;  %v6691_v25 = vld [vmem:[%s7195_s26 + $0x204] sm:$0xf]  ;;  %v5093_v31 = vld [vmem:[%s7195_s26 + $0x210] sm:$0xf0]  ;;  %v7692_v38 = vor.u32 %v6619_v10, %v4825_v11  ;;  %v4779_v11 = vld [vmem:[%s9127_s1 + $0x30] sm:$0xf] }
  0x87   : > { %3082 = vmatmul.bf16.gmra.mxu3 %v7577_v7  ;;  %9171 = vst [vmem:[#allocation11_spill] sm:$0xff] %v7633_v0  ;;  %v5096_v42 = vor.u32 %v6691_v25, %v5093_v31  ;;  %v6751_v43 = vld [vmem:[%s7195_s26 + $0x3e4] sm:$0xf]  ;;  %v4917_v56 = vld [vmem:[%s7195_s26 + $0xb0] sm:$0xf0] }
  0x88   : > { %3115 = vmatpush.bf16.msrb.mxu1 %v6020_v19  ;;  %v6675_v19 = vld [vmem:[%s7195_s26 + $0x184] sm:$0xf]  ;;  %v5301_v59 = vld [vmem:[%s7195_s26 + $0x3b0] sm:$0xf0] }
  0x89   : > { %v5032_v23 = vor.u32 %v6675_v19, %v5029_v20  ;;  %v4949_v19 = vld [vmem:[%s7195_s26 + $0xf0] sm:$0xf0]  ;;  %v7688_v20 = vor.u32 %v6625_v6, %v4823_v9  ;;  %v6651_v48 = vld [vmem:[%s7195_s26 + $0xc4] sm:$0xf] }
  0x8a   : > { %3252 = vmatpush.bf16.msrb.mxu3 %v5144_v49  ;;  %v4933_v49 = vld [vmem:[%s7195_s26 + $0xd0] sm:$0xf0]  ;;  %v6647_v55 = vld [vmem:[%s7195_s26 + $0xa4] sm:$0xf] }
  0x8b   : > { %3228 = vmatpush.bf16.msrb.mxu2 %v5032_v23  ;;  %v4952_v23 = vor.u32 %v6655_v18, %v4949_v19  ;;  %v4920_v57 = vor.u32 %v6647_v55, %v4917_v56  ;;  %v6643_v9 = vld [vmem:[%s7195_s26 + $0x84] sm:$0xf]  ;;  %v4901_v6 = vld [vmem:[%s7195_s26 + $0x90] sm:$0xf0] }
  0x8c   : > { %3116 = vmatpush.bf16.msrb.mxu1 %v6004_v51  ;;  %v4997_v51 = vld [vmem:[%s7195_s26 + $0x150] sm:$0xf0]  ;;  %v6613_v12 = vld [vmem:[%s9127_s1 + $0x60] sm:$0xf0]  ;;  %v4904_v15 = vor.u32 %v6643_v9, %v4901_v6 }
  0x8d   : > { %v5000_v53 = vor.u32 %v6667_v50, %v4997_v51  ;;  %v4936_v50 = vor.u32 %v6651_v48, %v4933_v49  ;;  %v6747_v51 = vld [vmem:[%s7195_s26 + $0x3c4] sm:$0xf]  ;;  %v5589_v55 = vld [vmem:[%s7195_s26 + $0x5f0] sm:$0xf0] }
  0x8e   : > { %3253 = vmatpush.bf16.msrb.mxu3 %v5128_v58  ;;  %v6743_v58 = vld [vmem:[%s7195_s26 + $0x3a4] sm:$0xf]  ;;  %v5253_v9 = vld [vmem:[%s7195_s26 + $0x350] sm:$0xf0] }
  0x8f   : > { %3229 = vmatpush.bf16.msrb.mxu2 %v5016_v44  ;;  %v5333_v44 = vld [vmem:[%s7195_s26 + $0x3f0] sm:$0xf0]  ;;  %v6739_v19 = vld [vmem:[%s7195_s26 + $0x384] sm:$0xf] }
  0x90   : > { %3117 = vmatpush.bf16.msrb.mxu1 %v5988_v1  ;;  %v6695_v1 = vld [vmem:[%s7195_s26 + $0x224] sm:$0xf]  ;;  %v5336_v46 = vor.u32 %v6751_v43, %v5333_v44 }
  0x91   : > { %v5112_v8 = vor.u32 %v6695_v1, %v5109_v4  ;;  %v286_v1 = vld [vmem:[%s9127_s1 + $0xf8] sm:$0xff]  ;;  %v5304_v4 = vor.u32 %v6743_v58, %v5301_v59  ;;  %v6639_v31 = vld [vmem:[%s7195_s26 + $0x64] sm:$0xf] }
  0x92   : > { %3271 = vmatpush.bf16.msra.mxu0 %v5336_v46  ;;  %v815_v10 = vunpack.c.l.b16 %v286_v1  ;;  %v816_v18 = vunpack.c.h.b16 %v286_v1  ;;  %v6635_v56 = vld [vmem:[%s7195_s26 + $0x44] sm:$0xf] }
  0x93   : > { %3031 = vmatmul.bf16.gmra.mxu1 %v7612_v3  ;;  %3230 = vmatpush.bf16.msrb.mxu2 %v5000_v53  ;;  %v5317_v53 = vld [vmem:[%s7195_s26 + $0x3d0] sm:$0xf0]  ;;  %v6811_v6 = vld [vmem:[%s7195_s26 + $0x5c4] sm:$0xf] }
  0x94   : > { %3254 = vmatpush.bf16.msrb.mxu3 %v5112_v8  ;;  %3202 = vmatpush.bf16.msra.mxu1 %v4952_v23  ;;  %v5320_v54 = vor.u32 %v6747_v51, %v5317_v53  ;;  %v7728_v23 = vor.u32 %v6613_v12, %v4779_v11  ;;  %v7735_v44 = vpack.c.b16 %v815_v10, %v815_v10  ;;  %v5269_v51 = vld [vmem:[%s7195_s26 + $0x370] sm:$0xf0]  ;;  %v6815_v53 = vld [vmem:[%s7195_s26 + $0x5e4] sm:$0xf] }
  0x95   : > { %3100 = vmatmul.bf16.gmra.mxu0 %v7633_v0  ;;  %3141 = vmatmul.bf16.vlgmr.msra.gmra.mxu2 %v7639_v21  ;;  %v7739_v49 = vpack.c.b16 %v816_v18, %v816_v18  ;;  %v5592_v58 = vor.u32 %v6815_v53, %v5589_v55  ;;  %v5573_v12 = vld [vmem:[%s7195_s26 + $0x5d0] sm:$0xf0]  ;;  %v4817_v53 = vld [vmem:[%s9127_s1 + $0xbc] sm:$0xf0]  ;;  %v4831_v55 = vld [vmem:[%s9127_s1 + $0x98] sm:$0xf] }
  0x96   : > { %3272 = vmatpush.bf16.msra.mxu0 %v5320_v54  ;;  %9173 = vst [vmem:[#allocation13_spill] sm:$0xff] %v7728_v23  ;;  %v4853_v18 = vld [vmem:[%s7195_s26 + $0x30] sm:$0xf0] }
  0x97   : > { %3164 = vmatmul.bf16.vlgmr.msra.gmra.mxu3 %v7643_v37  ;;  %3231 = vmatpush.bf16.msrb.mxu2 %v4984_v61  ;;  %v6605_v61 = vld [vmem:[%s9127_s1 + $0x24] sm:$0xf] }
  0x98   : > { %3255 = vmatpush.bf16.msrb.mxu3 %v5096_v42  ;;  %3203 = vmatpush.bf16.msra.mxu1 %v4936_v50  ;;  %v7718_v8 = vor.u32 %v6605_v61, %v4765_v62  ;;  %v4885_v42 = vld [vmem:[%s7195_s26 + $0x70] sm:$0xf0]  ;;  %v6735_v50 = vld [vmem:[%s7195_s26 + $0x364] sm:$0xf] }
  0x99   : > { %v4888_v48 = vor.u32 %v6639_v31, %v4885_v42  ;;  %v5272_v54 = vor.u32 %v6735_v50, %v5269_v51  ;;  %v6847_v61 = vld [vmem:[%s7195_s26 + $0x6e4] sm:$0xf]  ;;  %v5717_v62 = vld [vmem:[%s7195_s26 + $0x6f0] sm:$0xf0]  ;;  %v6618_v51 = vld [vmem:[%s9127_s1 + $0x8c] sm:$0xf] }
  0x9a   : > { %3273 = vmatpush.bf16.msra.mxu0 %v5304_v4  ;;  %v5720_v1 = vor.u32 %v6847_v61, %v5717_v62  ;;  %v6731_v4 = vld [vmem:[%s7195_s26 + $0x344] sm:$0xf]  ;;  %v5557_v61 = vld [vmem:[%s7195_s26 + $0x5b0] sm:$0xf0] }
  0x9b   : > { %3232 = vmatpush.bf16.msrb.mxu2 %v4968_v22  ;;  %v5285_v22 = vld [vmem:[%s7195_s26 + $0x390] sm:$0xf0]  ;;  %v5256_v11 = vor.u32 %v6731_v4, %v5253_v9  ;;  %v6843_v42 = vld [vmem:[%s7195_s26 + $0x6c4] sm:$0xf]  ;;  %v7782_v4 = vor.u32 %v6618_v51, %v4817_v53  ;;  %v6626_v9 = vld [vmem:[%s9127_s1 + $0xc8] sm:$0xf0] }
  0x9c   : > { %3204 = vmatpush.bf16.msra.mxu1 %v4920_v57  ;;  %v5288_v25 = vor.u32 %v6739_v19, %v5285_v22  ;;  %v4869_v57 = vld [vmem:[%s7195_s26 + $0x50] sm:$0xf0]  ;;  %3340 = vmatpush.bf16.msra.mxu3 %v5720_v1  ;;  %v6627_v62 = vld [vmem:[%s7195_s26 + $0x4] sm:$0xf] }
  0x9d   : > { %v4872_v59 = vor.u32 %v6635_v56, %v4869_v57  ;;  %v6727_v56 = vld [vmem:[%s7195_s26 + $0x324] sm:$0xf]  ;;  %v5237_v57 = vld [vmem:[%s7195_s26 + $0x330] sm:$0xf0]  ;;  %9174 = vst [vmem:[#allocation14_spill] sm:$0xff] %v7782_v4 }
  0x9e   : > { %3274 = vmatpush.bf16.msra.mxu0 %v5288_v25  ;;  %v5576_v25 = vor.u32 %v6811_v6, %v5573_v12  ;;  %v4837_v1 = vld [vmem:[%s7195_s26 + $0x10] sm:$0xf0]  ;;  %v6839_v12 = vld [vmem:[%s7195_s26 + $0x6a4] sm:$0xf] }
  0x9f   : > { %3317 = vmatpush.bf16.msra.mxu2 %v5592_v58  ;;  %v6807_v58 = vld [vmem:[%s7195_s26 + $0x5a4] sm:$0xf]  ;;  %v5541_v53 = vld [vmem:[%s7195_s26 + $0x590] sm:$0xf0] }
  0xa0   : > { %3205 = vmatpush.bf16.msra.mxu1 %v4904_v15  ;;  %v6631_v15 = vld [vmem:[%s7195_s26 + $0x24] sm:$0xf]  ;;  %v5560_v6 = vor.u32 %v6807_v58, %v5557_v61 }
  0xa1   : > { %v4856_v31 = vor.u32 %v6631_v15, %v4853_v18  ;;  %v5685_v15 = vld [vmem:[%s7195_s26 + $0x6b0] sm:$0xf0]  ;;  %v6835_v58 = vld [vmem:[%s7195_s26 + $0x684] sm:$0xf] }
  0xa2   : > { %3275 = vmatpush.bf16.msra.mxu0 %v5272_v54  ;;  %v5688_v18 = vor.u32 %v6839_v12, %v5685_v15  ;;  %v6795_v15 = vld [vmem:[%s7195_s26 + $0x544] sm:$0xf] }
  0xa3   : > { %3036 = vmatmul.bf16.gmra.mxu1 %v7665_v63  ;;  %3318 = vmatpush.bf16.msra.mxu2 %v5576_v25  ;;  %v6723_v25 = vld [vmem:[%s7195_s26 + $0x304] sm:$0xf] }
  0xa4   : > { %3206 = vmatpush.bf16.msra.mxu1 %v4888_v48  ;;  %v5701_v48 = vld [vmem:[%s7195_s26 + $0x6d0] sm:$0xf0] }
  0xa5   : > { %3105 = vmatmul.bf16.gmra.mxu0 %v7682_v13  ;;  %3146 = vmatmul.bf16.gmra.mxu2 %v7688_v20  ;;  %v5704_v54 = vor.u32 %v6843_v42, %v5701_v48  ;;  %v6803_v42 = vld [vmem:[%s7195_s26 + $0x584] sm:$0xf] }
  0xa6   : > { %3276 = vmatpush.bf16.msra.mxu0 %v5256_v11  ;;  %v4840_v11 = vor.u32 %v6627_v62, %v4837_v1  ;;  %v5525_v62 = vld [vmem:[%s7195_s26 + $0x570] sm:$0xf0] }
  0xa7   : > { %3169 = vmatmul.bf16.gmra.mxu3 %v7692_v38  ;;  %3319 = vmatpush.bf16.msra.mxu2 %v5560_v6  ;;  %v5653_v6 = vld [vmem:[%s7195_s26 + $0x670] sm:$0xf0] }
  0xa8   : > { %3207 = vmatpush.bf16.msra.mxu1 %v4872_v59  ;;  %3341 = vmatpush.bf16.msra.mxu3 %v5704_v54  ;;  %v5240_v59 = vor.u32 %v6727_v56, %v5237_v57  ;;  %v5544_v57 = vor.u32 %v6803_v42, %v5541_v53  ;;  %v814_v53 = vunpack.c.h.b16 %v7657_v52 }
  0xaa   : > { %3277 = vmatpush.bf16.msra.mxu0 %v5240_v59  ;;  %v5669_v59 = vld [vmem:[%s7195_s26 + $0x690] sm:$0xf0]  ;;  %v7832_v52 = vpack.c.b16 %v814_v53, %v814_v53 }
  0xab   : > { %v5672_v61 = vor.u32 %v6835_v58, %v5669_v59  ;;  %3320 = vmatpush.bf16.msra.mxu2 %v5544_v57  ;;  %v287_v57 = vld [vmem:[%s9127_s1 + $0x100] sm:$0xf]  ;;  %v6827_v58 = vld [vmem:[%s7195_s26 + $0x644] sm:$0xf]  ;;  %v5637_v59 = vld [vmem:[%s7195_s26 + $0x650] sm:$0xf0] }
  0xac   : > { %3208 = vmatpush.bf16.msra.mxu1 %v4856_v31  ;;  %v5221_v31 = vld [vmem:[%s7195_s26 + $0x310] sm:$0xf0]  ;;  %3342 = vmatpush.bf16.msra.mxu3 %v5688_v18 }
  0xad   : > { %v5224_v51 = vor.u32 %v6723_v25, %v5221_v31  ;;  %v5509_v18 = vld [vmem:[%s7195_s26 + $0x550] sm:$0xf0] }
  0xae   : > { %v5512_v31 = vor.u32 %v6795_v15, %v5509_v18  ;;  %v5621_v15 = vld [vmem:[%s7195_s26 + $0x630] sm:$0xf0] }
  0xaf   : > { %3278 = vmatpush.bf16.msra.mxu0 %v5224_v51 }
  0xb0   : > { %v7732_v43 = vpop.f32.mrf.mxu0  ;;  %v7737_v46 = vpop.f32.mrf.mxu1  ;;  %3209 = vmatpush.bf16.msra.mxu1 %v4840_v11  ;;  %3343 = vmatpush.bf16.msra.mxu3 %v5672_v61  ;;  %v5640_v61 = vor.u32 %v6827_v58, %v5637_v59  ;;  %v6787_v58 = vld [vmem:[%s7195_s26 + $0x504] sm:$0xf] }
  0xb1   : > { %v7812_v11 = vpop.permute.xlu0 %695 }
  0xb3   : > { %3118 = vmatmul.bf16.vlgmr.msrb.gmra.mxu1 %v7718_v8 }
  0xb5   : > { %6433 = vmatmul.msk.bf16.vlgmr.msrb.gmra.mxu0 %vm2893_vm0, %v7728_v23  ;;  %3151 = vmatmul.bf16.gmra.mxu2 %v7735_v44  ;;  %v6867_v23 = vld [vmem:[%s7195_s26 + $0x784] sm:$0xf] }
  0xb7   : > { %3174 = vmatmul.bf16.gmra.mxu3 %v7739_v49 }
  0xb8   : > { %v7756_v10 = vpop.f32.mrf.mxu2  ;;  %v7761_v19 = vpop.f32.mrf.mxu0 }
  0xb9   : > { %v7763_v22 = vpop.f32.mrf.mxu3  ;;  %v2924_v50 = vpop.f32.mrf.mxu1 }
  0xba   : > { %v7794_v50 = vor.u32 %v6626_v9, %v4831_v55  ;;  %v6799_v55 = vld [vmem:[%s7195_s26 + $0x564] sm:$0xf]  ;;  %v7840_v59 = vpop.permute.xlu0 %700 }
  0xbb   : > { %v5528_v1 = vor.u32 %v6799_v55, %v5525_v62  ;;  %v6831_v9 = vld [vmem:[%s7195_s26 + $0x664] sm:$0xf]  ;;  %v2913_v55 = vadd.f32 %v7732_v43, %v7812_v11  ;;  %v5477_v43 = vld [vmem:[%s7195_s26 + $0x510] sm:$0xf0] }
  0xbc   : > { %9175 = vst [vmem:[#allocation15_spill] sm:$0xff] %v7794_v50  ;;  %v5656_v12 = vor.u32 %v6831_v9, %v5653_v6  ;;  %v6791_v62 = vld [vmem:[%s7195_s26 + $0x524] sm:$0xf]  ;;  %v817_v9 = vunpack.c.l.b16 %v287_v57  ;;  %v5480_v53 = vor.u32 %v6787_v58, %v5477_v43  ;;  %v2915_v58 = vadd.f32 %v7761_v19, %v7840_v59 }
  0xbd   : > { %3321 = vmatpush.bf16.msra.mxu2 %v5528_v1  ;;  %v5493_v1 = vld [vmem:[%s7195_s26 + $0x530] sm:$0xf0]  ;;  %v6879_v43 = vld [vmem:[%s7195_s26 + $0x7e4] sm:$0xf] }
  0xbe   : > { %3344 = vmatpush.bf16.msra.mxu3 %v5656_v12  ;;  %v5496_v6 = vor.u32 %v6791_v62, %v5493_v1  ;;  %v6823_v12 = vld [vmem:[%s7195_s26 + $0x624] sm:$0xf]  ;;  %v7842_v57 = vpack.c.b16 %v817_v9, %v817_v9  ;;  %v5461_v62 = vld [vmem:[%s7195_s26 + $0x4f0] sm:$0xf0] }
  0xc0   : > { %v7792_v48 = vpop.f32.mrf.mxu2  ;;  %v7797_v54 = vpop.f32.mrf.mxu0  ;;  %9176 = vst [vmem:[#allocation16_spill] sm:$0xff] %v7842_v57 }
  0xc1   : > { %v7799_v56 = vpop.f32.mrf.mxu3  ;;  %3322 = vmatpush.bf16.msra.mxu2 %v5512_v31 }
  0xc2   : > { %3345 = vmatpush.bf16.msra.mxu3 %v5640_v61  ;;  %v6783_v61 = vld [vmem:[%s7195_s26 + $0x4e4] sm:$0xf] }
  0xc3   : > { %3123 = vmatmul.bf16.gmra.mxu1 %v7782_v4 }
  0xc5   : > { %6434 = vmatmul.msk.bf16.gmra.mxu0 %vm2893_vm0, %v7794_v50  ;;  %3233 = vmatmul.bf16.vlgmr.msrb.gmra.mxu2 %v7400_v16  ;;  %v5624_v50 = vor.u32 %v6823_v12, %v5621_v15  ;;  %v5464_v12 = vor.u32 %v6783_v61, %v5461_v62  ;;  %v6819_v15 = vld [vmem:[%s7195_s26 + $0x604] sm:$0xf]  ;;  %v5445_v62 = vld [vmem:[%s7195_s26 + $0x4d0] sm:$0xf0] }
  0xc6   : > { %3323 = vmatpush.bf16.msra.mxu2 %v5496_v6  ;;  %v6779_v61 = vld [vmem:[%s7195_s26 + $0x4c4] sm:$0xf] }
  0xc7   : > { %3256 = vmatmul.bf16.vlgmr.msrb.gmra.mxu3 %v7285_v32  ;;  %3294 = vmatpush.bf16.msrb.mxu1 %v5464_v12  ;;  %v5448_v19 = vor.u32 %v6779_v61, %v5445_v62  ;;  %v6875_v12 = vld [vmem:[%s7195_s26 + $0x7c4] sm:$0xf] }
  0xc8   : > { %v7816_v25 = vpop.f32.mrf.mxu2  ;;  %v7818_v42 = vpop.f32.mrf.mxu0  ;;  %3346 = vmatpush.bf16.msra.mxu3 %v5624_v50 }
  0xca   : > { %v7820_v51 = vpop.f32.mrf.mxu3  ;;  %3324 = vmatpush.bf16.msra.mxu2 %v5480_v53  ;;  %v7865_v53 = vpop.permute.xlu1 %705 }
  0xcb   : > { %3295 = vmatpush.bf16.msrb.mxu1 %v5448_v19 }
  0xd0   : > { %v2935_v18 = vpop.f32.mrf.mxu1  ;;  %v7838_v31 = vpop.f32.mrf.mxu2 }
  0xd1   : > { %v2936_v32 = vadd.f32 %v2935_v18, %v2913_v55  ;;  %v3004_v6 = vpop.f32.mrf.mxu0  ;;  %v5605_v18 = vld [vmem:[%s7195_s26 + $0x610] sm:$0xf0] }
  0xd2   : > { %v7847_v55 = vpop.f32.mrf.mxu3  ;;  %v5608_v9 = vor.u32 %v6819_v15, %v5605_v18  ;;  %v5829_v18 = vld [vmem:[%s7195_s26 + $0x7d0] sm:$0xf0] }
  0xd3   : > { %v2959_v1 = vadd.f32 %v7756_v10, %v2936_v32  ;;  %3128 = vmatmul.bf16.gmra.mxu1 %v7832_v52  ;;  %v5845_v32 = vld [vmem:[%s7195_s26 + $0x7f0] sm:$0xf0] }
  0xd4   : > { %3347 = vmatpush.bf16.msra.mxu3 %v5608_v9  ;;  %v5848_v10 = vor.u32 %v6879_v43, %v5845_v32  ;;  %v5429_v43 = vld [vmem:[%s7195_s26 + $0x4b0] sm:$0xf0] }
  0xd5   : > { %v2982_v50 = vadd.f32 %v7763_v22, %v2959_v1  ;;  %6435 = vmatmul.msk.bf16.gmra.mxu0 %vm2893_vm0, %v7842_v57  ;;  %3238 = vmatmul.bf16.gmra.mxu2 %v7458_v14 }
  0xd6   : > { %3363 = vmatpush.bf16.msrb.mxu0 %v5848_v10 }
  0xd7   : > { %v7861_v15 = vadd.f32 %v3004_v6, %v2982_v50  ;;  %3261 = vmatmul.bf16.gmra.mxu3 %v7348_v30  ;;  %v5832_v6 = vor.u32 %v6875_v12, %v5829_v18  ;;  %v6775_v50 = vld [vmem:[%s7195_s26 + $0x4a4] sm:$0xf] }
  0xd8   : > { %v2937_v22 = vpop.f32.mrf.mxu1  ;;  %v7869_v9 = vpop.f32.mrf.mxu2  ;;  %v5432_v57 = vor.u32 %v6775_v50, %v5429_v43  ;;  %v6871_v30 = vld [vmem:[%s7195_s26 + $0x7a4] sm:$0xf] }
  0xd9   : > { %v2938_v1 = vadd.f32 %v2937_v22, %v2915_v58  ;;  %v3006_v62 = vpop.f32.mrf.mxu0  ;;  %v5813_v58 = vld [vmem:[%s7195_s26 + $0x7b0] sm:$0xf0]  ;;  %v2918_v22 = vadd.f32 %v7797_v54, %v7865_v53  ;;  %v6771_v12 = vld [vmem:[%s7195_s26 + $0x484] sm:$0xf] }
  0xda   : > { %v7874_v61 = vpop.f32.mrf.mxu3  ;;  %3364 = vmatpush.bf16.msrb.mxu0 %v5832_v6  ;;  %v5816_v10 = vor.u32 %v6871_v30, %v5813_v58  ;;  %3296 = vmatpush.bf16.msrb.mxu1 %v5432_v57  ;;  %v5797_v30 = vld [vmem:[%s7195_s26 + $0x790] sm:$0xf0]  ;;  %v7887_v6 = vpop.permute.xlu1 %710 }
  0xdb   : > { %v2961_v32 = vadd.f32 %v7792_v48, %v2938_v1  ;;  %v5413_v48 = vld [vmem:[%s7195_s26 + $0x490] sm:$0xf0]  ;;  %v5800_v54 = vor.u32 %v6867_v23, %v5797_v30  ;;  %v2920_v23 = vadd.f32 %v7818_v42, %v7887_v6  ;;  %v6975_v42 = vld [vmem:[%s7195_s26 + $0xae4] sm:$0xf] }
  0xdc   : > { %v5416_v18 = vor.u32 %v6771_v12, %v5413_v48  ;;  %v5397_v57 = vld [vmem:[%s7195_s26 + $0x470] sm:$0xf0]  ;;  %v6863_v12 = vld [vmem:[%s7195_s26 + $0x764] sm:$0xf] }
  0xdd   : > { %v2984_v19 = vadd.f32 %v7799_v56, %v2961_v32  ;;  %v6767_v32 = vld [vmem:[%s7195_s26 + $0x464] sm:$0xf]  ;;  %v5781_v48 = vld [vmem:[%s7195_s26 + $0x770] sm:$0xf0] }
  0xde   : > { %3365 = vmatpush.bf16.msrb.mxu0 %v5816_v10  ;;  %3297 = vmatpush.bf16.msrb.mxu1 %v5416_v18  ;;  %v6943_v18 = vld [vmem:[%s7195_s26 + $0x9e4] sm:$0xf]  ;;  %v5381_v30 = vld [vmem:[%s7195_s26 + $0x450] sm:$0xf0] }
  0xdf   : > { %v7883_v1 = vadd.f32 %v3006_v62, %v2984_v19  ;;  %v5400_v19 = vor.u32 %v6767_v32, %v5397_v57  ;;  %v6229_v32 = vld [vmem:[%s7195_s26 + $0xaf0] sm:$0xf0] }
  0xe0   : > { %v2940_v50 = vpop.f32.mrf.mxu1  ;;  %v2970_v56 = vpop.f32.mrf.mxu2 }
  0xe1   : > { %v2941_v43 = vadd.f32 %v2940_v50, %v2918_v22  ;;  %v6101_v50 = vld [vmem:[%s7195_s26 + $0x9f0] sm:$0xf0] }
  0xe2   : > { %v2993_v58 = vpop.f32.mrf.mxu3  ;;  %v3009_v10 = vpop.f32.mrf.mxu0  ;;  %3366 = vmatpush.bf16.msrb.mxu0 %v5800_v54  ;;  %3298 = vmatpush.bf16.msrb.mxu1 %v5400_v19  ;;  %v5765_v19 = vld [vmem:[%s7195_s26 + $0x750] sm:$0xf0] }
  0xe3   : > { %v2964_v62 = vadd.f32 %v7816_v25, %v2941_v43  ;;  %3210 = vmatmul.bf16.vlgmr.msra.gmra.mxu1 %v7278_v27  ;;  %v5784_v25 = vor.u32 %v6863_v12, %v5781_v48  ;;  %v6763_v43 = vld [vmem:[%s7195_s26 + $0x444] sm:$0xf] }
  0xe4   : > { %v5384_v54 = vor.u32 %v6763_v43, %v5381_v30  ;;  %v5365_v43 = vld [vmem:[%s7195_s26 + $0x430] sm:$0xf0] }
  0xe5   : > { %v2987_v22 = vadd.f32 %v7820_v51, %v2964_v62  ;;  %3279 = vmatmul.bf16.vlgmr.msra.gmra.mxu0 %v7287_v35  ;;  %3243 = vmatmul.bf16.gmra.mxu2 %v7517_v17  ;;  %v6104_v51 = vor.u32 %v6943_v18, %v6101_v50  ;;  %v6232_v62 = vor.u32 %v6975_v42, %v6229_v32  ;;  %v6085_v18 = vld [vmem:[%s7195_s26 + $0x9d0] sm:$0xf0]  ;;  %v6759_v50 = vld [vmem:[%s7195_s26 + $0x424] sm:$0xf] }
  0xe6   : > { %3367 = vmatpush.bf16.msrb.mxu0 %v5784_v25  ;;  %3299 = vmatpush.bf16.msrb.mxu1 %v5384_v54  ;;  %v5368_v54 = vor.u32 %v6759_v50, %v5365_v43  ;;  %v6971_v42 = vld [vmem:[%s7195_s26 + $0xac4] sm:$0xf]  ;;  %v6213_v32 = vld [vmem:[%s7195_s26 + $0xad0] sm:$0xf0] }
  0xe7   : > { %v7903_v56 = vadd.f32 %v3009_v10, %v2987_v22  ;;  %3266 = vmatmul.bf16.gmra.mxu3 %v7412_v33  ;;  %3409 = vmatpush.bf16.msrb.mxu2 %v6104_v51  ;;  %v6859_v10 = vld [vmem:[%s7195_s26 + $0x744] sm:$0xf]  ;;  %v5349_v43 = vld [vmem:[%s7195_s26 + $0x410] sm:$0xf0] }
  0xe8   : > { %v2942_v57 = vpop.f32.mrf.mxu1  ;;  %v6939_v22 = vld [vmem:[%s7195_s26 + $0x9c4] sm:$0xf]  ;;  %v7912_v12 = vpop.f32.mrf.mxu2  ;;  %3432 = vmatpush.bf16.msrb.mxu3 %v6232_v62  ;;  %v5768_v48 = vor.u32 %v6859_v10, %v5765_v19  ;;  %v6216_v62 = vor.u32 %v6971_v42, %v6213_v32 }
  0xe9   : > { %v2943_v58 = vadd.f32 %v2942_v57, %v2920_v23  ;;  %v6088_v51 = vor.u32 %v6939_v22, %v6085_v18  ;;  %v7922_v57 = vpop.permute.xlu2 %715  ;;  %v6935_v19 = vld [vmem:[%s7195_s26 + $0x9a4] sm:$0xf]  ;;  %v6069_v18 = vld [vmem:[%s7195_s26 + $0x9b0] sm:$0xf0] }
  0xea   : > { %v3011_v23 = vpop.f32.mrf.mxu0  ;;  %v7918_v30 = vpop.f32.mrf.mxu3  ;;  %3368 = vmatpush.bf16.msrb.mxu0 %v5768_v48  ;;  %3300 = vmatpush.bf16.msrb.mxu1 %v5368_v54  ;;  %v6755_v50 = vld [vmem:[%s7195_s26 + $0x404] sm:$0xf]  ;;  %v2923_v48 = vadd.f32 %v7737_v46, %v7922_v57  ;;  %v6197_v54 = vld [vmem:[%s7195_s26 + $0xab0] sm:$0xf0] }
  0xeb   : > { %v2966_v25 = vadd.f32 %v7838_v31, %v2943_v58  ;;  %3410 = vmatpush.bf16.msrb.mxu2 %v6088_v51  ;;  %v6855_v31 = vld [vmem:[%s7195_s26 + $0x724] sm:$0xf]  ;;  %v5749_v58 = vld [vmem:[%s7195_s26 + $0x730] sm:$0xf0] }
  0xec   : > { %3433 = vmatpush.bf16.msrb.mxu3 %v6216_v62  ;;  %v5752_v22 = vor.u32 %v6855_v31, %v5749_v58  ;;  %v6967_v51 = vld [vmem:[%s7195_s26 + $0xaa4] sm:$0xf]  ;;  %v5733_v58 = vld [vmem:[%s7195_s26 + $0x710] sm:$0xf0] }
  0xed   : > { %v2989_v10 = vadd.f32 %v7847_v55, %v2966_v25  ;;  %v6072_v55 = vor.u32 %v6935_v19, %v6069_v18  ;;  %v5352_v25 = vor.u32 %v6755_v50, %v5349_v43  ;;  %v6200_v32 = vor.u32 %v6967_v51, %v6197_v54  ;;  %v6851_v31 = vld [vmem:[%s7195_s26 + $0x704] sm:$0xf]  ;;  %v6053_v19 = vld [vmem:[%s7195_s26 + $0x990] sm:$0xf0] }
  0xee   : > { %3369 = vmatpush.bf16.msrb.mxu0 %v5752_v22  ;;  %v5736_v46 = vor.u32 %v6851_v31, %v5733_v58  ;;  %v6927_v54 = vld [vmem:[%s7195_s26 + $0x964] sm:$0xf]  ;;  %v6165_v31 = vld [vmem:[%s7195_s26 + $0xa70] sm:$0xf0] }
  0xef   : > { %v7931_v35 = vadd.f32 %v3011_v23, %v2989_v10  ;;  %3411 = vmatpush.bf16.msrb.mxu2 %v6072_v55  ;;  %3301 = vmatpush.bf16.msrb.mxu1 %v5352_v25  ;;  %v6931_v23 = vld [vmem:[%s7195_s26 + $0x984] sm:$0xf]  ;;  %v6181_v55 = vld [vmem:[%s7195_s26 + $0xa90] sm:$0xf0] }
  0xf0   : > { %v2945_v42 = vpop.f32.mrf.mxu1  ;;  %v7940_v10 = vpop.f32.mrf.mxu2  ;;  %3434 = vmatpush.bf16.msrb.mxu3 %v6200_v32  ;;  %v6056_v43 = vor.u32 %v6931_v23, %v6053_v19  ;;  %v6923_v23 = vld [vmem:[%s7195_s26 + $0x944] sm:$0xf] }
  0xf1   : > { %v2946_v62 = vadd.f32 %v2945_v42, %v2923_v48  ;;  %v6963_v48 = vld [vmem:[%s7195_s26 + $0xa84] sm:$0xf]  ;;  %v6037_v42 = vld [vmem:[%s7195_s26 + $0x970] sm:$0xf0] }
  0xf2   : > { %v3014_v50 = vpop.f32.mrf.mxu0  ;;  %v7944_v22 = vpop.f32.mrf.mxu3  ;;  %3370 = vmatpush.bf16.msrb.mxu0 %v5736_v46  ;;  %v6184_v25 = vor.u32 %v6963_v48, %v6181_v55  ;;  %v6021_v46 = vld [vmem:[%s7195_s26 + $0x950] sm:$0xf0]  ;;  %v6955_v48 = vld [vmem:[%s7195_s26 + $0xa44] sm:$0xf] }
  0xf3   : > { %v2969_v18 = vadd.f32 %v7869_v9, %v2946_v62  ;;  %3215 = vmatmul.bf16.gmra.mxu1 %v7343_v24  ;;  %3412 = vmatpush.bf16.msrb.mxu2 %v6056_v43  ;;  %v6040_v9 = vor.u32 %v6927_v54, %v6037_v42  ;;  %v6959_v62 = vld [vmem:[%s7195_s26 + $0xa64] sm:$0xf]  ;;  %v6149_v55 = vld [vmem:[%s7195_s26 + $0xa50] sm:$0xf0] }
  0xf4   : > { %3435 = vmatpush.bf16.msrb.mxu3 %v6184_v25  ;;  %v6152_v25 = vor.u32 %v6955_v48, %v6149_v55  ;;  %v6005_v54 = vld [vmem:[%s7195_s26 + $0x930] sm:$0xf0]  ;;  %v6911_v48 = vld [vmem:[%s7195_s26 + $0x8e4] sm:$0xf] }
  0xf5   : > { %v2992_v51 = vadd.f32 %v7874_v61, %v2969_v18  ;;  %3284 = vmatmul.bf16.gmra.mxu0 %v7353_v36  ;;  %3325 = vmatmul.bf16.vlgmr.msra.gmra.mxu2 %v7562_v60  ;;  %v6168_v61 = vor.u32 %v6959_v62, %v6165_v31  ;;  %v6024_v18 = vor.u32 %v6923_v23, %v6021_v46  ;;  %v6133_v62 = vld [vmem:[%s7195_s26 + $0xa30] sm:$0xf0]  ;;  %v6915_v23 = vld [vmem:[%s7195_s26 + $0x904] sm:$0xf] }
  0xf6   : > { %v5989_v46 = vld [vmem:[%s7195_s26 + $0x910] sm:$0xf0] }
  0xf7   : > { %v7953_v32 = vadd.f32 %v3014_v50, %v2992_v51  ;;  %3348 = vmatmul.bf16.vlgmr.msra.gmra.mxu3 %v7482_v41  ;;  %3413 = vmatpush.bf16.msrb.mxu2 %v6040_v9  ;;  %v6919_v51 = vld [vmem:[%s7195_s26 + $0x924] sm:$0xf]  ;;  %v5973_v55 = vld [vmem:[%s7195_s26 + $0x8f0] sm:$0xf0] }
  0xf8   : > { %v2947_v58 = vpop.f32.mrf.mxu1  ;;  %v7961_v19 = vpop.f32.mrf.mxu2  ;;  %3436 = vmatpush.bf16.msrb.mxu3 %v6168_v61  ;;  %v6008_v42 = vor.u32 %v6919_v51, %v6005_v54  ;;  %v6951_v9 = vld [vmem:[%s7195_s26 + $0xa24] sm:$0xf] }
  0xf9   : > { %v6136_v58 = vor.u32 %v6951_v9, %v6133_v62  ;;  %v6117_v9 = vld [vmem:[%s7195_s26 + $0xa10] sm:$0xf0] }
  0xfa   : > { %v3016_v50 = vpop.f32.mrf.mxu0  ;;  %v7963_v43 = vpop.f32.mrf.mxu3 }
  0xfb   : > { %3414 = vmatpush.bf16.msrb.mxu2 %v6024_v18  ;;  %v5992_v18 = vor.u32 %v6915_v23, %v5989_v46  ;;  %v6357_v23 = vld [vmem:[%s7195_s26 + $0xbf0] sm:$0xf0] }
  0xfc   : > { %3437 = vmatpush.bf16.msrb.mxu3 %v6152_v25  ;;  %v5957_v46 = vld [vmem:[%s7195_s26 + $0x8d0] sm:$0xf0] }
  0xff   : > { %3415 = vmatpush.bf16.msrb.mxu2 %v6008_v42  ;;  %v6947_v42 = vld [vmem:[%s7195_s26 + $0xa04] sm:$0xf] }
 0x100   : > { %v3027_v31 = vpop.f32.mrf.mxu1  ;;  %v7974_v50 = vpop.f32.mrf.mxu2  ;;  %3438 = vmatpush.bf16.msrb.mxu3 %v6136_v58  ;;  %v6120_v62 = vor.u32 %v6947_v42, %v6117_v9  ;;  %v7007_v58 = vld [vmem:[%s7195_s26 + $0xbe4] sm:$0xf] }
 0x101   : > { %v3028_v61 = vadd.f32 %v3027_v31, %v7861_v15  ;;  %v5976_v15 = vor.u32 %v6911_v48, %v5973_v55  ;;  %v6903_v9 = vld [vmem:[%s7195_s26 + $0x8a4] sm:$0xf] }
 0x102   : > { %v7979_v51 = vpop.f32.mrf.mxu3  ;;  %v3096_v54 = vpop.f32.mrf.mxu0 }
 0x103   : > { %v3051_v25 = vadd.f32 %v7912_v12, %v3028_v61  ;;  %3220 = vmatmul.bf16.gmra.mxu1 %v7280_v28  ;;  %3416 = vmatpush.bf16.msrb.mxu2 %v5992_v18  ;;  %v6360_v12 = vor.u32 %v7007_v58, %v6357_v23  ;;  %v6907_v61 = vld [vmem:[%s7195_s26 + $0x8c4] sm:$0xf] }
 0x104   : > { %3386 = vmatpush.bf16.msra.mxu1 %v5976_v15  ;;  %3439 = vmatpush.bf16.msrb.mxu3 %v6120_v62  ;;  %v5960_v55 = vor.u32 %v6907_v61, %v5957_v46  ;;  %v6341_v15 = vld [vmem:[%s7195_s26 + $0xbd0] sm:$0xf0] }
 0x105   : > { %v3074_v31 = vadd.f32 %v7918_v30, %v3051_v25  ;;  %3289 = vmatmul.bf16.gmra.mxu0 %v7419_v40  ;;  %3330 = vmatmul.bf16.gmra.mxu2 %v7612_v3  ;;  %v7003_v25 = vld [vmem:[%s7195_s26 + $0xbc4] sm:$0xf]  ;;  %v5941_v62 = vld [vmem:[%s7195_s26 + $0x8b0] sm:$0xf0] }
 0x106   : > { %3455 = vmatpush.bf16.msra.mxu0 %v6360_v12  ;;  %v5944_v61 = vor.u32 %v6903_v9, %v5941_v62  ;;  %v6999_v12 = vld [vmem:[%s7195_s26 + $0xba4] sm:$0xf] }
 0x107   : > { %v7990_v48 = vadd.f32 %v3096_v54, %v3074_v31  ;;  %3353 = vmatmul.bf16.gmra.mxu3 %v7538_v39  ;;  %v6344_v54 = vor.u32 %v7003_v25, %v6341_v15  ;;  %v5925_v25 = vld [vmem:[%s7195_s26 + $0x890] sm:$0xf0]  ;;  %v6995_v9 = vld [vmem:[%s7195_s26 + $0xb84] sm:$0xf] }
 0x108   : > { %v3029_v30 = vpop.f32.mrf.mxu1  ;;  %3387 = vmatpush.bf16.msra.mxu1 %v5960_v55  ;;  %v7997_v42 = vpop.f32.mrf.mxu2 }
 0x109   : > { %v3030_v18 = vadd.f32 %v3029_v30, %v7883_v1  ;;  %v6325_v1 = vld [vmem:[%s7195_s26 + $0xbb0] sm:$0xf0]  ;;  %v6899_v30 = vld [vmem:[%s7195_s26 + $0x884] sm:$0xf] }
 0x10a   : > { %v8002_v58 = vpop.f32.mrf.mxu3  ;;  %v3098_v23 = vpop.f32.mrf.mxu0  ;;  %3456 = vmatpush.bf16.msra.mxu0 %v6344_v54  ;;  %v6328_v46 = vor.u32 %v6999_v12, %v6325_v1  ;;  %v6309_v54 = vld [vmem:[%s7195_s26 + $0xb90] sm:$0xf0] }
 0x10b   : > { %v3053_v31 = vadd.f32 %v7940_v10, %v3030_v18  ;;  %v5928_v10 = vor.u32 %v6899_v30, %v5925_v25  ;;  %v6312_v12 = vor.u32 %v6995_v9, %v6309_v54  ;;  %v6293_v30 = vld [vmem:[%s7195_s26 + $0xb70] sm:$0xf0]  ;;  %v4955_v25 = vld [vmem:[%s7195_s26 + $0xe8] sm:$0xf] }
 0x10c   : > { %3388 = vmatpush.bf16.msra.mxu1 %v5944_v61 }
 0x10d   : > { %v3076_v55 = vadd.f32 %v7944_v22, %v3053_v31  ;;  %v6895_v22 = vld [vmem:[%s7195_s26 + $0x864] sm:$0xf]  ;;  %v5909_v31 = vld [vmem:[%s7195_s26 + $0x870] sm:$0xf0] }
 0x10e   : > { %3457 = vmatpush.bf16.msra.mxu0 %v6328_v46 }
 0x10f   : > { %v8009_v15 = vadd.f32 %v3098_v23, %v3076_v55  ;;  %v6991_v55 = vld [vmem:[%s7195_s26 + $0xb64] sm:$0xf] }
 0x110   : > { %v3032_v18 = vpop.f32.mrf.mxu1  ;;  %3389 = vmatpush.bf16.msra.mxu1 %v5928_v10  ;;  %v3062_v62 = vpop.f32.mrf.mxu2  ;;  %v6296_v10 = vor.u32 %v6991_v55, %v6293_v30  ;;  %v6654_v30 = vld [vmem:[%s7195_s26 + $0xd4] sm:$0xf0] }
 0x111   : > { %v3033_v40 = vadd.f32 %v3032_v18, %v7903_v56  ;;  %v5912_v56 = vor.u32 %v6895_v22, %v5909_v31  ;;  %v6658_v18 = vld [vmem:[%s7195_s26 + $0xf4] sm:$0xf0] }
 0x112   : > { %v3085_v61 = vpop.f32.mrf.mxu3  ;;  %v3101_v1 = vpop.f32.mrf.mxu0  ;;  %3458 = vmatpush.bf16.msra.mxu0 %v6312_v12  ;;  %v4956_v54 = vor.u32 %v6658_v18, %v4955_v25  ;;  %v6690_v12 = vld [vmem:[%s7195_s26 + $0x1f4] sm:$0xf0]  ;;  %v6887_v25 = vld [vmem:[%s7195_s26 + $0x824] sm:$0xf] }
 0x113   : > { %v3056_v23 = vadd.f32 %v7961_v19, %v3033_v40  ;;  %3302 = vmatmul.bf16.vlgmr.msrb.gmra.mxu1 %v7409_v29  ;;  %v6891_v40 = vld [vmem:[%s7195_s26 + $0x844] sm:$0xf]  ;;  %v5893_v19 = vld [vmem:[%s7195_s26 + $0x850] sm:$0xf0] }
 0x114   : > { %3390 = vmatpush.bf16.msra.mxu1 %v5912_v56  ;;  %v5896_v62 = vor.u32 %v6891_v40, %v5893_v19  ;;  %3501 = vmatpush.bf16.msra.mxu2 %v4956_v54  ;;  %v6987_v61 = vld [vmem:[%s7195_s26 + $0xb44] sm:$0xf]  ;;  %v4939_v56 = vld [vmem:[%s7195_s26 + $0xc8] sm:$0xf] }
 0x115   : > { %v3079_v46 = vadd.f32 %v7963_v43, %v3056_v23  ;;  %3371 = vmatmul.bf16.vlgmr.msrb.gmra.mxu0 %v7487_v47  ;;  %3335 = vmatmul.bf16.gmra.mxu2 %v7665_v63  ;;  %v5083_v43 = vld [vmem:[%s7195_s26 + $0x1e8] sm:$0xf]  ;;  %v4940_v19 = vor.u32 %v6654_v30, %v4939_v56  ;;  %v6883_v56 = vld [vmem:[%s7195_s26 + $0x804] sm:$0xf]  ;;  %v5861_v30 = vld [vmem:[%s7195_s26 + $0x810] sm:$0xf0] }
 0x116   : > { %3459 = vmatpush.bf16.msra.mxu0 %v6296_v10  ;;  %v5084_v31 = vor.u32 %v6690_v12, %v5083_v43  ;;  %v5877_v10 = vld [vmem:[%s7195_s26 + $0x830] sm:$0xf0]  ;;  %v6686_v43 = vld [vmem:[%s7195_s26 + $0x1d4] sm:$0xf0] }
 0x117   : > { %v8026_v9 = vadd.f32 %v3101_v1, %v3079_v46  ;;  %3358 = vmatmul.bf16.gmra.mxu3 %v7575_v5  ;;  %v6277_v1 = vld [vmem:[%s7195_s26 + $0xb50] sm:$0xf0]  ;;  %v5880_v54 = vor.u32 %v6887_v25, %v5877_v10  ;;  %v5864_v10 = vor.u32 %v6883_v56, %v5861_v30  ;;  %v5035_v56 = vld [vmem:[%s7195_s26 + $0x188] sm:$0xf]  ;;  %v6678_v30 = vld [vmem:[%s7195_s26 + $0x194] sm:$0xf0] }
 0x118   : > { %v3034_v22 = vpop.f32.mrf.mxu1  ;;  %3391 = vmatpush.bf16.msra.mxu1 %v5896_v62  ;;  %v8036_v46 = vpop.f32.mrf.mxu2  ;;  %3524 = vmatpush.bf16.msra.mxu3 %v5084_v31  ;;  %v6280_v55 = vor.u32 %v6987_v61, %v6277_v1  ;;  %v5067_v62 = vld [vmem:[%s7195_s26 + $0x1c8] sm:$0xf]  ;;  %v6983_v31 = vld [vmem:[%s7195_s26 + $0xb24] sm:$0xf]  ;;  %v6650_v1 = vld [vmem:[%s7195_s26 + $0xb4] sm:$0xf0] }
 0x119   : > { %v3035_v23 = vadd.f32 %v3034_v22, %v7931_v35  ;;  %v5068_v12 = vor.u32 %v6686_v43, %v5067_v62  ;;  %3502 = vmatpush.bf16.msra.mxu2 %v4940_v19  ;;  %v5051_v62 = vld [vmem:[%s7195_s26 + $0x1a8] sm:$0xf]  ;;  %v6979_v43 = vld [vmem:[%s7195_s26 + $0xb04] sm:$0xf] }
 0x11a   : > { %v3103_v35 = vpop.f32.mrf.mxu0  ;;  %v8042_v40 = vpop.f32.mrf.mxu3  ;;  %3460 = vmatpush.bf16.msra.mxu0 %v6280_v55 }
 0x11b   : > { %v3058_v18 = vadd.f32 %v7974_v50, %v3035_v23  ;;  %v6261_v50 = vld [vmem:[%s7195_s26 + $0xb30] sm:$0xf0]  ;;  %v4923_v23 = vld [vmem:[%s7195_s26 + $0xa8] sm:$0xf] }
 0x11c   : > { %3392 = vmatpush.bf16.msra.mxu1 %v5880_v54  ;;  %3525 = vmatpush.bf16.msra.mxu3 %v5068_v12  ;;  %v6264_v61 = vor.u32 %v6983_v31, %v6261_v50  ;;  %v4924_v55 = vor.u32 %v6650_v1, %v4923_v23  ;;  %v6245_v12 = vld [vmem:[%s7195_s26 + $0xb10] sm:$0xf0]  ;;  %v4907_v31 = vld [vmem:[%s7195_s26 + $0x88] sm:$0xf]  ;;  %v6646_v50 = vld [vmem:[%s7195_s26 + $0x94] sm:$0xf0] }
 0x11d   : > { %v3081_v22 = vadd.f32 %v7979_v51, %v3058_v18  ;;  %v6682_v51 = vld [vmem:[%s7195_s26 + $0x1b4] sm:$0xf0] }
 0x11e   : > { %3461 = vmatpush.bf16.msra.mxu0 %v6264_v61  ;;  %v5052_v19 = vor.u32 %v6682_v51, %v5051_v62  ;;  %3503 = vmatpush.bf16.msra.mxu2 %v4924_v55  ;;  %v5036_v55 = vor.u32 %v6678_v30, %v5035_v56  ;;  %v4891_v62 = vld [vmem:[%s7195_s26 + $0x68] sm:$0xf]  ;;  %v6642_v51 = vld [vmem:[%s7195_s26 + $0x74] sm:$0xf0] }
 0x11f   : > { %v8053_v25 = vadd.f32 %v3103_v35, %v3081_v22  ;;  %v6248_v22 = vor.u32 %v6979_v43, %v6245_v12  ;;  %v4875_v12 = vld [vmem:[%s7195_s26 + $0x48] sm:$0xf]  ;;  %v6670_v56 = vld [vmem:[%s7195_s26 + $0x154] sm:$0xf0] }
 0x120   : > { %v3037_v18 = vpop.f32.mrf.mxu1  ;;  %3393 = vmatpush.bf16.msra.mxu1 %v5864_v10  ;;  %v8061_v35 = vpop.f32.mrf.mxu2  ;;  %3526 = vmatpush.bf16.msra.mxu3 %v5052_v19  ;;  %v5019_v19 = vld [vmem:[%s7195_s26 + $0x168] sm:$0xf] }
 0x121   : > { %v3038_v54 = vadd.f32 %v3037_v18, %v7953_v32  ;;  %v4908_v32 = vor.u32 %v6646_v50, %v4907_v31  ;;  %v6638_v31 = vld [vmem:[%s7195_s26 + $0x54] sm:$0xf0] }
 0x122   : > { %v3106_v61 = vpop.f32.mrf.mxu0  ;;  %v8065_v1 = vpop.f32.mrf.mxu3  ;;  %3462 = vmatpush.bf16.msra.mxu0 %v6248_v22  ;;  %v4876_v50 = vor.u32 %v6638_v31, %v4875_v12  ;;  %v6630_v12 = vld [vmem:[%s7195_s26 + $0x14] sm:$0xf0] }
 0x123   : > { %v3061_v23 = vadd.f32 %v7997_v42, %v3038_v54  ;;  %3307 = vmatmul.bf16.gmra.mxu1 %v7477_v34  ;;  %3504 = vmatpush.bf16.msra.mxu2 %v4908_v32  ;;  %v4892_v42 = vor.u32 %v6642_v51, %v4891_v62  ;;  %v6674_v54 = vld [vmem:[%s7195_s26 + $0x174] sm:$0xf0]  ;;  %v5003_v32 = vld [vmem:[%s7195_s26 + $0x148] sm:$0xf] }
 0x124   : > { %3527 = vmatpush.bf16.msra.mxu3 %v5036_v55  ;;  %v5004_v30 = vor.u32 %v6670_v56, %v5003_v32  ;;  %v4859_v55 = vld [vmem:[%s7195_s26 + $0x28] sm:$0xf] }
 0x125   : > { %v3084_v10 = vadd.f32 %v8002_v58, %v3061_v23  ;;  %3376 = vmatmul.bf16.gmra.mxu0 %v7542_v45  ;;  %3417 = vmatmul.bf16.vlgmr.msrb.gmra.mxu2 %v7718_v8  ;;  %v5020_v58 = vor.u32 %v6674_v54, %v5019_v19  ;;  %v4987_v51 = vld [vmem:[%s7195_s26 + $0x128] sm:$0xf] }
 0x127   : > { %v8074_v18 = vadd.f32 %v3106_v61, %v3084_v10  ;;  %3440 = vmatmul.bf16.vlgmr.msrb.gmra.mxu3 %v7639_v21  ;;  %3505 = vmatpush.bf16.msra.mxu2 %v4892_v42  ;;  %v6634_v10 = vld [vmem:[%s7195_s26 + $0x34] sm:$0xf0] }
 0x128   : > { %v3039_v43 = vpop.f32.mrf.mxu1  ;;  %v8082_v22 = vpop.f32.mrf.mxu2  ;;  %3528 = vmatpush.bf16.msra.mxu3 %v5020_v58  ;;  %v4860_v62 = vor.u32 %v6634_v10, %v4859_v55  ;;  %v6666_v42 = vld [vmem:[%s7195_s26 + $0x134] sm:$0xf0]  ;;  %v4843_v58 = vld [vmem:[%s7195_s26 + $0x8] sm:$0xf] }
 0x129   : > { %v4988_v54 = vor.u32 %v6666_v42, %v4987_v51  ;;  %v6662_v55 = vld [vmem:[%s7195_s26 + $0x114] sm:$0xf0] }
 0x12a   : > { %v3108_v23 = vpop.f32.mrf.mxu0  ;;  %v8084_v61 = vpop.f32.mrf.mxu3  ;;  %v6722_v51 = vld [vmem:[%s7195_s26 + $0x2f4] sm:$0xf0] }
 0x12b   : > { %3506 = vmatpush.bf16.msra.mxu2 %v4876_v50  ;;  %v4844_v50 = vor.u32 %v6630_v12, %v4843_v58  ;;  %v6718_v58 = vld [vmem:[%s7195_s26 + $0x2d4] sm:$0xf0] }
 0x12c   : > { %3529 = vmatpush.bf16.msra.mxu3 %v5004_v30  ;;  %v4971_v30 = vld [vmem:[%s7195_s26 + $0x108] sm:$0xf] }
 0x12f   : > { %3507 = vmatpush.bf16.msra.mxu2 %v4860_v62  ;;  %v5211_v62 = vld [vmem:[%s7195_s26 + $0x2e8] sm:$0xf] }
 0x130   : > { %v3119_v19 = vpop.f32.mrf.mxu1  ;;  %v8095_v31 = vpop.f32.mrf.mxu2  ;;  %3530 = vmatpush.bf16.msra.mxu3 %v4988_v54  ;;  %v5212_v42 = vor.u32 %v6722_v51, %v5211_v62 }
 0x131   : > { %v3120_v43 = vadd.f32 %v3119_v19, %v7990_v48  ;;  %v4972_v48 = vor.u32 %v6662_v55, %v4971_v30 }
 0x132   : > { %v8098_v32 = vpop.f32.mrf.mxu3  ;;  %v3188_v56 = vpop.f32.mrf.mxu0  ;;  %3547 = vmatpush.bf16.msrb.mxu0 %v5212_v42 }
 0x133   : > { %v3143_v23 = vadd.f32 %v8036_v46, %v3120_v43  ;;  %3312 = vmatmul.bf16.gmra.mxu1 %v7533_v26  ;;  %3508 = vmatpush.bf16.msra.mxu2 %v4844_v50  ;;  %v5195_v43 = vld [vmem:[%s7195_s26 + $0x2c8] sm:$0xf] }
 0x134   : > { %3531 = vmatpush.bf16.msra.mxu3 %v4972_v48  ;;  %v5196_v50 = vor.u32 %v6718_v58, %v5195_v43 }
 0x135   : > { %v3166_v10 = vadd.f32 %v8042_v40, %v3143_v23  ;;  %3381 = vmatmul.bf16.gmra.mxu0 %v7577_v7  ;;  %3422 = vmatmul.bf16.gmra.mxu2 %v7782_v4 }
 0x136   : > { %3548 = vmatpush.bf16.msrb.mxu0 %v5196_v50  ;;  %v6421_v50 = vld [vmem:[%s7195_s26 + $0xc70] sm:$0xf0] }
 0x137   : > { %v8107_v46 = vadd.f32 %v3188_v56, %v3166_v10  ;;  %3445 = vmatmul.bf16.gmra.mxu3 %v7688_v20  ;;  %v5179_v10 = vld [vmem:[%s7195_s26 + $0x2a8] sm:$0xf] }
 0x138   : > { %v3121_v19 = vpop.f32.mrf.mxu1  ;;  %v8115_v12 = vpop.f32.mrf.mxu2 }
 0x139   : > { %v4119_v54 = vmin.f32 %v8107_v46, 0.0  ;;  %v3122_v40 = vadd.f32 %v3121_v19, %v8009_v15  ;;  %v6714_v15 = vld [vmem:[%s7195_s26 + $0x2b4] sm:$0xf0]  ;;  %vm4099_vm1 = vcmp.gt.f32.partialorder %v8107_v46, 0.0 }
 0x13a   : > { %v8118_v56 = vpop.f32.mrf.mxu3  ;;  %v3190_v30 = vpop.f32.mrf.mxu0  ;;  %v5180_v62 = vor.u32 %v6714_v15, %v5179_v10  ;;  %v5147_v15 = vld [vmem:[%s7195_s26 + $0x268] sm:$0xf] }
 0x13b   : > { %v3145_v23 = vadd.f32 %v8061_v35, %v3122_v40  ;;  %v4139_v55 = vmul.f32 1.442695, %v4119_v54  ;;  %v5163_v40 = vld [vmem:[%s7195_s26 + $0x288] sm:$0xf]  ;;  %v6710_v54 = vld [vmem:[%s7195_s26 + $0x294] sm:$0xf0] }
 0x13c   : > { %3549 = vmatpush.bf16.msrb.mxu0 %v5180_v62  ;;  %v5164_v58 = vor.u32 %v6710_v54, %v5163_v40  ;;  %v6706_v62 = vld [vmem:[%s7195_s26 + $0x274] sm:$0xf0]  ;;  %v7019_v40 = vld [vmem:[%s7195_s26 + $0xc44] sm:$0xf]  ;;  %v6405_v54 = vld [vmem:[%s7195_s26 + $0xc50] sm:$0xf0] }
 0x13d   : > { %v3168_v48 = vadd.f32 %v8065_v1, %v3145_v23  ;;  %7097 = vpow2.f32 %v4139_v55  ;;  %v7023_v1 = vld [vmem:[%s7195_s26 + $0xc64] sm:$0xf] }
 0x13f   : > { %v8123_v51 = vadd.f32 %v3190_v30, %v3168_v48 }
 0x140   : > { %v3124_v42 = vpop.f32.mrf.mxu1  ;;  %v3154_v43 = vpop.f32.mrf.mxu2  ;;  %3550 = vmatpush.bf16.msrb.mxu0 %v5164_v58 }
 0x141   : > { %v4123_v35 = vmin.f32 %v8123_v51, 0.0  ;;  %v3125_v19 = vadd.f32 %v3124_v42, %v8026_v9  ;;  %v6424_v9 = vor.u32 %v7023_v1, %v6421_v50  ;;  %v5467_v42 = vld [vmem:[%s7195_s26 + $0x4e8] sm:$0xf]  ;;  %v6818_v50 = vld [vmem:[%s7195_s26 + $0x5f4] sm:$0xf0]  ;;  %vm4103_vm2 = vcmp.gt.f32.partialorder %v8123_v51, 0.0 }
 0x142   : > { %v3177_v55 = vpop.f32.mrf.mxu3  ;;  %v3193_v48 = vpop.f32.mrf.mxu0  ;;  %v5595_v1 = vld [vmem:[%s7195_s26 + $0x5e8] sm:$0xf] }
 0x143   : > { %v4147_v23 = vmul.f32 1.442695, %v4123_v35  ;;  %v3148_v30 = vadd.f32 %v8082_v22, %v3125_v19  ;;  %3394 = vmatmul.bf16.vlgmr.msra.gmra.mxu1 %v7570_v2  ;;  %v7098_v35 = vpop.eup %7097  ;;  %v5148_v22 = vor.u32 %v6706_v62, %v5147_v15  ;;  %v6786_v19 = vld [vmem:[%s7195_s26 + $0x4f4] sm:$0xf0] }
 0x144   : > { %3482 = vmatpush.bf16.msrb.mxu1 %v6424_v9  ;;  %v5468_v58 = vor.u32 %v6786_v19, %v5467_v42  ;;  %v6445_v55 = vadd.f32 -1.0, %v7098_v35  ;;  %v6702_v15 = vld [vmem:[%s7195_s26 + $0x254] sm:$0xf0]  ;;  %v5451_v19 = vld [vmem:[%s7195_s26 + $0x4c8] sm:$0xf] }
 0x145   : > { %7099 = vpow2.f32 %v4147_v23  ;;  %v3171_v10 = vadd.f32 %v8084_v61, %v3148_v30  ;;  %3463 = vmatmul.bf16.vlgmr.msra.gmra.mxu0 %v7643_v37  ;;  %3427 = vmatmul.bf16.gmra.mxu2 %v7832_v52  ;;  %v6408_v61 = vor.u32 %v7019_v40, %v6405_v54  ;;  %v5596_v30 = vor.u32 %v6818_v50, %v5595_v1  ;;  %v6782_v40 = vld [vmem:[%s7195_s26 + $0x4d4] sm:$0xf0]  ;;  %v6389_v1 = vld [vmem:[%s7195_s26 + $0xc30] sm:$0xf0]  ;;  %v5579_v50 = vld [vmem:[%s7195_s26 + $0x5c8] sm:$0xf] }
 0x146   : > { %3551 = vmatpush.bf16.msrb.mxu0 %v5148_v22  ;;  %3593 = vmatpush.bf16.msrb.mxu2 %v5468_v58  ;;  %v7015_v22 = vld [vmem:[%s7195_s26 + $0xc24] sm:$0xf]  ;;  %v5115_v37 = vld [vmem:[%s7195_s26 + $0x228] sm:$0xf]  ;;  %v8171_v7 = vsel %vm4099_vm1, %v8107_v46, %v6445_v55 }
 0x147   : > { %v8141_v43 = vadd.f32 %v3193_v48, %v3171_v10  ;;  %3450 = vmatmul.bf16.gmra.mxu3 %v7735_v44  ;;  %v5131_v10 = vld [vmem:[%s7195_s26 + $0x248] sm:$0xf]  ;;  %9177 = vst [vmem:[#allocation17_spill] sm:$0xff] %v8171_v7  ;;  %v6922_v7 = vld [vmem:[%s7195_s26 + $0x934] sm:$0xf0] }
 0x148   : > { %v3126_v23 = vpop.f32.mrf.mxu1  ;;  %3483 = vmatpush.bf16.msrb.mxu1 %v6408_v61  ;;  %v8151_v62 = vpop.f32.mrf.mxu2  ;;  %3616 = vmatpush.bf16.msrb.mxu3 %v5596_v30  ;;  %v5132_v42 = vor.u32 %v6702_v15, %v5131_v10  ;;  %v5452_v61 = vor.u32 %v6782_v40, %v5451_v19  ;;  %v6392_v10 = vor.u32 %v7015_v22, %v6389_v1  ;;  %v6814_v15 = vld [vmem:[%s7195_s26 + $0x5d4] sm:$0xf0]  ;;  %v5435_v40 = vld [vmem:[%s7195_s26 + $0x4a8] sm:$0xf] }
 0x149   : > { %v4127_v9 = vmin.f32 %v8141_v43, 0.0  ;;  %v3127_v48 = vadd.f32 %v3126_v23, %v8053_v25  ;;  %v6698_v19 = vld [vmem:[%s7195_s26 + $0x234] sm:$0xf0]  ;;  %v5563_v55 = vld [vmem:[%s7195_s26 + $0x5a8] sm:$0xf]  ;;  %vm4107_vm3 = vcmp.gt.f32.partialorder %v8141_v43, 0.0 }
 0x14a   : > { %v3195_v35 = vpop.f32.mrf.mxu0  ;;  %v8158_v58 = vpop.f32.mrf.mxu3  ;;  %3552 = vmatpush.bf16.msrb.mxu0 %v5132_v42  ;;  %3594 = vmatpush.bf16.msrb.mxu2 %v5452_v61  ;;  %v5116_v42 = vor.u32 %v6698_v19, %v5115_v37  ;;  %v6778_v22 = vld [vmem:[%s7195_s26 + $0x4b4] sm:$0xf0]  ;;  %v5419_v19 = vld [vmem:[%s7195_s26 + $0x488] sm:$0xf] }
 0x14b   : > { %v7100_v54 = vpop.eup %7099  ;;  %v3150_v25 = vadd.f32 %v8095_v31, %v3127_v48  ;;  %v4155_v30 = vmul.f32 1.442695, %v4127_v9  ;;  %v5580_v48 = vor.u32 %v6814_v15, %v5579_v50  ;;  %v5436_v1 = vor.u32 %v6778_v22, %v5435_v40  ;;  %v6694_v15 = vld [vmem:[%s7195_s26 + $0x214] sm:$0xf0] }
 0x14c   : > { %v6449_v23 = vadd.f32 -1.0, %v7100_v54  ;;  %3484 = vmatpush.bf16.msrb.mxu1 %v6392_v10  ;;  %v7011_v54 = vld [vmem:[%s7195_s26 + $0xc04] sm:$0xf]  ;;  %v6774_v40 = vld [vmem:[%s7195_s26 + $0x494] sm:$0xf0] }
 0x14d   : > { %v3173_v31 = vadd.f32 %v8098_v32, %v3150_v25  ;;  %v6373_v32 = vld [vmem:[%s7195_s26 + $0xc10] sm:$0xf0]  ;;  %3617 = vmatpush.bf16.msrb.mxu3 %v5580_v48  ;;  %7101 = vpow2.f32 %v4155_v30 }
 0x14e   : > { %v8174_v9 = vsel %vm4103_vm2, %v8123_v51, %v6449_v23  ;;  %v6376_v46 = vor.u32 %v7011_v54, %v6373_v32  ;;  %v6810_v51 = vld [vmem:[%s7195_s26 + $0x5b4] sm:$0xf0]  ;;  %3553 = vmatpush.bf16.msrb.mxu0 %v5116_v42  ;;  %3595 = vmatpush.bf16.msrb.mxu2 %v5436_v1  ;;  %v5547_v32 = vld [vmem:[%s7195_s26 + $0x588] sm:$0xf]  ;;  %vm4471_vm2 = vcmask 785408  }
 0x14f   : > { %9178 = vst [vmem:[#allocation18_spill] sm:$0xff] %v8174_v9  ;;  %v8181_v61 = vadd.f32 %v3195_v35, %v3173_v31  ;;  %v5564_v37 = vor.u32 %v6810_v51, %v5563_v55  ;;  %v5099_v35 = vld [vmem:[%s7195_s26 + $0x208] sm:$0xf]  ;;  %v6806_v1 = vld [vmem:[%s7195_s26 + $0x594] sm:$0xf0] }
 0x150   : > { %v3129_v50 = vpop.f32.mrf.mxu1  ;;  %v8189_v31 = vpop.f32.mrf.mxu2  ;;  %3485 = vmatpush.bf16.msrb.mxu1 %v6376_v46  ;;  %v5100_v48 = vor.u32 %v6694_v15, %v5099_v35  ;;  %v5548_v46 = vor.u32 %v6806_v1, %v5547_v32  ;;  %v6770_v51 = vld [vmem:[%s7195_s26 + $0x474] sm:$0xf0]  ;;  %v5515_v1 = vld [vmem:[%s7195_s26 + $0x548] sm:$0xf] }
 0x151   : > { %v4131_v23 = vmin.f32 %v8181_v61, 0.0  ;;  %v3130_v10 = vadd.f32 %v3129_v50, %v8074_v18  ;;  %3618 = vmatpush.bf16.msrb.mxu3 %v5564_v37  ;;  %v5420_v18 = vor.u32 %v6774_v40, %v5419_v19  ;;  %v6802_v35 = vld [vmem:[%s7195_s26 + $0x574] sm:$0xf0]  ;;  %vm4111_vm4 = vcmp.gt.f32.partialorder %v8181_v61, 0.0 }
 0x152   : > { %v3198_v22 = vpop.f32.mrf.mxu0  ;;  %v8194_v54 = vpop.f32.mrf.mxu3  ;;  %3554 = vmatpush.bf16.msrb.mxu0 %v5100_v48  ;;  %v5387_v48 = vld [vmem:[%s7195_s26 + $0x448] sm:$0xf]  ;;  %v6766_v19 = vld [vmem:[%s7195_s26 + $0x454] sm:$0xf0] }
 0x153   : > { %v4163_v42 = vmul.f32 1.442695, %v4131_v23  ;;  %v3153_v30 = vadd.f32 %v8115_v12, %v3130_v10  ;;  %3399 = vmatmul.bf16.gmra.mxu1 %v7633_v0  ;;  %3596 = vmatpush.bf16.msrb.mxu2 %v5420_v18  ;;  %v5403_v12 = vld [vmem:[%s7195_s26 + $0x468] sm:$0xf]  ;;  %v7102_v23 = vpop.eup %7101 }
 0x154   : > { %v5404_v50 = vor.u32 %v6770_v51, %v5403_v12  ;;  %v5531_v10 = vld [vmem:[%s7195_s26 + $0x568] sm:$0xf]  ;;  %v6453_v40 = vadd.f32 -1.0, %v7102_v23 }
 0x155   : > { %7103 = vpow2.f32 %v4163_v42  ;;  %v3176_v55 = vadd.f32 %v8118_v56, %v3153_v30  ;;  %3468 = vmatmul.bf16.gmra.mxu0 %v7692_v38  ;;  %3509 = vmatmul.bf16.vlgmr.msra.gmra.mxu2 %v7278_v27  ;;  %v5532_v56 = vor.u32 %v6802_v35, %v5531_v10  ;;  %v5388_v30 = vor.u32 %v6766_v19, %v5387_v48  ;;  %v5371_v51 = vld [vmem:[%s7195_s26 + $0x428] sm:$0xf]  ;;  %v6750_v48 = vld [vmem:[%s7195_s26 + $0x3d4] sm:$0xf0] }
 0x156   : > { %3619 = vmatpush.bf16.msrb.mxu3 %v5548_v46  ;;  %v6798_v46 = vld [vmem:[%s7195_s26 + $0x554] sm:$0xf0]  ;;  %v8222_v10 = vsel %vm4107_vm3, %v8141_v43, %v6453_v40  ;;  %v5339_v40 = vld [vmem:[%s7195_s26 + $0x3e8] sm:$0xf] }
 0x157   : > { %v8203_v37 = vadd.f32 %v3198_v22, %v3176_v55  ;;  %3532 = vmatmul.bf16.vlgmr.msra.gmra.mxu3 %v7400_v16  ;;  %3597 = vmatpush.bf16.msrb.mxu2 %v5404_v50  ;;  %v5516_v12 = vor.u32 %v6798_v46, %v5515_v1  ;;  %v6762_v50 = vld [vmem:[%s7195_s26 + $0x434] sm:$0xf0]  ;;  %9180 = vst [vmem:[#allocation20_spill] sm:$0xff] %v8222_v10  ;;  %v6091_v10 = vld [vmem:[%s7195_s26 + $0x9c8] sm:$0xf] }
 0x158   : > { %v3131_v15 = vpop.f32.mrf.mxu1  ;;  %v8211_v42 = vpop.f32.mrf.mxu2  ;;  %v5372_v23 = vor.u32 %v6762_v50, %v5371_v51  ;;  %v6758_v1 = vld [vmem:[%s7195_s26 + $0x414] sm:$0xf0] }
 0x159   : > { %9179 = vst [vmem:[#allocation19_spill] sm:$0xff] %v8203_v37  ;;  %v5499_v15 = vld [vmem:[%s7195_s26 + $0x528] sm:$0xf]  ;;  %v6754_v46 = vld [vmem:[%s7195_s26 + $0x3f4] sm:$0xf0] }
 0x15a   : > { %v3200_v18 = vpop.f32.mrf.mxu0  ;;  %v8213_v32 = vpop.f32.mrf.mxu3  ;;  %3620 = vmatpush.bf16.msrb.mxu3 %v5532_v56  ;;  %v6794_v56 = vld [vmem:[%s7195_s26 + $0x534] sm:$0xf0]  ;;  %v5340_v50 = vor.u32 %v6754_v46, %v5339_v40  ;;  %v5707_v46 = vld [vmem:[%s7195_s26 + $0x6c8] sm:$0xf] }
 0x15b   : > { %v7104_v22 = vpop.eup %7103  ;;  %3598 = vmatpush.bf16.msrb.mxu2 %v5388_v30  ;;  %v5500_v30 = vor.u32 %v6794_v56, %v5499_v15  ;;  %v5355_v18 = vld [vmem:[%s7195_s26 + $0x408] sm:$0xf]  ;;  %v6790_v15 = vld [vmem:[%s7195_s26 + $0x514] sm:$0xf0] }
 0x15c   : > { %v6457_v55 = vadd.f32 -1.0, %v7104_v22  ;;  %3570 = vmatpush.bf16.msra.mxu1 %v5340_v50 }
 0x15e   : > { %v8225_v35 = vsel %vm4111_vm4, %v8181_v61, %v6457_v55  ;;  %3621 = vmatpush.bf16.msrb.mxu3 %v5516_v12  ;;  %v5356_v61 = vor.u32 %v6758_v1, %v5355_v18  ;;  %v5723_v18 = vld [vmem:[%s7195_s26 + $0x6e8] sm:$0xf] }
 0x15f   : > { %9181 = vst [vmem:[#allocation21_spill] sm:$0xff] %v8225_v35  ;;  %3599 = vmatpush.bf16.msrb.mxu2 %v5372_v23  ;;  %v5483_v23 = vld [vmem:[%s7195_s26 + $0x508] sm:$0xf]  ;;  %v6942_v35 = vld [vmem:[%s7195_s26 + $0x9d4] sm:$0xf0] }
 0x160   : > { %v3211_v19 = vpop.f32.mrf.mxu1  ;;  %v8234_v43 = vpop.f32.mrf.mxu2  ;;  %v5484_v56 = vor.u32 %v6790_v15, %v5483_v23  ;;  %v5323_v1 = vld [vmem:[%s7195_s26 + $0x3c8] sm:$0xf]  ;;  %v6746_v15 = vld [vmem:[%s7195_s26 + $0x3b4] sm:$0xf0] }
 0x161   : > { %v3212_v22 = vadd.f32 %v3211_v19, %v7812_v11  ;;  %v5324_v40 = vor.u32 %v6750_v48, %v5323_v1  ;;  %v5307_v23 = vld [vmem:[%s7195_s26 + $0x3a8] sm:$0xf] }
 0x162   : > { %v8239_v12 = vpop.f32.mrf.mxu3  ;;  %v3280_v51 = vpop.f32.mrf.mxu0  ;;  %3622 = vmatpush.bf16.msrb.mxu3 %v5500_v30 }
 0x163   : > { %v3235_v55 = vadd.f32 %v8151_v62, %v3212_v22  ;;  %3404 = vmatmul.bf16.gmra.mxu1 %v7682_v13  ;;  %3600 = vmatpush.bf16.msrb.mxu2 %v5356_v61  ;;  %v6850_v62 = vld [vmem:[%s7195_s26 + $0x6f4] sm:$0xf0] }
 0x164   : > { %v5724_v22 = vor.u32 %v6850_v62, %v5723_v18  ;;  %3571 = vmatpush.bf16.msra.mxu1 %v5324_v40  ;;  %v5308_v18 = vor.u32 %v6746_v15, %v5307_v23  ;;  %v5691_v62 = vld [vmem:[%s7195_s26 + $0x6a8] sm:$0xf] }
 0x165   : > { %v3258_v19 = vadd.f32 %v8158_v58, %v3235_v55  ;;  %3473 = vmatmul.bf16.gmra.mxu0 %v7739_v49  ;;  %3514 = vmatmul.bf16.gmra.mxu2 %v7343_v24  ;;  %v6846_v55 = vld [vmem:[%s7195_s26 + $0x6d4] sm:$0xf0]  ;;  %v5675_v23 = vld [vmem:[%s7195_s26 + $0x688] sm:$0xf] }
 0x166   : > { %3623 = vmatpush.bf16.msrb.mxu3 %v5484_v56  ;;  %3639 = vmatpush.bf16.msra.mxu0 %v5724_v22  ;;  %v6842_v22 = vld [vmem:[%s7195_s26 + $0x6b4] sm:$0xf0] }
 0x167   : > { %v8250_v30 = vadd.f32 %v3280_v51, %v3258_v19  ;;  %3537 = vmatmul.bf16.gmra.mxu3 %v7458_v14  ;;  %v5708_v51 = vor.u32 %v6846_v55, %v5707_v46  ;;  %v5692_v1 = vor.u32 %v6842_v22, %v5691_v62  ;;  %v6742_v46 = vld [vmem:[%s7195_s26 + $0x394] sm:$0xf0] }
 0x168   : > { %v3213_v58 = vpop.f32.mrf.mxu1  ;;  %v8257_v50 = vpop.f32.mrf.mxu2  ;;  %3572 = vmatpush.bf16.msra.mxu1 %v5308_v18 }
 0x169   : > { %v3214_v61 = vadd.f32 %v3213_v58, %v7840_v59  ;;  %v5291_v58 = vld [vmem:[%s7195_s26 + $0x388] sm:$0xf] }
 0x16a   : > { %v8262_v56 = vpop.f32.mrf.mxu3  ;;  %v3282_v19 = vpop.f32.mrf.mxu0  ;;  %3640 = vmatpush.bf16.msra.mxu0 %v5708_v51  ;;  %v6838_v51 = vld [vmem:[%s7195_s26 + $0x694] sm:$0xf0] }
 0x16b   : > { %v3237_v48 = vadd.f32 %v8189_v31, %v3214_v61  ;;  %v5292_v31 = vor.u32 %v6742_v46, %v5291_v58  ;;  %v5676_v62 = vor.u32 %v6838_v51, %v5675_v23  ;;  %v5659_v46 = vld [vmem:[%s7195_s26 + $0x668] sm:$0xf]  ;;  %v9183_v23 = vld [vmem:[#allocation2_spill] sm:$0xff] }
 0x16d   : > { %v3260_v40 = vadd.f32 %v8194_v54, %v3237_v48  ;;  %3573 = vmatpush.bf16.msra.mxu1 %v5292_v31  ;;  %v5275_v54 = vld [vmem:[%s7195_s26 + $0x368] sm:$0xf]  ;;  %v6738_v48 = vld [vmem:[%s7195_s26 + $0x374] sm:$0xf0] }
 0x16e   : > { %3641 = vmatpush.bf16.msra.mxu0 %v5692_v1  ;;  %v9182_v1 = vld [vmem:[#allocation13_spill] sm:$0xff] }
 0x16f   : > { %v8269_v55 = vadd.f32 %v3282_v19, %v3260_v40  ;;  %v5276_v40 = vor.u32 %v6738_v48, %v5275_v54  ;;  %v6834_v31 = vld [vmem:[%s7195_s26 + $0x674] sm:$0xf0] }
 0x170   : > { %v3216_v61 = vpop.f32.mrf.mxu1  ;;  %v3246_v15 = vpop.f32.mrf.mxu2  ;;  %v5660_v51 = vor.u32 %v6834_v31, %v5659_v46  ;;  %v6946_v48 = vld [vmem:[%s7195_s26 + $0x9f4] sm:$0xf0]  ;;  %v5963_v31 = vld [vmem:[%s7195_s26 + $0x8c8] sm:$0xf] }
 0x171   : > { %v3217_v25 = vadd.f32 %v3216_v61, %v7865_v53  ;;  %3574 = vmatpush.bf16.msra.mxu1 %v5276_v40  ;;  %v5979_v61 = vld [vmem:[%s7195_s26 + $0x8e8] sm:$0xf]  ;;  %v6914_v15 = vld [vmem:[%s7195_s26 + $0x8f4] sm:$0xf0] }
 0x172   : > { %v3269_v18 = vpop.f32.mrf.mxu3  ;;  %v3285_v22 = vpop.f32.mrf.mxu0  ;;  %3642 = vmatpush.bf16.msra.mxu0 %v5676_v62  ;;  %v5980_v62 = vor.u32 %v6914_v15, %v5979_v61 }
 0x173   : > { %v3240_v19 = vadd.f32 %v8211_v42, %v3217_v25  ;;  %6436 = vmatmul.msk.bf16.vlgmr.msrb.gmra.mxu1 %vm2893_vm0, %v9182_v1  ;;  %v5259_v25 = vld [vmem:[%s7195_s26 + $0x348] sm:$0xf]  ;;  %v6734_v42 = vld [vmem:[%s7195_s26 + $0x354] sm:$0xf0] }
 0x174   : > { %v5260_v54 = vor.u32 %v6734_v42, %v5259_v25  ;;  %3685 = vmatpush.bf16.msra.mxu2 %v5980_v62  ;;  %v6910_v25 = vld [vmem:[%s7195_s26 + $0x8d4] sm:$0xf0]  ;;  %v5243_v42 = vld [vmem:[%s7195_s26 + $0x328] sm:$0xf] }
 0x175   : > { %v3263_v58 = vadd.f32 %v8213_v32, %v3240_v19  ;;  %3555 = vmatmul.bf16.vlgmr.msrb.gmra.mxu0 %v9183_v23  ;;  %3519 = vmatmul.bf16.gmra.mxu2 %v7280_v28  ;;  %v6107_v32 = vld [vmem:[%s7195_s26 + $0x9e8] sm:$0xf]  ;;  %v6878_v23 = vld [vmem:[%s7195_s26 + $0x7d4] sm:$0xf0] }
 0x176   : > { %3643 = vmatpush.bf16.msra.mxu0 %v5660_v51  ;;  %v6108_v40 = vor.u32 %v6946_v48, %v6107_v32  ;;  %3575 = vmatpush.bf16.msra.mxu1 %v5260_v54  ;;  %v6730_v51 = vld [vmem:[%s7195_s26 + $0x334] sm:$0xf0]  ;;  %v5964_v54 = vor.u32 %v6910_v25, %v5963_v31  ;;  %v5227_v25 = vld [vmem:[%s7195_s26 + $0x308] sm:$0xf] }
 0x177   : > { %v8287_v18 = vadd.f32 %v3285_v22, %v3263_v58  ;;  %3542 = vmatmul.bf16.gmra.mxu3 %v7517_v17  ;;  %v5643_v22 = vld [vmem:[%s7195_s26 + $0x648] sm:$0xf]  ;;  %v6830_v58 = vld [vmem:[%s7195_s26 + $0x654] sm:$0xf0] }
 0x178   : > { %v3218_v19 = vpop.f32.mrf.mxu1  ;;  %v8297_v61 = vpop.f32.mrf.mxu2  ;;  %3708 = vmatpush.bf16.msra.mxu3 %v6108_v40  ;;  %v5644_v15 = vor.u32 %v6830_v58, %v5643_v22  ;;  %v6092_v40 = vor.u32 %v6942_v35, %v6091_v10  ;;  %3686 = vmatpush.bf16.msra.mxu2 %v5964_v54  ;;  %v5627_v58 = vld [vmem:[%s7195_s26 + $0x628] sm:$0xf]  ;;  %v6906_v31 = vld [vmem:[%s7195_s26 + $0x8b4] sm:$0xf0] }
 0x179   : > { %v3219_v46 = vadd.f32 %v3218_v19, %v7887_v6  ;;  %v5244_v19 = vor.u32 %v6730_v51, %v5243_v42  ;;  %v6726_v42 = vld [vmem:[%s7195_s26 + $0x314] sm:$0xf0]  ;;  %v6075_v35 = vld [vmem:[%s7195_s26 + $0x9a8] sm:$0xf] }
 0x17a   : > { %v3287_v48 = vpop.f32.mrf.mxu0  ;;  %v8303_v62 = vpop.f32.mrf.mxu3  ;;  %3644 = vmatpush.bf16.msra.mxu0 %v5644_v15  ;;  %v5228_v10 = vor.u32 %v6726_v42, %v5227_v25  ;;  %v9184_v42 = vld [vmem:[#allocation15_spill] sm:$0xff] }
 0x17b   : > { %v3242_v32 = vadd.f32 %v8234_v43, %v3219_v46  ;;  %3576 = vmatpush.bf16.msra.mxu1 %v5244_v19  ;;  %v6826_v43 = vld [vmem:[%s7195_s26 + $0x634] sm:$0xf0]  ;;  %v5947_v46 = vld [vmem:[%s7195_s26 + $0x8a8] sm:$0xf] }
 0x17c   : > { %3709 = vmatpush.bf16.msra.mxu3 %v6092_v40  ;;  %v5628_v37 = vor.u32 %v6826_v43, %v5627_v58  ;;  %v5948_v15 = vor.u32 %v6906_v31, %v5947_v46  ;;  %v5611_v40 = vld [vmem:[%s7195_s26 + $0x608] sm:$0xf]  ;;  %v6822_v58 = vld [vmem:[%s7195_s26 + $0x614] sm:$0xf0] }
 0x17d   : > { %v3265_v22 = vadd.f32 %v8239_v12, %v3242_v32  ;;  %v6938_v12 = vld [vmem:[%s7195_s26 + $0x9b4] sm:$0xf0]  ;;  %v5931_v43 = vld [vmem:[%s7195_s26 + $0x888] sm:$0xf] }
 0x17e   : > { %3645 = vmatpush.bf16.msra.mxu0 %v5628_v37  ;;  %v6076_v54 = vor.u32 %v6938_v12, %v6075_v35  ;;  %3687 = vmatpush.bf16.msra.mxu2 %v5948_v15  ;;  %v6902_v46 = vld [vmem:[%s7195_s26 + $0x894] sm:$0xf0] }
 0x17f   : > { %v8314_v51 = vadd.f32 %v3287_v48, %v3265_v22  ;;  %3577 = vmatpush.bf16.msra.mxu1 %v5228_v10  ;;  %v5612_v22 = vor.u32 %v6822_v58, %v5611_v40  ;;  %v5932_v15 = vor.u32 %v6902_v46, %v5931_v43  ;;  %v6059_v10 = vld [vmem:[%s7195_s26 + $0x988] sm:$0xf]  ;;  %v6934_v35 = vld [vmem:[%s7195_s26 + $0x994] sm:$0xf0] }
 0x180   : > { %v3221_v32 = vpop.f32.mrf.mxu1  ;;  %v8322_v48 = vpop.f32.mrf.mxu2  ;;  %3710 = vmatpush.bf16.msra.mxu3 %v6076_v54  ;;  %v6060_v12 = vor.u32 %v6934_v35, %v6059_v10  ;;  %v5915_v54 = vld [vmem:[%s7195_s26 + $0x868] sm:$0xf] }
 0x181   : > { %v3222_v19 = vadd.f32 %v3221_v32, %v7922_v57  ;;  %v6043_v43 = vld [vmem:[%s7195_s26 + $0x968] sm:$0xf] }
 0x182   : > { %v3290_v37 = vpop.f32.mrf.mxu0  ;;  %v8326_v25 = vpop.f32.mrf.mxu3  ;;  %3646 = vmatpush.bf16.msra.mxu0 %v5612_v22  ;;  %3688 = vmatpush.bf16.msra.mxu2 %v5932_v15  ;;  %v6930_v22 = vld [vmem:[%s7195_s26 + $0x974] sm:$0xf0] }
 0x183   : > { %v3245_v31 = vadd.f32 %v8257_v50, %v3222_v19  ;;  %6437 = vmatmul.msk.bf16.gmra.mxu1 %vm2893_vm0, %v9184_v42  ;;  %v6898_v50 = vld [vmem:[%s7195_s26 + $0x874] sm:$0xf0]  ;;  %v9185_v19 = vld [vmem:[#allocation4_spill] sm:$0xff] }
 0x184   : > { %3711 = vmatpush.bf16.msra.mxu3 %v6060_v12  ;;  %v5916_v40 = vor.u32 %v6898_v50, %v5915_v54  ;;  %v6894_v15 = vld [vmem:[%s7195_s26 + $0x854] sm:$0xf0] }
 0x185   : > { %v3268_v32 = vadd.f32 %v8262_v56, %v3245_v31  ;;  %3560 = vmatmul.bf16.gmra.mxu0 %v9185_v19  ;;  %3601 = vmatmul.bf16.vlgmr.msrb.gmra.mxu2 %v7409_v29  ;;  %v6044_v56 = vor.u32 %v6930_v22, %v6043_v43  ;;  %v5899_v31 = vld [vmem:[%s7195_s26 + $0x848] sm:$0xf]  ;;  %v6926_v54 = vld [vmem:[%s7195_s26 + $0x954] sm:$0xf0] }
 0x186   : > { %3689 = vmatpush.bf16.msra.mxu2 %v5916_v40  ;;  %v5883_v43 = vld [vmem:[%s7195_s26 + $0x828] sm:$0xf]  ;;  %v6890_v40 = vld [vmem:[%s7195_s26 + $0x834] sm:$0xf0] }
 0x187   : > { %v8336_v58 = vadd.f32 %v3290_v37, %v3268_v32  ;;  %3624 = vmatmul.bf16.vlgmr.msrb.gmra.mxu3 %v7562_v60  ;;  %v5900_v37 = vor.u32 %v6894_v15, %v5899_v31  ;;  %v6027_v32 = vld [vmem:[%s7195_s26 + $0x948] sm:$0xf]  ;;  %v5884_v22 = vor.u32 %v6890_v40, %v5883_v43  ;;  %v9186_v40 = vld [vmem:[#allocation16_spill] sm:$0xff] }
 0x188   : > { %v3223_v46 = vpop.f32.mrf.mxu1  ;;  %v8344_v10 = vpop.f32.mrf.mxu2  ;;  %3712 = vmatpush.bf16.msra.mxu3 %v6044_v56  ;;  %v6028_v50 = vor.u32 %v6926_v54, %v6027_v32  ;;  %v5867_v15 = vld [vmem:[%s7195_s26 + $0x808] sm:$0xf]  ;;  %v6882_v54 = vld [vmem:[%s7195_s26 + $0x7f4] sm:$0xf0] }
 0x189   : > { %v6011_v46 = vld [vmem:[%s7195_s26 + $0x928] sm:$0xf] }
 0x18a   : > { %v3292_v35 = vpop.f32.mrf.mxu0  ;;  %v8346_v12 = vpop.f32.mrf.mxu3  ;;  %3690 = vmatpush.bf16.msra.mxu2 %v5900_v37  ;;  %v6012_v56 = vor.u32 %v6922_v7, %v6011_v46  ;;  %v5851_v32 = vld [vmem:[%s7195_s26 + $0x7e8] sm:$0xf] }
 0x18b   : > { %v6886_v35 = vld [vmem:[%s7195_s26 + $0x814] sm:$0xf0] }
 0x18c   : > { %3713 = vmatpush.bf16.msra.mxu3 %v6028_v50  ;;  %v5868_v37 = vor.u32 %v6886_v35, %v5867_v15  ;;  %v6235_v15 = vld [vmem:[%s7195_s26 + $0xae8] sm:$0xf] }
 0x18d   : > { %v5835_v35 = vld [vmem:[%s7195_s26 + $0x7c8] sm:$0xf] }
 0x18e   : > { %3691 = vmatpush.bf16.msra.mxu2 %v5884_v22  ;;  %v6918_v22 = vld [vmem:[%s7195_s26 + $0x914] sm:$0xf0] }
 0x190   : > { %v3303_v9 = vpop.f32.mrf.mxu1  ;;  %v8357_v19 = vpop.f32.mrf.mxu2  ;;  %3714 = vmatpush.bf16.msra.mxu3 %v6012_v56 }
 0x191   : > { %v3304_v31 = vadd.f32 %v3303_v9, %v8250_v30  ;;  %v5852_v9 = vor.u32 %v6882_v54, %v5851_v32  ;;  %v5995_v30 = vld [vmem:[%s7195_s26 + $0x908] sm:$0xf]  ;;  %v5836_v54 = vor.u32 %v6878_v23, %v5835_v35 }
 0x192   : > { %v8362_v43 = vpop.f32.mrf.mxu3  ;;  %v3372_v7 = vpop.f32.mrf.mxu0  ;;  %v5996_v46 = vor.u32 %v6918_v22, %v5995_v30  ;;  %3692 = vmatpush.bf16.msra.mxu2 %v5868_v37  ;;  %v5819_v22 = vld [vmem:[%s7195_s26 + $0x7a8] sm:$0xf] }
 0x193   : > { %v3327_v50 = vadd.f32 %v8297_v61, %v3304_v31  ;;  %6438 = vmatmul.msk.bf16.gmra.mxu1 %vm2893_vm0, %v9186_v40  ;;  %v6978_v61 = vld [vmem:[%s7195_s26 + $0xaf4] sm:$0xf0]  ;;  %v6203_v35 = vld [vmem:[%s7195_s26 + $0xaa8] sm:$0xf] }
 0x194   : > { %3662 = vmatpush.bf16.msrb.mxu1 %v5852_v9  ;;  %3715 = vmatpush.bf16.msra.mxu3 %v5996_v46  ;;  %v6236_v31 = vor.u32 %v6978_v61, %v6235_v15  ;;  %v6974_v9 = vld [vmem:[%s7195_s26 + $0xad4] sm:$0xf0] }
 0x195   : > { %v3350_v56 = vadd.f32 %v8303_v62, %v3327_v50  ;;  %3565 = vmatmul.bf16.gmra.mxu0 %v7412_v33  ;;  %3606 = vmatmul.bf16.gmra.mxu2 %v7477_v34  ;;  %v6219_v50 = vld [vmem:[%s7195_s26 + $0xac8] sm:$0xf]  ;;  %v6874_v46 = vld [vmem:[%s7195_s26 + $0x7b4] sm:$0xf0] }
 0x196   : > { %3731 = vmatpush.bf16.msrb.mxu0 %v6236_v31  ;;  %7067 = vmatpush.bf16.msrb.mxu2 %v6236_v31  ;;  %v5820_v61 = vor.u32 %v6874_v46, %v5819_v22  ;;  %v6187_v46 = vld [vmem:[%s7195_s26 + $0xa88] sm:$0xf] }
 0x197   : > { %v8374_v32 = vadd.f32 %v3372_v7, %v3350_v56  ;;  %3629 = vmatmul.bf16.gmra.mxu3 %v7612_v3  ;;  %v6220_v7 = vor.u32 %v6974_v9, %v6219_v50  ;;  %v6870_v50 = vld [vmem:[%s7195_s26 + $0x794] sm:$0xf0] }
 0x198   : > { %v3305_v62 = vpop.f32.mrf.mxu1  ;;  %3663 = vmatpush.bf16.msrb.mxu1 %v5836_v54  ;;  %v8381_v30 = vpop.f32.mrf.mxu2 }
 0x199   : > { %v3306_v37 = vadd.f32 %v3305_v62, %v8269_v55  ;;  %v6970_v55 = vld [vmem:[%s7195_s26 + $0xab4] sm:$0xf0]  ;;  %v5803_v62 = vld [vmem:[%s7195_s26 + $0x788] sm:$0xf] }
 0x19a   : > { %v8386_v56 = vpop.f32.mrf.mxu3  ;;  %v3374_v15 = vpop.f32.mrf.mxu0  ;;  %3732 = vmatpush.bf16.msrb.mxu0 %v6220_v7  ;;  %v6204_v54 = vor.u32 %v6970_v55, %v6203_v35  ;;  %7068 = vmatpush.bf16.msrb.mxu2 %v6220_v7  ;;  %v6966_v35 = vld [vmem:[%s7195_s26 + $0xa94] sm:$0xf0] }
 0x19b   : > { %v3329_v23 = vadd.f32 %v8322_v48, %v3306_v37  ;;  %v5804_v48 = vor.u32 %v6870_v50, %v5803_v62  ;;  %v6866_v7 = vld [vmem:[%s7195_s26 + $0x774] sm:$0xf0]  ;;  %v9187_v62 = vld [vmem:[#allocation3_spill] sm:$0xff] }
 0x19c   : > { %3664 = vmatpush.bf16.msrb.mxu1 %v5820_v61  ;;  %v5787_v61 = vld [vmem:[%s7195_s26 + $0x768] sm:$0xf] }
 0x19d   : > { %v3352_v31 = vadd.f32 %v8326_v25, %v3329_v23  ;;  %v6188_v23 = vor.u32 %v6966_v35, %v6187_v46 }
 0x19e   : > { %3733 = vmatpush.bf16.msrb.mxu0 %v6204_v54  ;;  %7069 = vmatpush.bf16.msrb.mxu2 %v6204_v54  ;;  %v6171_v54 = vld [vmem:[%s7195_s26 + $0xa68] sm:$0xf] }
 0x19f   : > { %v8393_v9 = vadd.f32 %v3374_v15, %v3352_v31 }
 0x1a0   : > { %v3308_v37 = vpop.f32.mrf.mxu1  ;;  %3665 = vmatpush.bf16.msrb.mxu1 %v5804_v48  ;;  %v3338_v25 = vpop.f32.mrf.mxu2  ;;  %v6962_v48 = vld [vmem:[%s7195_s26 + $0xa74] sm:$0xf0] }
 0x1a1   : > { %v3309_v22 = vadd.f32 %v3308_v37, %v8287_v18  ;;  %v5788_v18 = vor.u32 %v6866_v7, %v5787_v61  ;;  %v6172_v37 = vor.u32 %v6962_v48, %v6171_v54  ;;  %v6656_v25 = vld [vmem:[%s7195_s26 + $0xec] sm:$0xf]  ;;  %v6858_v54 = vld [vmem:[%s7195_s26 + $0x734] sm:$0xf0] }
 0x1a2   : > { %v3361_v55 = vpop.f32.mrf.mxu3  ;;  %v3377_v31 = vpop.f32.mrf.mxu0  ;;  %3734 = vmatpush.bf16.msrb.mxu0 %v6188_v23  ;;  %7070 = vmatpush.bf16.msrb.mxu2 %v6188_v23 }
 0x1a3   : > { %v3332_v15 = vadd.f32 %v8344_v10, %v3309_v22  ;;  %3578 = vmatmul.bf16.vlgmr.msra.gmra.mxu1 %v9187_v62  ;;  %v5771_v10 = vld [vmem:[%s7195_s26 + $0x748] sm:$0xf]  ;;  %v6862_v22 = vld [vmem:[%s7195_s26 + $0x754] sm:$0xf0] }
 0x1a4   : > { %3666 = vmatpush.bf16.msrb.mxu1 %v5788_v18  ;;  %v5772_v35 = vor.u32 %v6862_v22, %v5771_v10  ;;  %v6958_v55 = vld [vmem:[%s7195_s26 + $0xa54] sm:$0xf0] }
 0x1a5   : > { %v3355_v50 = vadd.f32 %v8346_v12, %v3332_v15  ;;  %3647 = vmatmul.bf16.vlgmr.msra.gmra.mxu0 %v7482_v41  ;;  %3611 = vmatmul.bf16.gmra.mxu2 %v7533_v26  ;;  %v4957_v12 = vld [vmem:[%s7195_s26 + $0xf8] sm:$0xf0]  ;;  %v6155_v15 = vld [vmem:[%s7195_s26 + $0xa48] sm:$0xf] }
 0x1a6   : > { %3735 = vmatpush.bf16.msrb.mxu0 %v6172_v37  ;;  %v4960_v23 = vor.u32 %v6656_v25, %v4957_v12  ;;  %7071 = vmatpush.bf16.msrb.mxu2 %v6172_v37  ;;  %v6156_v18 = vor.u32 %v6958_v55, %v6155_v15  ;;  %v4941_v37 = vld [vmem:[%s7195_s26 + $0xd8] sm:$0xf0]  ;;  %v6854_v15 = vld [vmem:[%s7195_s26 + $0x714] sm:$0xf0] }
 0x1a7   : > { %v8408_v46 = vadd.f32 %v3377_v31, %v3355_v50  ;;  %3634 = vmatmul.bf16.gmra.mxu3 %v7665_v63  ;;  %v5755_v50 = vld [vmem:[%s7195_s26 + $0x728] sm:$0xf]  ;;  %v4925_v41 = vld [vmem:[%s7195_s26 + $0xb8] sm:$0xf0] }
 0x1a8   : > { %v3310_v61 = vpop.f32.mrf.mxu1  ;;  %3667 = vmatpush.bf16.msrb.mxu1 %v5772_v35  ;;  %v8417_v31 = vpop.f32.mrf.mxu2  ;;  %3800 = vmatpush.bf16.msrb.mxu3 %v4960_v23  ;;  %v6652_v35 = vld [vmem:[%s7195_s26 + $0xcc] sm:$0xf]  ;;  %v6954_v23 = vld [vmem:[%s7195_s26 + $0xa34] sm:$0xf0] }
 0x1a9   : > { %v3311_v7 = vadd.f32 %v3310_v61, %v8314_v51  ;;  %v5756_v51 = vor.u32 %v6858_v54, %v5755_v50  ;;  %v4944_v25 = vor.u32 %v6652_v35, %v4941_v37  ;;  %v6139_v61 = vld [vmem:[%s7195_s26 + $0xa28] sm:$0xf]  ;;  %v6648_v54 = vld [vmem:[%s7195_s26 + $0xac] sm:$0xf] }
 0x1aa   : > { %v3379_v10 = vpop.f32.mrf.mxu0  ;;  %v8422_v22 = vpop.f32.mrf.mxu3  ;;  %3736 = vmatpush.bf16.msrb.mxu0 %v6156_v18  ;;  %7072 = vmatpush.bf16.msrb.mxu2 %v6156_v18  ;;  %v6950_v18 = vld [vmem:[%s7195_s26 + $0xa14] sm:$0xf0] }
 0x1ab   : > { %v3334_v48 = vadd.f32 %v8357_v19, %v3311_v7  ;;  %v6140_v19 = vor.u32 %v6954_v23, %v6139_v61  ;;  %v5739_v7 = vld [vmem:[%s7195_s26 + $0x708] sm:$0xf]  ;;  %v6688_v23 = vld [vmem:[%s7195_s26 + $0x1ec] sm:$0xf] }
 0x1ac   : > { %3668 = vmatpush.bf16.msrb.mxu1 %v5756_v51  ;;  %3801 = vmatpush.bf16.msrb.mxu3 %v4944_v25  ;;  %v5740_v50 = vor.u32 %v6854_v15, %v5739_v7  ;;  %v6123_v51 = vld [vmem:[%s7195_s26 + $0xa08] sm:$0xf]  ;;  %v6640_v15 = vld [vmem:[%s7195_s26 + $0x6c] sm:$0xf] }
 0x1ad   : > { %v3357_v12 = vadd.f32 %v8362_v43, %v3334_v48  ;;  %v4928_v43 = vor.u32 %v6648_v54, %v4925_v41  ;;  %v4909_v41 = vld [vmem:[%s7195_s26 + $0x98] sm:$0xf0] }
 0x1ae   : > { %3737 = vmatpush.bf16.msrb.mxu0 %v6140_v19  ;;  %7073 = vmatpush.bf16.msrb.mxu2 %v6140_v19  ;;  %v5085_v19 = vld [vmem:[%s7195_s26 + $0x1f8] sm:$0xf0] }
 0x1af   : > { %v8431_v55 = vadd.f32 %v3379_v10, %v3357_v12  ;;  %v6124_v10 = vor.u32 %v6950_v18, %v6123_v51 }
 0x1b0   : > { %v3313_v33 = vpop.f32.mrf.mxu1  ;;  %3669 = vmatpush.bf16.msrb.mxu1 %v5740_v50  ;;  %v8438_v35 = vpop.f32.mrf.mxu2  ;;  %3802 = vmatpush.bf16.msrb.mxu3 %v4928_v43  ;;  %v4893_v50 = vld [vmem:[%s7195_s26 + $0x78] sm:$0xf0]  ;;  %v6684_v43 = vld [vmem:[%s7195_s26 + $0x1cc] sm:$0xf] }
 0x1b1   : > { %v3314_v48 = vadd.f32 %v3313_v33, %v8336_v58  ;;  %v6644_v33 = vld [vmem:[%s7195_s26 + $0x8c] sm:$0xf] }
 0x1b2   : > { %v3382_v25 = vpop.f32.mrf.mxu0  ;;  %v8441_v12 = vpop.f32.mrf.mxu3  ;;  %3738 = vmatpush.bf16.msrb.mxu0 %v6124_v10  ;;  %v4912_v58 = vor.u32 %v6644_v33, %v4909_v41  ;;  %7074 = vmatpush.bf16.msrb.mxu2 %v6124_v10  ;;  %v4877_v33 = vld [vmem:[%s7195_s26 + $0x58] sm:$0xf0] }
 0x1b3   : > { %v3337_v37 = vadd.f32 %v8381_v30, %v3314_v48  ;;  %3583 = vmatmul.bf16.gmra.mxu1 %v7353_v36  ;;  %v5088_v30 = vor.u32 %v6688_v23, %v5085_v19  ;;  %v5069_v48 = vld [vmem:[%s7195_s26 + $0x1d8] sm:$0xf0]  ;;  %v6632_v19 = vld [vmem:[%s7195_s26 + $0x2c] sm:$0xf] }
 0x1b4   : > { %3803 = vmatpush.bf16.msrb.mxu3 %v4912_v58  ;;  %v5072_v18 = vor.u32 %v6684_v43, %v5069_v48  ;;  %v6680_v58 = vld [vmem:[%s7195_s26 + $0x1ac] sm:$0xf]  ;;  %v5037_v43 = vld [vmem:[%s7195_s26 + $0x198] sm:$0xf0] }
 0x1b5   : > { %v3360_v61 = vadd.f32 %v8386_v56, %v3337_v37  ;;  %3652 = vmatmul.bf16.gmra.mxu0 %v7538_v39  ;;  %3693 = vmatmul.bf16.vlgmr.msra.gmra.mxu2 %v7570_v2  ;;  %v4896_v56 = vor.u32 %v6640_v15, %v4893_v50  ;;  %v6347_v39 = vld [vmem:[%s7195_s26 + $0xbc8] sm:$0xf] }
 0x1b6   : > { %3823 = vmatpush.bf16.msra.mxu0 %v5088_v30  ;;  %v4861_v30 = vld [vmem:[%s7195_s26 + $0x38] sm:$0xf0] }
 0x1b7   : > { %v8450_v7 = vadd.f32 %v3382_v25, %v3360_v61  ;;  %3716 = vmatmul.bf16.vlgmr.msra.gmra.mxu3 %v7718_v8  ;;  %v6636_v25 = vld [vmem:[%s7195_s26 + $0x4c] sm:$0xf]  ;;  %v5053_v61 = vld [vmem:[%s7195_s26 + $0x1b8] sm:$0xf0]  ;;  %v4864_v50 = vor.u32 %v6632_v19, %v4861_v30 }
 0x1b8   : > { %v3315_v54 = vpop.f32.mrf.mxu1  ;;  %v8458_v51 = vpop.f32.mrf.mxu2  ;;  %3804 = vmatpush.bf16.msrb.mxu3 %v4896_v56  ;;  %v4880_v41 = vor.u32 %v6636_v25, %v4877_v33  ;;  %v5056_v23 = vor.u32 %v6680_v58, %v5053_v61  ;;  %v6676_v56 = vld [vmem:[%s7195_s26 + $0x18c] sm:$0xf]  ;;  %v7010_v25 = vld [vmem:[%s7195_s26 + $0xbf4] sm:$0xf0]  ;;  %v9188_v61 = vld [vmem:[#allocation6_spill] sm:$0xff] }
 0x1b9   : > { %v4845_v19 = vld [vmem:[%s7195_s26 + $0x18] sm:$0xf0] }
 0x1ba   : > { %v3384_v10 = vpop.f32.mrf.mxu0  ;;  %v8460_v37 = vpop.f32.mrf.mxu3  ;;  %3824 = vmatpush.bf16.msra.mxu0 %v5072_v18  ;;  %v5040_v18 = vor.u32 %v6676_v56, %v5037_v43  ;;  %v7026_v56 = vld [vmem:[%s7195_s26 + $0xc74] sm:$0xf0]  ;;  %v6672_v43 = vld [vmem:[%s7195_s26 + $0x16c] sm:$0xf] }
 0x1bb   : > { %v6363_v10 = vld [vmem:[%s7195_s26 + $0xbe8] sm:$0xf] }
 0x1bc   : > { %3805 = vmatpush.bf16.msrb.mxu3 %v4880_v41 }
 0x1be   : > { %3825 = vmatpush.bf16.msra.mxu0 %v5056_v23  ;;  %v6628_v23 = vld [vmem:[%s7195_s26 + $0xc] sm:$0xf] }
 0x1bf   : > { %v4848_v30 = vor.u32 %v6628_v23, %v4845_v19  ;;  %v6411_v23 = vld [vmem:[%s7195_s26 + $0xc48] sm:$0xf]  ;;  %v7022_v19 = vld [vmem:[%s7195_s26 + $0xc54] sm:$0xf0] }
 0x1c0   : > { %v3395_v15 = vpop.f32.mrf.mxu1  ;;  %v8471_v48 = vpop.f32.mrf.mxu2  ;;  %3806 = vmatpush.bf16.msrb.mxu3 %v4864_v50  ;;  %v6427_v50 = vld [vmem:[%s7195_s26 + $0xc68] sm:$0xf] }
 0x1c1   : > { %v3396_v54 = vadd.f32 %v3395_v15, %v8374_v32  ;;  %v6364_v32 = vor.u32 %v7010_v25, %v6363_v10  ;;  %v7006_v10 = vld [vmem:[%s7195_s26 + $0xbd4] sm:$0xf0] }
 0x1c2   : > { %v8476_v41 = vpop.f32.mrf.mxu3  ;;  %v3464_v58 = vpop.f32.mrf.mxu0  ;;  %3826 = vmatpush.bf16.msra.mxu0 %v5040_v18  ;;  %v6348_v18 = vor.u32 %v7006_v10, %v6347_v39  ;;  %v6331_v39 = vld [vmem:[%s7195_s26 + $0xba8] sm:$0xf] }
 0x1c3   : > { %v3419_v33 = vadd.f32 %v8417_v31, %v3396_v54  ;;  %3588 = vmatmul.bf16.gmra.mxu1 %v9188_v61  ;;  %v6428_v31 = vor.u32 %v7026_v56, %v6427_v50  ;;  %v5021_v54 = vld [vmem:[%s7195_s26 + $0x178] sm:$0xf0]  ;;  %v7002_v56 = vld [vmem:[%s7195_s26 + $0xbb4] sm:$0xf0] }
 0x1c4   : > { %3754 = vmatpush.bf16.msra.mxu1 %v6364_v32  ;;  %3807 = vmatpush.bf16.msrb.mxu3 %v4848_v30  ;;  %v6668_v30 = vld [vmem:[%s7195_s26 + $0x14c] sm:$0xf]  ;;  %v5005_v50 = vld [vmem:[%s7195_s26 + $0x158] sm:$0xf0]  ;;  %v6332_v10 = vor.u32 %v7002_v56, %v6331_v39  ;;  %v6379_v56 = vld [vmem:[%s7195_s26 + $0xc08] sm:$0xf] }
 0x1c5   : > { %v3442_v15 = vadd.f32 %v8422_v22, %v3419_v33  ;;  %3657 = vmatmul.bf16.gmra.mxu0 %v7575_v5  ;;  %3698 = vmatmul.bf16.gmra.mxu2 %v7633_v0  ;;  %v5024_v22 = vor.u32 %v6672_v43, %v5021_v54  ;;  %v5008_v54 = vor.u32 %v6668_v30, %v5005_v50  ;;  %v4989_v5 = vld [vmem:[%s7195_s26 + $0x138] sm:$0xf0]  ;;  %v6994_v0 = vld [vmem:[%s7195_s26 + $0xb74] sm:$0xf0] }
 0x1c6   : > { %3781 = vmatpush.bf16.msra.mxu2 %v6428_v31 }
 0x1c7   : > { %v8489_v25 = vadd.f32 %v3464_v58, %v3442_v15  ;;  %3721 = vmatmul.bf16.gmra.mxu3 %v7782_v4  ;;  %3827 = vmatpush.bf16.msra.mxu0 %v5024_v22  ;;  %v6412_v15 = vor.u32 %v7022_v19, %v6411_v23  ;;  %v6664_v23 = vld [vmem:[%s7195_s26 + $0x12c] sm:$0xf]  ;;  %v6299_v4 = vld [vmem:[%s7195_s26 + $0xb68] sm:$0xf] }
 0x1c8   : > { %v3397_v33 = vpop.f32.mrf.mxu1  ;;  %3755 = vmatpush.bf16.msra.mxu1 %v6348_v18  ;;  %v8497_v58 = vpop.f32.mrf.mxu2  ;;  %v6395_v18 = vld [vmem:[%s7195_s26 + $0xc28] sm:$0xf] }
 0x1c9   : > { %v3398_v32 = vadd.f32 %v3397_v33, %v8393_v9  ;;  %v7018_v33 = vld [vmem:[%s7195_s26 + $0xc34] sm:$0xf0] }
 0x1ca   : > { %v8503_v9 = vpop.f32.mrf.mxu3  ;;  %v3466_v31 = vpop.f32.mrf.mxu0  ;;  %3782 = vmatpush.bf16.msra.mxu2 %v6412_v15  ;;  %v6396_v19 = vor.u32 %v7018_v33, %v6395_v18  ;;  %v4992_v15 = vor.u32 %v6664_v23, %v4989_v5  ;;  %v4973_v33 = vld [vmem:[%s7195_s26 + $0x118] sm:$0xf0]  ;;  %v6300_v23 = vor.u32 %v6994_v0, %v6299_v4 }
 0x1cb   : > { %v3421_v43 = vadd.f32 %v8438_v35, %v3398_v32  ;;  %3828 = vmatpush.bf16.msra.mxu0 %v5008_v54  ;;  %v6315_v35 = vld [vmem:[%s7195_s26 + $0xb88] sm:$0xf]  ;;  %v6998_v32 = vld [vmem:[%s7195_s26 + $0xb94] sm:$0xf0]  ;;  %v6660_v54 = vld [vmem:[%s7195_s26 + $0x10c] sm:$0xf] }
 0x1cc   : > { %3756 = vmatpush.bf16.msra.mxu1 %v6332_v10  ;;  %v6316_v50 = vor.u32 %v6998_v32, %v6315_v35  ;;  %v6283_v35 = vld [vmem:[%s7195_s26 + $0xb48] sm:$0xf]  ;;  %v6990_v32 = vld [vmem:[%s7195_s26 + $0xb54] sm:$0xf0] }
 0x1cd   : > { %v3444_v22 = vadd.f32 %v8441_v12, %v3421_v43  ;;  %v7014_v43 = vld [vmem:[%s7195_s26 + $0xc14] sm:$0xf0] }
 0x1ce   : > { %3783 = vmatpush.bf16.msra.mxu2 %v6396_v19  ;;  %v6380_v18 = vor.u32 %v7014_v43, %v6379_v56  ;;  %v6267_v56 = vld [vmem:[%s7195_s26 + $0xb28] sm:$0xf]  ;;  %v6986_v43 = vld [vmem:[%s7195_s26 + $0xb34] sm:$0xf0] }
 0x1cf   : > { %v8512_v30 = vadd.f32 %v3466_v31, %v3444_v22  ;;  %3829 = vmatpush.bf16.msra.mxu0 %v4992_v15  ;;  %v6284_v15 = vor.u32 %v6990_v32, %v6283_v35  ;;  %v6982_v35 = vld [vmem:[%s7195_s26 + $0xb14] sm:$0xf0] }
 0x1d0   : > { %v3400_v12 = vpop.f32.mrf.mxu1  ;;  %3757 = vmatpush.bf16.msra.mxu1 %v6316_v50  ;;  %v3430_v10 = vpop.f32.mrf.mxu2  ;;  %v6784_v50 = vld [vmem:[%s7195_s26 + $0x4ec] sm:$0xf] }
 0x1d1   : > { %v3401_v39 = vadd.f32 %v3400_v12, %v8408_v46  ;;  %v4976_v46 = vor.u32 %v6660_v54, %v4973_v33  ;;  %v5469_v12 = vld [vmem:[%s7195_s26 + $0x4f8] sm:$0xf0] }
 0x1d2   : > { %v3453_v5 = vpop.f32.mrf.mxu3  ;;  %v3469_v22 = vpop.f32.mrf.mxu0  ;;  %3784 = vmatpush.bf16.msra.mxu2 %v6380_v18  ;;  %v5472_v4 = vor.u32 %v6784_v50, %v5469_v12  ;;  %v5437_v50 = vld [vmem:[%s7195_s26 + $0x4b8] sm:$0xf0] }
 0x1d3   : > { %v3424_v31 = vadd.f32 %v8458_v51, %v3401_v39  ;;  %3670 = vmatmul.bf16.vlgmr.msrb.gmra.mxu1 %v7487_v47  ;;  %3830 = vmatpush.bf16.msra.mxu0 %v4976_v46  ;;  %v6780_v5 = vld [vmem:[%s7195_s26 + $0x4cc] sm:$0xf] }
 0x1d4   : > { %3758 = vmatpush.bf16.msra.mxu1 %v6300_v23  ;;  %3892 = vmatpush.bf16.msra.mxu3 %v5472_v4 }
 0x1d5   : > { %v3447_v19 = vadd.f32 %v8460_v37, %v3424_v31  ;;  %3739 = vmatmul.bf16.vlgmr.msrb.gmra.mxu0 %v7639_v21  ;;  %3703 = vmatmul.bf16.gmra.mxu2 %v7682_v13  ;;  %v6268_v31 = vor.u32 %v6986_v43, %v6267_v56 }
 0x1d7   : > { %v8527_v51 = vadd.f32 %v3469_v22, %v3447_v19  ;;  %3726 = vmatmul.bf16.gmra.mxu3 %v7832_v52  ;;  %v5453_v22 = vld [vmem:[%s7195_s26 + $0x4d8] sm:$0xf0]  ;;  %v6251_v19 = vld [vmem:[%s7195_s26 + $0xb08] sm:$0xf] }
 0x1d8   : > { %v3402_v0 = vpop.f32.mrf.mxu1  ;;  %3759 = vmatpush.bf16.msra.mxu1 %v6284_v15  ;;  %v3510_v39 = vpop.f32.mrf.mxu2  ;;  %v5456_v46 = vor.u32 %v6780_v5, %v5453_v22  ;;  %v6252_v32 = vor.u32 %v6982_v35, %v6251_v19  ;;  %v6776_v15 = vld [vmem:[%s7195_s26 + $0x4ac] sm:$0xf]  ;;  %v5341_v5 = vld [vmem:[%s7195_s26 + $0x3f8] sm:$0xf0] }
 0x1d9   : > { %v3403_v37 = vadd.f32 %v3402_v0, %v8431_v55  ;;  %v3511_v10 = vadd.f32 %v3510_v39, %v7812_v11  ;;  %v5440_v0 = vor.u32 %v6776_v15, %v5437_v50  ;;  %v5405_v35 = vld [vmem:[%s7195_s26 + $0x478] sm:$0xf0]  ;;  %v6748_v50 = vld [vmem:[%s7195_s26 + $0x3cc] sm:$0xf] }
 0x1da   : > { %v3471_v18 = vpop.f32.mrf.mxu0  ;;  %v3533_v33 = vpop.f32.mrf.mxu3  ;;  %3893 = vmatpush.bf16.msra.mxu3 %v5456_v46  ;;  %v5597_v46 = vld [vmem:[%s7195_s26 + $0x5f8] sm:$0xf0] }
 0x1db   : > { %v3426_v54 = vadd.f32 %v8471_v48, %v3403_v37  ;;  %v8541_v23 = vadd.f32 %v3533_v33, %v3511_v10  ;;  %v5421_v10 = vld [vmem:[%s7195_s26 + $0x498] sm:$0xf0] }
 0x1dc   : > { %3760 = vmatpush.bf16.msra.mxu1 %v6268_v31  ;;  %v6752_v31 = vld [vmem:[%s7195_s26 + $0x3ec] sm:$0xf] }
 0x1dd   : > { %v3449_v55 = vadd.f32 %v8476_v41, %v3426_v54  ;;  %v6772_v54 = vld [vmem:[%s7195_s26 + $0x48c] sm:$0xf]  ;;  %v5344_v22 = vor.u32 %v6752_v31, %v5341_v5  ;;  %v5309_v5 = vld [vmem:[%s7195_s26 + $0x3b8] sm:$0xf0] }
 0x1de   : > { %3894 = vmatpush.bf16.msra.mxu3 %v5440_v0  ;;  %v6812_v0 = vld [vmem:[%s7195_s26 + $0x5cc] sm:$0xf] }
 0x1df   : > { %v8545_v48 = vadd.f32 %v3471_v18, %v3449_v55  ;;  %v5424_v18 = vor.u32 %v6772_v54, %v5421_v10  ;;  %v6764_v54 = vld [vmem:[%s7195_s26 + $0x44c] sm:$0xf]  ;;  %v5389_v10 = vld [vmem:[%s7195_s26 + $0x458] sm:$0xf0] }
 0x1e0   : > { %v3405_v12 = vpop.f32.mrf.mxu1  ;;  %3761 = vmatpush.bf16.msra.mxu1 %v6252_v32  ;;  %v3512_v41 = vpop.f32.mrf.mxu2  ;;  %v6744_v31 = vld [vmem:[%s7195_s26 + $0x3ac] sm:$0xf] }
 0x1e1   : > { %v3406_v4 = vadd.f32 %v3405_v12, %v8450_v7  ;;  %v3513_v39 = vadd.f32 %v3512_v41, %v7840_v59  ;;  %v5325_v12 = vld [vmem:[%s7195_s26 + $0x3d8] sm:$0xf0] }
 0x1e2   : > { %v3474_v56 = vpop.f32.mrf.mxu0  ;;  %v3535_v43 = vpop.f32.mrf.mxu3  ;;  %3895 = vmatpush.bf16.msra.mxu3 %v5424_v18  ;;  %v5328_v41 = vor.u32 %v6748_v50, %v5325_v12  ;;  %v5392_v18 = vor.u32 %v6764_v54, %v5389_v10  ;;  %v6740_v12 = vld [vmem:[%s7195_s26 + $0x38c] sm:$0xf] }
 0x1e3   : > { %v3429_v37 = vadd.f32 %v8497_v58, %v3406_v4  ;;  %3675 = vmatmul.bf16.gmra.mxu1 %v7542_v45  ;;  %v8556_v33 = vadd.f32 %v3535_v43, %v3513_v39  ;;  %v6816_v58 = vld [vmem:[%s7195_s26 + $0x5ec] sm:$0xf] }
 0x1e4   : > { %v5600_v19 = vor.u32 %v6816_v58, %v5597_v46  ;;  %v6808_v58 = vld [vmem:[%s7195_s26 + $0x5ac] sm:$0xf]  ;;  %v5565_v46 = vld [vmem:[%s7195_s26 + $0x5b8] sm:$0xf0] }
 0x1e5   : > { %v3452_v7 = vadd.f32 %v8503_v9, %v3429_v37  ;;  %3744 = vmatmul.bf16.gmra.mxu0 %v7688_v20  ;;  %3749 = vmatmul.bf16.vlgmr.msrb.gmra.mxu2 %v7735_v44  ;;  %v6768_v9 = vld [vmem:[%s7195_s26 + $0x46c] sm:$0xf]  ;;  %v5581_v37 = vld [vmem:[%s7195_s26 + $0x5d8] sm:$0xf0] }
 0x1e6   : > { %3869 = vmatpush.bf16.msrb.mxu2 %v5344_v22  ;;  %v5408_v15 = vor.u32 %v6768_v9, %v5405_v35  ;;  %3915 = vmatpush.bf16.msrb.mxu0 %v5600_v19  ;;  %v5584_v43 = vor.u32 %v6812_v0, %v5581_v37  ;;  %v5312_v22 = vor.u32 %v6744_v31, %v5309_v5  ;;  %v6760_v9 = vld [vmem:[%s7195_s26 + $0x42c] sm:$0xf]  ;;  %v5373_v35 = vld [vmem:[%s7195_s26 + $0x438] sm:$0xf0] }
 0x1e7   : > { %v8563_v55 = vadd.f32 %v3474_v56, %v3452_v7  ;;  %3808 = vmatmul.bf16.vlgmr.msrb.gmra.mxu3 %v7278_v27  ;;  %v5568_v19 = vor.u32 %v6808_v58, %v5565_v46  ;;  %v5293_v0 = vld [vmem:[%s7195_s26 + $0x398] sm:$0xf0]  ;;  %v6756_v5 = vld [vmem:[%s7195_s26 + $0x40c] sm:$0xf] }
 0x1e8   : > { %v3407_v32 = vpop.f32.mrf.mxu1  ;;  %v3515_v4 = vpop.f32.mrf.mxu2  ;;  %3896 = vmatpush.bf16.msra.mxu3 %v5408_v15  ;;  %v5376_v15 = vor.u32 %v6760_v9, %v5373_v35  ;;  %v5296_v37 = vor.u32 %v6740_v12, %v5293_v0  ;;  %v5357_v58 = vld [vmem:[%s7195_s26 + $0x418] sm:$0xf0]  ;;  %v6736_v35 = vld [vmem:[%s7195_s26 + $0x36c] sm:$0xf] }
 0x1e9   : > { %v3516_v39 = vadd.f32 %v3515_v4, %v7865_v53  ;;  %v6804_v4 = vld [vmem:[%s7195_s26 + $0x58c] sm:$0xf]  ;;  %v5533_v0 = vld [vmem:[%s7195_s26 + $0x578] sm:$0xf0] }
 0x1ea   : > { %v3476_v56 = vpop.f32.mrf.mxu0  ;;  %v3538_v27 = vpop.f32.mrf.mxu3  ;;  %3870 = vmatpush.bf16.msrb.mxu2 %v5328_v41  ;;  %3916 = vmatpush.bf16.msrb.mxu0 %v5584_v43  ;;  %v6800_v12 = vld [vmem:[%s7195_s26 + $0x56c] sm:$0xf] }
 0x1eb   : > { %v8576_v7 = vadd.f32 %v3538_v27, %v3516_v39  ;;  %v5549_v39 = vld [vmem:[%s7195_s26 + $0x598] sm:$0xf0]  ;;  %v6720_v56 = vld [vmem:[%s7195_s26 + $0x2ec] sm:$0xf] }
 0x1ec   : > { %3897 = vmatpush.bf16.msra.mxu3 %v5392_v18  ;;  %v5213_v27 = vld [vmem:[%s7195_s26 + $0x2f8] sm:$0xf0]  ;;  %v9189_v18 = vld [vmem:[#allocation10_spill] sm:$0xff]  ;;  %v5552_v31 = vor.u32 %v6804_v4, %v5549_v39 }
 0x1ed   : > { %v5216_v46 = vor.u32 %v6720_v56, %v5213_v27  ;;  %v6732_v27 = vld [vmem:[%s7195_s26 + $0x34c] sm:$0xf] }
 0x1ee   : > { %3871 = vmatpush.bf16.msrb.mxu2 %v5312_v22  ;;  %3917 = vmatpush.bf16.msrb.mxu0 %v5568_v19  ;;  %v5360_v19 = vor.u32 %v6756_v5, %v5357_v58  ;;  %v6712_v5 = vld [vmem:[%s7195_s26 + $0x2ac] sm:$0xf]  ;;  %v5181_v58 = vld [vmem:[%s7195_s26 + $0x2b8] sm:$0xf0] }
 0x1ef   : > { %3846 = vmatpush.bf16.msrb.mxu1 %v5216_v46 }
 0x1f0   : > { %v3487_v32 = vpop.f32.mrf.mxu1  ;;  %v3517_v41 = vpop.f32.mrf.mxu2  ;;  %3898 = vmatpush.bf16.msra.mxu3 %v5376_v15 }
 0x1f1   : > { %v8585_v50 = vadd.f32 %v3487_v32, %v8489_v25  ;;  %v3518_v54 = vadd.f32 %v3517_v41, %v7887_v6  ;;  %v5277_v32 = vld [vmem:[%s7195_s26 + $0x378] sm:$0xf0]  ;;  %v5536_v41 = vor.u32 %v6800_v12, %v5533_v0 }
 0x1f2   : > { %v3540_v25 = vpop.f32.mrf.mxu3  ;;  %v3556_v10 = vpop.f32.mrf.mxu0  ;;  %3872 = vmatpush.bf16.msrb.mxu2 %v5296_v37  ;;  %3918 = vmatpush.bf16.msrb.mxu0 %v5552_v31  ;;  %v5280_v15 = vor.u32 %v6736_v35, %v5277_v32  ;;  %v5197_v37 = vld [vmem:[%s7195_s26 + $0x2d8] sm:$0xf0] }
 0x1f3   : > { %v4120_v43 = vmin.f32 %v8585_v50, 0.0  ;;  %3680 = vmatmul.bf16.gmra.mxu1 %v9189_v18  ;;  %v8599_v22 = vadd.f32 %v3556_v10, %v8541_v23  ;;  %v8601_v9 = vadd.f32 %v3540_v25, %v3518_v54  ;;  %v6716_v23 = vld [vmem:[%s7195_s26 + $0x2cc] sm:$0xf]  ;;  %v5517_v31 = vld [vmem:[%s7195_s26 + $0x558] sm:$0xf0]  ;;  %vm4100_vm5 = vcmp.gt.f32.partialorder %v8585_v50, 0.0 }
 0x1f4   : > { %3899 = vmatpush.bf16.msra.mxu3 %v5360_v19  ;;  %v6796_v54 = vld [vmem:[%s7195_s26 + $0x54c] sm:$0xf] }
 0x1f5   : > { %3831 = vmatmul.bf16.vlgmr.msra.gmra.mxu0 %v7400_v16  ;;  %v4141_v4 = vmul.f32 1.442695, %v4120_v43  ;;  %6439 = vmatmul.msk.bf16.vlgmr.msra.gmra.mxu2 %vm2893_vm0, %v9182_v1  ;;  %v5200_v16 = vor.u32 %v6716_v23, %v5197_v37  ;;  %v5261_v43 = vld [vmem:[%s7195_s26 + $0x358] sm:$0xf0]  ;;  %v5520_v35 = vor.u32 %v6796_v54, %v5517_v31  ;;  %v6728_v23 = vld [vmem:[%s7195_s26 + $0x32c] sm:$0xf] }
 0x1f6   : > { %3873 = vmatpush.bf16.msrb.mxu2 %v5280_v15  ;;  %3919 = vmatpush.bf16.msrb.mxu0 %v5536_v41  ;;  %v5264_v10 = vor.u32 %v6732_v27, %v5261_v43  ;;  %v5184_v15 = vor.u32 %v6712_v5, %v5181_v58  ;;  %v6792_v37 = vld [vmem:[%s7195_s26 + $0x52c] sm:$0xf]  ;;  %v5165_v27 = vld [vmem:[%s7195_s26 + $0x298] sm:$0xf0] }
 0x1f7   : > { %3813 = vmatmul.bf16.gmra.mxu3 %v7343_v24  ;;  %3847 = vmatpush.bf16.msrb.mxu1 %v5200_v16  ;;  %7105 = vpow2.f32 %v4141_v4  ;;  %v5245_v4 = vld [vmem:[%s7195_s26 + $0x338] sm:$0xf0]  ;;  %v6724_v31 = vld [vmem:[%s7195_s26 + $0x30c] sm:$0xf] }
 0x1f8   : > { %v3489_v39 = vpop.f32.mrf.mxu1  ;;  %v3520_v25 = vpop.f32.mrf.mxu2  ;;  %v5248_v41 = vor.u32 %v6728_v23, %v5245_v4  ;;  %v5229_v5 = vld [vmem:[%s7195_s26 + $0x318] sm:$0xf0]  ;;  %v6788_v58 = vld [vmem:[%s7195_s26 + $0x50c] sm:$0xf]  ;;  %v9190_v4 = vld [vmem:[#allocation12_spill] sm:$0xff] }
 0x1f9   : > { %v8614_v56 = vadd.f32 %v3489_v39, %v8512_v30  ;;  %v3521_v30 = vadd.f32 %v3520_v25, %v7922_v57  ;;  %v5501_v39 = vld [vmem:[%s7195_s26 + $0x538] sm:$0xf0] }
 0x1fa   : > { %v3543_v46 = vpop.f32.mrf.mxu3  ;;  %v3558_v19 = vpop.f32.mrf.mxu0  ;;  %3874 = vmatpush.bf16.msrb.mxu2 %v5264_v10  ;;  %3920 = vmatpush.bf16.msrb.mxu0 %v5520_v35  ;;  %v5504_v16 = vor.u32 %v6792_v37, %v5501_v39  ;;  %v5149_v35 = vld [vmem:[%s7195_s26 + $0x278] sm:$0xf0] }
 0x1fb   : > { %v4124_v24 = vmin.f32 %v8614_v56, 0.0  ;;  %v8625_v32 = vadd.f32 %v3558_v19, %v8556_v33  ;;  %v8627_v0 = vadd.f32 %v3543_v46, %v3521_v30  ;;  %3848 = vmatpush.bf16.msrb.mxu1 %v5184_v15  ;;  %v6708_v33 = vld [vmem:[%s7195_s26 + $0x28c] sm:$0xf]  ;;  %v5232_v30 = vor.u32 %v6724_v31, %v5229_v5  ;;  %v5485_v46 = vld [vmem:[%s7195_s26 + $0x518] sm:$0xf0] }
 0x1fc   : > { %v5168_v54 = vor.u32 %v6708_v33, %v5165_v27  ;;  %v6704_v19 = vld [vmem:[%s7195_s26 + $0x26c] sm:$0xf]  ;;  %vm4104_vm6 = vcmp.gt.f32.partialorder %v8614_v56, 0.0  ;;  %v5981_v31 = vld [vmem:[%s7195_s26 + $0x8f8] sm:$0xf0] }
 0x1fd   : > { %v4149_v12 = vmul.f32 1.442695, %v4124_v24  ;;  %v7106_v25 = vpop.eup %7105  ;;  %v6700_v27 = vld [vmem:[%s7195_s26 + $0x24c] sm:$0xf] }
 0x1fe   : > { %3875 = vmatpush.bf16.msrb.mxu2 %v5248_v41  ;;  %3921 = vmatpush.bf16.msrb.mxu0 %v5504_v16  ;;  %v5152_v41 = vor.u32 %v6704_v19, %v5149_v35  ;;  %v6446_v37 = vadd.f32 -1.0, %v7106_v25  ;;  %v6912_v25 = vld [vmem:[%s7195_s26 + $0x8ec] sm:$0xf] }
 0x1ff   : > { %7107 = vpow2.f32 %v4149_v12  ;;  %3849 = vmatpush.bf16.msrb.mxu1 %v5168_v54 }
 0x200   : > { %v3492_v43 = vpop.f32.mrf.mxu1  ;;  %v3522_v24 = vpop.f32.mrf.mxu2  ;;  %v8659_v5 = vsel %vm4100_vm5, %v8585_v50, %v6446_v37  ;;  %v6696_v50 = vld [vmem:[%s7195_s26 + $0x22c] sm:$0xf] }
 0x201   : > { %v8636_v10 = vadd.f32 %v3492_v43, %v8527_v51  ;;  %v5488_v51 = vor.u32 %v6788_v58, %v5485_v46  ;;  %v5133_v43 = vld [vmem:[%s7195_s26 + $0x258] sm:$0xf0]  ;;  %v5984_v24 = vor.u32 %v6912_v25, %v5981_v31 }
 0x202   : > { %v3545_v12 = vpop.f32.mrf.mxu3  ;;  %v3561_v23 = vpop.f32.mrf.mxu0  ;;  %3876 = vmatpush.bf16.msrb.mxu2 %v5232_v30 }
 0x203   : > { %v4128_v15 = vmin.f32 %v8636_v10, 0.0  ;;  %3762 = vmatmul.bf16.vlgmr.msra.gmra.mxu1 %v9190_v4  ;;  %v8647_v39 = vadd.f32 %v3561_v23, %v8576_v7  ;;  %3922 = vmatpush.bf16.msrb.mxu0 %v5488_v51  ;;  %v5136_v7 = vor.u32 %v6700_v27, %v5133_v43  ;;  %v6908_v23 = vld [vmem:[%s7195_s26 + $0x8cc] sm:$0xf]  ;;  %v5965_v51 = vld [vmem:[%s7195_s26 + $0x8d8] sm:$0xf0]  ;;  %vm4108_vm7 = vcmp.gt.f32.partialorder %v8636_v10, 0.0 }
 0x204   : > { %3850 = vmatpush.bf16.msrb.mxu1 %v5152_v41  ;;  %3984 = vmatpush.bf16.msrb.mxu3 %v5984_v24  ;;  %v5968_v41 = vor.u32 %v6908_v23, %v5965_v51  ;;  %v6904_v43 = vld [vmem:[%s7195_s26 + $0x8ac] sm:$0xf] }
 0x205   : > { %v7108_v16 = vpop.eup %7107  ;;  %3836 = vmatmul.bf16.gmra.mxu0 %v7458_v14  ;;  %v4157_v54 = vmul.f32 1.442695, %v4128_v15  ;;  %6440 = vmatmul.msk.bf16.gmra.mxu2 %vm2893_vm0, %v9184_v42  ;;  %v6880_v51 = vld [vmem:[%s7195_s26 + $0x7ec] sm:$0xf] }
 0x206   : > { %v6450_v33 = vadd.f32 -1.0, %v7108_v16  ;;  %v6692_v16 = vld [vmem:[%s7195_s26 + $0x20c] sm:$0xf] }
 0x207   : > { %3818 = vmatmul.bf16.gmra.mxu3 %v7280_v28  ;;  %7109 = vpow2.f32 %v4157_v54  ;;  %v5949_v54 = vld [vmem:[%s7195_s26 + $0x8b8] sm:$0xf0] }
 0x208   : > { %v8662_v58 = vsel %vm4104_vm6, %v8614_v56, %v6450_v33  ;;  %v3494_v14 = vpop.f32.mrf.mxu1  ;;  %v8668_v19 = vpop.f32.mrf.mxu2  ;;  %3851 = vmatpush.bf16.msrb.mxu1 %v5136_v7  ;;  %v5117_v56 = vld [vmem:[%s7195_s26 + $0x238] sm:$0xf0]  ;;  %3985 = vmatpush.bf16.msrb.mxu3 %v5968_v41  ;;  %v5952_v25 = vor.u32 %v6904_v43, %v5949_v54  ;;  %v6896_v43 = vld [vmem:[%s7195_s26 + $0x86c] sm:$0xf]  ;;  %vm4634_vm6 = vcmask 1043456  }
 0x209   : > { %v4220_v30 = vpack.c.bf16 %v8662_v58, %v8659_v5  ;;  %v3495_v46 = vadd.f32 %v3494_v14, %v8545_v48  ;;  %v5120_v12 = vor.u32 %v6696_v50, %v5117_v56  ;;  %v5101_v33 = vld [vmem:[%s7195_s26 + $0x218] sm:$0xf0]  ;;  %v6900_v56 = vld [vmem:[%s7195_s26 + $0x88c] sm:$0xf] }
 0x20a   : > { %v3563_v15 = vpop.f32.mrf.mxu0  ;;  %v8672_v28 = vpop.f32.mrf.mxu3  ;;  %v5104_v27 = vor.u32 %v6692_v16, %v5101_v33  ;;  %v5853_v41 = vld [vmem:[%s7195_s26 + $0x7f8] sm:$0xf0]  ;;  %v6944_v33 = vld [vmem:[%s7195_s26 + $0x9ec] sm:$0xf] }
 0x20b   : > { %v4132_v35 = vmin.f32 %v3495_v46, 0.0  ;;  %v8677_v48 = vadd.f32 %v3563_v15, %v8601_v9  ;;  %v5856_v16 = vor.u32 %v6880_v51, %v5853_v41  ;;  %vm4112_vm8 = vcmp.gt.f32.partialorder %v3495_v46, 0.0  ;;  %v5917_v54 = vld [vmem:[%s7195_s26 + $0x878] sm:$0xf0]  ;;  %v6892_v41 = vld [vmem:[%s7195_s26 + $0x84c] sm:$0xf] }
 0x20c   : > { %3852 = vmatpush.bf16.msrb.mxu1 %v5120_v12  ;;  %3986 = vmatpush.bf16.msrb.mxu3 %v5952_v25  ;;  %v6093_v51 = vld [vmem:[%s7195_s26 + $0x9d8] sm:$0xf0] }
 0x20d   : > { %v4165_v37 = vmul.f32 1.442695, %v4132_v35  ;;  %v7110_v31 = vpop.eup %7109  ;;  %v5933_v35 = vld [vmem:[%s7195_s26 + $0x898] sm:$0xf0]  ;;  %3961 = vmatpush.bf16.msra.mxu2 %v5856_v16 }
 0x20e   : > { %v6454_v15 = vadd.f32 -1.0, %v7110_v31 }
 0x20f   : > { %7111 = vpow2.f32 %v4165_v37 }
 0x210   : > { %v3497_v7 = vpop.f32.mrf.mxu1  ;;  %v8686_v14 = vpop.f32.mrf.mxu2  ;;  %3853 = vmatpush.bf16.msrb.mxu1 %v5104_v27  ;;  %v6109_v27 = vld [vmem:[%s7195_s26 + $0x9f8] sm:$0xf0]  ;;  %v8708_v25 = vsel %vm4108_vm7, %v8636_v10, %v6454_v15  ;;  %vm4624_vm7 = vcmask 326656  }
 0x211   : > { %v8684_v9 = vadd.f32 %v3497_v7, %v8563_v55  ;;  %v5936_v55 = vor.u32 %v6900_v56, %v5933_v35  ;;  %v5837_v56 = vld [vmem:[%s7195_s26 + $0x7d8] sm:$0xf0]  ;;  %v6940_v35 = vld [vmem:[%s7195_s26 + $0x9cc] sm:$0xf] }
 0x212   : > { %v3566_v24 = vpop.f32.mrf.mxu0  ;;  %v8688_v50 = vpop.f32.mrf.mxu3  ;;  %v6096_v15 = vor.u32 %v6940_v35, %v6093_v51  ;;  %v6868_v51 = vld [vmem:[%s7195_s26 + $0x78c] sm:$0xf] }
 0x213   : > { %3767 = vmatmul.bf16.gmra.mxu1 %v7692_v38  ;;  %v8694_v12 = vadd.f32 %v3566_v24, %v8627_v0  ;;  %3987 = vmatpush.bf16.msrb.mxu3 %v5936_v55  ;;  %v6112_v0 = vor.u32 %v6944_v33, %v6109_v27  ;;  %v6876_v24 = vld [vmem:[%s7195_s26 + $0x7cc] sm:$0xf]  ;;  %v5821_v27 = vld [vmem:[%s7195_s26 + $0x7b8] sm:$0xf0]  ;;  %vm4116_vm14 = vcmp.gt.f32.partialorder %v8684_v9, 0.0 }
 0x214   : > { %v6872_v33 = vld [vmem:[%s7195_s26 + $0x7ac] sm:$0xf] }
 0x215   : > { %v7112_v23 = vpop.eup %7111  ;;  %3841 = vmatmul.bf16.gmra.mxu0 %v7517_v17  ;;  %6441 = vmatmul.msk.bf16.gmra.mxu2 %vm2893_vm0, %v9186_v40  ;;  %v5920_v17 = vor.u32 %v6896_v43, %v5917_v54  ;;  %v5824_v43 = vor.u32 %v6872_v33, %v5821_v27  ;;  %v6077_v54 = vld [vmem:[%s7195_s26 + $0x9b8] sm:$0xf0]  ;;  %v6848_v33 = vld [vmem:[%s7195_s26 + $0x6ec] sm:$0xf] }
 0x216   : > { %v6458_v37 = vadd.f32 -1.0, %v7112_v23  ;;  %4007 = vmatpush.bf16.msra.mxu0 %v6112_v0  ;;  %v5840_v23 = vor.u32 %v6876_v24, %v5837_v56  ;;  %v6936_v0 = vld [vmem:[%s7195_s26 + $0x9ac] sm:$0xf]  ;;  %v5885_v24 = vld [vmem:[%s7195_s26 + $0x838] sm:$0xf0] }
 0x217   : > { %3900 = vmatmul.bf16.vlgmr.msra.gmra.mxu3 %v7409_v29  ;;  %v5725_v27 = vld [vmem:[%s7195_s26 + $0x6f8] sm:$0xf0] }
 0x218   : > { %v3499_v7 = vpop.f32.mrf.mxu1  ;;  %v8710_v31 = vsel %vm4112_vm8, %v3495_v46, %v6458_v37  ;;  %v8717_v29 = vpop.f32.mrf.mxu2  ;;  %3988 = vmatpush.bf16.msrb.mxu3 %v5920_v17  ;;  %v5901_v37 = vld [vmem:[%s7195_s26 + $0x858] sm:$0xf0]  ;;  %3962 = vmatpush.bf16.msra.mxu2 %v5840_v23  ;;  %v6888_v17 = vld [vmem:[%s7195_s26 + $0x82c] sm:$0xf]  ;;  %vm4661_vm8 = vcmask 130048  }
 0x219   : > { %v4224_v55 = vpack.c.bf16 %v8710_v31, %v8708_v25  ;;  %v5904_v16 = vor.u32 %v6892_v41, %v5901_v37  ;;  %v6080_v7 = vor.u32 %v6936_v0, %v6077_v54  ;;  %v5888_v35 = vor.u32 %v6888_v17, %v5885_v24  ;;  %v6884_v17 = vld [vmem:[%s7195_s26 + $0x80c] sm:$0xf]  ;;  %v5869_v24 = vld [vmem:[%s7195_s26 + $0x818] sm:$0xf0] }
 0x21a   : > { %v3568_v10 = vpop.f32.mrf.mxu0  ;;  %v8720_v46 = vpop.f32.mrf.mxu3  ;;  %4008 = vmatpush.bf16.msra.mxu0 %v6096_v15  ;;  %v6932_v15 = vld [vmem:[%s7195_s26 + $0x98c] sm:$0xf] }
 0x21b   : > { %v5805_v10 = vld [vmem:[%s7195_s26 + $0x798] sm:$0xf0] }
 0x21c   : > { %3989 = vmatpush.bf16.msrb.mxu3 %v5904_v16  ;;  %3963 = vmatpush.bf16.msra.mxu2 %v5824_v43  ;;  %v5808_v37 = vor.u32 %v6868_v51, %v5805_v10  ;;  %v6061_v16 = vld [vmem:[%s7195_s26 + $0x998] sm:$0xf0]  ;;  %v6864_v51 = vld [vmem:[%s7195_s26 + $0x76c] sm:$0xf] }
 0x21d   : > { %v6064_v54 = vor.u32 %v6932_v15, %v6061_v16  ;;  %v6045_v15 = vld [vmem:[%s7195_s26 + $0x978] sm:$0xf0]  ;;  %v6844_v16 = vld [vmem:[%s7195_s26 + $0x6cc] sm:$0xf] }
 0x21e   : > { %4009 = vmatpush.bf16.msra.mxu0 %v6080_v7  ;;  %v5728_v7 = vor.u32 %v6848_v33, %v5725_v27  ;;  %v5709_v33 = vld [vmem:[%s7195_s26 + $0x6d8] sm:$0xf0] }
 0x21f   : > { %v5712_v27 = vor.u32 %v6844_v16, %v5709_v33  ;;  %v6920_v16 = vld [vmem:[%s7195_s26 + $0x92c] sm:$0xf] }
 0x220   : > { %v3579_v56 = vpop.f32.mrf.mxu1  ;;  %v8734_v41 = vpop.f32.mrf.mxu2  ;;  %3990 = vmatpush.bf16.msrb.mxu3 %v5888_v35  ;;  %3964 = vmatpush.bf16.msra.mxu2 %v5808_v37 }
 0x221   : > { %v3580_v23 = vadd.f32 %v3579_v56, %v8599_v22  ;;  %v5872_v56 = vor.u32 %v6884_v17, %v5869_v24  ;;  %3938 = vmatpush.bf16.msra.mxu1 %v5728_v7  ;;  %v6924_v7 = vld [vmem:[%s7195_s26 + $0x94c] sm:$0xf]  ;;  %v6029_v24 = vld [vmem:[%s7195_s26 + $0x958] sm:$0xf0] }
 0x222   : > { %v8740_v43 = vpop.f32.mrf.mxu3  ;;  %v3648_v22 = vpop.f32.mrf.mxu0  ;;  %4010 = vmatpush.bf16.msra.mxu0 %v6064_v54  ;;  %v6860_v54 = vld [vmem:[%s7195_s26 + $0x74c] sm:$0xf] }
 0x223   : > { %v3603_v0 = vadd.f32 %v8668_v19, %v3580_v23  ;;  %3772 = vmatmul.bf16.gmra.mxu1 %v7739_v49  ;;  %v5789_v19 = vld [vmem:[%s7195_s26 + $0x778] sm:$0xf0]  ;;  %v6928_v23 = vld [vmem:[%s7195_s26 + $0x96c] sm:$0xf] }
 0x224   : > { %3991 = vmatpush.bf16.msrb.mxu3 %v5872_v56  ;;  %v5792_v10 = vor.u32 %v6864_v51, %v5789_v19  ;;  %v6840_v56 = vld [vmem:[%s7195_s26 + $0x6ac] sm:$0xf]  ;;  %v6032_v19 = vor.u32 %v6924_v7, %v6029_v24 }
 0x225   : > { %v3626_v35 = vadd.f32 %v8672_v28, %v3603_v0  ;;  %3923 = vmatmul.bf16.vlgmr.msrb.gmra.mxu0 %v7562_v60  ;;  %3877 = vmatmul.bf16.vlgmr.msrb.gmra.mxu2 %v9187_v62  ;;  %v6048_v28 = vor.u32 %v6928_v23, %v6045_v15  ;;  %v5757_v15 = vld [vmem:[%s7195_s26 + $0x738] sm:$0xf0]  ;;  %v6852_v24 = vld [vmem:[%s7195_s26 + $0x70c] sm:$0xf] }
 0x226   : > { %3965 = vmatpush.bf16.msra.mxu2 %v5792_v10  ;;  %3939 = vmatpush.bf16.msra.mxu1 %v5712_v27  ;;  %v6856_v10 = vld [vmem:[%s7195_s26 + $0x72c] sm:$0xf] }
 0x227   : > { %v8753_v37 = vadd.f32 %v3648_v22, %v3626_v35  ;;  %3905 = vmatmul.bf16.gmra.mxu3 %v7477_v34  ;;  %4011 = vmatpush.bf16.msra.mxu0 %v6048_v28  ;;  %v5773_v22 = vld [vmem:[%s7195_s26 + $0x758] sm:$0xf0]  ;;  %v5760_v33 = vor.u32 %v6856_v10, %v5757_v15 }
 0x228   : > { %v3581_v0 = vpop.f32.mrf.mxu1  ;;  %v8761_v17 = vpop.f32.mrf.mxu2  ;;  %v5776_v62 = vor.u32 %v6860_v54, %v5773_v22  ;;  %v5693_v35 = vld [vmem:[%s7195_s26 + $0x6b8] sm:$0xf0] }
 0x229   : > { %v3582_v60 = vadd.f32 %v3581_v0, %v8625_v32  ;;  %v5696_v23 = vor.u32 %v6840_v56, %v5693_v35  ;;  %v6013_v28 = vld [vmem:[%s7195_s26 + $0x938] sm:$0xf0]  ;;  %v6836_v0 = vld [vmem:[%s7195_s26 + $0x68c] sm:$0xf] }
 0x22a   : > { %v8767_v32 = vpop.f32.mrf.mxu3  ;;  %v3650_v51 = vpop.f32.mrf.mxu0  ;;  %3966 = vmatpush.bf16.msra.mxu2 %v5776_v62  ;;  %v5741_v56 = vld [vmem:[%s7195_s26 + $0x718] sm:$0xf0] }
 0x22b   : > { %v3605_v34 = vadd.f32 %v8686_v14, %v3582_v60  ;;  %4012 = vmatpush.bf16.msra.mxu0 %v6032_v19  ;;  %3940 = vmatpush.bf16.msra.mxu1 %v5696_v23  ;;  %v6016_v14 = vor.u32 %v6920_v16, %v6013_v28  ;;  %v5677_v60 = vld [vmem:[%s7195_s26 + $0x698] sm:$0xf0]  ;;  %v6832_v23 = vld [vmem:[%s7195_s26 + $0x66c] sm:$0xf] }
 0x22c   : > { %v5680_v22 = vor.u32 %v6836_v0, %v5677_v60  ;;  %v5997_v19 = vld [vmem:[%s7195_s26 + $0x918] sm:$0xf0] }
 0x22d   : > { %v3628_v27 = vadd.f32 %v8688_v50, %v3605_v34  ;;  %v6916_v50 = vld [vmem:[%s7195_s26 + $0x90c] sm:$0xf]  ;;  %v5744_v34 = vor.u32 %v6852_v24, %v5741_v56  ;;  %v5661_v10 = vld [vmem:[%s7195_s26 + $0x678] sm:$0xf0] }
 0x22e   : > { %3967 = vmatpush.bf16.msra.mxu2 %v5760_v33  ;;  %v9191_v33 = vld [vmem:[#allocation2_spill] sm:$0xff]  ;;  %v5664_v28 = vor.u32 %v6832_v23, %v5661_v10  ;;  %v5645_v0 = vld [vmem:[%s7195_s26 + $0x658] sm:$0xf0]  ;;  %v6824_v56 = vld [vmem:[%s7195_s26 + $0x62c] sm:$0xf] }
 0x22f   : > { %v8776_v54 = vadd.f32 %v3650_v51, %v3628_v27  ;;  %4013 = vmatpush.bf16.msra.mxu0 %v6016_v14  ;;  %3941 = vmatpush.bf16.msra.mxu1 %v5680_v22  ;;  %v6828_v14 = vld [vmem:[%s7195_s26 + $0x64c] sm:$0xf]  ;;  %v6221_v23 = vld [vmem:[%s7195_s26 + $0xad8] sm:$0xf0] }
 0x230   : > { %v3584_v7 = vpop.f32.mrf.mxu1  ;;  %v3614_v35 = vpop.f32.mrf.mxu2  ;;  %v5648_v60 = vor.u32 %v6828_v14, %v5645_v0  ;;  %v6976_v22 = vld [vmem:[%s7195_s26 + $0xaec] sm:$0xf] }
 0x231   : > { %v3585_v62 = vadd.f32 %v3584_v7, %v8647_v39  ;;  %v6000_v39 = vor.u32 %v6916_v50, %v5997_v19  ;;  %v6237_v7 = vld [vmem:[%s7195_s26 + $0xaf8] sm:$0xf0] }
 0x232   : > { %v3637_v15 = vpop.f32.mrf.mxu3  ;;  %v3653_v16 = vpop.f32.mrf.mxu0  ;;  %3968 = vmatpush.bf16.msra.mxu2 %v5744_v34 }
 0x233   : > { %v3608_v51 = vadd.f32 %v8717_v29, %v3585_v62  ;;  %3854 = vmatmul.bf16.vlgmr.msrb.gmra.mxu1 %v9191_v33  ;;  %4014 = vmatpush.bf16.msra.mxu0 %v6000_v39  ;;  %v5613_v15 = vld [vmem:[%s7195_s26 + $0x618] sm:$0xf0]  ;;  %v6968_v39 = vld [vmem:[%s7195_s26 + $0xaac] sm:$0xf] }
 0x234   : > { %3942 = vmatpush.bf16.msra.mxu1 %v5664_v28 }
 0x235   : > { %v3631_v27 = vadd.f32 %v8720_v46, %v3608_v51  ;;  %3928 = vmatmul.bf16.gmra.mxu0 %v7612_v3  ;;  %3882 = vmatmul.bf16.gmra.mxu2 %v7353_v36  ;;  %v6240_v46 = vor.u32 %v6976_v22, %v6237_v7  ;;  %v5629_v36 = vld [vmem:[%s7195_s26 + $0x638] sm:$0xf0]  ;;  %v6820_v51 = vld [vmem:[%s7195_s26 + $0x60c] sm:$0xf]  ;;  %v9192_v7 = vld [vmem:[#allocation4_spill] sm:$0xff] }
 0x236   : > { %v5632_v19 = vor.u32 %v6824_v56, %v5629_v36  ;;  %v5616_v33 = vor.u32 %v6820_v51, %v5613_v15 }
 0x237   : > { %v8791_v29 = vadd.f32 %v3653_v16, %v3631_v27  ;;  %3910 = vmatmul.bf16.gmra.mxu3 %v7533_v26  ;;  %v6972_v26 = vld [vmem:[%s7195_s26 + $0xacc] sm:$0xf] }
 0x238   : > { %v3586_v62 = vpop.f32.mrf.mxu1  ;;  %3943 = vmatpush.bf16.msra.mxu1 %v5648_v60  ;;  %v8798_v3 = vpop.f32.mrf.mxu2  ;;  %7075 = vmatpush.bf16.msra.mxu3 %v6240_v46  ;;  %v6224_v10 = vor.u32 %v6972_v26, %v6221_v23  ;;  %v6173_v26 = vld [vmem:[%s7195_s26 + $0xa78] sm:$0xf0]  ;;  %v7004_v23 = vld [vmem:[%s7195_s26 + $0xbcc] sm:$0xf] }
 0x239   : > { %v3587_v24 = vadd.f32 %v3586_v62, %v8677_v48  ;;  %v6964_v62 = vld [vmem:[%s7195_s26 + $0xa8c] sm:$0xf] }
 0x23a   : > { %v3655_v35 = vpop.f32.mrf.mxu0  ;;  %v8803_v34 = vpop.f32.mrf.mxu3 }
 0x23b   : > { %v3610_v50 = vadd.f32 %v8734_v41, %v3587_v24  ;;  %v6205_v41 = vld [vmem:[%s7195_s26 + $0xab8] sm:$0xf0] }
 0x23c   : > { %3944 = vmatpush.bf16.msra.mxu1 %v5632_v19  ;;  %7076 = vmatpush.bf16.msra.mxu3 %v6224_v10  ;;  %v6208_v27 = vor.u32 %v6968_v39, %v6205_v41  ;;  %v6189_v24 = vld [vmem:[%s7195_s26 + $0xa98] sm:$0xf0]  ;;  %v6960_v19 = vld [vmem:[%s7195_s26 + $0xa6c] sm:$0xf] }
 0x23d   : > { %v3633_v48 = vadd.f32 %v8740_v43, %v3610_v50  ;;  %v6192_v56 = vor.u32 %v6964_v62, %v6189_v24  ;;  %v6365_v50 = vld [vmem:[%s7195_s26 + $0xbf8] sm:$0xf0] }
 0x23e   : > { %v6157_v39 = vld [vmem:[%s7195_s26 + $0xa58] sm:$0xf0] }
 0x23f   : > { %v8810_v16 = vadd.f32 %v3655_v35, %v3633_v48  ;;  %v6349_v48 = vld [vmem:[%s7195_s26 + $0xbd8] sm:$0xf0] }
 0x240   : > { %v3589_v28 = vpop.f32.mrf.mxu1  ;;  %3945 = vmatpush.bf16.msra.mxu1 %v5616_v33  ;;  %v8815_v0 = vpop.f32.mrf.mxu2  ;;  %7077 = vmatpush.bf16.msra.mxu3 %v6208_v27  ;;  %v6141_v62 = vld [vmem:[%s7195_s26 + $0xa38] sm:$0xf0] }
 0x241   : > { %v3590_v14 = vadd.f32 %v3589_v28, %v8694_v12  ;;  %v7008_v12 = vld [vmem:[%s7195_s26 + $0xbec] sm:$0xf] }
 0x242   : > { %v3658_v60 = vpop.f32.mrf.mxu0  ;;  %v8818_v22 = vpop.f32.mrf.mxu3  ;;  %v7000_v28 = vld [vmem:[%s7195_s26 + $0xbac] sm:$0xf] }
 0x243   : > { %v3613_v43 = vadd.f32 %v8761_v17, %v3590_v14  ;;  %3859 = vmatmul.bf16.gmra.mxu1 %v9192_v7  ;;  %v6368_v17 = vor.u32 %v7008_v12, %v6365_v50  ;;  %v6333_v14 = vld [vmem:[%s7195_s26 + $0xbb8] sm:$0xf0]  ;;  %v6952_v7 = vld [vmem:[%s7195_s26 + $0xa2c] sm:$0xf] }
 0x244   : > { %4030 = vmatpush.bf16.msrb.mxu1 %v6240_v46  ;;  %7078 = vmatpush.bf16.msra.mxu3 %v6192_v56  ;;  %v7034_v46 = vld [vmem:[%s9129_s3 + $0x38] sm:$0xff]  ;;  %v6996_v12 = vld [vmem:[%s7195_s26 + $0xb8c] sm:$0xf] }
 0x245   : > { %v3636_v36 = vadd.f32 %v8767_v32, %v3613_v43  ;;  %3933 = vmatmul.bf16.gmra.mxu0 %v7665_v63  ;;  %3887 = vmatmul.bf16.gmra.mxu2 %v9188_v61  ;;  %v6176_v63 = vor.u32 %v6960_v19, %v6173_v26  ;;  %v6352_v61 = vor.u32 %v7004_v23, %v6349_v48  ;;  %v6317_v50 = vld [vmem:[%s7195_s26 + $0xb98] sm:$0xf0] }
 0x246   : > { %4053 = vmatpush.bf16.msrb.mxu2 %v6368_v17  ;;  %4481 = vmatpush.bf16.msrb.mxu0 %v7034_v46  ;;  %v6336_v43 = vor.u32 %v7000_v28, %v6333_v14  ;;  %v6320_v46 = vor.u32 %v6996_v12, %v6317_v50  ;;  %v9193_v23 = vld [vmem:[#allocation5_spill] sm:$0xff] }
 0x247   : > { %v8830_v35 = vadd.f32 %v3658_v60, %v3636_v36  ;;  %3992 = vmatmul.bf16.vlgmr.msrb.gmra.mxu3 %v7570_v2  ;;  %v6956_v2 = vld [vmem:[%s7195_s26 + $0xa4c] sm:$0xf]  ;;  %v6125_v48 = vld [vmem:[%s7195_s26 + $0xa18] sm:$0xf0] }
 0x248   : > { %4031 = vmatpush.bf16.msrb.mxu1 %v6224_v10  ;;  %v3591_v32 = vpop.f32.mrf.mxu1  ;;  %v8838_v51 = vpop.f32.mrf.mxu2  ;;  %7079 = vmatpush.bf16.msra.mxu3 %v6176_v63  ;;  %v7033_v10 = vld [vmem:[%s9129_s3 + $0x30] sm:$0xff]  ;;  %v6160_v41 = vor.u32 %v6956_v2, %v6157_v39  ;;  %v7032_v60 = vld [vmem:[%s9129_s3 + $0x28] sm:$0xff]  ;;  %v6301_v2 = vld [vmem:[%s7195_s26 + $0xb78] sm:$0xf0] }
 0x249   : > { %v7030_v39 = vld [vmem:[%s9129_s3 + $0x18] sm:$0xff] }
 0x24a   : > { %v3660_v15 = vpop.f32.mrf.mxu0  ;;  %v8843_v33 = vpop.f32.mrf.mxu3  ;;  %4054 = vmatpush.bf16.msrb.mxu2 %v6352_v61  ;;  %4482 = vmatpush.bf16.msrb.mxu0 %v7033_v10  ;;  %v6429_v14 = vld [vmem:[%s7195_s26 + $0xc78] sm:$0xf0] }
 0x24b   : > { %v6992_v15 = vld [vmem:[%s7195_s26 + $0xb6c] sm:$0xf] }
 0x24c   : > { %4032 = vmatpush.bf16.msrb.mxu1 %v6208_v27  ;;  %7080 = vmatpush.bf16.msra.mxu3 %v6160_v41  ;;  %v6144_v27 = vor.u32 %v6952_v7, %v6141_v62  ;;  %v6988_v7 = vld [vmem:[%s7195_s26 + $0xb4c] sm:$0xf]  ;;  %v6285_v62 = vld [vmem:[%s7195_s26 + $0xb58] sm:$0xf0] }
 0x24e   : > { %4055 = vmatpush.bf16.msrb.mxu2 %v6336_v43  ;;  %4483 = vmatpush.bf16.msrb.mxu0 %v7032_v60  ;;  %v9194_v43 = vld [vmem:[#allocation11_spill] sm:$0xff] }
 0x250   : > { %4033 = vmatpush.bf16.msrb.mxu1 %v6192_v56  ;;  %v3671_v24 = vpop.f32.mrf.mxu1  ;;  %v8857_v17 = vpop.f32.mrf.mxu2  ;;  %7081 = vmatpush.bf16.msra.mxu3 %v6144_v27  ;;  %v7031_v56 = vld [vmem:[%s9129_s3 + $0x20] sm:$0xff] }
 0x251   : > { %v3672_v36 = vadd.f32 %v3671_v24, %v8753_v37  ;;  %v6948_v37 = vld [vmem:[%s7195_s26 + $0xa0c] sm:$0xf] }
 0x252   : > { %v8863_v26 = vpop.f32.mrf.mxu3  ;;  %v3740_v32 = vpop.f32.mrf.mxu0  ;;  %4056 = vmatpush.bf16.msrb.mxu2 %v6320_v46  ;;  %v6128_v61 = vor.u32 %v6948_v37, %v6125_v48  ;;  %4484 = vmatpush.bf16.msrb.mxu0 %v7031_v56  ;;  %v6413_v56 = vld [vmem:[%s7195_s26 + $0xc58] sm:$0xf0]  ;;  %v4582_v48 = vld [vmem:[%s9131_s5 + $0x8] sm:$0xff] }
 0x253   : > { %v3695_v19 = vadd.f32 %v8798_v3, %v3672_v36  ;;  %3864 = vmatmul.bf16.gmra.mxu1 %v9193_v23  ;;  %v6304_v3 = vor.u32 %v6992_v15, %v6301_v2  ;;  %v7029_v36 = vld [vmem:[%s9129_s3 + $0x10] sm:$0xff]  ;;  %4593 = vperm.xlu0 %7094, %v4582_v48   ;;  %v7016_v15 = vld [vmem:[%s7195_s26 + $0xc2c] sm:$0xf]  ;;  %v6397_v2 = vld [vmem:[%s7195_s26 + $0xc38] sm:$0xf0] }
 0x254   : > { %4034 = vmatpush.bf16.msrb.mxu1 %v6176_v63  ;;  %7082 = vmatpush.bf16.msra.mxu3 %v6128_v61  ;;  %v7024_v63 = vld [vmem:[%s7195_s26 + $0xc6c] sm:$0xf] }
 0x255   : > { %v3718_v10 = vadd.f32 %v8803_v34, %v3695_v19  ;;  %4015 = vmatmul.bf16.vlgmr.msra.gmra.mxu0 %v7718_v8  ;;  %3969 = vmatmul.bf16.vlgmr.msra.gmra.mxu2 %v7487_v47  ;;  %v6432_v60 = vor.u32 %v7024_v63, %v6429_v14  ;;  %v6288_v47 = vor.u32 %v6988_v7, %v6285_v62  ;;  %v6980_v63 = vld [vmem:[%s7195_s26 + $0xb0c] sm:$0xf]  ;;  %v6253_v14 = vld [vmem:[%s7195_s26 + $0xb18] sm:$0xf0] }
 0x256   : > { %4057 = vmatpush.bf16.msrb.mxu2 %v6304_v3  ;;  %4485 = vmatpush.bf16.msrb.mxu0 %v7030_v39  ;;  %v6400_v3 = vor.u32 %v7016_v15, %v6397_v2  ;;  %v9195_v62 = vld [vmem:[#allocation7_spill] sm:$0xff] }
 0x257   : > { %v8875_v28 = vadd.f32 %v3740_v32, %v3718_v10  ;;  %3997 = vmatmul.bf16.gmra.mxu3 %v9194_v43  ;;  %v6269_v32 = vld [vmem:[%s7195_s26 + $0xb38] sm:$0xf0]  ;;  %v7027_v43 = vld [vmem:[%s9129_s3] sm:$0xff] }
 0x258   : > { %v3673_v34 = vpop.f32.mrf.mxu1  ;;  %4035 = vmatpush.bf16.msrb.mxu1 %v6160_v41  ;;  %v8884_v24 = vpop.f32.mrf.mxu2  ;;  %4080 = vmatpush.bf16.msrb.mxu3 %v6432_v60  ;;  %v6984_v41 = vld [vmem:[%s7195_s26 + $0xb2c] sm:$0xf] }
 0x259   : > { %v3674_v8 = vadd.f32 %v3673_v34, %v8776_v54  ;;  %v7020_v54 = vld [vmem:[%s7195_s26 + $0xc4c] sm:$0xf]  ;;  %v6272_v37 = vor.u32 %v6984_v41, %v6269_v32 }
 0x25a   : > { %v8890_v50 = vpop.f32.mrf.mxu3  ;;  %v3742_v46 = vpop.f32.mrf.mxu0  ;;  %4058 = vmatpush.bf16.msrb.mxu2 %v6288_v47  ;;  %v6416_v19 = vor.u32 %v7020_v54, %v6413_v56  ;;  %4486 = vmatpush.bf16.msrb.mxu0 %v7029_v36  ;;  %v7012_v47 = vld [vmem:[%s7195_s26 + $0xc0c] sm:$0xf]  ;;  %v6381_v36 = vld [vmem:[%s7195_s26 + $0xc18] sm:$0xf0] }
 0x25b   : > { %v3697_v12 = vadd.f32 %v8815_v0, %v3674_v8  ;;  %v7028_v0 = vld [vmem:[%s9129_s3 + $0x8] sm:$0xff] }
 0x25c   : > { %4036 = vmatpush.bf16.msrb.mxu1 %v6144_v27  ;;  %4081 = vmatpush.bf16.msrb.mxu3 %v6416_v19  ;;  %v6256_v27 = vor.u32 %v6980_v63, %v6253_v14 }
 0x25d   : > { %v3720_v23 = vadd.f32 %v8818_v22, %v3697_v12 }
 0x25e   : > { %4059 = vmatpush.bf16.msrb.mxu2 %v6272_v37  ;;  %4487 = vmatpush.bf16.msrb.mxu0 %v7028_v0 }
 0x25f   : > { %v8903_v10 = vadd.f32 %v3742_v46, %v3720_v23 }
 0x260   : > { %v3676_v22 = vpop.f32.mrf.mxu1  ;;  %4037 = vmatpush.bf16.msrb.mxu1 %v6128_v61  ;;  %v3706_v34 = vpop.f32.mrf.mxu2  ;;  %4082 = vmatpush.bf16.msrb.mxu3 %v6400_v3  ;;  %v9196_v61 = vld [vmem:[#allocation14_spill] sm:$0xff] }
 0x261   : > { %v3677_v39 = vadd.f32 %v3676_v22, %v8791_v29  ;;  %v6384_v29 = vor.u32 %v7012_v47, %v6381_v36  ;;  %v9197_v22 = vld [vmem:[#allocation8_spill] sm:$0xff]  ;;  %v7040_v34 = vld [vmem:[%s9129_s3 + $0x68] sm:$0xff] }
 0x262   : > { %v3729_v8 = vpop.f32.mrf.mxu3  ;;  %v3745_v7 = vpop.f32.mrf.mxu0  ;;  %4060 = vmatpush.bf16.msrb.mxu2 %v6256_v27  ;;  %4488 = vmatpush.bf16.msrb.mxu0 %v7027_v43  ;;  %v7039_v27 = vld [vmem:[%s9129_s3 + $0x60] sm:$0xff] }
 0x263   : > { %v3700_v60 = vadd.f32 %v8838_v51, %v3677_v39  ;;  %3946 = vmatmul.bf16.vlgmr.msra.gmra.mxu1 %v9195_v62  ;;  %v4585_v51 = vld [vmem:[%s9131_s5 + $0x20] sm:$0xff] }
 0x264   : > { %4083 = vmatpush.bf16.msrb.mxu3 %v6384_v29  ;;  %4608 = vperm.xlu0 %7094, %v4585_v51   ;;  %v7047_v62 = vld [vmem:[%s9129_s3 + $0xa0] sm:$0xff]  ;;  %v9200_v51 = vld [vmem:[#allocation17_spill] sm:$0xff] }
 0x265   : > { %v3723_v12 = vadd.f32 %v8843_v33, %v3700_v60  ;;  %4020 = vmatmul.bf16.gmra.mxu0 %v9196_v61  ;;  %3974 = vmatmul.bf16.gmra.mxu2 %v7542_v45 }
 0x267   : > { %v8919_v46 = vadd.f32 %v3745_v7, %v3723_v12  ;;  %4002 = vmatmul.bf16.gmra.mxu3 %v7682_v13  ;;  %v9198_v12 = vld [vmem:[#allocation9_spill] sm:$0xff] }
 0x268   : > { %v3678_v54 = vpop.f32.mrf.mxu1  ;;  %v3750_v19 = vpop.f32.mrf.mxu2 }
 0x269   : > { %v3679_v56 = vadd.f32 %v3678_v54, %v8810_v16  ;;  %v9199_v54 = vld [vmem:[#allocation18_spill] sm:$0xff] }
 0x26a   : > { %v3747_v41 = vpop.f32.mrf.mxu0  ;;  %v3809_v32 = vpop.f32.mrf.mxu3 }
 0x26b   : > { %v3702_v33 = vadd.f32 %v8857_v17, %v3679_v56  ;;  %v3810_v45 = vadd.f32 %v3809_v32, %v7812_v11  ;;  %v7042_v17 = vld [vmem:[%s9129_s3 + $0x78] sm:$0xff]  ;;  %v9201_v56 = vpack.c.bf16 %v9199_v54, %v9200_v51 }
 0x26c   : > { %4504 = vmatpush.bf16.msra.mxu1 %v7042_v17 }
 0x26d   : > { %v3725_v23 = vadd.f32 %v8863_v26, %v3702_v33  ;;  %v7037_v33 = vld [vmem:[%s9129_s3 + $0x50] sm:$0xff] }
 0x26f   : > { %v8929_v37 = vadd.f32 %v3747_v41, %v3725_v23 }
 0x270   : > { %v3681_v0 = vpop.f32.mrf.mxu1  ;;  %v3752_v48 = vpop.f32.mrf.mxu2 }
 0x271   : > { %v3682_v13 = vadd.f32 %v3681_v0, %v8830_v35  ;;  %v7050_v35 = vld [vmem:[%s9129_s3 + $0xb8] sm:$0xff]  ;;  %v7045_v0 = vld [vmem:[%s9129_s3 + $0x90] sm:$0xff] }
 0x272   : > { %v8934_v2 = vpop.f32.mrf.mxu3  ;;  %v3832_v16 = vpop.f32.mrf.mxu0  ;;  %4527 = vmatpush.bf16.msra.mxu2 %v7050_v35 }
 0x273   : > { %v3705_v15 = vadd.f32 %v8884_v24, %v3682_v13  ;;  %3951 = vmatmul.bf16.gmra.mxu1 %v9197_v22  ;;  %v8940_v26 = vadd.f32 %v3832_v16, %v3810_v45  ;;  %v7041_v24 = vld [vmem:[%s9129_s3 + $0x70] sm:$0xff]  ;;  %v9202_v16 = vld [vmem:[#allocation19_spill] sm:$0xff] }
 0x274   : > { %4505 = vmatpush.bf16.msra.mxu1 %v7041_v24  ;;  %vm4115_vm11 = vcmp.gt.f32.partialorder %v9202_v16, 0.0 }
 0x275   : > { %v3728_v11 = vadd.f32 %v8890_v50, %v3705_v15  ;;  %4025 = vmatmul.bf16.gmra.mxu0 %v7832_v52  ;;  %3979 = vmatmul.bf16.gmra.mxu2 %v9189_v18  ;;  %v4583_v52 = vld [vmem:[%s9131_s5 + $0x10] sm:$0xff]  ;;  %v7036_v15 = vld [vmem:[%s9129_s3 + $0x48] sm:$0xff] }
 0x276   : > { %4598 = vperm.xlu1 %7095, %v4583_v52   ;;  %v7049_v18 = vld [vmem:[%s9129_s3 + $0xb0] sm:$0xff] }
 0x277   : > { %v8951_v3 = vadd.f32 %v3750_v19, %v3728_v11  ;;  %4048 = vmatmul.bf16.vlgmr.msra.gmra.mxu3 %v7735_v44  ;;  %4528 = vmatpush.bf16.msra.mxu2 %v7049_v18  ;;  %v7048_v44 = vld [vmem:[%s9129_s3 + $0xa8] sm:$0xff]  ;;  %v7046_v19 = vld [vmem:[%s9129_s3 + $0x98] sm:$0xff]  ;;  %v7035_v11 = vld [vmem:[%s9129_s3 + $0x40] sm:$0xff] }
 0x278   : > { %v3683_v39 = vpop.f32.mrf.mxu1  ;;  %v3786_v50 = vpop.f32.mrf.mxu2  ;;  %4506 = vmatpush.bf16.msra.mxu1 %v7040_v34  ;;  %v7043_v18 = vld [vmem:[%s9129_s3 + $0x80] sm:$0xff] }
 0x27a   : > { %v3814_v63 = vpop.f32.mrf.mxu3  ;;  %v8960_v14 = vpop.f32.mrf.mxu0 }
 0x27b   : > { %v3815_v43 = vadd.f32 %v3814_v63, %v7865_v53  ;;  %4529 = vmatpush.bf16.msra.mxu2 %v7048_v44  ;;  %v7038_v53 = vld [vmem:[%s9129_s3 + $0x58] sm:$0xff] }
 0x27c   : > { %4507 = vmatpush.bf16.msra.mxu1 %v7039_v27 }
 0x27f   : > { %4530 = vmatpush.bf16.msra.mxu2 %v7047_v62 }
 0x280   : > { %v3763_v60 = vpop.f32.mrf.mxu1  ;;  %v3788_v7 = vpop.f32.mrf.mxu2  ;;  %4508 = vmatpush.bf16.msra.mxu1 %v7038_v53 }
 0x281   : > { %v3764_v8 = vadd.f32 %v3763_v60, %v8875_v28 }
 0x282   : > { %v8978_v36 = vpop.f32.mrf.mxu3  ;;  %v3837_v29 = vpop.f32.mrf.mxu0 }
 0x283   : > { %v8976_v47 = vadd.f32 %v3786_v50, %v3764_v8  ;;  %3956 = vmatmul.bf16.gmra.mxu1 %v9198_v12  ;;  %v8984_v61 = vadd.f32 %v3837_v29, %v3815_v43  ;;  %4531 = vmatpush.bf16.msra.mxu2 %v7046_v19  ;;  %v9203_v8 = vld [vmem:[#allocation21_spill] sm:$0xff] }
 0x284   : > { %4509 = vmatpush.bf16.msra.mxu1 %v7037_v33 }
 0x285   : > { %v4121_v28 = vmin.f32 %v8976_v47, 0.0  ;;  %4489 = vmatmul.bf16.vlgmr.msrb.gmra.mxu0 %v9201_v56  ;;  %4061 = vmatmul.bf16.vlgmr.msrb.gmra.mxu2 %v9190_v4  ;;  %vm4101_vm9 = vcmp.gt.f32.partialorder %v8976_v47, 0.0 }
 0x287   : > { %6442 = vmatmul.msk.bf16.vlgmr.msrb.gmra.mxu3 %vm2893_vm0, %v9182_v1  ;;  %v4143_v32 = vmul.f32 1.442695, %v4121_v28  ;;  %v4135_v1 = vmin.f32 %v9202_v16, 0.0  ;;  %4532 = vmatpush.bf16.msra.mxu2 %v7045_v0 }
 0x288   : > { %v3765_v41 = vpop.f32.mrf.mxu1  ;;  %v3791_v45 = vpop.f32.mrf.mxu2  ;;  %4510 = vmatpush.bf16.msra.mxu1 %v7036_v15 }
 0x289   : > { %v3766_v23 = vadd.f32 %v3765_v41, %v8903_v10  ;;  %v7044_v10 = vld [vmem:[%s9129_s3 + $0x88] sm:$0xff]  ;;  %7113 = vpow2.f32 %v4143_v32  ;;  %v4171_v35 = vmul.f32 1.442695, %v4135_v1  ;;  %v4581_v32 = vld [vmem:[%s9131_s5] sm:$0xff] }
 0x28a   : > { %v3819_v4 = vpop.f32.mrf.mxu3  ;;  %v9003_v48 = vpop.f32.mrf.mxu0  ;;  %4588 = vperm.xlu2 %7096, %v4581_v32  }
 0x28b   : > { %v3789_v13 = vadd.f32 %v3788_v7, %v3766_v23  ;;  %v3820_v24 = vadd.f32 %v3819_v4, %v7922_v57  ;;  %4533 = vmatpush.bf16.msra.mxu2 %v7044_v10 }
 0x28c   : > { %4511 = vmatpush.bf16.msra.mxu1 %v7035_v11 }
 0x28d   : > { %v4125_v22 = vmin.f32 %v3789_v13, 0.0  ;;  %vm4105_vm10 = vcmp.gt.f32.partialorder %v3789_v13, 0.0 }
 0x28f   : > { %v4151_v17 = vmul.f32 1.442695, %v4125_v22  ;;  %v7114_v63 = vpop.eup %7113  ;;  %4534 = vmatpush.bf16.msra.mxu2 %v7043_v18 }
 0x290   : > { %v3768_v39 = vpop.f32.mrf.mxu1  ;;  %v3793_v50 = vpop.f32.mrf.mxu2  ;;  %v6447_v60 = vadd.f32 -1.0, %v7114_v63 }
 0x291   : > { %7115 = vpow2.f32 %v4151_v17  ;;  %v3769_v52 = vadd.f32 %v3768_v39, %v8919_v46  ;;  %v9204_v46 = vld [vmem:[#allocation20_spill] sm:$0xff]  ;;  %v4584_v17 = vld [vmem:[%s9131_s5 + $0x18] sm:$0xff] }
 0x292   : > { %v3821_v44 = vpop.f32.mrf.mxu3  ;;  %v3842_v27 = vpop.f32.mrf.mxu0  ;;  %7117 = vpow2.f32 %v4171_v35  ;;  %v9205_v7 = vpack.c.bf16 %v9203_v8, %v9204_v46  ;;  %v4201_v54 = vsel %vm4101_vm9, %v8976_v47, %v6447_v60  ;;  %4603 = vperm.xlu2 %7096, %v4584_v17  }
 0x293   : > { %v3792_v34 = vadd.f32 %v3791_v45, %v3769_v52  ;;  %4038 = vmatmul.bf16.vlgmr.msrb.gmra.mxu1 %v7639_v21  ;;  %v9021_v43 = vadd.f32 %v3842_v27, %v3820_v24 }
 0x295   : > { %v4129_v57 = vmin.f32 %v3792_v34, 0.0  ;;  %4494 = vmatmul.bf16.gmra.mxu0 %v9205_v7  ;;  %4066 = vmatmul.bf16.gmra.mxu2 %v7692_v38  ;;  %vm4109_vm12 = vcmp.gt.f32.partialorder %v3792_v34, 0.0 }
 0x297   : > { %v7116_v62 = vpop.eup %7115  ;;  %6443 = vmatmul.msk.bf16.gmra.mxu3 %vm2893_vm0, %v9184_v42  ;;  %v4159_v21 = vmul.f32 1.442695, %v4129_v57 }
 0x298   : > { %v6451_v29 = vadd.f32 -1.0, %v7116_v62  ;;  %v3770_v12 = vpop.f32.mrf.mxu1  ;;  %v7118_v28 = vpop.eup %7117 }
 0x299   : > { %v3771_v53 = vadd.f32 %v3770_v12, %v8929_v37  ;;  %v3796_v56 = vpop.f32.mrf.mxu2  ;;  %v6461_v42 = vadd.f32 -1.0, %v7118_v28  ;;  %7119 = vpow2.f32 %v4159_v21 }
 0x29a   : > { %v4205_v51 = vsel %vm4105_vm10, %v3789_v13, %v6451_v29  ;;  %v3844_v41 = vpop.f32.mrf.mxu0  ;;  %v3901_v38 = vpop.f32.mrf.mxu3 }
 0x29b   : > { %v4221_v19 = vpack.c.bf16 %v4205_v51, %v4201_v54  ;;  %v3794_v33 = vadd.f32 %v3793_v50, %v3771_v53  ;;  %v4215_v47 = vsel %vm4115_vm11, %v9202_v16, %v6461_v42 }
 0x29c   : > { %v4227_v1 = vpack.c.bf16 %v4215_v47, %v4215_v47 }
 0x29d   : > { %v4133_v23 = vmin.f32 %v3794_v33, 0.0  ;;  %vm4113_vm13 = vcmp.gt.f32.partialorder %v3794_v33, 0.0 }
 0x29f   : > { %v4167_v45 = vmul.f32 1.442695, %v4133_v23  ;;  %v7120_v13 = vpop.eup %7119 }
 0x2a0   : > { %v3773_v37 = vpop.f32.mrf.mxu1  ;;  %v6455_v10 = vadd.f32 -1.0, %v7120_v13 }
 0x2a1   : > { %7121 = vpow2.f32 %v4167_v45  ;;  %v3798_v0 = vpop.f32.mrf.mxu2 }
 0x2a2   : > { %v3903_v4 = vpop.f32.mrf.mxu3  ;;  %v3924_v15 = vpop.f32.mrf.mxu0 }
 0x2a3   : > { %4043 = vmatmul.bf16.gmra.mxu1 %v7688_v20  ;;  %v4209_v20 = vsel %vm4109_vm12, %v3792_v34, %v6455_v10  ;;  %v3774_v34 = vadd.f32 %v3773_v37, %v8951_v3 }
 0x2a5   : > { %4499 = vmatmul.bf16.gmra.mxu0 %v4227_v1  ;;  %4071 = vmatmul.bf16.gmra.mxu2 %v7739_v49  ;;  %v3797_v62 = vadd.f32 %v3796_v56, %v3774_v34  ;;  %v3817_v56 = vadd.f32 %v8978_v36, %v7887_v6 }
 0x2a7   : > { %v7122_v22 = vpop.eup %7121  ;;  %6444 = vmatmul.msk.bf16.gmra.mxu3 %vm2893_vm0, %v9186_v40  ;;  %v3812_v40 = vadd.f32 %v8934_v2, %v7840_v59  ;;  %v3840_v32 = vadd.f32 %v9003_v48, %v3817_v56  ;;  %vm4117_vm15 = vcmp.gt.f32.partialorder %v3797_v62, 0.0  ;;  %v7054_v56 = vld [vmem:[%s9129_s3 + $0xd8] sm:$0xff] }
 0x2a8   : > { %v3775_v11 = vpop.f32.mrf.mxu1  ;;  %v6459_v16 = vadd.f32 -1.0, %v7122_v22 }
 0x2a9   : > { %v3878_v35 = vpop.f32.mrf.mxu2  ;;  %v3835_v8 = vadd.f32 %v8960_v14, %v3812_v40 }
 0x2aa   : > { %v4213_v24 = vsel %vm4113_vm13, %v3794_v33, %v6459_v16  ;;  %v3906_v39 = vpop.f32.mrf.mxu3  ;;  %v3926_v52 = vpop.f32.mrf.mxu0 }
 0x2ab   : > { %v4225_v50 = vpack.c.bf16 %v4213_v24, %v4209_v20 }
 0x2b0   : > { %v3855_v18 = vpop.f32.mrf.mxu1 }
 0x2b1   : > { %v3856_v49 = vadd.f32 %v3855_v18, %v8940_v26  ;;  %v3880_v63 = vpop.f32.mrf.mxu2  ;;  %v4136_v26 = vmin.f32 %v8684_v9, 0.0 }
 0x2b2   : > { %v3908_v27 = vpop.f32.mrf.mxu3  ;;  %v3929_v57 = vpop.f32.mrf.mxu0 }
 0x2b3   : > { %v3879_v44 = vadd.f32 %v3878_v35, %v3856_v49  ;;  %4512 = vmatmul.bf16.vlgmr.msra.gmra.mxu1 %v4220_v30  ;;  %v4173_v58 = vmul.f32 1.442695, %v4136_v26  ;;  %v4137_v30 = vmin.f32 %v3797_v62, 0.0 }
 0x2b5   : > { %v3902_v60 = vadd.f32 %v3901_v38, %v3879_v44  ;;  %4535 = vmatmul.bf16.vlgmr.msra.gmra.mxu2 %v4221_v19  ;;  %7123 = vpow2.f32 %v4173_v58  ;;  %v4175_v3 = vmul.f32 1.442695, %v4137_v30  ;;  %v7056_v30 = vld [vmem:[%s9129_s3 + $0xe8] sm:$0xff] }
 0x2b6   : > { %4552 = vmatpush.bf16.msra.mxu3 %v7056_v30 }
 0x2b7   : > { %v3925_v46 = vadd.f32 %v3924_v15, %v3902_v60  ;;  %7125 = vpow2.f32 %v4175_v3 }
 0x2b8   : > { %v3857_v7 = vpop.f32.mrf.mxu1 }
 0x2b9   : > { %v3858_v29 = vadd.f32 %v3857_v7, %v3835_v8  ;;  %v3883_v12 = vpop.f32.mrf.mxu2 }
 0x2ba   : > { %v3911_v53 = vpop.f32.mrf.mxu3  ;;  %v3931_v5 = vpop.f32.mrf.mxu0 }
 0x2bb   : > { %v3881_v21 = vadd.f32 %v3880_v63, %v3858_v29  ;;  %v7124_v38 = vpop.eup %7123 }
 0x2bc   : > { %v6462_v45 = vadd.f32 -1.0, %v7124_v38 }
 0x2bd   : > { %v3904_v28 = vadd.f32 %v3903_v4, %v3881_v21  ;;  %v7126_v47 = vpop.eup %7125 }
 0x2be   : > { %v4216_v6 = vsel %vm4116_vm14, %v8684_v9, %v6462_v45  ;;  %v6463_v31 = vadd.f32 -1.0, %v7126_v47  ;;  %v7053_v45 = vld [vmem:[%s9129_s3 + $0xd0] sm:$0xff]  ;;  %v7052_v47 = vld [vmem:[%s9129_s3 + $0xc8] sm:$0xff] }
 0x2bf   : > { %v3927_v59 = vadd.f32 %v3926_v52, %v3904_v28  ;;  %v4228_v15 = vpack.c.bf16 %v4216_v6, %v4216_v6 }
 0x2c0   : > { %v3860_v2 = vpop.f32.mrf.mxu1  ;;  %v4217_v10 = vsel %vm4117_vm15, %v3797_v62, %v6463_v31  ;;  %v7051_v31 = vld [vmem:[%s9129_s3 + $0xc0] sm:$0xff] }
 0x2c1   : > { %v3861_v14 = vadd.f32 %v3860_v2, %v8984_v61  ;;  %v3885_v54 = vpop.f32.mrf.mxu2  ;;  %v4229_v16 = vpack.c.bf16 %v4217_v10, %v4217_v10 }
 0x2c2   : > { %v3913_v19 = vpop.f32.mrf.mxu3  ;;  %v3934_v33 = vpop.f32.mrf.mxu0 }
 0x2c3   : > { %v3884_v51 = vadd.f32 %v3883_v12, %v3861_v14  ;;  %4517 = vmatmul.bf16.gmra.mxu1 %v4224_v55  ;;  %v7055_v19 = vld [vmem:[%s9129_s3 + $0xe0] sm:$0xff] }
 0x2c4   : > { %4553 = vmatpush.bf16.msra.mxu3 %v7055_v19 }
 0x2c5   : > { %v3907_v41 = vadd.f32 %v3906_v39, %v3884_v51  ;;  %4540 = vmatmul.bf16.gmra.mxu2 %v4225_v50 }
 0x2c7   : > { %v3930_v42 = vadd.f32 %v3929_v57, %v3907_v41 }
 0x2c8   : > { %v3862_v23 = vpop.f32.mrf.mxu1  ;;  %4554 = vmatpush.bf16.msra.mxu3 %v7054_v56 }
 0x2c9   : > { %v3863_v61 = vadd.f32 %v3862_v23, %v3840_v32  ;;  %v3888_v37 = vpop.f32.mrf.mxu2 }
 0x2ca   : > { %v3936_v13 = vpop.f32.mrf.mxu0  ;;  %v3993_v4 = vpop.f32.mrf.mxu3 }
 0x2cb   : > { %v3886_v0 = vadd.f32 %v3885_v54, %v3863_v61 }
 0x2cc   : > { %4555 = vmatpush.bf16.msra.mxu3 %v7053_v45 }
 0x2cd   : > { %v3909_v25 = vadd.f32 %v3908_v27, %v3886_v0 }
 0x2cf   : > { %v3932_v55 = vadd.f32 %v3931_v5, %v3909_v25 }
 0x2d0   : > { %v3865_v36 = vpop.f32.mrf.mxu1  ;;  %4556 = vmatpush.bf16.msra.mxu3 %v7052_v47 }
 0x2d1   : > { %v3866_v48 = vadd.f32 %v3865_v36, %v9021_v43  ;;  %v3890_v1 = vpop.f32.mrf.mxu2 }
 0x2d2   : > { %v3995_v17 = vpop.f32.mrf.mxu3  ;;  %v4016_v11 = vpop.f32.mrf.mxu0 }
 0x2d3   : > { %v3889_v22 = vadd.f32 %v3888_v37, %v3866_v48  ;;  %4522 = vmatmul.bf16.gmra.mxu1 %v4228_v15 }
 0x2d4   : > { %4557 = vmatpush.bf16.msra.mxu3 %v7051_v31 }
 0x2d5   : > { %v3912_v35 = vadd.f32 %v3911_v53, %v3889_v22  ;;  %4545 = vmatmul.bf16.gmra.mxu2 %v4229_v16 }
 0x2d7   : > { %v3935_v20 = vadd.f32 %v3934_v33, %v3912_v35 }
 0x2d8   : > { %v3867_v24 = vpop.f32.mrf.mxu1 }
 0x2d9   : > { %v3970_v39 = vpop.f32.mrf.mxu2 }
 0x2da   : > { %v3998_v9 = vpop.f32.mrf.mxu3  ;;  %v9063_v52 = vpop.f32.mrf.mxu0 }
 0x2e0   : > { %v3947_v50 = vpop.f32.mrf.mxu1 }
 0x2e1   : > { %v3948_v18 = vadd.f32 %v3947_v50, %v3925_v46  ;;  %v3972_v43 = vpop.f32.mrf.mxu2 }
 0x2e2   : > { %v4000_v63 = vpop.f32.mrf.mxu3  ;;  %v4021_v44 = vpop.f32.mrf.mxu0 }
 0x2e3   : > { %v3971_v49 = vadd.f32 %v3970_v39, %v3948_v18 }
 0x2e5   : > { %v3994_v27 = vadd.f32 %v3993_v4, %v3971_v49 }
 0x2e7   : > { %v4017_v57 = vadd.f32 %v4016_v11, %v3994_v27 }
 0x2e8   : > { %v3949_v40 = vpop.f32.mrf.mxu1 }
 0x2e9   : > { %v3950_v34 = vadd.f32 %v3949_v40, %v3927_v59  ;;  %v3975_v60 = vpop.f32.mrf.mxu2 }
 0x2ea   : > { %v4003_v7 = vpop.f32.mrf.mxu3  ;;  %v9065_v26 = vpop.f32.mrf.mxu0 }
 0x2eb   : > { %v3973_v8 = vadd.f32 %v3972_v43, %v3950_v34 }
 0x2ed   : > { %v3996_v62 = vadd.f32 %v3995_v17, %v3973_v8 }
 0x2ef   : > { %v4019_v11 = vadd.f32 %v9063_v52, %v3996_v62 }
 0x2f0   : > { %v3952_v29 = vpop.f32.mrf.mxu1 }
 0x2f1   : > { %v3953_v12 = vadd.f32 %v3952_v29, %v3930_v42  ;;  %v3977_v21 = vpop.f32.mrf.mxu2 }
 0x2f2   : > { %v4005_v5 = vpop.f32.mrf.mxu3  ;;  %v4026_v46 = vpop.f32.mrf.mxu0 }
 0x2f3   : > { %v3976_v53 = vadd.f32 %v3975_v60, %v3953_v12 }
 0x2f5   : > { %v3999_v58 = vadd.f32 %v3998_v9, %v3976_v53 }
 0x2f7   : > { %v4022_v28 = vadd.f32 %v4021_v44, %v3999_v58 }
 0x2f8   : > { %v3954_v2 = vpop.f32.mrf.mxu1 }
 0x2f9   : > { %v3955_v59 = vadd.f32 %v3954_v2, %v3932_v55  ;;  %v3980_v3 = vpop.f32.mrf.mxu2 }
 0x2fa   : > { %v4028_v54 = vpop.f32.mrf.mxu0  ;;  %v4049_v51 = vpop.f32.mrf.mxu3 }
 0x2fb   : > { %v3978_v14 = vadd.f32 %v3977_v21, %v3955_v59 }
 0x2fd   : > { %v4001_v33 = vadd.f32 %v4000_v63, %v3978_v14 }
 0x300   : > { %v3957_v41 = vpop.f32.mrf.mxu1 }
 0x301   : > { %v3958_v38 = vadd.f32 %v3957_v41, %v3935_v20  ;;  %v3982_v32 = vpop.f32.mrf.mxu2 }
 0x302   : > { %v4051_v23 = vpop.f32.mrf.mxu3  ;;  %v9076_v61 = vpop.f32.mrf.mxu0 }
 0x303   : > { %v3981_v42 = vadd.f32 %v3980_v3, %v3958_v38 }
 0x305   : > { %v4004_v37 = vadd.f32 %v4003_v7, %v3981_v42  ;;  %v4024_v7 = vadd.f32 %v9065_v26, %v4001_v33 }
 0x307   : > { %v4027_v0 = vadd.f32 %v4026_v46, %v4004_v37 }
 0x308   : > { %v3959_v13 = vpop.f32.mrf.mxu1 }
 0x309   : > { %v4062_v4 = vpop.f32.mrf.mxu2  ;;  %v4050_v5 = vadd.f32 %v4049_v51, %v4027_v0 }
 0x30a   : > { %v4085_v25 = vpop.f32.mrf.mxu3  ;;  %v9084_v6 = vpop.f32.mrf.mxu0 }
 0x310   : > { %v4039_v55 = vpop.f32.mrf.mxu1 }
 0x311   : > { %v4040_v36 = vadd.f32 %v4039_v55, %v4017_v57  ;;  %v4064_v48 = vpop.f32.mrf.mxu2 }
 0x312   : > { %v4087_v1 = vpop.f32.mrf.mxu3  ;;  %v9089_v10 = vpop.f32.mrf.mxu0 }
 0x313   : > { %v4063_v15 = vadd.f32 %v4062_v4, %v4040_v36 }
 0x315   : > { %v4086_v22 = vadd.f32 %v4085_v25, %v4063_v15 }
 0x317   : > { %v4122_v17 = vmin.f32 %v4086_v22, 0.0  ;;  %vm4102_vm0 = vcmp.gt.f32.partialorder %v4086_v22, 0.0 }
 0x318   : > { %v4041_v16 = vpop.f32.mrf.mxu1 }
 0x319   : > { %v4042_v35 = vadd.f32 %v4041_v16, %v4019_v11  ;;  %v4067_v20 = vpop.f32.mrf.mxu2  ;;  %v4145_v24 = vmul.f32 1.442695, %v4122_v17 }
 0x31a   : > { %v4090_v9 = vpop.f32.mrf.mxu3  ;;  %v9092_v50 = vpop.f32.mrf.mxu0 }
 0x31b   : > { %v4065_v39 = vadd.f32 %v4064_v48, %v4042_v35  ;;  %7127 = vpow2.f32 %v4145_v24 }
 0x31d   : > { %v4088_v18 = vadd.f32 %v4087_v1, %v4065_v39 }
 0x31f   : > { %v4126_v43 = vmin.f32 %v4088_v18, 0.0  ;;  %vm4106_vm1 = vcmp.gt.f32.partialorder %v4088_v18, 0.0 }
 0x320   : > { %v4044_v49 = vpop.f32.mrf.mxu1 }
 0x321   : > { %v4153_v63 = vmul.f32 1.442695, %v4126_v43  ;;  %v4045_v44 = vadd.f32 %v4044_v49, %v4022_v28  ;;  %v4069_v27 = vpop.f32.mrf.mxu2  ;;  %v7128_v52 = vpop.eup %7127 }
 0x322   : > { %v4092_v40 = vpop.f32.mrf.mxu3  ;;  %v9094_v34 = vpop.f32.mrf.mxu0  ;;  %v6448_v62 = vadd.f32 -1.0, %v7128_v52 }
 0x323   : > { %7129 = vpow2.f32 %v4153_v63  ;;  %v4068_v57 = vadd.f32 %v4067_v20, %v4045_v44 }
 0x324   : > { %v4202_v59 = vsel %vm4102_vm0, %v4086_v22, %v6448_v62 }
 0x325   : > { %v4091_v60 = vadd.f32 %v4090_v9, %v4068_v57 }
 0x327   : > { %v4130_v8 = vmin.f32 %v4091_v60, 0.0  ;;  %vm4110_vm3 = vcmp.gt.f32.partialorder %v4091_v60, 0.0 }
 0x328   : > { %v4046_v29 = vpop.f32.mrf.mxu1 }
 0x329   : > { %v7130_v12 = vpop.eup %7129  ;;  %v4047_v21 = vadd.f32 %v4046_v29, %v4024_v7  ;;  %v4072_v46 = vpop.f32.mrf.mxu2  ;;  %v4161_v58 = vmul.f32 1.442695, %v4130_v8 }
 0x32a   : > { %v6452_v53 = vadd.f32 -1.0, %v7130_v12  ;;  %v4095_v28 = vpop.f32.mrf.mxu3  ;;  %v4502_v2 = vpop.f32.mrf.mxu0  ;;  %v4073_v19 = vadd.f32 %v4072_v46, %v4050_v5 }
 0x32b   : > { %v4070_v30 = vadd.f32 %v4069_v27, %v4047_v21  ;;  %7131 = vpow2.f32 %v4161_v58  ;;  %v7057_v58 = vld [vmem:[%s9130_s4] sm:$0xff] }
 0x32c   : > { %v4206_v3 = vsel %vm4106_vm1, %v4088_v18, %v6452_v53  ;;  %v4096_v51 = vadd.f32 %v4095_v28, %v4073_v19  ;;  %v4577_v28 = vld [vmem:[%s9130_s4 + $0x10] sm:$0xf]  ;;  %v4594_v19 = vpop.permute.xlu0 %4593 }
 0x32d   : > { %v4222_v14 = vpack.c.bf16 %v4206_v3, %v4202_v59  ;;  %v4093_v54 = vadd.f32 %v4092_v40, %v4070_v30  ;;  %v7058_v30 = vld [vmem:[%s9130_s4 + $0x8] sm:$0xff]  ;;  %v4620_v2 = vunpack.c.l.b16 %v4577_v28  ;;  %v4589_v3 = vpop.permute.xlu2 %4588 }
 0x32e   : > { %v4138_v23 = vmin.f32 %v4096_v51, 0.0  ;;  %vm4118_vm5 = vcmp.gt.f32.partialorder %v4096_v51, 0.0 }
 0x32f   : > { %v4134_v26 = vmin.f32 %v4093_v54, 0.0  ;;  %6585 = vmatmul.msk.bf16.vlgmr.msra.gmra.mxu3 %vm4471_vm2, %v4222_v14  ;;  %vm4114_vm4 = vcmp.gt.f32.partialorder %v4093_v54, 0.0  ;;  %v4623_v59 = vpack.c.b16 %v4620_v2, %v4620_v2 }
 0x330   : > { %v4513_v33 = vpop.f32.mrf.mxu1  ;;  %v4177_v0 = vmul.f32 1.442695, %v4138_v23 }
 0x331   : > { %v4169_v56 = vmul.f32 1.442695, %v4134_v26  ;;  %v4514_v41 = vadd.f32 %v4513_v33, %v9076_v61  ;;  %v4074_v38 = vpop.f32.mrf.mxu2  ;;  %v7132_v42 = vpop.eup %7131 }
 0x332   : > { %v4097_v32 = vpop.f32.mrf.mxu3  ;;  %v6456_v45 = vadd.f32 -1.0, %v7132_v42 }
 0x333   : > { %7133 = vpow2.f32 %v4169_v56  ;;  %v4599_v56 = vpop.permute.xlu1 %4598 }
 0x334   : > { %v4210_v55 = vsel %vm4110_vm3, %v4091_v60, %v6456_v45  ;;  %7135 = vpow2.f32 %v4177_v0  ;;  %v4609_v23 = vpop.permute.xlu0 %4608 }
 0x335   : > { %v4604_v38 = vpop.permute.xlu2 %4603 }
 0x338   : > { %v4515_v37 = vpop.f32.mrf.mxu1 }
 0x339   : > { %v7134_v47 = vpop.eup %7133  ;;  %v4516_v13 = vadd.f32 %v4515_v37, %v9084_v6  ;;  %v4536_v25 = vpop.f32.mrf.mxu2 }
 0x33a   : > { %v6460_v4 = vadd.f32 -1.0, %v7134_v47  ;;  %v4537_v31 = vadd.f32 %v4536_v25, %v4514_v41  ;;  %v7136_v22 = vpop.eup %7135 }
 0x33b   : > { %v6464_v11 = vadd.f32 -1.0, %v7136_v22 }
 0x33c   : > { %v4214_v36 = vsel %vm4114_vm4, %v4093_v54, %v6460_v4 }
 0x33d   : > { %v4226_v61 = vpack.c.bf16 %v4214_v36, %v4210_v55  ;;  %v4218_v35 = vsel %vm4118_vm5, %v4096_v51, %v6464_v11 }
 0x33e   : > { %v4230_v39 = vpack.c.bf16 %v4218_v35, %v4218_v35 }
 0x33f   : > { %6586 = vmatmul.msk.bf16.gmra.mxu3 %vm4471_vm2, %v4226_v61 }
 0x340   : > { %v4518_v48 = vpop.f32.mrf.mxu1 }
 0x341   : > { %v4519_v15 = vadd.f32 %v4518_v48, %v9089_v10  ;;  %v4538_v1 = vpop.f32.mrf.mxu2 }
 0x342   : > { %v4539_v17 = vadd.f32 %v4538_v1, %v4516_v13 }
 0x348   : > { %v4520_v16 = vpop.f32.mrf.mxu1 }
 0x349   : > { %v4521_v6 = vadd.f32 %v4520_v16, %v9092_v50  ;;  %v4541_v20 = vpop.f32.mrf.mxu2 }
 0x34a   : > { %v4542_v24 = vadd.f32 %v4541_v20, %v4519_v15 }
 0x34f   : > { %6587 = vmatmul.msk.bf16.gmra.mxu3 %vm4471_vm2, %v4230_v39 }
 0x350   : > { %v4523_v9 = vpop.f32.mrf.mxu1 }
 0x351   : > { %v4524_v18 = vadd.f32 %v4523_v9, %v9094_v34  ;;  %v4543_v43 = vpop.f32.mrf.mxu2 }
 0x352   : > { %v4544_v49 = vadd.f32 %v4543_v43, %v4521_v6 }
 0x358   : > { %v4525_v10 = vpop.f32.mrf.mxu1 }
 0x359   : > { %v4546_v63 = vpop.f32.mrf.mxu2 }
 0x35a   : > { %v4547_v44 = vadd.f32 %v4546_v63, %v4524_v18 }
 0x361   : > { %v4548_v27 = vpop.f32.mrf.mxu2 }
 0x3b2   : > { %v4559_v57 = vpop.f32.mrf.mxu3 }
 0x3b3   : > { %v4560_v52 = vadd.f32 %v4559_v57, %v4537_v31 }
 0x3ba   : > { %v4561_v40 = vpop.f32.mrf.mxu3 }
 0x3bb   : > { %v4562_v60 = vadd.f32 %v4561_v40, %v4539_v17 }
 0x3bd   : > { %v4578_v50 = vpack.c.bf16 %v4562_v60, %v4560_v52 }
 0x3c2   : > { %v4564_v8 = vpop.f32.mrf.mxu3 }
 0x3c3   : > { %v4565_v62 = vadd.f32 %v4564_v8, %v4542_v24 }
 0x3ca   : > { %v4566_v7 = vpop.f32.mrf.mxu3 }
 0x3cb   : > { %v4567_v29 = vadd.f32 %v4566_v7, %v4544_v49 }
 0x3cd   : > { %v4579_v12 = vpack.c.bf16 %v4567_v29, %v4565_v62 }
 0x3d2   : > { %v4569_v21 = vpop.f32.mrf.mxu3 }
 0x3d3   : > { %v4570_v53 = vadd.f32 %v4569_v21, %v4547_v44 }
 0x3d5   : > { %v4580_v34 = vpack.c.bf16 %v4570_v53, %v4570_v53 }
 0x3d7   : > { %v4636_v5 = vsel %vm4634_vm6, %v4580_v34, 0 }
 0x3d8   : > { %4643 = vmatpush.bf16.msra.mxu0 %v4636_v5 }
 0x3da   : > { %v4571_v46 = vpop.f32.mrf.mxu3 }
 0x3dc   : > { %4644 = vmatpush.bf16.msra.mxu0 %v4579_v12 }
 0x3e0   : > { %4645 = vmatpush.bf16.msra.mxu0 %v4578_v50 }
 0x3e3   : > { %6596 = vmatmul.msk.bf16.vlgmr.msra.gmra.mxu0 %vm4624_vm7, %v7057_v58 }
 0x3f3   : > { %6597 = vmatmul.msk.bf16.gmra.mxu0 %vm4624_vm7, %v7058_v30 }
 0x403   : > { %6598 = vmatmul.msk.bf16.gmra.mxu0 %vm4624_vm7, %v4623_v59 }
 0x460   : > { %v4647_v14 = vpop.f32.mrf.mxu0 }
 0x461   : > { %v4648_v54 = vadd.f32 %v4647_v14, %v4589_v3 }
 0x463   : > { %4662 = vst.msk [vmem:[%s251_s18] sm:$0xff] %vm4661_vm8, %v4648_v54 }
 0x468   : > { %v4649_v26 = vpop.f32.mrf.mxu0 }
 0x469   : > { %v4650_v33 = vadd.f32 %v4649_v26, %v4594_v19 }
 0x46b   : > { %4663 = vst.msk [vmem:[%s251_s18 + $0x8] sm:$0xff] %vm4661_vm8, %v4650_v33 }
 0x470   : > { %v4652_v51 = vpop.f32.mrf.mxu0 }
 0x471   : > { %v4653_v41 = vadd.f32 %v4652_v51, %v4599_v56 }
 0x473   : > { %4664 = vst.msk [vmem:[%s251_s18 + $0x10] sm:$0xff] %vm4661_vm8, %v4653_v41 }
 0x478   : > { %v4654_v32 = vpop.f32.mrf.mxu0 }
 0x479   : > { %v4655_v42 = vadd.f32 %v4654_v32, %v4604_v38 }
 0x47b   : > { %4665 = vst.msk [vmem:[%s251_s18 + $0x18] sm:$0xff] %vm4661_vm8, %v4655_v42 }
 0x480   : > { %v4657_v45 = vpop.f32.mrf.mxu0 }
 0x481   : > { %v4658_v37 = vadd.f32 %v4657_v45, %v4609_v23 }
 0x483   : > { %4666 = vst.msk [vmem:[%s251_s18 + $0x20] sm:$0xff] %vm4661_vm8, %v4658_v37 }
 0x488   : > { %v4659_v47 = vpop.f32.mrf.mxu0 }
 0x489 PF: > { %s16_s21 = sadd.s32 1, %s7143_s21  }
 0x48a   : > { %p13_p4 = scmp.ge.s32.totalorder %s16_s21, 4  }
 0x48c   :  { %15 = sbr.rel (!%p13_p4) target bundleno = 1 (0x1), region = 74 }

</bundles_post_ra>
